<compile_context>
chip_gen: v7x
topology: tpu7x:2x2x1
jax: 0.10.0
libtpu: 0.0.40
codegen_flags: <defaults>
</compile_context>

<pallas_src>
import math
import functools

import jax
import jax.numpy as jnp
from jax import lax
from jax.experimental import pallas as pl
from jax.experimental.pallas import tpu as pltpu

MAX_DIL = 5  # largest dilation among the three branches -> single halo pad


# --------------------------------------------------------------------------
# Fused Pallas kernel: one batch element per grid step.
# --------------------------------------------------------------------------
def _conv_our_fused_kernel(x_ref,
                           w1_ref, s1_ref, b1_ref,
                           w3_ref, s3_ref, b3_ref,
                           w5_ref, s5_ref, b5_ref,
                           wc1_ref, sc1_ref, bc1_ref,
                           watt_ref, batt_ref,
                           o_ref, xpad_ref, lhs_ref):
    _, H, W, out_ch = o_ref.shape
    Cin = x_ref.shape[3]
    med = w1_ref.shape[1]
    P = MAX_DIL

    # Zero-pad the image once in VMEM (no padded copy ever lives in HBM).
    # Full zero every grid step keeps the kernel correct under megacore
    # sharding (each core owns its own scratch instance); it is a tiny store.
    xpad_ref[...] = jnp.zeros_like(xpad_ref)
    xpad_ref[P:P + H, P:P + W, :] = x_ref[0]

    def branch(d, w_ref, s_ref, b_ref):
        # im2col: pack the 9 dilated taps into the (H*W, 9*Cin) VMEM scratch,
        # then one MXU dot against the pre-reshaped (9*Cin, med) weight.
        for kh in range(3):
            for kw in range(3):
                r0 = (P - d) + kh * d
                c0 = (P - d) + kw * d
                tap = xpad_ref[r0:r0 + H, c0:c0 + W, :].reshape(H * W, Cin)
                k = kh * 3 + kw
                lhs_ref[:, k * Cin:(k + 1) * Cin] = tap
        y = jnp.dot(lhs_ref[...], w_ref[...],
                    preferred_element_type=jnp.float32)
        # folded BN + ReLU, kept in f32 (v5e has no bf16 VPU path)
        return jnp.maximum(y * s_ref[...] + b_ref[...], 0.0)

    x1 = branch(1, w1_ref, s1_ref, b1_ref)
    x3 = branch(3, w3_ref, s3_ref, b3_ref)
    x5 = branch(5, w5_ref, s5_ref, b5_ref)
    xs = x1 + x3 + x5                                           # (H*W, med)

    # Centre tap (kh=kw=1) lands at offset P for every dilation, so after the
    # last branch the im2col scratch still holds the un-shifted centre window
    # in columns [4*Cin, 5*Cin) -> reuse it for the 1x1 branch (no re-gather).
    xc = lhs_ref[:, 4 * Cin:5 * Cin]                            # (H*W, Cin)

    # SE-style channel attention: GAP -> 1x1 -> sigmoid -> per-channel scale.
    pooled = jnp.mean(xs, axis=0, keepdims=True)                # (1, med)
    att = jax.nn.sigmoid(
        jnp.dot(pooled, watt_ref[...], preferred_element_type=jnp.float32)
        + batt_ref[...])                                        # (1, med)
    xa = xs * att                                               # (H*W, med)

    # 1x1 conv branch (c1) + folded BN + ReLU.
    xn = jnp.dot(xc, wc1_ref[...], preferred_element_type=jnp.float32)
    xn = jnp.maximum(xn * sc1_ref[...] + bc1_ref[...], 0.0)     # (H*W, med)

    # concat([xa, xn], channel)[:, :out_ch] -> single full-block store.
    if out_ch <= med:
        out2d = xa[:, :out_ch]
    else:
        out2d = jnp.concatenate([xa, xn[:, :out_ch - med]], axis=-1)
    o_ref[0] = out2d.reshape(H, W, out_ch).astype(o_ref.dtype)


# --------------------------------------------------------------------------
# Wrapper: NCHW in / NCHW out (matching the PyTorch module)
# --------------------------------------------------------------------------
@functools.partial(jax.jit, static_argnums=(2,))
def conv_our_forward(x_nchw, params, out_ch):
    x = jnp.transpose(x_nchw, (0, 2, 3, 1)).astype(jnp.float32)  # NCHW -> NHWC
    N, H, W, Cin = x.shape
    med = params["w1"].shape[-1]
    Hp, Wp = H + 2 * MAX_DIL, W + 2 * MAX_DIL

    # pre-reshape 3x3 HWIO weights to (9*Cin, med) to match the im2col order
    w1r = params["w1"].reshape(9 * Cin, med)
    w3r = params["w3"].reshape(9 * Cin, med)
    w5r = params["w5"].reshape(9 * Cin, med)

    rep = lambda shape: pl.BlockSpec(shape, lambda n: (0, 0))

    out_nhwc = pl.pallas_call(
        _conv_our_fused_kernel,
        out_shape=jax.ShapeDtypeStruct((N, H, W, out_ch), x_nchw.dtype),
        grid=(N,),
        in_specs=[
            pl.BlockSpec((1, H, W, Cin), lambda n: (n, 0, 0, 0)),
            rep((9 * Cin, med)), rep((1, med)), rep((1, med)),
            rep((9 * Cin, med)), rep((1, med)), rep((1, med)),
            rep((9 * Cin, med)), rep((1, med)), rep((1, med)),
            rep((Cin, med)), rep((1, med)), rep((1, med)),
            rep((med, med)), rep((1, med)),
        ],
        out_specs=pl.BlockSpec((1, H, W, out_ch), lambda n: (n, 0, 0, 0)),
        scratch_shapes=[
            pltpu.VMEM((Hp, Wp, Cin), jnp.float32),       # in-kernel halo pad
            pltpu.VMEM((H * W, 9 * Cin), jnp.float32),    # im2col lhs
        ],
        compiler_params=pltpu.CompilerParams(
            dimension_semantics=("parallel",),
            vmem_limit_bytes=32 * 1024 * 1024,
        ),
    )(x,
      w1r, params["s1"], params["b1"],
      w3r, params["s3"], params["b3"],
      w5r, params["s5"], params["b5"],
      params["wc1"], params["sc1"], params["bc1"],
      params["w_att"], params["b_att"])

    return jnp.transpose(out_nhwc, (0, 3, 1, 2))                 # NHWC -> NCHW


# --------------------------------------------------------------------------
# Pure-JAX reference (correctness check)
# --------------------------------------------------------------------------
def ref_forward(x_nchw, params, out_ch):
    def branch(w, s, b, d):
        y = lax.conv_general_dilated(
            x_nchw, w, (1, 1), [(d, d), (d, d)], rhs_dilation=(d, d),
            dimension_numbers=("NCHW", "HWIO", "NCHW"))
        y = y * s[0][None, :, None, None] + b[0][None, :, None, None]
        return jnp.maximum(y, 0.0)

    x1 = branch(params["w1"], params["s1"], params["b1"], 1)
    x3 = branch(params["w3"], params["s3"], params["b3"], 3)
    x5 = branch(params["w5"], params["s5"], params["b5"], 5)
    xs = x1 + x3 + x5
    pooled = jnp.mean(xs, axis=(2, 3))                            # (N, C)
    a = jax.nn.sigmoid(pooled @ params["w_att"] + params["b_att"][0])
    xa = xs * a[:, :, None, None]
    xn = jnp.einsum("nchw,co->nohw", x_nchw, params["wc1"])
    xn = xn * params["sc1"][0][None, :, None, None] \
        + params["bc1"][0][None, :, None, None]
    xn = jnp.maximum(xn, 0.0)
    out = jnp.concatenate([xa, xn], axis=1)
    return out[:, :out_ch, :, :]


# --------------------------------------------------------------------------
# Deterministic synthetic parameters
# --------------------------------------------------------------------------
def make_params(in_ch, out_ch, key):
    med_ch = math.ceil(out_ch / 2)
    keys = jax.random.split(key, 16)
    eps = 1e-5

    def folded_bn(kg, kb, km, kv, c):
        gamma = 1.0 + 0.1 * jax.random.normal(kg, (c,), jnp.float32)
        beta = 0.1 * jax.random.normal(kb, (c,), jnp.float32)
        rmean = 0.1 * jax.random.normal(km, (c,), jnp.float32)
        rvar = 0.5 + jax.random.uniform(kv, (c,), jnp.float32)
        scale = gamma / jnp.sqrt(rvar + eps)
        bias = beta - rmean * scale
        return scale.reshape(1, c), bias.reshape(1, c)

    p = {}
    p["w1"] = 0.2 * jax.random.normal(keys[0], (3, 3, in_ch, med_ch), jnp.float32)
    p["w3"] = 0.2 * jax.random.normal(keys[1], (3, 3, in_ch, med_ch), jnp.float32)
    p["w5"] = 0.2 * jax.random.normal(keys[2], (3, 3, in_ch, med_ch), jnp.float32)
    p["s1"], p["b1"] = folded_bn(keys[3], keys[4], keys[5], keys[6], med_ch)
    p["s3"], p["b3"] = folded_bn(keys[7], keys[8], keys[5], keys[6], med_ch)
    p["s5"], p["b5"] = folded_bn(keys[9], keys[10], keys[5], keys[6], med_ch)
    p["wc1"] = 0.2 * jax.random.normal(keys[11], (in_ch, med_ch), jnp.float32)
    p["sc1"], p["bc1"] = folded_bn(keys[12], keys[13], keys[5], keys[6], med_ch)
    p["w_att"] = 0.2 * jax.random.normal(keys[14], (med_ch, med_ch), jnp.float32)
    p["b_att"] = 0.1 * jax.random.normal(keys[15], (1, med_ch), jnp.float32)
    return p, med_ch


# --------------------------------------------------------------------------
if __name__ == "__main__":
    in_ch, out_ch = 4, 7            # med_ch = ceil(7/2) = 4; exercises the slice
    N, H, W = 2, 16, 16

    key = jax.random.PRNGKey(0)
    kx, kp = jax.random.split(key)
    x = jax.random.normal(kx, (N, in_ch, H, W), jnp.float32)   # NCHW like PyTorch
    params, med_ch = make_params(in_ch, out_ch, kp)

    out = conv_our_forward(x, params, out_ch)
    out = jax.block_until_ready(out)

    ref = jax.block_until_ready(ref_forward(x, params, out_ch))
    assert out.shape == (N, out_ch, H, W), out.shape
    assert jnp.allclose(out, ref, atol=1e-4, rtol=1e-4), \
        float(jnp.max(jnp.abs(out - ref)))

    print("KERNEL_OK")
</pallas_src>

<mosaic_0001>
module attributes {stable_mosaic.version = 11 : i64} {
  func.func @_conv_our_fused_kernel(%arg0: i32, %arg1: memref<1x16x16x4xf32, #tpu.memory_space<vmem>>, %arg2: memref<36x4xf32, #tpu.memory_space<vmem>>, %arg3: memref<1x4xf32, #tpu.memory_space<vmem>>, %arg4: memref<1x4xf32, #tpu.memory_space<vmem>>, %arg5: memref<36x4xf32, #tpu.memory_space<vmem>>, %arg6: memref<1x4xf32, #tpu.memory_space<vmem>>, %arg7: memref<1x4xf32, #tpu.memory_space<vmem>>, %arg8: memref<36x4xf32, #tpu.memory_space<vmem>>, %arg9: memref<1x4xf32, #tpu.memory_space<vmem>>, %arg10: memref<1x4xf32, #tpu.memory_space<vmem>>, %arg11: memref<4x4xf32, #tpu.memory_space<vmem>>, %arg12: memref<1x4xf32, #tpu.memory_space<vmem>>, %arg13: memref<1x4xf32, #tpu.memory_space<vmem>>, %arg14: memref<4x4xf32, #tpu.memory_space<vmem>>, %arg15: memref<1x4xf32, #tpu.memory_space<vmem>>, %arg16: memref<1x16x16x7xf32, #tpu.memory_space<vmem>>, %arg17: memref<26x26x4xf32, #tpu.memory_space<vmem>>, %arg18: memref<256x36xf32, #tpu.memory_space<vmem>>) attributes {dimension_semantics = [#tpu.dimension_semantics<parallel>], iteration_bounds = array<i64: 2>, scalar_prefetch = 0 : i64, scratch_operands = 2 : i64, tpu.core_type = #tpu.core_type<tc>, window_params = [{transform_indices = @transform_0, window_bounds = array<i64: 1, 16, 16, 4>}, {pipeline_mode = #tpu.pipeline_mode<synchronous>, transform_indices = @transform_1, window_bounds = array<i64: 36, 4>}, {pipeline_mode = #tpu.pipeline_mode<synchronous>, transform_indices = @transform_2, window_bounds = array<i64: 1, 4>}, {pipeline_mode = #tpu.pipeline_mode<synchronous>, transform_indices = @transform_3, window_bounds = array<i64: 1, 4>}, {pipeline_mode = #tpu.pipeline_mode<synchronous>, transform_indices = @transform_4, window_bounds = array<i64: 36, 4>}, {pipeline_mode = #tpu.pipeline_mode<synchronous>, transform_indices = @transform_5, window_bounds = array<i64: 1, 4>}, {pipeline_mode = #tpu.pipeline_mode<synchronous>, transform_indices = @transform_6, window_bounds = array<i64: 1, 4>}, {pipeline_mode = #tpu.pipeline_mode<synchronous>, transform_indices = @transform_7, window_bounds = array<i64: 36, 4>}, {pipeline_mode = #tpu.pipeline_mode<synchronous>, transform_indices = @transform_8, window_bounds = array<i64: 1, 4>}, {pipeline_mode = #tpu.pipeline_mode<synchronous>, transform_indices = @transform_9, window_bounds = array<i64: 1, 4>}, {pipeline_mode = #tpu.pipeline_mode<synchronous>, transform_indices = @transform_10, window_bounds = array<i64: 4, 4>}, {pipeline_mode = #tpu.pipeline_mode<synchronous>, transform_indices = @transform_11, window_bounds = array<i64: 1, 4>}, {pipeline_mode = #tpu.pipeline_mode<synchronous>, transform_indices = @transform_12, window_bounds = array<i64: 1, 4>}, {pipeline_mode = #tpu.pipeline_mode<synchronous>, transform_indices = @transform_13, window_bounds = array<i64: 4, 4>}, {pipeline_mode = #tpu.pipeline_mode<synchronous>, transform_indices = @transform_14, window_bounds = array<i64: 1, 4>}, {transform_indices = @transform_15, window_bounds = array<i64: 1, 16, 16, 7>}]} {
    %cst = arith.constant 0.000000e+00 : f32
    %0 = vector.broadcast %cst : f32 to vector<26x26x4xf32>
    %c0 = arith.constant 0 : index
    %c0_0 = arith.constant 0 : index
    %c0_1 = arith.constant 0 : index
    %1 = vector.load %arg17[%c0, %c0_0, %c0_1] : memref<26x26x4xf32, #tpu.memory_space<vmem>>, vector<26x26x4xf32>
    tpu.vector_store %arg17[%c0, %c0_0, %c0_1], %0 {strides = array<i32>} : memref<26x26x4xf32, #tpu.memory_space<vmem>>, vector<26x26x4xf32>,
    %c0_2 = arith.constant 0 : index
    %c0_3 = arith.constant 0 : index
    %c0_4 = arith.constant 0 : index
    %c0_5 = arith.constant 0 : index
    %2 = vector.load %arg1[%c0_2, %c0_3, %c0_4, %c0_5] : memref<1x16x16x4xf32, #tpu.memory_space<vmem>>, vector<1x16x16x4xf32>
    %3 = vector.shape_cast %2 : vector<1x16x16x4xf32> to vector<16x16x4xf32>
    %c5 = arith.constant 5 : index
    %c5_6 = arith.constant 5 : index
    %c0_7 = arith.constant 0 : index
    %4 = vector.load %arg17[%c5, %c5_6, %c0_7] : memref<26x26x4xf32, #tpu.memory_space<vmem>>, vector<16x16x4xf32>
    tpu.vector_store %arg17[%c5, %c5_6, %c0_7], %3 {strides = array<i32>} : memref<26x26x4xf32, #tpu.memory_space<vmem>>, vector<16x16x4xf32>,
    %c4 = arith.constant 4 : index
    %c4_8 = arith.constant 4 : index
    %c0_9 = arith.constant 0 : index
    %5 = vector.load %arg17[%c4, %c4_8, %c0_9] : memref<26x26x4xf32, #tpu.memory_space<vmem>>, vector<16x16x4xf32>
    %6 = vector.shape_cast %5 : vector<16x16x4xf32> to vector<256x4xf32>
    %c0_10 = arith.constant 0 : index
    %c0_11 = arith.constant 0 : index
    %7 = vector.load %arg18[%c0_10, %c0_11] : memref<256x36xf32, #tpu.memory_space<vmem>>, vector<256x4xf32>
    tpu.vector_store %arg18[%c0_10, %c0_11], %6 {strides = array<i32>} : memref<256x36xf32, #tpu.memory_space<vmem>>, vector<256x4xf32>,
    %c4_12 = arith.constant 4 : index
    %c5_13 = arith.constant 5 : index
    %c0_14 = arith.constant 0 : index
    %8 = vector.load %arg17[%c4_12, %c5_13, %c0_14] : memref<26x26x4xf32, #tpu.memory_space<vmem>>, vector<16x16x4xf32>
    %9 = vector.shape_cast %8 : vector<16x16x4xf32> to vector<256x4xf32>
    %c0_15 = arith.constant 0 : index
    %c4_16 = arith.constant 4 : index
    %10 = vector.load %arg18[%c0_15, %c4_16] : memref<256x36xf32, #tpu.memory_space<vmem>>, vector<256x4xf32>
    tpu.vector_store %arg18[%c0_15, %c4_16], %9 {strides = array<i32>} : memref<256x36xf32, #tpu.memory_space<vmem>>, vector<256x4xf32>,
    %c4_17 = arith.constant 4 : index
    %c6 = arith.constant 6 : index
    %c0_18 = arith.constant 0 : index
    %11 = vector.load %arg17[%c4_17, %c6, %c0_18] : memref<26x26x4xf32, #tpu.memory_space<vmem>>, vector<16x16x4xf32>
    %12 = vector.shape_cast %11 : vector<16x16x4xf32> to vector<256x4xf32>
    %c0_19 = arith.constant 0 : index
    %c8 = arith.constant 8 : index
    %13 = vector.load %arg18[%c0_19, %c8] : memref<256x36xf32, #tpu.memory_space<vmem>>, vector<256x4xf32>
    tpu.vector_store %arg18[%c0_19, %c8], %12 {strides = array<i32>} : memref<256x36xf32, #tpu.memory_space<vmem>>, vector<256x4xf32>,
    %c5_20 = arith.constant 5 : index
    %c4_21 = arith.constant 4 : index
    %c0_22 = arith.constant 0 : index
    %14 = vector.load %arg17[%c5_20, %c4_21, %c0_22] : memref<26x26x4xf32, #tpu.memory_space<vmem>>, vector<16x16x4xf32>
    %15 = vector.shape_cast %14 : vector<16x16x4xf32> to vector<256x4xf32>
    %c0_23 = arith.constant 0 : index
    %c12 = arith.constant 12 : index
    %16 = vector.load %arg18[%c0_23, %c12] : memref<256x36xf32, #tpu.memory_space<vmem>>, vector<256x4xf32>
    tpu.vector_store %arg18[%c0_23, %c12], %15 {strides = array<i32>} : memref<256x36xf32, #tpu.memory_space<vmem>>, vector<256x4xf32>,
    %c5_24 = arith.constant 5 : index
    %c5_25 = arith.constant 5 : index
    %c0_26 = arith.constant 0 : index
    %17 = vector.load %arg17[%c5_24, %c5_25, %c0_26] : memref<26x26x4xf32, #tpu.memory_space<vmem>>, vector<16x16x4xf32>
    %18 = vector.shape_cast %17 : vector<16x16x4xf32> to vector<256x4xf32>
    %c0_27 = arith.constant 0 : index
    %c16 = arith.constant 16 : index
    %19 = vector.load %arg18[%c0_27, %c16] : memref<256x36xf32, #tpu.memory_space<vmem>>, vector<256x4xf32>
    tpu.vector_store %arg18[%c0_27, %c16], %18 {strides = array<i32>} : memref<256x36xf32, #tpu.memory_space<vmem>>, vector<256x4xf32>,
    %c5_28 = arith.constant 5 : index
    %c6_29 = arith.constant 6 : index
    %c0_30 = arith.constant 0 : index
    %20 = vector.load %arg17[%c5_28, %c6_29, %c0_30] : memref<26x26x4xf32, #tpu.memory_space<vmem>>, vector<16x16x4xf32>
    %21 = vector.shape_cast %20 : vector<16x16x4xf32> to vector<256x4xf32>
    %c0_31 = arith.constant 0 : index
    %c20 = arith.constant 20 : index
    %22 = vector.load %arg18[%c0_31, %c20] : memref<256x36xf32, #tpu.memory_space<vmem>>, vector<256x4xf32>
    tpu.vector_store %arg18[%c0_31, %c20], %21 {strides = array<i32>} : memref<256x36xf32, #tpu.memory_space<vmem>>, vector<256x4xf32>,
    %c6_32 = arith.constant 6 : index
    %c4_33 = arith.constant 4 : index
    %c0_34 = arith.constant 0 : index
    %23 = vector.load %arg17[%c6_32, %c4_33, %c0_34] : memref<26x26x4xf32, #tpu.memory_space<vmem>>, vector<16x16x4xf32>
    %24 = vector.shape_cast %23 : vector<16x16x4xf32> to vector<256x4xf32>
    %c0_35 = arith.constant 0 : index
    %c24 = arith.constant 24 : index
    %25 = vector.load %arg18[%c0_35, %c24] : memref<256x36xf32, #tpu.memory_space<vmem>>, vector<256x4xf32>
    tpu.vector_store %arg18[%c0_35, %c24], %24 {strides = array<i32>} : memref<256x36xf32, #tpu.memory_space<vmem>>, vector<256x4xf32>,
    %c6_36 = arith.constant 6 : index
    %c5_37 = arith.constant 5 : index
    %c0_38 = arith.constant 0 : index
    %26 = vector.load %arg17[%c6_36, %c5_37, %c0_38] : memref<26x26x4xf32, #tpu.memory_space<vmem>>, vector<16x16x4xf32>
    %27 = vector.shape_cast %26 : vector<16x16x4xf32> to vector<256x4xf32>
    %c0_39 = arith.constant 0 : index
    %c28 = arith.constant 28 : index
    %28 = vector.load %arg18[%c0_39, %c28] : memref<256x36xf32, #tpu.memory_space<vmem>>, vector<256x4xf32>
    tpu.vector_store %arg18[%c0_39, %c28], %27 {strides = array<i32>} : memref<256x36xf32, #tpu.memory_space<vmem>>, vector<256x4xf32>,
    %c6_40 = arith.constant 6 : index
    %c6_41 = arith.constant 6 : index
    %c0_42 = arith.constant 0 : index
    %29 = vector.load %arg17[%c6_40, %c6_41, %c0_42] : memref<26x26x4xf32, #tpu.memory_space<vmem>>, vector<16x16x4xf32>
    %30 = vector.shape_cast %29 : vector<16x16x4xf32> to vector<256x4xf32>
    %c0_43 = arith.constant 0 : index
    %c32 = arith.constant 32 : index
    %31 = vector.load %arg18[%c0_43, %c32] : memref<256x36xf32, #tpu.memory_space<vmem>>, vector<256x4xf32>
    tpu.vector_store %arg18[%c0_43, %c32], %30 {strides = array<i32>} : memref<256x36xf32, #tpu.memory_space<vmem>>, vector<256x4xf32>,
    %c0_44 = arith.constant 0 : index
    %c0_45 = arith.constant 0 : index
    %32 = vector.load %arg18[%c0_44, %c0_45] : memref<256x36xf32, #tpu.memory_space<vmem>>, vector<256x36xf32>
    %c0_46 = arith.constant 0 : index
    %c0_47 = arith.constant 0 : index
    %33 = vector.load %arg2[%c0_46, %c0_47] : memref<36x4xf32, #tpu.memory_space<vmem>>, vector<36x4xf32>
    %cst_48 = arith.constant dense<0.000000e+00> : vector<256x4xf32>
    %34 = tpu.matmul %32, %33, %cst_48 {dimension_numbers = #tpu.dot_dimension_numbers<[1], [0], [0], [1], [0, 0, 1, 1], [], []>} : vector<256x36xf32>, vector<36x4xf32>, vector<256x4xf32> -> vector<256x4xf32>
    %c0_49 = arith.constant 0 : index
    %c0_50 = arith.constant 0 : index
    %35 = vector.load %arg3[%c0_49, %c0_50] : memref<1x4xf32, #tpu.memory_space<vmem>>, vector<1x4xf32>
    %36 = vector.broadcast %35 : vector<1x4xf32> to vector<256x4xf32>
    %37 = arith.mulf %34, %36 : vector<256x4xf32>
    %c0_51 = arith.constant 0 : index
    %c0_52 = arith.constant 0 : index
    %38 = vector.load %arg4[%c0_51, %c0_52] : memref<1x4xf32, #tpu.memory_space<vmem>>, vector<1x4xf32>
    %39 = vector.broadcast %38 : vector<1x4xf32> to vector<256x4xf32>
    %40 = arith.addf %37, %39 : vector<256x4xf32>
    %cst_53 = arith.constant 0.000000e+00 : f32
    %41 = vector.broadcast %cst_53 : f32 to vector<256x4xf32>
    %42 = arith.maximumf %40, %41 : vector<256x4xf32>
    %c2 = arith.constant 2 : index
    %c2_54 = arith.constant 2 : index
    %c0_55 = arith.constant 0 : index
    %43 = vector.load %arg17[%c2, %c2_54, %c0_55] : memref<26x26x4xf32, #tpu.memory_space<vmem>>, vector<16x16x4xf32>
    %44 = vector.shape_cast %43 : vector<16x16x4xf32> to vector<256x4xf32>
    %c0_56 = arith.constant 0 : index
    %c0_57 = arith.constant 0 : index
    %45 = vector.load %arg18[%c0_56, %c0_57] : memref<256x36xf32, #tpu.memory_space<vmem>>, vector<256x4xf32>
    tpu.vector_store %arg18[%c0_56, %c0_57], %44 {strides = array<i32>} : memref<256x36xf32, #tpu.memory_space<vmem>>, vector<256x4xf32>,
    %c2_58 = arith.constant 2 : index
    %c5_59 = arith.constant 5 : index
    %c0_60 = arith.constant 0 : index
    %46 = vector.load %arg17[%c2_58, %c5_59, %c0_60] : memref<26x26x4xf32, #tpu.memory_space<vmem>>, vector<16x16x4xf32>
    %47 = vector.shape_cast %46 : vector<16x16x4xf32> to vector<256x4xf32>
    %c0_61 = arith.constant 0 : index
    %c4_62 = arith.constant 4 : index
    %48 = vector.load %arg18[%c0_61, %c4_62] : memref<256x36xf32, #tpu.memory_space<vmem>>, vector<256x4xf32>
    tpu.vector_store %arg18[%c0_61, %c4_62], %47 {strides = array<i32>} : memref<256x36xf32, #tpu.memory_space<vmem>>, vector<256x4xf32>,
    %c2_63 = arith.constant 2 : index
    %c8_64 = arith.constant 8 : index
    %c0_65 = arith.constant 0 : index
    %49 = vector.load %arg17[%c2_63, %c8_64, %c0_65] : memref<26x26x4xf32, #tpu.memory_space<vmem>>, vector<16x16x4xf32>
    %50 = vector.shape_cast %49 : vector<16x16x4xf32> to vector<256x4xf32>
    %c0_66 = arith.constant 0 : index
    %c8_67 = arith.constant 8 : index
    %51 = vector.load %arg18[%c0_66, %c8_67] : memref<256x36xf32, #tpu.memory_space<vmem>>, vector<256x4xf32>
    tpu.vector_store %arg18[%c0_66, %c8_67], %50 {strides = array<i32>} : memref<256x36xf32, #tpu.memory_space<vmem>>, vector<256x4xf32>,
    %c5_68 = arith.constant 5 : index
    %c2_69 = arith.constant 2 : index
    %c0_70 = arith.constant 0 : index
    %52 = vector.load %arg17[%c5_68, %c2_69, %c0_70] : memref<26x26x4xf32, #tpu.memory_space<vmem>>, vector<16x16x4xf32>
    %53 = vector.shape_cast %52 : vector<16x16x4xf32> to vector<256x4xf32>
    %c0_71 = arith.constant 0 : index
    %c12_72 = arith.constant 12 : index
    %54 = vector.load %arg18[%c0_71, %c12_72] : memref<256x36xf32, #tpu.memory_space<vmem>>, vector<256x4xf32>
    tpu.vector_store %arg18[%c0_71, %c12_72], %53 {strides = array<i32>} : memref<256x36xf32, #tpu.memory_space<vmem>>, vector<256x4xf32>,
    %c5_73 = arith.constant 5 : index
    %c5_74 = arith.constant 5 : index
    %c0_75 = arith.constant 0 : index
    %55 = vector.load %arg17[%c5_73, %c5_74, %c0_75] : memref<26x26x4xf32, #tpu.memory_space<vmem>>, vector<16x16x4xf32>
    %56 = vector.shape_cast %55 : vector<16x16x4xf32> to vector<256x4xf32>
    %c0_76 = arith.constant 0 : index
    %c16_77 = arith.constant 16 : index
    %57 = vector.load %arg18[%c0_76, %c16_77] : memref<256x36xf32, #tpu.memory_space<vmem>>, vector<256x4xf32>
    tpu.vector_store %arg18[%c0_76, %c16_77], %56 {strides = array<i32>} : memref<256x36xf32, #tpu.memory_space<vmem>>, vector<256x4xf32>,
    %c5_78 = arith.constant 5 : index
    %c8_79 = arith.constant 8 : index
    %c0_80 = arith.constant 0 : index
    %58 = vector.load %arg17[%c5_78, %c8_79, %c0_80] : memref<26x26x4xf32, #tpu.memory_space<vmem>>, vector<16x16x4xf32>
    %59 = vector.shape_cast %58 : vector<16x16x4xf32> to vector<256x4xf32>
    %c0_81 = arith.constant 0 : index
    %c20_82 = arith.constant 20 : index
    %60 = vector.load %arg18[%c0_81, %c20_82] : memref<256x36xf32, #tpu.memory_space<vmem>>, vector<256x4xf32>
    tpu.vector_store %arg18[%c0_81, %c20_82], %59 {strides = array<i32>} : memref<256x36xf32, #tpu.memory_space<vmem>>, vector<256x4xf32>,
    %c8_83 = arith.constant 8 : index
    %c2_84 = arith.constant 2 : index
    %c0_85 = arith.constant 0 : index
    %61 = vector.load %arg17[%c8_83, %c2_84, %c0_85] : memref<26x26x4xf32, #tpu.memory_space<vmem>>, vector<16x16x4xf32>
    %62 = vector.shape_cast %61 : vector<16x16x4xf32> to vector<256x4xf32>
    %c0_86 = arith.constant 0 : index
    %c24_87 = arith.constant 24 : index
    %63 = vector.load %arg18[%c0_86, %c24_87] : memref<256x36xf32, #tpu.memory_space<vmem>>, vector<256x4xf32>
    tpu.vector_store %arg18[%c0_86, %c24_87], %62 {strides = array<i32>} : memref<256x36xf32, #tpu.memory_space<vmem>>, vector<256x4xf32>,
    %c8_88 = arith.constant 8 : index
    %c5_89 = arith.constant 5 : index
    %c0_90 = arith.constant 0 : index
    %64 = vector.load %arg17[%c8_88, %c5_89, %c0_90] : memref<26x26x4xf32, #tpu.memory_space<vmem>>, vector<16x16x4xf32>
    %65 = vector.shape_cast %64 : vector<16x16x4xf32> to vector<256x4xf32>
    %c0_91 = arith.constant 0 : index
    %c28_92 = arith.constant 28 : index
    %66 = vector.load %arg18[%c0_91, %c28_92] : memref<256x36xf32, #tpu.memory_space<vmem>>, vector<256x4xf32>
    tpu.vector_store %arg18[%c0_91, %c28_92], %65 {strides = array<i32>} : memref<256x36xf32, #tpu.memory_space<vmem>>, vector<256x4xf32>,
    %c8_93 = arith.constant 8 : index
    %c8_94 = arith.constant 8 : index
    %c0_95 = arith.constant 0 : index
    %67 = vector.load %arg17[%c8_93, %c8_94, %c0_95] : memref<26x26x4xf32, #tpu.memory_space<vmem>>, vector<16x16x4xf32>
    %68 = vector.shape_cast %67 : vector<16x16x4xf32> to vector<256x4xf32>
    %c0_96 = arith.constant 0 : index
    %c32_97 = arith.constant 32 : index
    %69 = vector.load %arg18[%c0_96, %c32_97] : memref<256x36xf32, #tpu.memory_space<vmem>>, vector<256x4xf32>
    tpu.vector_store %arg18[%c0_96, %c32_97], %68 {strides = array<i32>} : memref<256x36xf32, #tpu.memory_space<vmem>>, vector<256x4xf32>,
    %c0_98 = arith.constant 0 : index
    %c0_99 = arith.constant 0 : index
    %70 = vector.load %arg18[%c0_98, %c0_99] : memref<256x36xf32, #tpu.memory_space<vmem>>, vector<256x36xf32>
    %c0_100 = arith.constant 0 : index
    %c0_101 = arith.constant 0 : index
    %71 = vector.load %arg5[%c0_100, %c0_101] : memref<36x4xf32, #tpu.memory_space<vmem>>, vector<36x4xf32>
    %cst_102 = arith.constant dense<0.000000e+00> : vector<256x4xf32>
    %72 = tpu.matmul %70, %71, %cst_102 {dimension_numbers = #tpu.dot_dimension_numbers<[1], [0], [0], [1], [0, 0, 1, 1], [], []>} : vector<256x36xf32>, vector<36x4xf32>, vector<256x4xf32> -> vector<256x4xf32>
    %c0_103 = arith.constant 0 : index
    %c0_104 = arith.constant 0 : index
    %73 = vector.load %arg6[%c0_103, %c0_104] : memref<1x4xf32, #tpu.memory_space<vmem>>, vector<1x4xf32>
    %74 = vector.broadcast %73 : vector<1x4xf32> to vector<256x4xf32>
    %75 = arith.mulf %72, %74 : vector<256x4xf32>
    %c0_105 = arith.constant 0 : index
    %c0_106 = arith.constant 0 : index
    %76 = vector.load %arg7[%c0_105, %c0_106] : memref<1x4xf32, #tpu.memory_space<vmem>>, vector<1x4xf32>
    %77 = vector.broadcast %76 : vector<1x4xf32> to vector<256x4xf32>
    %78 = arith.addf %75, %77 : vector<256x4xf32>
    %cst_107 = arith.constant 0.000000e+00 : f32
    %79 = vector.broadcast %cst_107 : f32 to vector<256x4xf32>
    %80 = arith.maximumf %78, %79 : vector<256x4xf32>
    %c0_108 = arith.constant 0 : index
    %c0_109 = arith.constant 0 : index
    %c0_110 = arith.constant 0 : index
    %81 = vector.load %arg17[%c0_108, %c0_109, %c0_110] : memref<26x26x4xf32, #tpu.memory_space<vmem>>, vector<16x16x4xf32>
    %82 = vector.shape_cast %81 : vector<16x16x4xf32> to vector<256x4xf32>
    %c0_111 = arith.constant 0 : index
    %c0_112 = arith.constant 0 : index
    %83 = vector.load %arg18[%c0_111, %c0_112] : memref<256x36xf32, #tpu.memory_space<vmem>>, vector<256x4xf32>
    tpu.vector_store %arg18[%c0_111, %c0_112], %82 {strides = array<i32>} : memref<256x36xf32, #tpu.memory_space<vmem>>, vector<256x4xf32>,
    %c0_113 = arith.constant 0 : index
    %c5_114 = arith.constant 5 : index
    %c0_115 = arith.constant 0 : index
    %84 = vector.load %arg17[%c0_113, %c5_114, %c0_115] : memref<26x26x4xf32, #tpu.memory_space<vmem>>, vector<16x16x4xf32>
    %85 = vector.shape_cast %84 : vector<16x16x4xf32> to vector<256x4xf32>
    %c0_116 = arith.constant 0 : index
    %c4_117 = arith.constant 4 : index
    %86 = vector.load %arg18[%c0_116, %c4_117] : memref<256x36xf32, #tpu.memory_space<vmem>>, vector<256x4xf32>
    tpu.vector_store %arg18[%c0_116, %c4_117], %85 {strides = array<i32>} : memref<256x36xf32, #tpu.memory_space<vmem>>, vector<256x4xf32>,
    %c0_118 = arith.constant 0 : index
    %c10 = arith.constant 10 : index
    %c0_119 = arith.constant 0 : index
    %87 = vector.load %arg17[%c0_118, %c10, %c0_119] : memref<26x26x4xf32, #tpu.memory_space<vmem>>, vector<16x16x4xf32>
    %88 = vector.shape_cast %87 : vector<16x16x4xf32> to vector<256x4xf32>
    %c0_120 = arith.constant 0 : index
    %c8_121 = arith.constant 8 : index
    %89 = vector.load %arg18[%c0_120, %c8_121] : memref<256x36xf32, #tpu.memory_space<vmem>>, vector<256x4xf32>
    tpu.vector_store %arg18[%c0_120, %c8_121], %88 {strides = array<i32>} : memref<256x36xf32, #tpu.memory_space<vmem>>, vector<256x4xf32>,
    %c5_122 = arith.constant 5 : index
    %c0_123 = arith.constant 0 : index
    %c0_124 = arith.constant 0 : index
    %90 = vector.load %arg17[%c5_122, %c0_123, %c0_124] : memref<26x26x4xf32, #tpu.memory_space<vmem>>, vector<16x16x4xf32>
    %91 = vector.shape_cast %90 : vector<16x16x4xf32> to vector<256x4xf32>
    %c0_125 = arith.constant 0 : index
    %c12_126 = arith.constant 12 : index
    %92 = vector.load %arg18[%c0_125, %c12_126] : memref<256x36xf32, #tpu.memory_space<vmem>>, vector<256x4xf32>
    tpu.vector_store %arg18[%c0_125, %c12_126], %91 {strides = array<i32>} : memref<256x36xf32, #tpu.memory_space<vmem>>, vector<256x4xf32>,
    %c5_127 = arith.constant 5 : index
    %c5_128 = arith.constant 5 : index
    %c0_129 = arith.constant 0 : index
    %93 = vector.load %arg17[%c5_127, %c5_128, %c0_129] : memref<26x26x4xf32, #tpu.memory_space<vmem>>, vector<16x16x4xf32>
    %94 = vector.shape_cast %93 : vector<16x16x4xf32> to vector<256x4xf32>
    %c0_130 = arith.constant 0 : index
    %c16_131 = arith.constant 16 : index
    %95 = vector.load %arg18[%c0_130, %c16_131] : memref<256x36xf32, #tpu.memory_space<vmem>>, vector<256x4xf32>
    tpu.vector_store %arg18[%c0_130, %c16_131], %94 {strides = array<i32>} : memref<256x36xf32, #tpu.memory_space<vmem>>, vector<256x4xf32>,
    %c5_132 = arith.constant 5 : index
    %c10_133 = arith.constant 10 : index
    %c0_134 = arith.constant 0 : index
    %96 = vector.load %arg17[%c5_132, %c10_133, %c0_134] : memref<26x26x4xf32, #tpu.memory_space<vmem>>, vector<16x16x4xf32>
    %97 = vector.shape_cast %96 : vector<16x16x4xf32> to vector<256x4xf32>
    %c0_135 = arith.constant 0 : index
    %c20_136 = arith.constant 20 : index
    %98 = vector.load %arg18[%c0_135, %c20_136] : memref<256x36xf32, #tpu.memory_space<vmem>>, vector<256x4xf32>
    tpu.vector_store %arg18[%c0_135, %c20_136], %97 {strides = array<i32>} : memref<256x36xf32, #tpu.memory_space<vmem>>, vector<256x4xf32>,
    %c10_137 = arith.constant 10 : index
    %c0_138 = arith.constant 0 : index
    %c0_139 = arith.constant 0 : index
    %99 = vector.load %arg17[%c10_137, %c0_138, %c0_139] : memref<26x26x4xf32, #tpu.memory_space<vmem>>, vector<16x16x4xf32>
    %100 = vector.shape_cast %99 : vector<16x16x4xf32> to vector<256x4xf32>
    %c0_140 = arith.constant 0 : index
    %c24_141 = arith.constant 24 : index
    %101 = vector.load %arg18[%c0_140, %c24_141] : memref<256x36xf32, #tpu.memory_space<vmem>>, vector<256x4xf32>
    tpu.vector_store %arg18[%c0_140, %c24_141], %100 {strides = array<i32>} : memref<256x36xf32, #tpu.memory_space<vmem>>, vector<256x4xf32>,
    %c10_142 = arith.constant 10 : index
    %c5_143 = arith.constant 5 : index
    %c0_144 = arith.constant 0 : index
    %102 = vector.load %arg17[%c10_142, %c5_143, %c0_144] : memref<26x26x4xf32, #tpu.memory_space<vmem>>, vector<16x16x4xf32>
    %103 = vector.shape_cast %102 : vector<16x16x4xf32> to vector<256x4xf32>
    %c0_145 = arith.constant 0 : index
    %c28_146 = arith.constant 28 : index
    %104 = vector.load %arg18[%c0_145, %c28_146] : memref<256x36xf32, #tpu.memory_space<vmem>>, vector<256x4xf32>
    tpu.vector_store %arg18[%c0_145, %c28_146], %103 {strides = array<i32>} : memref<256x36xf32, #tpu.memory_space<vmem>>, vector<256x4xf32>,
    %c10_147 = arith.constant 10 : index
    %c10_148 = arith.constant 10 : index
    %c0_149 = arith.constant 0 : index
    %105 = vector.load %arg17[%c10_147, %c10_148, %c0_149] : memref<26x26x4xf32, #tpu.memory_space<vmem>>, vector<16x16x4xf32>
    %106 = vector.shape_cast %105 : vector<16x16x4xf32> to vector<256x4xf32>
    %c0_150 = arith.constant 0 : index
    %c32_151 = arith.constant 32 : index
    %107 = vector.load %arg18[%c0_150, %c32_151] : memref<256x36xf32, #tpu.memory_space<vmem>>, vector<256x4xf32>
    tpu.vector_store %arg18[%c0_150, %c32_151], %106 {strides = array<i32>} : memref<256x36xf32, #tpu.memory_space<vmem>>, vector<256x4xf32>,
    %c0_152 = arith.constant 0 : index
    %c0_153 = arith.constant 0 : index
    %108 = vector.load %arg18[%c0_152, %c0_153] : memref<256x36xf32, #tpu.memory_space<vmem>>, vector<256x36xf32>
    %c0_154 = arith.constant 0 : index
    %c0_155 = arith.constant 0 : index
    %109 = vector.load %arg8[%c0_154, %c0_155] : memref<36x4xf32, #tpu.memory_space<vmem>>, vector<36x4xf32>
    %cst_156 = arith.constant dense<0.000000e+00> : vector<256x4xf32>
    %110 = tpu.matmul %108, %109, %cst_156 {dimension_numbers = #tpu.dot_dimension_numbers<[1], [0], [0], [1], [0, 0, 1, 1], [], []>} : vector<256x36xf32>, vector<36x4xf32>, vector<256x4xf32> -> vector<256x4xf32>
    %c0_157 = arith.constant 0 : index
    %c0_158 = arith.constant 0 : index
    %111 = vector.load %arg9[%c0_157, %c0_158] : memref<1x4xf32, #tpu.memory_space<vmem>>, vector<1x4xf32>
    %112 = vector.broadcast %111 : vector<1x4xf32> to vector<256x4xf32>
    %113 = arith.mulf %110, %112 : vector<256x4xf32>
    %c0_159 = arith.constant 0 : index
    %c0_160 = arith.constant 0 : index
    %114 = vector.load %arg10[%c0_159, %c0_160] : memref<1x4xf32, #tpu.memory_space<vmem>>, vector<1x4xf32>
    %115 = vector.broadcast %114 : vector<1x4xf32> to vector<256x4xf32>
    %116 = arith.addf %113, %115 : vector<256x4xf32>
    %cst_161 = arith.constant 0.000000e+00 : f32
    %117 = vector.broadcast %cst_161 : f32 to vector<256x4xf32>
    %118 = arith.maximumf %116, %117 : vector<256x4xf32>
    %119 = arith.addf %42, %80 : vector<256x4xf32>
    %120 = arith.addf %119, %118 : vector<256x4xf32>
    %c0_162 = arith.constant 0 : index
    %c16_163 = arith.constant 16 : index
    %121 = vector.load %arg18[%c0_162, %c16_163] : memref<256x36xf32, #tpu.memory_space<vmem>>, vector<256x4xf32>
    %cst_164 = arith.constant dense<0.000000e+00> : vector<4xf32>
    %122 = vector.multi_reduction <add>, %120, %cst_164 [0] : vector<256x4xf32> to vector<4xf32>
    %123 = vector.shape_cast %122 : vector<4xf32> to vector<1x4xf32>
    %cst_165 = arith.constant 2.560000e+02 : f32
    %124 = vector.broadcast %cst_165 : f32 to vector<1x4xf32>
    %125 = arith.divf %123, %124 : vector<1x4xf32>
    %c0_166 = arith.constant 0 : index
    %c0_167 = arith.constant 0 : index
    %126 = vector.load %arg14[%c0_166, %c0_167] : memref<4x4xf32, #tpu.memory_space<vmem>>, vector<4x4xf32>
    %cst_168 = arith.constant dense<0.000000e+00> : vector<1x4xf32>
    %127 = tpu.matmul %125, %126, %cst_168 {dimension_numbers = #tpu.dot_dimension_numbers<[1], [0], [0], [1], [0, 0, 1, 1], [], []>} : vector<1x4xf32>, vector<4x4xf32>, vector<1x4xf32> -> vector<1x4xf32>
    %c0_169 = arith.constant 0 : index
    %c0_170 = arith.constant 0 : index
    %128 = vector.load %arg15[%c0_169, %c0_170] : memref<1x4xf32, #tpu.memory_space<vmem>>, vector<1x4xf32>
    %129 = arith.addf %127, %128 : vector<1x4xf32>
    %130 = arith.negf %129 : vector<1x4xf32>
    %131 = math.exp %130 : vector<1x4xf32>
    %cst_171 = arith.constant 1.000000e+00 : f32
    %132 = vector.broadcast %cst_171 : f32 to vector<1x4xf32>
    %133 = arith.addf %132, %131 : vector<1x4xf32>
    %134 = arith.divf %132, %133 : vector<1x4xf32>
    %135 = vector.broadcast %134 : vector<1x4xf32> to vector<256x4xf32>
    %136 = arith.mulf %120, %135 : vector<256x4xf32>
    %c0_172 = arith.constant 0 : index
    %c0_173 = arith.constant 0 : index
    %137 = vector.load %arg11[%c0_172, %c0_173] : memref<4x4xf32, #tpu.memory_space<vmem>>, vector<4x4xf32>
    %cst_174 = arith.constant dense<0.000000e+00> : vector<256x4xf32>
    %138 = tpu.matmul %121, %137, %cst_174 {dimension_numbers = #tpu.dot_dimension_numbers<[1], [0], [0], [1], [0, 0, 1, 1], [], []>} : vector<256x4xf32>, vector<4x4xf32>, vector<256x4xf32> -> vector<256x4xf32>
    %c0_175 = arith.constant 0 : index
    %c0_176 = arith.constant 0 : index
    %139 = vector.load %arg12[%c0_175, %c0_176] : memref<1x4xf32, #tpu.memory_space<vmem>>, vector<1x4xf32>
    %140 = vector.broadcast %139 : vector<1x4xf32> to vector<256x4xf32>
    %141 = arith.mulf %138, %140 : vector<256x4xf32>
    %c0_177 = arith.constant 0 : index
    %c0_178 = arith.constant 0 : index
    %142 = vector.load %arg13[%c0_177, %c0_178] : memref<1x4xf32, #tpu.memory_space<vmem>>, vector<1x4xf32>
    %143 = vector.broadcast %142 : vector<1x4xf32> to vector<256x4xf32>
    %144 = arith.addf %141, %143 : vector<256x4xf32>
    %cst_179 = arith.constant 0.000000e+00 : f32
    %145 = vector.broadcast %cst_179 : f32 to vector<256x4xf32>
    %146 = arith.maximumf %144, %145 : vector<256x4xf32>
    %147 = vector.extract_strided_slice %146 {offsets = [0, 0], sizes = [256, 3], strides = [1, 1]} : vector<256x4xf32> to vector<256x3xf32>
    %148 = tpu.concatenate %136, %147 in 1 : vector<256x4xf32>, vector<256x3xf32> -> vector<256x7xf32>
    %149 = vector.shape_cast %148 : vector<256x7xf32> to vector<16x16x7xf32>
    %c0_180 = arith.constant 0 : index
    %c0_181 = arith.constant 0 : index
    %c0_182 = arith.constant 0 : index
    %c0_183 = arith.constant 0 : index
    %150 = vector.load %arg16[%c0_180, %c0_181, %c0_182, %c0_183] : memref<1x16x16x7xf32, #tpu.memory_space<vmem>>, vector<1x16x16x7xf32>
    %151 = vector.shape_cast %150 : vector<1x16x16x7xf32> to vector<16x16x7xf32>
    %152 = vector.shape_cast %149 : vector<16x16x7xf32> to vector<1x16x16x7xf32>
    tpu.vector_store %arg16[%c0_180, %c0_181, %c0_182, %c0_183], %152 {strides = array<i32>} : memref<1x16x16x7xf32, #tpu.memory_space<vmem>>, vector<1x16x16x7xf32>,
    return
  }
  func.func @transform_0(%arg0: i32) -> (i32, i32, i32, i32) {
    %c0_i32 = arith.constant 0 : i32
    %c0_i32_0 = arith.constant 0 : i32
    %c0_i32_1 = arith.constant 0 : i32
    %c0_i32_2 = arith.constant 0 : i32
    return %arg0, %c0_i32, %c0_i32_0, %c0_i32_1 : i32, i32, i32, i32
  }
  func.func @transform_1(%arg0: i32) -> (i32, i32) {
    %c0_i32 = arith.constant 0 : i32
    %c0_i32_0 = arith.constant 0 : i32
    %c0_i32_1 = arith.constant 0 : i32
    return %c0_i32, %c0_i32_0 : i32, i32
  }
  func.func @transform_2(%arg0: i32) -> (i32, i32) {
    %c0_i32 = arith.constant 0 : i32
    %c0_i32_0 = arith.constant 0 : i32
    %c0_i32_1 = arith.constant 0 : i32
    return %c0_i32, %c0_i32_0 : i32, i32
  }
  func.func @transform_3(%arg0: i32) -> (i32, i32) {
    %c0_i32 = arith.constant 0 : i32
    %c0_i32_0 = arith.constant 0 : i32
    %c0_i32_1 = arith.constant 0 : i32
    return %c0_i32, %c0_i32_0 : i32, i32
  }
  func.func @transform_4(%arg0: i32) -> (i32, i32) {
    %c0_i32 = arith.constant 0 : i32
    %c0_i32_0 = arith.constant 0 : i32
    %c0_i32_1 = arith.constant 0 : i32
    return %c0_i32, %c0_i32_0 : i32, i32
  }
  func.func @transform_5(%arg0: i32) -> (i32, i32) {
    %c0_i32 = arith.constant 0 : i32
    %c0_i32_0 = arith.constant 0 : i32
    %c0_i32_1 = arith.constant 0 : i32
    return %c0_i32, %c0_i32_0 : i32, i32
  }
  func.func @transform_6(%arg0: i32) -> (i32, i32) {
    %c0_i32 = arith.constant 0 : i32
    %c0_i32_0 = arith.constant 0 : i32
    %c0_i32_1 = arith.constant 0 : i32
    return %c0_i32, %c0_i32_0 : i32, i32
  }
  func.func @transform_7(%arg0: i32) -> (i32, i32) {
    %c0_i32 = arith.constant 0 : i32
    %c0_i32_0 = arith.constant 0 : i32
    %c0_i32_1 = arith.constant 0 : i32
    return %c0_i32, %c0_i32_0 : i32, i32
  }
  func.func @transform_8(%arg0: i32) -> (i32, i32) {
    %c0_i32 = arith.constant 0 : i32
    %c0_i32_0 = arith.constant 0 : i32
    %c0_i32_1 = arith.constant 0 : i32
    return %c0_i32, %c0_i32_0 : i32, i32
  }
  func.func @transform_9(%arg0: i32) -> (i32, i32) {
    %c0_i32 = arith.constant 0 : i32
    %c0_i32_0 = arith.constant 0 : i32
    %c0_i32_1 = arith.constant 0 : i32
    return %c0_i32, %c0_i32_0 : i32, i32
  }
  func.func @transform_10(%arg0: i32) -> (i32, i32) {
    %c0_i32 = arith.constant 0 : i32
    %c0_i32_0 = arith.constant 0 : i32
    %c0_i32_1 = arith.constant 0 : i32
    return %c0_i32, %c0_i32_0 : i32, i32
  }
  func.func @transform_11(%arg0: i32) -> (i32, i32) {
    %c0_i32 = arith.constant 0 : i32
    %c0_i32_0 = arith.constant 0 : i32
    %c0_i32_1 = arith.constant 0 : i32
    return %c0_i32, %c0_i32_0 : i32, i32
  }
  func.func @transform_12(%arg0: i32) -> (i32, i32) {
    %c0_i32 = arith.constant 0 : i32
    %c0_i32_0 = arith.constant 0 : i32
    %c0_i32_1 = arith.constant 0 : i32
    return %c0_i32, %c0_i32_0 : i32, i32
  }
  func.func @transform_13(%arg0: i32) -> (i32, i32) {
    %c0_i32 = arith.constant 0 : i32
    %c0_i32_0 = arith.constant 0 : i32
    %c0_i32_1 = arith.constant 0 : i32
    return %c0_i32, %c0_i32_0 : i32, i32
  }
  func.func @transform_14(%arg0: i32) -> (i32, i32) {
    %c0_i32 = arith.constant 0 : i32
    %c0_i32_0 = arith.constant 0 : i32
    %c0_i32_1 = arith.constant 0 : i32
    return %c0_i32, %c0_i32_0 : i32, i32
  }
  func.func @transform_15(%arg0: i32) -> (i32, i32, i32, i32) {
    %c0_i32 = arith.constant 0 : i32
    %c0_i32_0 = arith.constant 0 : i32
    %c0_i32_1 = arith.constant 0 : i32
    %c0_i32_2 = arith.constant 0 : i32
    return %arg0, %c0_i32, %c0_i32_0, %c0_i32_1 : i32, i32, i32, i32
  }
}

</mosaic_0001>

<bundles_post_ra>
// kernel: conv_our_forward.1
= control target key start
LH: loop header
LB: loop body
LE: loop exit
PB: predicated region body
PF: predicated region fallthrough
CT: control target
= control target key end

     0   :  { %s8562_s18 = smov 0   ;;  %s12867_s0 = inlined_call_operand.vmem [shape: f32[2,16,16,4], index: 0, kind: input, shape index: {}]   ;;  %s12868_s1 = inlined_call_operand.vmem [shape: f32[36,4], index: 1, kind: input, shape index: {}]   ;;  %s12869_s2 = inlined_call_operand.vmem [shape: f32[1,4], index: 2, kind: input, shape index: {}]   ;;  %s12870_s3 = inlined_call_operand.vmem [shape: f32[1,4], index: 3, kind: input, shape index: {}]   ;;  %s12871_s4 = inlined_call_operand.vmem [shape: f32[36,4], index: 4, kind: input, shape index: {}]   ;;  %s12872_s5 = inlined_call_operand.vmem [shape: f32[1,4], index: 5, kind: input, shape index: {}]   ;;  %s12873_s6 = inlined_call_operand.vmem [shape: f32[1,4], index: 6, kind: input, shape index: {}]   ;;  %s12874_s7 = inlined_call_operand.vmem [shape: f32[36,4], index: 7, kind: input, shape index: {}]   ;;  %s12875_s8 = inlined_call_operand.vmem [shape: f32[1,4], index: 8, kind: input, shape index: {}]   ;;  %s12876_s9 = inlined_call_operand.vmem [shape: f32[1,4], index: 9, kind: input, shape index: {}]   ;;  %s12877_s10 = inlined_call_operand.vmem [shape: f32[4,4], index: 10, kind: input, shape index: {}]   ;;  %s12878_s11 = inlined_call_operand.vmem [shape: f32[1,4], index: 11, kind: input, shape index: {}]   ;;  %s12879_s12 = inlined_call_operand.vmem [shape: f32[1,4], index: 12, kind: input, shape index: {}]   ;;  %s12880_s13 = inlined_call_operand.vmem [shape: f32[4,4], index: 13, kind: input, shape index: {}]   ;;  %s12881_s14 = inlined_call_operand.vmem [shape: f32[1,4], index: 14, kind: input, shape index: {}]   ;;  %s12882_s15 = inlined_call_operand.vmem [shape: f32[2,16,16,7], index: 15, kind: output, shape index: {}]  }
   0x1 LB: > { %s7864_s19 = sadd.s32 4294967295, %s8469_s18   ;;  %p7868_p0 = scmp.ge.s32.totalorder %s8469_s18, 1  ;;  %s8469_s18 = sphi %s8562_s18, %s25_s18  }
   0x2   : > { %p437_p1 = scmp.lt.s32.totalorder %s8469_s18, 3 }
   0x4   : > { %p438_p2 = pnand %p7868_p0, %p437_p1 }
   0x6   : > { %441 = sbr.rel (%p438_p2) target bundleno = 2356 (0x934), region = 80 }
   0xd   : > { %vm495_vm0 = vcmask 31744   ;;  %p8572_p3 = scmp.lt.s32.totalorder %s7864_s19, 1  ;;  %v12883_v0 = vmov 0.0   ;;  %s8472_s25 = smov 4   ;;  %vm891_vm1 = vcmask 64544   ;;  %vm1084_vm2 = vcmask 97344  }
   0xe   : > { %513 = vst.msk [vmem:[#allocation2 + $0x80] sm:$0xff] %vm495_vm0, %v12883_v0  ;;  %514 = vst.msk [vmem:[#allocation2 + $0x88] sm:$0xff] %vm495_vm0, %v12883_v0  ;;  %s8473_s26 = smov 8   ;;  %s8474_s27 = smov 12   ;;  %vm1277_vm3 = vcmask 130144   ;;  %vm1470_vm4 = vcmask 162944  }
   0xf   : > { %496 = vst.msk [vmem:[#allocation2] sm:$0xff] %vm495_vm0, %v12883_v0  ;;  %497 = vst.msk [vmem:[#allocation2 + $0x8] sm:$0xff] %vm495_vm0, %v12883_v0  ;;  %s13057_s19 = smov (!%p8572_p3, %s7864_s19), 1  ;;  %s8475_s28 = smov 16   ;;  %vm1663_vm5 = vcmask 195744   ;;  %vm1857_vm6 = vcmask 228544  }
  0x10   : > { %498 = vst.msk [vmem:[#allocation2 + $0x10] sm:$0xff] %vm495_vm0, %v12883_v0  ;;  %501 = vst.msk [vmem:[#allocation2 + $0x20] sm:$0xff] %vm495_vm0, %v12883_v0  ;;  %s8018_s21 = sshll.u32 %s13057_s19, 8  ;;  %s8476_s29 = smov 20   ;;  %vm2410_vm7 = vcmask 1043456   ;;  %vm2050_vm8 = vcmask 261344  }
  0x11   : > { %502 = vst.msk [vmem:[#allocation2 + $0x28] sm:$0xff] %vm495_vm0, %v12883_v0  ;;  %503 = vst.msk [vmem:[#allocation2 + $0x30] sm:$0xff] %vm495_vm0, %v12883_v0  ;;  %s8744_s24 = scalar_lea.vmem %s12867_s0, %s8018_s21  ;;  %s8477_s30 = smov 24   ;;  %vm2243_vm9 = vcmask 294144   ;;  %vm2313_vm10 = vcmask 293888   ;;  %vm499_vm11 = vcmask 25600  }
  0x12   : > { %505 = vst.msk [vmem:[#allocation2 + $0x40] sm:$0xff] %vm495_vm0, %v12883_v0  ;;  %506 = vst.msk [vmem:[#allocation2 + $0x48] sm:$0xff] %vm495_vm0, %v12883_v0  ;;  %v601_v1 = vld [vmem:[%s8744_s24] sm:$0xff]  ;;  %v603_v2 = vld [vmem:[%s8744_s24 + $0x10] sm:$0xff]  ;;  %s8478_s16 = smov 28   ;;  %s8479_s17 = smov 32  }
  0x13   : > { %507 = vst.msk [vmem:[#allocation2 + $0x50] sm:$0xff] %vm495_vm0, %v12883_v0  ;;  %509 = vst.msk [vmem:[#allocation2 + $0x60] sm:$0xff] %vm495_vm0, %v12883_v0  ;;  %v602_v3 = vld [vmem:[%s8744_s24 + $0x8] sm:$0xff]  ;;  %v605_v4 = vld [vmem:[%s8744_s24 + $0x20] sm:$0xff]  ;;  %vm8481_vm12 = vmmov 0   ;;  %vm7776_vm13 = vcmask 56320  }
  0x14   : > { %510 = vst.msk [vmem:[#allocation2 + $0x68] sm:$0xff] %vm495_vm0, %v12883_v0  ;;  %511 = vst.msk [vmem:[#allocation2 + $0x70] sm:$0xff] %vm495_vm0, %v12883_v0  ;;  %v604_v5 = vld [vmem:[%s8744_s24 + $0x18] sm:$0xff]  ;;  %v607_v6 = vld [vmem:[%s8744_s24 + $0x30] sm:$0xff] }
  0x15   : > { %515 = vst.msk [vmem:[#allocation2 + $0x90] sm:$0xff] %vm495_vm0, %v12883_v0  ;;  %517 = vst.msk [vmem:[#allocation2 + $0xa0] sm:$0xff] %vm495_vm0, %v12883_v0  ;;  %v731_v7 = vld [vmem:[#allocation2 + $0x85] sm:$0xff]  ;;  %v608_v11 = vld [vmem:[%s8744_s24 + $0x38] sm:$0xff] }
  0x16   : > { %518 = vst.msk [vmem:[#allocation2 + $0xa8] sm:$0xff] %vm495_vm0, %v12883_v0  ;;  %519 = vst.msk [vmem:[#allocation2 + $0xb0] sm:$0xff] %vm495_vm0, %v12883_v0  ;;  %v606_v9 = vld [vmem:[%s8744_s24 + $0x28] sm:$0xff]  ;;  %795 = vrot.lane.b32.xlu0 %v731_v7, %s8472_s25  ;;  %v609_v10 = vld [vmem:[%s8744_s24 + $0x40] sm:$0xff] }
  0x17   : > { %521 = vst.msk [vmem:[#allocation2 + $0xc0] sm:$0xff] %vm495_vm0, %v12883_v0  ;;  %522 = vst.msk [vmem:[#allocation2 + $0xc8] sm:$0xff] %vm495_vm0, %v12883_v0  ;;  %v611_v12 = vld [vmem:[%s8744_s24 + $0x50] sm:$0xff]  ;;  %v610_v13 = vld [vmem:[%s8744_s24 + $0x48] sm:$0xff] }
  0x18   : > { %523 = vst.msk [vmem:[#allocation2 + $0xd0] sm:$0xff] %vm495_vm0, %v12883_v0  ;;  %525 = vst.msk [vmem:[#allocation2 + $0xe0] sm:$0xff] %vm495_vm0, %v12883_v0  ;;  %v613_v14 = vld [vmem:[%s8744_s24 + $0x60] sm:$0xff]  ;;  %v612_v15 = vld [vmem:[%s8744_s24 + $0x58] sm:$0xff] }
  0x19   : > { %526 = vst.msk [vmem:[#allocation2 + $0xe8] sm:$0xff] %vm495_vm0, %v12883_v0  ;;  %527 = vst.msk [vmem:[#allocation2 + $0xf0] sm:$0xff] %vm495_vm0, %v12883_v0  ;;  %v615_v16 = vld [vmem:[%s8744_s24 + $0x70] sm:$0xff]  ;;  %v614_v17 = vld [vmem:[%s8744_s24 + $0x68] sm:$0xff] }
  0x1a   : > { %529 = vst.msk [vmem:[#allocation2 + $0x100] sm:$0xff] %vm495_vm0, %v12883_v0  ;;  %530 = vst.msk [vmem:[#allocation2 + $0x108] sm:$0xff] %vm495_vm0, %v12883_v0  ;;  %v617_v18 = vld [vmem:[%s8744_s24 + $0x80] sm:$0xff]  ;;  %v616_v19 = vld [vmem:[%s8744_s24 + $0x78] sm:$0xff] }
  0x1b   : > { %531 = vst.msk [vmem:[#allocation2 + $0x110] sm:$0xff] %vm495_vm0, %v12883_v0  ;;  %533 = vst.msk [vmem:[#allocation2 + $0x120] sm:$0xff] %vm495_vm0, %v12883_v0  ;;  %v619_v20 = vld [vmem:[%s8744_s24 + $0x90] sm:$0xff]  ;;  %v618_v21 = vld [vmem:[%s8744_s24 + $0x88] sm:$0xff] }
  0x1c   : > { %534 = vst.msk [vmem:[#allocation2 + $0x128] sm:$0xff] %vm495_vm0, %v12883_v0  ;;  %535 = vst.msk [vmem:[#allocation2 + $0x130] sm:$0xff] %vm495_vm0, %v12883_v0  ;;  %v732_v8 = vld [vmem:[#allocation2 + $0x8d] sm:$0xff]  ;;  %v621_v22 = vld [vmem:[%s8744_s24 + $0xa0] sm:$0xff] }
  0x1d   : > { %537 = vst.msk [vmem:[#allocation2 + $0x140] sm:$0xff] %vm495_vm0, %v12883_v0  ;;  %538 = vst.msk [vmem:[#allocation2 + $0x148] sm:$0xff] %vm495_vm0, %v12883_v0  ;;  %797 = vrot.lane.b32.xlu0 %v732_v8, %s8472_s25  ;;  %v620_v23 = vld [vmem:[%s8744_s24 + $0x98] sm:$0xff]  ;;  %v623_v24 = vld [vmem:[%s8744_s24 + $0xb0] sm:$0xff] }
  0x1e   : > { %539 = vst.msk [vmem:[#allocation2 + $0x150] sm:$0xff] %vm495_vm0, %v12883_v0  ;;  %541 = vst.msk [vmem:[#allocation2 + $0x160] sm:$0xff] %vm495_vm0, %v12883_v0  ;;  %v622_v28 = vld [vmem:[%s8744_s24 + $0xa8] sm:$0xff]  ;;  %v625_v29 = vld [vmem:[%s8744_s24 + $0xc0] sm:$0xff] }
  0x1f   : > { %542 = vst.msk [vmem:[#allocation2 + $0x168] sm:$0xff] %vm495_vm0, %v12883_v0  ;;  %543 = vst.msk [vmem:[#allocation2 + $0x170] sm:$0xff] %vm495_vm0, %v12883_v0  ;;  %v624_v33 = vld [vmem:[%s8744_s24 + $0xb8] sm:$0xff]  ;;  %v627_v34 = vld [vmem:[%s8744_s24 + $0xd0] sm:$0xff] }
  0x20   : > { %545 = vst.msk [vmem:[#allocation2 + $0x180] sm:$0xff] %vm495_vm0, %v12883_v0  ;;  %546 = vst.msk [vmem:[#allocation2 + $0x188] sm:$0xff] %vm495_vm0, %v12883_v0  ;;  %v626_v35 = vld [vmem:[%s8744_s24 + $0xc8] sm:$0xff]  ;;  %v629_v36 = vld [vmem:[%s8744_s24 + $0xe0] sm:$0xff] }
  0x21   : > { %547 = vst.msk [vmem:[#allocation2 + $0x190] sm:$0xff] %vm495_vm0, %v12883_v0  ;;  %549 = vst.msk [vmem:[#allocation2 + $0x1a0] sm:$0xff] %vm495_vm0, %v12883_v0  ;;  %v628_v37 = vld [vmem:[%s8744_s24 + $0xd8] sm:$0xff]  ;;  %v630_v39 = vld [vmem:[%s8744_s24 + $0xe8] sm:$0xff] }
  0x22   : > { %550 = vst.msk [vmem:[#allocation2 + $0x1a8] sm:$0xff] %vm495_vm0, %v12883_v0  ;;  %551 = vst.msk [vmem:[#allocation2 + $0x1b0] sm:$0xff] %vm495_vm0, %v12883_v0  ;;  %v667_v45 = vld [vmem:[#allocation2 + $0x84] sm:$0xff]  ;;  %v668_v46 = vld [vmem:[#allocation2 + $0x8c] sm:$0xff] }
  0x23   : > { %553 = vst.msk [vmem:[#allocation2 + $0x1c0] sm:$0xff] %vm495_vm0, %v12883_v0  ;;  %554 = vst.msk [vmem:[#allocation2 + $0x1c8] sm:$0xff] %vm495_vm0, %v12883_v0 }
  0x24   : > { %555 = vst.msk [vmem:[#allocation2 + $0x1d0] sm:$0xff] %vm495_vm0, %v12883_v0  ;;  %557 = vst.msk [vmem:[#allocation2 + $0x1e0] sm:$0xff] %vm495_vm0, %v12883_v0 }
  0x25   : > { %558 = vst.msk [vmem:[#allocation2 + $0x1e8] sm:$0xff] %vm495_vm0, %v12883_v0  ;;  %559 = vst.msk [vmem:[#allocation2 + $0x1f0] sm:$0xff] %vm495_vm0, %v12883_v0 }
  0x26   : > { %561 = vst.msk [vmem:[#allocation2 + $0x200] sm:$0xff] %vm495_vm0, %v12883_v0  ;;  %562 = vst.msk [vmem:[#allocation2 + $0x208] sm:$0xff] %vm495_vm0, %v12883_v0 }
  0x27   : > { %563 = vst.msk [vmem:[#allocation2 + $0x210] sm:$0xff] %vm495_vm0, %v12883_v0  ;;  %565 = vst.msk [vmem:[#allocation2 + $0x220] sm:$0xff] %vm495_vm0, %v12883_v0 }
  0x28   : > { %566 = vst.msk [vmem:[#allocation2 + $0x228] sm:$0xff] %vm495_vm0, %v12883_v0  ;;  %567 = vst.msk [vmem:[#allocation2 + $0x230] sm:$0xff] %vm495_vm0, %v12883_v0 }
  0x29   : > { %569 = vst.msk [vmem:[#allocation2 + $0x240] sm:$0xff] %vm495_vm0, %v12883_v0  ;;  %570 = vst.msk [vmem:[#allocation2 + $0x248] sm:$0xff] %vm495_vm0, %v12883_v0 }
  0x2a   : > { %571 = vst.msk [vmem:[#allocation2 + $0x250] sm:$0xff] %vm495_vm0, %v12883_v0  ;;  %573 = vst.msk [vmem:[#allocation2 + $0x260] sm:$0xff] %vm495_vm0, %v12883_v0 }
  0x2b   : > { %574 = vst.msk [vmem:[#allocation2 + $0x268] sm:$0xff] %vm495_vm0, %v12883_v0  ;;  %575 = vst.msk [vmem:[#allocation2 + $0x270] sm:$0xff] %vm495_vm0, %v12883_v0 }
  0x2c   : > { %577 = vst.msk [vmem:[#allocation2 + $0x280] sm:$0xff] %vm495_vm0, %v12883_v0  ;;  %578 = vst.msk [vmem:[#allocation2 + $0x288] sm:$0xff] %vm495_vm0, %v12883_v0 }
  0x2d   : > { %579 = vst.msk [vmem:[#allocation2 + $0x290] sm:$0xff] %vm495_vm0, %v12883_v0  ;;  %581 = vst.msk [vmem:[#allocation2 + $0x2a0] sm:$0xff] %vm495_vm0, %v12883_v0 }
  0x2e   : > { %582 = vst.msk [vmem:[#allocation2 + $0x2a8] sm:$0xff] %vm495_vm0, %v12883_v0  ;;  %583 = vst.msk [vmem:[#allocation2 + $0x2b0] sm:$0xff] %vm495_vm0, %v12883_v0 }
  0x2f   : > { %585 = vst.msk [vmem:[#allocation2 + $0x2c0] sm:$0xff] %vm495_vm0, %v12883_v0  ;;  %586 = vst.msk [vmem:[#allocation2 + $0x2c8] sm:$0xff] %vm495_vm0, %v12883_v0 }
  0x30   : > { %587 = vst.msk [vmem:[#allocation2 + $0x2d0] sm:$0xff] %vm495_vm0, %v12883_v0  ;;  %589 = vst.msk [vmem:[#allocation2 + $0x2e0] sm:$0xff] %vm495_vm0, %v12883_v0 }
  0x31   : > { %590 = vst.msk [vmem:[#allocation2 + $0x2e8] sm:$0xff] %vm495_vm0, %v12883_v0  ;;  %591 = vst.msk [vmem:[#allocation2 + $0x2f0] sm:$0xff] %vm495_vm0, %v12883_v0 }
  0x32   : > { %593 = vst.msk [vmem:[#allocation2 + $0x300] sm:$0xff] %vm495_vm0, %v12883_v0  ;;  %594 = vst.msk [vmem:[#allocation2 + $0x308] sm:$0xff] %vm495_vm0, %v12883_v0 }
  0x33   : > { %595 = vst.msk [vmem:[#allocation2 + $0x310] sm:$0xff] %vm495_vm0, %v12883_v0  ;;  %597 = vst.msk [vmem:[#allocation2 + $0x320] sm:$0xff] %vm495_vm0, %v12883_v0 }
  0x34   : > { %598 = vst.msk [vmem:[#allocation2 + $0x328] sm:$0xff] %vm495_vm0, %v12883_v0  ;;  %599 = vst.msk [vmem:[#allocation2 + $0x330] sm:$0xff] %vm495_vm0, %v12883_v0 }
  0x35   : > { %634 = vst.msk [vmem:[#allocation2 + $0xa5] sm:$0xff] %vm495_vm0, %v601_v1  ;;  %636 = vst.msk [vmem:[#allocation2 + $0xc5] sm:$0xff] %vm495_vm0, %v603_v2 }
  0x36   : > { %635 = vst.msk [vmem:[#allocation2 + $0xad] sm:$0xff] %vm495_vm0, %v602_v3  ;;  %638 = vst.msk [vmem:[#allocation2 + $0xe5] sm:$0xff] %vm495_vm0, %v605_v4 }
  0x37   : > { %637 = vst.msk [vmem:[#allocation2 + $0xcd] sm:$0xff] %vm495_vm0, %v604_v5  ;;  %640 = vst.msk [vmem:[#allocation2 + $0x105] sm:$0xff] %vm495_vm0, %v607_v6 }
  0x38   : > { %639 = vst.msk [vmem:[#allocation2 + $0xed] sm:$0xff] %vm495_vm0, %v606_v9  ;;  %642 = vst.msk [vmem:[#allocation2 + $0x125] sm:$0xff] %vm495_vm0, %v609_v10 }
  0x39   : > { %641 = vst.msk [vmem:[#allocation2 + $0x10d] sm:$0xff] %vm495_vm0, %v608_v11  ;;  %644 = vst.msk [vmem:[#allocation2 + $0x145] sm:$0xff] %vm495_vm0, %v611_v12 }
  0x3a   : > { %643 = vst.msk [vmem:[#allocation2 + $0x12d] sm:$0xff] %vm495_vm0, %v610_v13  ;;  %646 = vst.msk [vmem:[#allocation2 + $0x165] sm:$0xff] %vm495_vm0, %v613_v14 }
  0x3b   : > { %645 = vst.msk [vmem:[#allocation2 + $0x14d] sm:$0xff] %vm495_vm0, %v612_v15  ;;  %648 = vst.msk [vmem:[#allocation2 + $0x185] sm:$0xff] %vm495_vm0, %v615_v16 }
  0x3c   : > { %647 = vst.msk [vmem:[#allocation2 + $0x16d] sm:$0xff] %vm495_vm0, %v614_v17  ;;  %650 = vst.msk [vmem:[#allocation2 + $0x1a5] sm:$0xff] %vm495_vm0, %v617_v18  ;;  %v8789_v25 = vld [vmem:[#allocation2 + $0xa5] sm:$0xff] }
  0x3d   : > { %649 = vst.msk [vmem:[#allocation2 + $0x18d] sm:$0xff] %vm495_vm0, %v616_v19  ;;  %652 = vst.msk [vmem:[#allocation2 + $0x1c5] sm:$0xff] %vm495_vm0, %v619_v20  ;;  %v8791_v26 = vld [vmem:[#allocation2 + $0xc5] sm:$0xff]  ;;  %799 = vrot.lane.b32.xlu1 %v8789_v25, %s8472_s25  ;;  %v8798_v27 = vld [vmem:[#allocation2 + $0xad] sm:$0xff] }
  0x3e   : > { %651 = vst.msk [vmem:[#allocation2 + $0x1ad] sm:$0xff] %vm495_vm0, %v618_v21  ;;  %654 = vst.msk [vmem:[#allocation2 + $0x1e5] sm:$0xff] %vm495_vm0, %v621_v22  ;;  %803 = vrot.lane.b32.xlu0 %v8791_v26, %s8472_s25  ;;  %v8806_v30 = vld [vmem:[#allocation2 + $0xe5] sm:$0xff]  ;;  %v8810_v31 = vld [vmem:[#allocation2 + $0xcd] sm:$0xff] }
  0x3f   : > { %653 = vst.msk [vmem:[#allocation2 + $0x1cd] sm:$0xff] %vm495_vm0, %v620_v23  ;;  %656 = vst.msk [vmem:[#allocation2 + $0x205] sm:$0xff] %vm495_vm0, %v623_v24  ;;  %v8814_v32 = vld [vmem:[#allocation2 + $0x105] sm:$0xff]  ;;  %v8826_v38 = vld [vmem:[#allocation2 + $0xed] sm:$0xff] }
  0x40   : > { %655 = vst.msk [vmem:[#allocation2 + $0x1ed] sm:$0xff] %vm495_vm0, %v622_v28  ;;  %658 = vst.msk [vmem:[#allocation2 + $0x225] sm:$0xff] %vm495_vm0, %v625_v29  ;;  %v8834_v40 = vld [vmem:[#allocation2 + $0x125] sm:$0xff]  ;;  %v8838_v41 = vld [vmem:[#allocation2 + $0x10d] sm:$0xff] }
  0x41   : > { %801 = vrot.lane.b32.xlu1 %v8798_v27, %s8472_s25  ;;  %657 = vst.msk [vmem:[#allocation2 + $0x20d] sm:$0xff] %vm495_vm0, %v624_v33  ;;  %660 = vst.msk [vmem:[#allocation2 + $0x245] sm:$0xff] %vm495_vm0, %v627_v34  ;;  %v8842_v42 = vld [vmem:[#allocation2 + $0x145] sm:$0xff]  ;;  %v8846_v43 = vld [vmem:[#allocation2 + $0x12d] sm:$0xff] }
  0x42   : > { %807 = vrot.lane.b32.xlu0 %v8806_v30, %s8472_s25  ;;  %659 = vst.msk [vmem:[#allocation2 + $0x22d] sm:$0xff] %vm495_vm0, %v626_v35  ;;  %662 = vst.msk [vmem:[#allocation2 + $0x265] sm:$0xff] %vm495_vm0, %v629_v36  ;;  %v8850_v44 = vld [vmem:[#allocation2 + $0x165] sm:$0xff]  ;;  %v8855_v47 = vld [vmem:[#allocation2 + $0x14d] sm:$0xff] }
  0x43   : > { %661 = vst.msk [vmem:[#allocation2 + $0x24d] sm:$0xff] %vm495_vm0, %v628_v37  ;;  %663 = vst.msk [vmem:[#allocation2 + $0x26d] sm:$0xff] %vm495_vm0, %v630_v39  ;;  %v8858_v48 = vld [vmem:[#allocation2 + $0xa4] sm:$0xff]  ;;  %v8870_v51 = vld [vmem:[#allocation2 + $0xac] sm:$0xff] }
  0x44   : > { %699 = vst.msk [vmem:[#allocation3] sm:$0xff] %vm495_vm0, %v667_v45  ;;  %700 = vst.msk [vmem:[#allocation3 + $0x8] sm:$0xff] %vm495_vm0, %v668_v46  ;;  %v8864_v49 = vld [vmem:[#allocation2 + $0xc4] sm:$0xff]  ;;  %v8876_v53 = vld [vmem:[#allocation2 + $0x16d] sm:$0xff] }
  0x45   : > { %805 = vrot.lane.b32.xlu1 %v8810_v31, %s8472_s25  ;;  %701 = vst.msk [vmem:[#allocation3 + $0x10] sm:$0xff] %vm495_vm0, %v8858_v48  ;;  %v8866_v50 = vld [vmem:[#allocation2 + $0x185] sm:$0xff]  ;;  %703 = vst.msk [vmem:[#allocation3 + $0x20] sm:$0xff] %vm495_vm0, %v8864_v49  ;;  %v8912_v63 = vld [vmem:[#allocation2 + $0x18d] sm:$0xff] }
  0x46   : > { %811 = vrot.lane.b32.xlu0 %v8814_v32, %s8472_s25  ;;  %v8872_v52 = vld [vmem:[#allocation2 + $0xe4] sm:$0xff]  ;;  %702 = vst.msk [vmem:[#allocation3 + $0x18] sm:$0xff] %vm495_vm0, %v8870_v51  ;;  %v8882_v54 = vld [vmem:[#allocation2 + $0xcc] sm:$0xff]  ;;  %v632_v37 = vld [vmem:[%s8744_s24 + $0xf8] sm:$0xff] }
  0x47   : > { %705 = vst.msk [vmem:[#allocation3 + $0x30] sm:$0xff] %vm495_vm0, %v8872_v52  ;;  %v8884_v55 = vld [vmem:[#allocation2 + $0x104] sm:$0xff]  ;;  %704 = vst.msk [vmem:[#allocation3 + $0x28] sm:$0xff] %vm495_vm0, %v8882_v54  ;;  %v8892_v57 = vld [vmem:[#allocation2 + $0xec] sm:$0xff] }
  0x48   : > { %v8886_v56 = vld [vmem:[#allocation2 + $0x1a5] sm:$0xff]  ;;  %707 = vst.msk [vmem:[#allocation3 + $0x40] sm:$0xff] %vm495_vm0, %v8884_v55  ;;  %706 = vst.msk [vmem:[#allocation3 + $0x38] sm:$0xff] %vm495_vm0, %v8892_v57  ;;  %v8976_v14 = vld [vmem:[#allocation2 + $0x1ad] sm:$0xff] }
  0x49   : > { %809 = vrot.lane.b32.xlu1 %v8826_v38, %s8472_s25  ;;  %v8894_v58 = vld [vmem:[#allocation2 + $0x124] sm:$0xff]  ;;  %v8896_v59 = vld [vmem:[#allocation2 + $0x10c] sm:$0xff]  ;;  %665 = vst.msk [vmem:[#allocation2 + $0x28d] sm:$0xff] %vm495_vm0, %v632_v37 }
  0x4a   : > { %815 = vrot.lane.b32.xlu0 %v8834_v40, %s8472_s25  ;;  %709 = vst.msk [vmem:[#allocation3 + $0x50] sm:$0xff] %vm495_vm0, %v8894_v58  ;;  %708 = vst.msk [vmem:[#allocation3 + $0x48] sm:$0xff] %vm495_vm0, %v8896_v59  ;;  %v8906_v60 = vld [vmem:[#allocation2 + $0x144] sm:$0xff]  ;;  %v8908_v61 = vld [vmem:[#allocation2 + $0x12c] sm:$0xff] }
  0x4b   : > { %v8910_v62 = vld [vmem:[#allocation2 + $0x164] sm:$0xff]  ;;  %711 = vst.msk [vmem:[#allocation3 + $0x60] sm:$0xff] %vm495_vm0, %v8906_v60  ;;  %710 = vst.msk [vmem:[#allocation3 + $0x58] sm:$0xff] %vm495_vm0, %v8908_v61  ;;  %v8920_v1 = vld [vmem:[#allocation2 + $0x14c] sm:$0xff] }
  0x4c   : > { %713 = vst.msk [vmem:[#allocation3 + $0x70] sm:$0xff] %vm495_vm0, %v8910_v62  ;;  %v8922_v2 = vld [vmem:[#allocation2 + $0x184] sm:$0xff]  ;;  %v8924_v3 = vld [vmem:[#allocation2 + $0x16c] sm:$0xff]  ;;  %712 = vst.msk [vmem:[#allocation3 + $0x68] sm:$0xff] %vm495_vm0, %v8920_v1 }
  0x4d   : > { %813 = vrot.lane.b32.xlu1 %v8838_v41, %s8472_s25  ;;  %715 = vst.msk [vmem:[#allocation3 + $0x80] sm:$0xff] %vm495_vm0, %v8922_v2  ;;  %714 = vst.msk [vmem:[#allocation3 + $0x78] sm:$0xff] %vm495_vm0, %v8924_v3  ;;  %v8934_v4 = vld [vmem:[#allocation2 + $0x1a4] sm:$0xff]  ;;  %v8936_v5 = vld [vmem:[#allocation2 + $0x18c] sm:$0xff] }
  0x4e   : > { %819 = vrot.lane.b32.xlu0 %v8842_v42, %s8472_s25  ;;  %v8938_v6 = vld [vmem:[#allocation2 + $0x1c4] sm:$0xff]  ;;  %717 = vst.msk [vmem:[#allocation3 + $0x90] sm:$0xff] %vm495_vm0, %v8934_v4  ;;  %716 = vst.msk [vmem:[#allocation3 + $0x88] sm:$0xff] %vm495_vm0, %v8936_v5  ;;  %v8946_v7 = vld [vmem:[#allocation2 + $0x1ac] sm:$0xff] }
  0x4f   : > { %719 = vst.msk [vmem:[#allocation3 + $0xa0] sm:$0xff] %vm495_vm0, %v8938_v6  ;;  %v8948_v8 = vld [vmem:[#allocation2 + $0x1e4] sm:$0xff]  ;;  %v8950_v9 = vld [vmem:[#allocation2 + $0x1cc] sm:$0xff]  ;;  %718 = vst.msk [vmem:[#allocation3 + $0x98] sm:$0xff] %vm495_vm0, %v8946_v7 }
  0x50   : > { %721 = vst.msk [vmem:[#allocation3 + $0xb0] sm:$0xff] %vm495_vm0, %v8948_v8  ;;  %720 = vst.msk [vmem:[#allocation3 + $0xa8] sm:$0xff] %vm495_vm0, %v8950_v9  ;;  %v8960_v10 = vld [vmem:[#allocation2 + $0x204] sm:$0xff]  ;;  %v8962_v11 = vld [vmem:[#allocation2 + $0x1ec] sm:$0xff] }
  0x51   : > { %817 = vrot.lane.b32.xlu1 %v8846_v43, %s8472_s25  ;;  %v8964_v12 = vld [vmem:[#allocation2 + $0x1c5] sm:$0xff]  ;;  %723 = vst.msk [vmem:[#allocation3 + $0xc0] sm:$0xff] %vm495_vm0, %v8960_v10  ;;  %722 = vst.msk [vmem:[#allocation3 + $0xb8] sm:$0xff] %vm495_vm0, %v8962_v11  ;;  %v8992_v18 = vld [vmem:[#allocation2 + $0x1cd] sm:$0xff] }
  0x52   : > { %823 = vrot.lane.b32.xlu0 %v8850_v44, %s8472_s25  ;;  %v8970_v13 = vld [vmem:[#allocation2 + $0x224] sm:$0xff]  ;;  %v8978_v15 = vld [vmem:[#allocation2 + $0x20c] sm:$0xff] }
  0x53   : > { %725 = vst.msk [vmem:[#allocation3 + $0xd0] sm:$0xff] %vm495_vm0, %v8970_v13  ;;  %724 = vst.msk [vmem:[#allocation3 + $0xc8] sm:$0xff] %vm495_vm0, %v8978_v15  ;;  %v8984_v16 = vld [vmem:[#allocation2 + $0x1e5] sm:$0xff]  ;;  %v9008_v22 = vld [vmem:[#allocation2 + $0x1ed] sm:$0xff] }
  0x54   : > { %v8986_v17 = vld [vmem:[#allocation2 + $0x244] sm:$0xff]  ;;  %v8994_v19 = vld [vmem:[#allocation2 + $0x22c] sm:$0xff] }
  0x55   : > { %821 = vrot.lane.b32.xlu1 %v8855_v47, %s8472_s25  ;;  %727 = vst.msk [vmem:[#allocation3 + $0xe0] sm:$0xff] %vm495_vm0, %v8986_v17  ;;  %726 = vst.msk [vmem:[#allocation3 + $0xd8] sm:$0xff] %vm495_vm0, %v8994_v19  ;;  %v9000_v20 = vld [vmem:[#allocation2 + $0x205] sm:$0xff]  ;;  %v9020_v28 = vld [vmem:[#allocation2 + $0x20d] sm:$0xff] }
  0x56   : > { %827 = vrot.lane.b32.xlu0 %v8866_v50, %s8472_s25  ;;  %v9002_v21 = vld [vmem:[#allocation2 + $0x264] sm:$0xff]  ;;  %v9010_v23 = vld [vmem:[#allocation2 + $0x24c] sm:$0xff] }
  0x57   : > { %729 = vst.msk [vmem:[#allocation3 + $0xf0] sm:$0xff] %vm495_vm0, %v9002_v21  ;;  %728 = vst.msk [vmem:[#allocation3 + $0xe8] sm:$0xff] %vm495_vm0, %v9010_v23  ;;  %v9016_v24 = vld [vmem:[#allocation2 + $0x225] sm:$0xff]  ;;  %v631_v33 = vld [vmem:[%s8744_s24 + $0xf0] sm:$0xff] }
  0x58   : > { %v9022_v29 = vld [vmem:[#allocation2 + $0x26c] sm:$0xff]  ;;  %664 = vst.msk [vmem:[#allocation2 + $0x285] sm:$0xff] %vm495_vm0, %v631_v33 }
  0x59   : > { %825 = vrot.lane.b32.xlu1 %v8876_v53, %s8472_s25  ;;  %730 = vst.msk [vmem:[#allocation3 + $0xf8] sm:$0xff] %vm495_vm0, %v9022_v29  ;;  %v9030_v34 = vld [vmem:[#allocation2 + $0x245] sm:$0xff]  ;;  %v9034_v35 = vld [vmem:[#allocation2 + $0x22d] sm:$0xff] }
  0x5a   : > { %831 = vrot.lane.b32.xlu0 %v8886_v56, %s8472_s25  ;;  %12932 = vst [vmem:[#allocation4_spill] sm:$0xff] %v9034_v35  ;;  %v9038_v36 = vld [vmem:[#allocation2 + $0x265] sm:$0xff]  ;;  %v9044_v39 = vld [vmem:[#allocation2 + $0x24d] sm:$0xff] }
  0x5b   : > { %12933 = vst [vmem:[#allocation5_spill] sm:$0xff] %v9038_v36  ;;  %12934 = vst [vmem:[#allocation6_spill] sm:$0xff] %v9044_v39  ;;  %v924_v45 = vld [vmem:[#allocation2 + $0x86] sm:$0xff]  ;;  %v925_v37 = vld [vmem:[#allocation2 + $0x8e] sm:$0xff] }
  0x5c   : > { %v9050_v46 = vld [vmem:[#allocation2 + $0x26d] sm:$0xff] }
  0x5d   : > { %829 = vrot.lane.b32.xlu1 %v8912_v63, %s8472_s25  ;;  %12935 = vst [vmem:[#allocation7_spill] sm:$0xff] %v9050_v46  ;;  %v9053_v33 = vld [vmem:[#allocation2 + $0xa6] sm:$0xff] }
  0x5e   : > { %835 = vrot.lane.b32.xlu0 %v8964_v12, %s8472_s25  ;;  %12936 = vst [vmem:[#allocation8_spill] sm:$0xff] %v9053_v33  ;;  %v9059_v0 = vld [vmem:[#allocation2 + $0xc6] sm:$0xff] }
  0x5f   : > { %12937 = vst [vmem:[#allocation9_spill] sm:$0xff] %v9059_v0 }
  0x61   : > { %833 = vrot.lane.b32.xlu1 %v8976_v14, %s8472_s25 }
  0x62   : > { %839 = vrot.lane.b32.xlu0 %v8984_v16, %s8472_s25 }
  0x65   : > { %837 = vrot.lane.b32.xlu1 %v8992_v18, %s8472_s25 }
  0x66   : > { %843 = vrot.lane.b32.xlu0 %v9000_v20, %s8472_s25 }
  0x69   : > { %841 = vrot.lane.b32.xlu1 %v9008_v22, %s8472_s25 }
  0x6a   : > { %847 = vrot.lane.b32.xlu0 %v9016_v24, %s8472_s25 }
  0x6d   : > { %845 = vrot.lane.b32.xlu1 %v9020_v28, %s8472_s25 }
  0x6e   : > { %851 = vrot.lane.b32.xlu0 %v9030_v34, %s8472_s25 }
  0x71   : > { %849 = vrot.lane.b32.xlu1 %v9034_v35, %s8472_s25 }
  0x72   : > { %855 = vrot.lane.b32.xlu0 %v9038_v36, %s8472_s25  ;;  %v9062_v36 = vld [vmem:[#allocation2 + $0xae] sm:$0xff] }
  0x73   : > { %12938 = vst [vmem:[#allocation10_spill] sm:$0xff] %v9062_v36 }
  0x75   : > { %853 = vrot.lane.b32.xlu1 %v9044_v39, %s8472_s25  ;;  %v9066_v39 = vld [vmem:[#allocation2 + $0xe6] sm:$0xff] }
  0x76   : > { %988 = vrot.lane.b32.xlu0 %v924_v45, %s8473_s26  ;;  %12939 = vst [vmem:[#allocation11_spill] sm:$0xff] %v9066_v39  ;;  %v9070_v45 = vld [vmem:[#allocation2 + $0xce] sm:$0xff] }
  0x77   : > { %12940 = vst [vmem:[#allocation12_spill] sm:$0xff] %v9070_v45 }
  0x79   : > { %857 = vrot.lane.b32.xlu1 %v9050_v46, %s8472_s25 }
  0x7a   : > { %992 = vrot.lane.b32.xlu0 %v9053_v33, %s8473_s26  ;;  %v9074_v33 = vld [vmem:[#allocation2 + $0x106] sm:$0xff] }
  0x7b   : > { %12941 = vst [vmem:[#allocation13_spill] sm:$0xff] %v9074_v33 }
  0x7d   : > { %990 = vrot.lane.b32.xlu1 %v925_v37, %s8473_s26  ;;  %v9078_v37 = vld [vmem:[#allocation2 + $0xee] sm:$0xff] }
  0x7e   : > { %996 = vrot.lane.b32.xlu0 %v9059_v0, %s8473_s26  ;;  %12942 = vst [vmem:[#allocation14_spill] sm:$0xff] %v9078_v37  ;;  %v9082_v0 = vld [vmem:[#allocation2 + $0x126] sm:$0xff] }
  0x7f   : > { %12943 = vst [vmem:[#allocation15_spill] sm:$0xff] %v9082_v0 }
  0x81   : > { %994 = vrot.lane.b32.xlu1 %v9062_v36, %s8473_s26  ;;  %v9086_v36 = vld [vmem:[#allocation2 + $0x10e] sm:$0xff] }
  0x82   : > { %1000 = vrot.lane.b32.xlu0 %v9066_v39, %s8473_s26  ;;  %12944 = vst [vmem:[#allocation16_spill] sm:$0xff] %v9086_v36  ;;  %v9090_v39 = vld [vmem:[#allocation2 + $0x146] sm:$0xff] }
  0x83   : > { %12945 = vst [vmem:[#allocation17_spill] sm:$0xff] %v9090_v39 }
  0x85   : > { %998 = vrot.lane.b32.xlu1 %v9070_v45, %s8473_s26  ;;  %v9094_v45 = vld [vmem:[#allocation2 + $0x12e] sm:$0xff] }
  0x86   : > { %1004 = vrot.lane.b32.xlu0 %v9074_v33, %s8473_s26  ;;  %12946 = vst [vmem:[#allocation18_spill] sm:$0xff] %v9094_v45  ;;  %v9098_v33 = vld [vmem:[#allocation2 + $0x166] sm:$0xff] }
  0x87   : > { %12947 = vst [vmem:[#allocation19_spill] sm:$0xff] %v9098_v33 }
  0x88   : > { %v796_v46 = vpop.permute.xlu0 %795 }
  0x89   : > { %1002 = vrot.lane.b32.xlu1 %v9078_v37, %s8473_s26  ;;  %v9102_v37 = vld [vmem:[#allocation2 + $0x14e] sm:$0xff]  ;;  %892 = vst.msk [vmem:[#allocation3] sm:$0xff] %vm891_vm1, %v796_v46  ;;  %v9165_v46 = vld [vmem:[#allocation2 + $0x266] sm:$0xff] }
  0x8a   : > { %1008 = vrot.lane.b32.xlu0 %v9082_v0, %s8473_s26  ;;  %12948 = vst [vmem:[#allocation20_spill] sm:$0xff] %v9102_v37  ;;  %v9106_v0 = vld [vmem:[#allocation2 + $0x186] sm:$0xff] }
  0x8b   : > { %12949 = vst [vmem:[#allocation21_spill] sm:$0xff] %v9106_v0 }
  0x8d   : > { %1006 = vrot.lane.b32.xlu1 %v9086_v36, %s8473_s26  ;;  %v9110_v36 = vld [vmem:[#allocation2 + $0x16e] sm:$0xff] }
  0x8e   : > { %1012 = vrot.lane.b32.xlu0 %v9090_v39, %s8473_s26  ;;  %12950 = vst [vmem:[#allocation22_spill] sm:$0xff] %v9110_v36  ;;  %v9114_v39 = vld [vmem:[#allocation2 + $0x1a6] sm:$0xff] }
  0x8f   : > { %12951 = vst [vmem:[#allocation23_spill] sm:$0xff] %v9114_v39 }
  0x91   : > { %1010 = vrot.lane.b32.xlu1 %v9094_v45, %s8473_s26  ;;  %v9118_v45 = vld [vmem:[#allocation2 + $0x18e] sm:$0xff] }
  0x92   : > { %1016 = vrot.lane.b32.xlu0 %v9098_v33, %s8473_s26  ;;  %12952 = vst [vmem:[#allocation24_spill] sm:$0xff] %v9118_v45  ;;  %v9122_v33 = vld [vmem:[#allocation2 + $0x1c6] sm:$0xff] }
  0x93   : > { %12953 = vst [vmem:[#allocation25_spill] sm:$0xff] %v9122_v33 }
  0x95   : > { %1014 = vrot.lane.b32.xlu1 %v9102_v37, %s8473_s26  ;;  %v9126_v37 = vld [vmem:[#allocation2 + $0x1ae] sm:$0xff] }
  0x96   : > { %1020 = vrot.lane.b32.xlu0 %v9106_v0, %s8473_s26  ;;  %12954 = vst [vmem:[#allocation26_spill] sm:$0xff] %v9126_v37  ;;  %v9130_v0 = vld [vmem:[#allocation2 + $0x1e6] sm:$0xff] }
  0x97   : > { %12955 = vst [vmem:[#allocation27_spill] sm:$0xff] %v9130_v0 }
  0x99   : > { %1018 = vrot.lane.b32.xlu1 %v9110_v36, %s8473_s26  ;;  %v9134_v36 = vld [vmem:[#allocation2 + $0x1ce] sm:$0xff] }
  0x9a   : > { %1024 = vrot.lane.b32.xlu0 %v9114_v39, %s8473_s26  ;;  %12956 = vst [vmem:[#allocation28_spill] sm:$0xff] %v9134_v36  ;;  %v9138_v39 = vld [vmem:[#allocation2 + $0x206] sm:$0xff] }
  0x9b   : > { %12957 = vst [vmem:[#allocation29_spill] sm:$0xff] %v9138_v39 }
  0x9d   : > { %1022 = vrot.lane.b32.xlu1 %v9118_v45, %s8473_s26  ;;  %v9142_v45 = vld [vmem:[#allocation2 + $0x1ee] sm:$0xff] }
  0x9e   : > { %1028 = vrot.lane.b32.xlu0 %v9122_v33, %s8473_s26  ;;  %12958 = vst [vmem:[#allocation30_spill] sm:$0xff] %v9142_v45  ;;  %v9146_v33 = vld [vmem:[#allocation2 + $0x226] sm:$0xff] }
  0x9f   : > { %12959 = vst [vmem:[#allocation31_spill] sm:$0xff] %v9146_v33 }
  0xa1   : > { %1026 = vrot.lane.b32.xlu1 %v9126_v37, %s8473_s26  ;;  %v798_v37 = vpop.permute.xlu0 %797 }
  0xa2   : > { %1032 = vrot.lane.b32.xlu0 %v9130_v0, %s8473_s26  ;;  %v9151_v0 = vld [vmem:[#allocation2 + $0x20e] sm:$0xff]  ;;  %893 = vst.msk [vmem:[#allocation3 + $0x8] sm:$0xff] %vm891_vm1, %v798_v37 }
  0xa5   : > { %1030 = vrot.lane.b32.xlu1 %v9134_v36, %s8473_s26  ;;  %v9155_v36 = vld [vmem:[#allocation2 + $0x246] sm:$0xff] }
  0xa6   : > { %1036 = vrot.lane.b32.xlu0 %v9138_v39, %s8473_s26  ;;  %12960 = vst [vmem:[#allocation32_spill] sm:$0xff] %v9155_v36  ;;  %v9160_v39 = vld [vmem:[#allocation2 + $0x22e] sm:$0xff] }
  0xa7   : > { %12961 = vst [vmem:[#allocation33_spill] sm:$0xff] %v9160_v39 }
  0xa9   : > { %1034 = vrot.lane.b32.xlu1 %v9142_v45, %s8473_s26 }
  0xaa   : > { %1040 = vrot.lane.b32.xlu0 %v9146_v33, %s8473_s26  ;;  %v9170_v33 = vld [vmem:[#allocation2 + $0x24e] sm:$0xff] }
  0xad   : > { %1038 = vrot.lane.b32.xlu1 %v9151_v0, %s8473_s26 }
  0xae   : > { %1044 = vrot.lane.b32.xlu0 %v9155_v36, %s8473_s26 }
  0xaf   : > { %v800_v45 = vpop.permute.xlu1 %799 }
  0xb0   : > { %894 = vst.msk [vmem:[#allocation3 + $0x10] sm:$0xff] %vm891_vm1, %v800_v45  ;;  %v804_v35 = vpop.permute.xlu0 %803  ;;  %v9178_v45 = vld [vmem:[#allocation2 + $0x26e] sm:$0xff] }
  0xb1   : > { %1042 = vrot.lane.b32.xlu1 %v9160_v39, %s8473_s26  ;;  %896 = vst.msk [vmem:[#allocation3 + $0x20] sm:$0xff] %vm891_vm1, %v804_v35 }
  0xb2   : > { %1048 = vrot.lane.b32.xlu0 %v9165_v46, %s8473_s26 }
  0xb3   : > { %v802_v37 = vpop.permute.xlu1 %801 }
  0xb4   : > { %895 = vst.msk [vmem:[#allocation3 + $0x18] sm:$0xff] %vm891_vm1, %v802_v37  ;;  %v808_v36 = vpop.permute.xlu0 %807 }
  0xb5   : > { %1046 = vrot.lane.b32.xlu1 %v9170_v33, %s8473_s26  ;;  %898 = vst.msk [vmem:[#allocation3 + $0x30] sm:$0xff] %vm891_vm1, %v808_v36 }
  0xb6   : > { %1181 = vrot.lane.b32.xlu0 %v8858_v48, %s8474_s27 }
  0xb7   : > { %v806_v35 = vpop.permute.xlu1 %805 }
  0xb8   : > { %897 = vst.msk [vmem:[#allocation3 + $0x28] sm:$0xff] %vm891_vm1, %v806_v35  ;;  %v812_v39 = vpop.permute.xlu0 %811 }
  0xb9   : > { %1050 = vrot.lane.b32.xlu1 %v9178_v45, %s8473_s26  ;;  %900 = vst.msk [vmem:[#allocation3 + $0x40] sm:$0xff] %vm891_vm1, %v812_v39 }
  0xba   : > { %1185 = vrot.lane.b32.xlu0 %v8864_v49, %s8474_s27 }
  0xbb   : > { %v810_v37 = vpop.permute.xlu1 %809 }
  0xbc   : > { %899 = vst.msk [vmem:[#allocation3 + $0x38] sm:$0xff] %vm891_vm1, %v810_v37  ;;  %v816_v36 = vpop.permute.xlu0 %815 }
  0xbd   : > { %1183 = vrot.lane.b32.xlu1 %v8870_v51, %s8474_s27  ;;  %902 = vst.msk [vmem:[#allocation3 + $0x50] sm:$0xff] %vm891_vm1, %v816_v36 }
  0xbe   : > { %1189 = vrot.lane.b32.xlu0 %v8872_v52, %s8474_s27 }
  0xbf   : > { %v814_v48 = vpop.permute.xlu1 %813 }
  0xc0   : > { %901 = vst.msk [vmem:[#allocation3 + $0x48] sm:$0xff] %vm891_vm1, %v814_v48  ;;  %v820_v35 = vpop.permute.xlu0 %819 }
  0xc1   : > { %1187 = vrot.lane.b32.xlu1 %v8882_v54, %s8474_s27  ;;  %904 = vst.msk [vmem:[#allocation3 + $0x60] sm:$0xff] %vm891_vm1, %v820_v35 }
  0xc2   : > { %1193 = vrot.lane.b32.xlu0 %v8884_v55, %s8474_s27 }
  0xc3   : > { %v818_v39 = vpop.permute.xlu1 %817 }
  0xc4   : > { %903 = vst.msk [vmem:[#allocation3 + $0x58] sm:$0xff] %vm891_vm1, %v818_v39  ;;  %v824_v51 = vpop.permute.xlu0 %823 }
  0xc5   : > { %1191 = vrot.lane.b32.xlu1 %v8892_v57, %s8474_s27  ;;  %906 = vst.msk [vmem:[#allocation3 + $0x70] sm:$0xff] %vm891_vm1, %v824_v51 }
  0xc6   : > { %1197 = vrot.lane.b32.xlu0 %v8894_v58, %s8474_s27 }
  0xc7   : > { %v822_v37 = vpop.permute.xlu1 %821 }
  0xc8   : > { %905 = vst.msk [vmem:[#allocation3 + $0x68] sm:$0xff] %vm891_vm1, %v822_v37  ;;  %v828_v36 = vpop.permute.xlu0 %827 }
  0xc9   : > { %1195 = vrot.lane.b32.xlu1 %v8896_v59, %s8474_s27  ;;  %908 = vst.msk [vmem:[#allocation3 + $0x80] sm:$0xff] %vm891_vm1, %v828_v36 }
  0xca   : > { %1201 = vrot.lane.b32.xlu0 %v8906_v60, %s8474_s27 }
  0xcb   : > { %v826_v48 = vpop.permute.xlu1 %825 }
  0xcc   : > { %907 = vst.msk [vmem:[#allocation3 + $0x78] sm:$0xff] %vm891_vm1, %v826_v48  ;;  %v832_v35 = vpop.permute.xlu0 %831 }
  0xcd   : > { %1199 = vrot.lane.b32.xlu1 %v8908_v61, %s8474_s27  ;;  %910 = vst.msk [vmem:[#allocation3 + $0x90] sm:$0xff] %vm891_vm1, %v832_v35 }
  0xce   : > { %1205 = vrot.lane.b32.xlu0 %v8910_v62, %s8474_s27 }
  0xcf   : > { %v830_v39 = vpop.permute.xlu1 %829 }
  0xd0   : > { %909 = vst.msk [vmem:[#allocation3 + $0x88] sm:$0xff] %vm891_vm1, %v830_v39  ;;  %v836_v51 = vpop.permute.xlu0 %835 }
  0xd1   : > { %1203 = vrot.lane.b32.xlu1 %v8920_v1, %s8474_s27  ;;  %912 = vst.msk [vmem:[#allocation3 + $0xa0] sm:$0xff] %vm891_vm1, %v836_v51 }
  0xd2   : > { %1209 = vrot.lane.b32.xlu0 %v8922_v2, %s8474_s27 }
  0xd3   : > { %v834_v37 = vpop.permute.xlu1 %833 }
  0xd4   : > { %911 = vst.msk [vmem:[#allocation3 + $0x98] sm:$0xff] %vm891_vm1, %v834_v37  ;;  %v840_v36 = vpop.permute.xlu0 %839 }
  0xd5   : > { %1207 = vrot.lane.b32.xlu1 %v8924_v3, %s8474_s27  ;;  %914 = vst.msk [vmem:[#allocation3 + $0xb0] sm:$0xff] %vm891_vm1, %v840_v36 }
  0xd6   : > { %1213 = vrot.lane.b32.xlu0 %v8934_v4, %s8474_s27 }
  0xd7   : > { %v838_v48 = vpop.permute.xlu1 %837 }
  0xd8   : > { %913 = vst.msk [vmem:[#allocation3 + $0xa8] sm:$0xff] %vm891_vm1, %v838_v48  ;;  %v844_v35 = vpop.permute.xlu0 %843 }
  0xd9   : > { %1211 = vrot.lane.b32.xlu1 %v8936_v5, %s8474_s27  ;;  %916 = vst.msk [vmem:[#allocation3 + $0xc0] sm:$0xff] %vm891_vm1, %v844_v35 }
  0xda   : > { %1217 = vrot.lane.b32.xlu0 %v8938_v6, %s8474_s27 }
  0xdb   : > { %v842_v39 = vpop.permute.xlu1 %841 }
  0xdc   : > { %915 = vst.msk [vmem:[#allocation3 + $0xb8] sm:$0xff] %vm891_vm1, %v842_v39  ;;  %v848_v51 = vpop.permute.xlu0 %847 }
  0xdd   : > { %1215 = vrot.lane.b32.xlu1 %v8946_v7, %s8474_s27  ;;  %918 = vst.msk [vmem:[#allocation3 + $0xd0] sm:$0xff] %vm891_vm1, %v848_v51 }
  0xde   : > { %1221 = vrot.lane.b32.xlu0 %v8948_v8, %s8474_s27 }
  0xdf   : > { %v846_v37 = vpop.permute.xlu1 %845 }
  0xe0   : > { %917 = vst.msk [vmem:[#allocation3 + $0xc8] sm:$0xff] %vm891_vm1, %v846_v37  ;;  %v852_v36 = vpop.permute.xlu0 %851 }
  0xe1   : > { %1219 = vrot.lane.b32.xlu1 %v8950_v9, %s8474_s27  ;;  %920 = vst.msk [vmem:[#allocation3 + $0xe0] sm:$0xff] %vm891_vm1, %v852_v36 }
  0xe2   : > { %1225 = vrot.lane.b32.xlu0 %v8960_v10, %s8474_s27 }
  0xe3   : > { %v850_v48 = vpop.permute.xlu1 %849 }
  0xe4   : > { %919 = vst.msk [vmem:[#allocation3 + $0xd8] sm:$0xff] %vm891_vm1, %v850_v48  ;;  %v856_v35 = vpop.permute.xlu0 %855 }
  0xe5   : > { %1223 = vrot.lane.b32.xlu1 %v8962_v11, %s8474_s27  ;;  %922 = vst.msk [vmem:[#allocation3 + $0xf0] sm:$0xff] %vm891_vm1, %v856_v35  ;;  %v9267_v35 = vld [vmem:[#allocation2 + $0x284] sm:$0xff] }
  0xe6   : > { %1229 = vrot.lane.b32.xlu0 %v8970_v13, %s8474_s27 }
  0xe7   : > { %v854_v39 = vpop.permute.xlu1 %853 }
  0xe8   : > { %921 = vst.msk [vmem:[#allocation3 + $0xe8] sm:$0xff] %vm891_vm1, %v854_v39  ;;  %v989_v51 = vpop.permute.xlu0 %988 }
  0xe9   : > { %1227 = vrot.lane.b32.xlu1 %v8978_v15, %s8474_s27  ;;  %1085 = vst.msk [vmem:[#allocation3] sm:$0xff] %vm1084_vm2, %v989_v51 }
  0xea   : > { %1233 = vrot.lane.b32.xlu0 %v8986_v17, %s8474_s27 }
  0xeb   : > { %v858_v37 = vpop.permute.xlu1 %857 }
  0xec   : > { %923 = vst.msk [vmem:[#allocation3 + $0xf8] sm:$0xff] %vm891_vm1, %v858_v37  ;;  %v993_v36 = vpop.permute.xlu0 %992 }
  0xed   : > { %1231 = vrot.lane.b32.xlu1 %v8994_v19, %s8474_s27  ;;  %1087 = vst.msk [vmem:[#allocation3 + $0x10] sm:$0xff] %vm1084_vm2, %v993_v36  ;;  %v9278_v36 = vld [vmem:[#allocation2 + $0x28c] sm:$0xff] }
  0xee   : > { %1237 = vrot.lane.b32.xlu0 %v9002_v21, %s8474_s27 }
  0xef   : > { %v991_v48 = vpop.permute.xlu1 %990 }
  0xf0   : > { %1086 = vst.msk [vmem:[#allocation3 + $0x8] sm:$0xff] %vm1084_vm2, %v991_v48  ;;  %v997_v39 = vpop.permute.xlu0 %996 }
  0xf1   : > { %1235 = vrot.lane.b32.xlu1 %v9010_v23, %s8474_s27  ;;  %1089 = vst.msk [vmem:[#allocation3 + $0x20] sm:$0xff] %vm1084_vm2, %v997_v39 }
  0xf2   : > { %1241 = vrot.lane.b32.xlu0 %v9267_v35, %s8474_s27 }
  0xf3   : > { %v995_v51 = vpop.permute.xlu1 %994 }
  0xf4   : > { %1088 = vst.msk [vmem:[#allocation3 + $0x18] sm:$0xff] %vm1084_vm2, %v995_v51  ;;  %v1001_v37 = vpop.permute.xlu0 %1000 }
  0xf5   : > { %1239 = vrot.lane.b32.xlu1 %v9022_v29, %s8474_s27  ;;  %1091 = vst.msk [vmem:[#allocation3 + $0x30] sm:$0xff] %vm1084_vm2, %v1001_v37 }
  0xf6   : > { %1374 = vrot.lane.b32.xlu0 %v8789_v25, %s8475_s28 }
  0xf7   : > { %v999_v48 = vpop.permute.xlu1 %998 }
  0xf8   : > { %1090 = vst.msk [vmem:[#allocation3 + $0x28] sm:$0xff] %vm1084_vm2, %v999_v48  ;;  %v1005_v39 = vpop.permute.xlu0 %1004 }
  0xf9   : > { %1243 = vrot.lane.b32.xlu1 %v9278_v36, %s8474_s27  ;;  %1093 = vst.msk [vmem:[#allocation3 + $0x40] sm:$0xff] %vm1084_vm2, %v1005_v39  ;;  %v12962_v39 = vld [vmem:[#allocation4_spill] sm:$0xff] }
  0xfa   : > { %1378 = vrot.lane.b32.xlu0 %v8791_v26, %s8475_s28 }
  0xfb   : > { %v1003_v51 = vpop.permute.xlu1 %1002 }
  0xfc   : > { %1092 = vst.msk [vmem:[#allocation3 + $0x38] sm:$0xff] %vm1084_vm2, %v1003_v51  ;;  %v1009_v37 = vpop.permute.xlu0 %1008 }
  0xfd   : > { %1376 = vrot.lane.b32.xlu1 %v8798_v27, %s8475_s28  ;;  %1095 = vst.msk [vmem:[#allocation3 + $0x50] sm:$0xff] %vm1084_vm2, %v1009_v37 }
  0xfe   : > { %1382 = vrot.lane.b32.xlu0 %v8806_v30, %s8475_s28 }
  0xff   : > { %v1007_v25 = vpop.permute.xlu1 %1006 }
 0x100   : > { %1094 = vst.msk [vmem:[#allocation3 + $0x48] sm:$0xff] %vm1084_vm2, %v1007_v25  ;;  %v1013_v48 = vpop.permute.xlu0 %1012 }
 0x101   : > { %1380 = vrot.lane.b32.xlu1 %v8810_v31, %s8475_s28  ;;  %1097 = vst.msk [vmem:[#allocation3 + $0x60] sm:$0xff] %vm1084_vm2, %v1013_v48 }
 0x102   : > { %1386 = vrot.lane.b32.xlu0 %v8814_v32, %s8475_s28 }
 0x103   : > { %v1011_v26 = vpop.permute.xlu1 %1010 }
 0x104   : > { %1096 = vst.msk [vmem:[#allocation3 + $0x58] sm:$0xff] %vm1084_vm2, %v1011_v26  ;;  %v1017_v27 = vpop.permute.xlu0 %1016  ;;  %v12965_v26 = vld [vmem:[#allocation7_spill] sm:$0xff] }
 0x105   : > { %1384 = vrot.lane.b32.xlu1 %v8826_v38, %s8475_s28  ;;  %1099 = vst.msk [vmem:[#allocation3 + $0x70] sm:$0xff] %vm1084_vm2, %v1017_v27  ;;  %v9378_v27 = vld [vmem:[#allocation2 + $0x28d] sm:$0xff] }
 0x106   : > { %1390 = vrot.lane.b32.xlu0 %v8834_v40, %s8475_s28 }
 0x107   : > { %v1015_v30 = vpop.permute.xlu1 %1014 }
 0x108   : > { %1098 = vst.msk [vmem:[#allocation3 + $0x68] sm:$0xff] %vm1084_vm2, %v1015_v30  ;;  %v1021_v31 = vpop.permute.xlu0 %1020  ;;  %v12966_v30 = vld [vmem:[#allocation8_spill] sm:$0xff] }
 0x109   : > { %1388 = vrot.lane.b32.xlu1 %v8838_v41, %s8475_s28  ;;  %1101 = vst.msk [vmem:[#allocation3 + $0x80] sm:$0xff] %vm1084_vm2, %v1021_v31 }
 0x10a   : > { %1394 = vrot.lane.b32.xlu0 %v8842_v42, %s8475_s28 }
 0x10b   : > { %v1019_v32 = vpop.permute.xlu1 %1018 }
 0x10c   : > { %1100 = vst.msk [vmem:[#allocation3 + $0x78] sm:$0xff] %vm1084_vm2, %v1019_v32  ;;  %v1025_v38 = vpop.permute.xlu0 %1024 }
 0x10d   : > { %1392 = vrot.lane.b32.xlu1 %v8846_v43, %s8475_s28  ;;  %1103 = vst.msk [vmem:[#allocation3 + $0x90] sm:$0xff] %vm1084_vm2, %v1025_v38  ;;  %v12967_v38 = vld [vmem:[#allocation9_spill] sm:$0xff] }
 0x10e   : > { %1398 = vrot.lane.b32.xlu0 %v8850_v44, %s8475_s28 }
 0x10f   : > { %v1023_v40 = vpop.permute.xlu1 %1022 }
 0x110   : > { %1102 = vst.msk [vmem:[#allocation3 + $0x88] sm:$0xff] %vm1084_vm2, %v1023_v40  ;;  %v1029_v41 = vpop.permute.xlu0 %1028 }
 0x111   : > { %1396 = vrot.lane.b32.xlu1 %v8855_v47, %s8475_s28  ;;  %1105 = vst.msk [vmem:[#allocation3 + $0xa0] sm:$0xff] %vm1084_vm2, %v1029_v41 }
 0x112   : > { %1402 = vrot.lane.b32.xlu0 %v8866_v50, %s8475_s28 }
 0x113   : > { %v1027_v42 = vpop.permute.xlu1 %1026 }
 0x114   : > { %1104 = vst.msk [vmem:[#allocation3 + $0x98] sm:$0xff] %vm1084_vm2, %v1027_v42  ;;  %v1033_v43 = vpop.permute.xlu0 %1032  ;;  %v12968_v42 = vld [vmem:[#allocation10_spill] sm:$0xff] }
 0x115   : > { %1400 = vrot.lane.b32.xlu1 %v8876_v53, %s8475_s28  ;;  %1107 = vst.msk [vmem:[#allocation3 + $0xb0] sm:$0xff] %vm1084_vm2, %v1033_v43  ;;  %v12969_v43 = vld [vmem:[#allocation11_spill] sm:$0xff] }
 0x116   : > { %1406 = vrot.lane.b32.xlu0 %v8886_v56, %s8475_s28 }
 0x117   : > { %v1031_v44 = vpop.permute.xlu1 %1030 }
 0x118   : > { %1106 = vst.msk [vmem:[#allocation3 + $0xa8] sm:$0xff] %vm1084_vm2, %v1031_v44  ;;  %v1037_v47 = vpop.permute.xlu0 %1036 }
 0x119   : > { %1404 = vrot.lane.b32.xlu1 %v8912_v63, %s8475_s28  ;;  %1109 = vst.msk [vmem:[#allocation3 + $0xc0] sm:$0xff] %vm1084_vm2, %v1037_v47 }
 0x11a   : > { %1410 = vrot.lane.b32.xlu0 %v8964_v12, %s8475_s28 }
 0x11b   : > { %v1035_v50 = vpop.permute.xlu1 %1034 }
 0x11c   : > { %1108 = vst.msk [vmem:[#allocation3 + $0xb8] sm:$0xff] %vm1084_vm2, %v1035_v50  ;;  %v1041_v53 = vpop.permute.xlu0 %1040  ;;  %v12970_v50 = vld [vmem:[#allocation12_spill] sm:$0xff] }
 0x11d   : > { %1408 = vrot.lane.b32.xlu1 %v8976_v14, %s8475_s28  ;;  %1111 = vst.msk [vmem:[#allocation3 + $0xd0] sm:$0xff] %vm1084_vm2, %v1041_v53  ;;  %v12971_v53 = vld [vmem:[#allocation13_spill] sm:$0xff] }
 0x11e   : > { %1414 = vrot.lane.b32.xlu0 %v8984_v16, %s8475_s28 }
 0x11f   : > { %v1039_v56 = vpop.permute.xlu1 %1038 }
 0x120   : > { %1110 = vst.msk [vmem:[#allocation3 + $0xc8] sm:$0xff] %vm1084_vm2, %v1039_v56  ;;  %v1045_v63 = vpop.permute.xlu0 %1044 }
 0x121   : > { %1412 = vrot.lane.b32.xlu1 %v8992_v18, %s8475_s28  ;;  %1113 = vst.msk [vmem:[#allocation3 + $0xe0] sm:$0xff] %vm1084_vm2, %v1045_v63 }
 0x122   : > { %1418 = vrot.lane.b32.xlu0 %v9000_v20, %s8475_s28 }
 0x123   : > { %v1043_v12 = vpop.permute.xlu1 %1042 }
 0x124   : > { %1112 = vst.msk [vmem:[#allocation3 + $0xd8] sm:$0xff] %vm1084_vm2, %v1043_v12  ;;  %v1049_v14 = vpop.permute.xlu0 %1048  ;;  %v12972_v12 = vld [vmem:[#allocation14_spill] sm:$0xff] }
 0x125   : > { %1416 = vrot.lane.b32.xlu1 %v9008_v22, %s8475_s28  ;;  %1115 = vst.msk [vmem:[#allocation3 + $0xf0] sm:$0xff] %vm1084_vm2, %v1049_v14  ;;  %v12973_v14 = vld [vmem:[#allocation15_spill] sm:$0xff] }
 0x126   : > { %1422 = vrot.lane.b32.xlu0 %v9016_v24, %s8475_s28  ;;  %v12963_v24 = vld [vmem:[#allocation5_spill] sm:$0xff] }
 0x127   : > { %v1047_v16 = vpop.permute.xlu1 %1046 }
 0x128   : > { %1114 = vst.msk [vmem:[#allocation3 + $0xe8] sm:$0xff] %vm1084_vm2, %v1047_v16  ;;  %v1182_v18 = vpop.permute.xlu0 %1181 }
 0x129   : > { %1420 = vrot.lane.b32.xlu1 %v9020_v28, %s8475_s28  ;;  %1278 = vst.msk [vmem:[#allocation3] sm:$0xff] %vm1277_vm3, %v1182_v18  ;;  %v9367_v28 = vld [vmem:[#allocation2 + $0x285] sm:$0xff] }
 0x12a   : > { %1426 = vrot.lane.b32.xlu0 %v9030_v34, %s8475_s28  ;;  %v12964_v34 = vld [vmem:[#allocation6_spill] sm:$0xff] }
 0x12b   : > { %v1051_v20 = vpop.permute.xlu1 %1050 }
 0x12c   : > { %1116 = vst.msk [vmem:[#allocation3 + $0xf8] sm:$0xff] %vm1084_vm2, %v1051_v20  ;;  %v1186_v22 = vpop.permute.xlu0 %1185  ;;  %v12974_v20 = vld [vmem:[#allocation16_spill] sm:$0xff] }
 0x12d   : > { %1424 = vrot.lane.b32.xlu1 %v12962_v39, %s8475_s28  ;;  %1280 = vst.msk [vmem:[#allocation3 + $0x10] sm:$0xff] %vm1277_vm3, %v1186_v22  ;;  %v12975_v22 = vld [vmem:[#allocation17_spill] sm:$0xff] }
 0x12e   : > { %1430 = vrot.lane.b32.xlu0 %v12963_v24, %s8475_s28 }
 0x12f   : > { %v1184_v51 = vpop.permute.xlu1 %1183 }
 0x130   : > { %1279 = vst.msk [vmem:[#allocation3 + $0x8] sm:$0xff] %vm1277_vm3, %v1184_v51  ;;  %v1190_v37 = vpop.permute.xlu0 %1189  ;;  %v12976_v51 = vld [vmem:[#allocation18_spill] sm:$0xff] }
 0x131   : > { %1428 = vrot.lane.b32.xlu1 %v12964_v34, %s8475_s28  ;;  %1282 = vst.msk [vmem:[#allocation3 + $0x20] sm:$0xff] %vm1277_vm3, %v1190_v37  ;;  %v12977_v37 = vld [vmem:[#allocation19_spill] sm:$0xff] }
 0x132   : > { %1434 = vrot.lane.b32.xlu0 %v9367_v28, %s8475_s28 }
 0x133   : > { %v1188_v25 = vpop.permute.xlu1 %1187 }
 0x134   : > { %1281 = vst.msk [vmem:[#allocation3 + $0x18] sm:$0xff] %vm1277_vm3, %v1188_v25  ;;  %v1194_v48 = vpop.permute.xlu0 %1193 }
 0x135   : > { %1432 = vrot.lane.b32.xlu1 %v12965_v26, %s8475_s28  ;;  %1284 = vst.msk [vmem:[#allocation3 + $0x30] sm:$0xff] %vm1277_vm3, %v1194_v48  ;;  %v12978_v48 = vld [vmem:[#allocation20_spill] sm:$0xff]  ;;  %v12979_v26 = vld [vmem:[#allocation21_spill] sm:$0xff] }
 0x136   : > { %1567 = vrot.lane.b32.xlu0 %v12966_v30, %s8476_s29 }
 0x137   : > { %v1192_v31 = vpop.permute.xlu1 %1191 }
 0x138   : > { %1283 = vst.msk [vmem:[#allocation3 + $0x28] sm:$0xff] %vm1277_vm3, %v1192_v31  ;;  %v1198_v32 = vpop.permute.xlu0 %1197 }
 0x139   : > { %1436 = vrot.lane.b32.xlu1 %v9378_v27, %s8475_s28  ;;  %1286 = vst.msk [vmem:[#allocation3 + $0x40] sm:$0xff] %vm1277_vm3, %v1198_v32  ;;  %v12980_v32 = vld [vmem:[#allocation22_spill] sm:$0xff] }
 0x13a   : > { %1571 = vrot.lane.b32.xlu0 %v12967_v38, %s8476_s29  ;;  %v12981_v38 = vld [vmem:[#allocation23_spill] sm:$0xff] }
 0x13b   : > { %v1196_v40 = vpop.permute.xlu1 %1195 }
 0x13c   : > { %1285 = vst.msk [vmem:[#allocation3 + $0x38] sm:$0xff] %vm1277_vm3, %v1196_v40  ;;  %v1202_v41 = vpop.permute.xlu0 %1201 }
 0x13d   : > { %1569 = vrot.lane.b32.xlu1 %v12968_v42, %s8476_s29  ;;  %1288 = vst.msk [vmem:[#allocation3 + $0x50] sm:$0xff] %vm1277_vm3, %v1202_v41  ;;  %v12982_v42 = vld [vmem:[#allocation24_spill] sm:$0xff] }
 0x13e   : > { %1575 = vrot.lane.b32.xlu0 %v12969_v43, %s8476_s29  ;;  %v12983_v43 = vld [vmem:[#allocation25_spill] sm:$0xff] }
 0x13f   : > { %v1200_v44 = vpop.permute.xlu1 %1199 }
 0x140   : > { %1287 = vst.msk [vmem:[#allocation3 + $0x48] sm:$0xff] %vm1277_vm3, %v1200_v44  ;;  %v1206_v47 = vpop.permute.xlu0 %1205 }
 0x141   : > { %1573 = vrot.lane.b32.xlu1 %v12970_v50, %s8476_s29  ;;  %1290 = vst.msk [vmem:[#allocation3 + $0x60] sm:$0xff] %vm1277_vm3, %v1206_v47  ;;  %v12984_v50 = vld [vmem:[#allocation26_spill] sm:$0xff] }
 0x142   : > { %1579 = vrot.lane.b32.xlu0 %v12971_v53, %s8476_s29  ;;  %v12985_v53 = vld [vmem:[#allocation27_spill] sm:$0xff] }
 0x143   : > { %v1204_v56 = vpop.permute.xlu1 %1203 }
 0x144   : > { %1289 = vst.msk [vmem:[#allocation3 + $0x58] sm:$0xff] %vm1277_vm3, %v1204_v56  ;;  %v1210_v63 = vpop.permute.xlu0 %1209 }
 0x145   : > { %1577 = vrot.lane.b32.xlu1 %v12972_v12, %s8476_s29  ;;  %1292 = vst.msk [vmem:[#allocation3 + $0x70] sm:$0xff] %vm1277_vm3, %v1210_v63  ;;  %v12986_v12 = vld [vmem:[#allocation28_spill] sm:$0xff] }
 0x146   : > { %1583 = vrot.lane.b32.xlu0 %v12973_v14, %s8476_s29  ;;  %v12987_v14 = vld [vmem:[#allocation29_spill] sm:$0xff] }
 0x147   : > { %v1208_v16 = vpop.permute.xlu1 %1207 }
 0x148   : > { %1291 = vst.msk [vmem:[#allocation3 + $0x68] sm:$0xff] %vm1277_vm3, %v1208_v16  ;;  %v1214_v18 = vpop.permute.xlu0 %1213 }
 0x149   : > { %1581 = vrot.lane.b32.xlu1 %v12974_v20, %s8476_s29  ;;  %1294 = vst.msk [vmem:[#allocation3 + $0x80] sm:$0xff] %vm1277_vm3, %v1214_v18  ;;  %v12988_v20 = vld [vmem:[#allocation30_spill] sm:$0xff] }
 0x14a   : > { %1587 = vrot.lane.b32.xlu0 %v12975_v22, %s8476_s29  ;;  %v12989_v22 = vld [vmem:[#allocation31_spill] sm:$0xff] }
 0x14b   : > { %v1212_v39 = vpop.permute.xlu1 %1211 }
 0x14c   : > { %1293 = vst.msk [vmem:[#allocation3 + $0x78] sm:$0xff] %vm1277_vm3, %v1212_v39  ;;  %v1218_v24 = vpop.permute.xlu0 %1217 }
 0x14d   : > { %1585 = vrot.lane.b32.xlu1 %v12976_v51, %s8476_s29  ;;  %1296 = vst.msk [vmem:[#allocation3 + $0x90] sm:$0xff] %vm1277_vm3, %v1218_v24  ;;  %v12990_v51 = vld [vmem:[#allocation32_spill] sm:$0xff] }
 0x14e   : > { %1591 = vrot.lane.b32.xlu0 %v12977_v37, %s8476_s29 }
 0x14f   : > { %v1216_v34 = vpop.permute.xlu1 %1215 }
 0x150   : > { %1295 = vst.msk [vmem:[#allocation3 + $0x88] sm:$0xff] %vm1277_vm3, %v1216_v34  ;;  %v1222_v25 = vpop.permute.xlu0 %1221 }
 0x151   : > { %1589 = vrot.lane.b32.xlu1 %v12978_v48, %s8476_s29  ;;  %1298 = vst.msk [vmem:[#allocation3 + $0xa0] sm:$0xff] %vm1277_vm3, %v1222_v25  ;;  %v12991_v25 = vld [vmem:[#allocation33_spill] sm:$0xff] }
 0x152   : > { %1595 = vrot.lane.b32.xlu0 %v12979_v26, %s8476_s29 }
 0x153   : > { %v1220_v30 = vpop.permute.xlu1 %1219 }
 0x154   : > { %1297 = vst.msk [vmem:[#allocation3 + $0x98] sm:$0xff] %vm1277_vm3, %v1220_v30  ;;  %v1226_v31 = vpop.permute.xlu0 %1225 }
 0x155   : > { %1593 = vrot.lane.b32.xlu1 %v12980_v32, %s8476_s29  ;;  %1300 = vst.msk [vmem:[#allocation3 + $0xb0] sm:$0xff] %vm1277_vm3, %v1226_v31 }
 0x156   : > { %1599 = vrot.lane.b32.xlu0 %v12981_v38, %s8476_s29 }
 0x157   : > { %v1224_v40 = vpop.permute.xlu1 %1223 }
 0x158   : > { %1299 = vst.msk [vmem:[#allocation3 + $0xa8] sm:$0xff] %vm1277_vm3, %v1224_v40  ;;  %v1230_v41 = vpop.permute.xlu0 %1229 }
 0x159   : > { %1597 = vrot.lane.b32.xlu1 %v12982_v42, %s8476_s29  ;;  %1302 = vst.msk [vmem:[#allocation3 + $0xc0] sm:$0xff] %vm1277_vm3, %v1230_v41 }
 0x15a   : > { %1603 = vrot.lane.b32.xlu0 %v12983_v43, %s8476_s29  ;;  %v9580_v43 = vld [vmem:[#allocation2 + $0xe5] sm:$0xff] }
 0x15b   : > { %v1228_v44 = vpop.permute.xlu1 %1227 }
 0x15c   : > { %1301 = vst.msk [vmem:[#allocation3 + $0xb8] sm:$0xff] %vm1277_vm3, %v1228_v44  ;;  %v1234_v47 = vpop.permute.xlu0 %1233 }
 0x15d   : > { %1601 = vrot.lane.b32.xlu1 %v12984_v50, %s8476_s29  ;;  %1304 = vst.msk [vmem:[#allocation3 + $0xd0] sm:$0xff] %vm1277_vm3, %v1234_v47  ;;  %v9584_v47 = vld [vmem:[#allocation2 + $0xcd] sm:$0xff]  ;;  %v9589_v50 = vld [vmem:[#allocation2 + $0x105] sm:$0xff] }
 0x15e   : > { %1607 = vrot.lane.b32.xlu0 %v12985_v53, %s8476_s29 }
 0x15f   : > { %v1232_v56 = vpop.permute.xlu1 %1231 }
 0x160   : > { %1303 = vst.msk [vmem:[#allocation3 + $0xc8] sm:$0xff] %vm1277_vm3, %v1232_v56  ;;  %v1238_v63 = vpop.permute.xlu0 %1237  ;;  %v9594_v56 = vld [vmem:[#allocation2 + $0xed] sm:$0xff] }
 0x161   : > { %1605 = vrot.lane.b32.xlu1 %v12986_v12, %s8476_s29  ;;  %1306 = vst.msk [vmem:[#allocation3 + $0xe0] sm:$0xff] %vm1277_vm3, %v1238_v63  ;;  %v9599_v12 = vld [vmem:[#allocation2 + $0x125] sm:$0xff] }
 0x162   : > { %1611 = vrot.lane.b32.xlu0 %v12987_v14, %s8476_s29 }
 0x163   : > { %v1236_v16 = vpop.permute.xlu1 %1235 }
 0x164   : > { %1305 = vst.msk [vmem:[#allocation3 + $0xd8] sm:$0xff] %vm1277_vm3, %v1236_v16  ;;  %v1242_v18 = vpop.permute.xlu0 %1241  ;;  %v9604_v16 = vld [vmem:[#allocation2 + $0x10d] sm:$0xff] }
 0x165   : > { %1609 = vrot.lane.b32.xlu1 %v12988_v20, %s8476_s29  ;;  %1308 = vst.msk [vmem:[#allocation3 + $0xf0] sm:$0xff] %vm1277_vm3, %v1242_v18  ;;  %v9609_v20 = vld [vmem:[#allocation2 + $0x145] sm:$0xff] }
 0x166   : > { %1615 = vrot.lane.b32.xlu0 %v12989_v22, %s8476_s29 }
 0x167   : > { %v1240_v39 = vpop.permute.xlu1 %1239 }
 0x168   : > { %1307 = vst.msk [vmem:[#allocation3 + $0xe8] sm:$0xff] %vm1277_vm3, %v1240_v39  ;;  %v1375_v24 = vpop.permute.xlu0 %1374  ;;  %v9614_v39 = vld [vmem:[#allocation2 + $0x12d] sm:$0xff] }
 0x169   : > { %1613 = vrot.lane.b32.xlu1 %v9151_v0, %s8476_s29  ;;  %1471 = vst.msk [vmem:[#allocation3] sm:$0xff] %vm1470_vm4, %v1375_v24  ;;  %v9467_v0 = vld [vmem:[#allocation2 + $0x286] sm:$0xff] }
 0x16a   : > { %1619 = vrot.lane.b32.xlu0 %v12990_v51, %s8476_s29  ;;  %v9619_v51 = vld [vmem:[#allocation2 + $0x165] sm:$0xff] }
 0x16b   : > { %v1244_v37 = vpop.permute.xlu1 %1243 }
 0x16c   : > { %1309 = vst.msk [vmem:[#allocation3 + $0xf8] sm:$0xff] %vm1277_vm3, %v1244_v37  ;;  %v1379_v34 = vpop.permute.xlu0 %1378 }
 0x16d   : > { %1617 = vrot.lane.b32.xlu1 %v12991_v25, %s8476_s29  ;;  %1473 = vst.msk [vmem:[#allocation3 + $0x10] sm:$0xff] %vm1470_vm4, %v1379_v34  ;;  %v9624_v34 = vld [vmem:[#allocation2 + $0x14d] sm:$0xff] }
 0x16e   : > { %1623 = vrot.lane.b32.xlu0 %v9165_v46, %s8476_s29  ;;  %v9478_v46 = vld [vmem:[#allocation2 + $0x28e] sm:$0xff] }
 0x16f   : > { %v1377_v48 = vpop.permute.xlu1 %1376 }
 0x170   : > { %1472 = vst.msk [vmem:[#allocation3 + $0x8] sm:$0xff] %vm1470_vm4, %v1377_v48  ;;  %v1383_v26 = vpop.permute.xlu0 %1382  ;;  %v9629_v48 = vld [vmem:[#allocation2 + $0x185] sm:$0xff] }
 0x171   : > { %1621 = vrot.lane.b32.xlu1 %v9170_v33, %s8476_s29  ;;  %1475 = vst.msk [vmem:[#allocation3 + $0x20] sm:$0xff] %vm1470_vm4, %v1383_v26 }
 0x172   : > { %1627 = vrot.lane.b32.xlu0 %v9467_v0, %s8476_s29 }
 0x173   : > { %v1381_v30 = vpop.permute.xlu1 %1380 }
 0x174   : > { %1474 = vst.msk [vmem:[#allocation3 + $0x18] sm:$0xff] %vm1470_vm4, %v1381_v30  ;;  %v1387_v31 = vpop.permute.xlu0 %1386  ;;  %v9634_v30 = vld [vmem:[#allocation2 + $0x16d] sm:$0xff] }
 0x175   : > { %1625 = vrot.lane.b32.xlu1 %v9178_v45, %s8476_s29  ;;  %1477 = vst.msk [vmem:[#allocation3 + $0x30] sm:$0xff] %vm1470_vm4, %v1387_v31 }
 0x176   : > { %1761 = vrot.lane.b32.xlu0 %v8864_v49, %s8477_s30 }
 0x177   : > { %v1385_v33 = vpop.permute.xlu1 %1384 }
 0x178   : > { %1476 = vst.msk [vmem:[#allocation3 + $0x28] sm:$0xff] %vm1470_vm4, %v1385_v33  ;;  %v1391_v32 = vpop.permute.xlu0 %1390  ;;  %v9639_v33 = vld [vmem:[#allocation2 + $0x1a5] sm:$0xff] }
 0x179   : > { %1629 = vrot.lane.b32.xlu1 %v9478_v46, %s8476_s29  ;;  %1479 = vst.msk [vmem:[#allocation3 + $0x40] sm:$0xff] %vm1470_vm4, %v1391_v32 }
 0x17a   : > { %1765 = vrot.lane.b32.xlu0 %v8872_v52, %s8477_s30 }
 0x17b   : > { %v1389_v45 = vpop.permute.xlu1 %1388 }
 0x17c   : > { %1478 = vst.msk [vmem:[#allocation3 + $0x38] sm:$0xff] %vm1470_vm4, %v1389_v45  ;;  %v1395_v38 = vpop.permute.xlu0 %1394  ;;  %v9644_v45 = vld [vmem:[#allocation2 + $0x18d] sm:$0xff] }
 0x17d   : > { %1763 = vrot.lane.b32.xlu1 %v8882_v54, %s8477_s30  ;;  %1481 = vst.msk [vmem:[#allocation3 + $0x50] sm:$0xff] %vm1470_vm4, %v1395_v38 }
 0x17e   : > { %1769 = vrot.lane.b32.xlu0 %v8884_v55, %s8477_s30 }
 0x17f   : > { %v1393_v49 = vpop.permute.xlu1 %1392 }
 0x180   : > { %1480 = vst.msk [vmem:[#allocation3 + $0x48] sm:$0xff] %vm1470_vm4, %v1393_v49  ;;  %v1399_v40 = vpop.permute.xlu0 %1398  ;;  %v9649_v49 = vld [vmem:[#allocation2 + $0x1c5] sm:$0xff] }
 0x181   : > { %1767 = vrot.lane.b32.xlu1 %v8892_v57, %s8477_s30  ;;  %1483 = vst.msk [vmem:[#allocation3 + $0x60] sm:$0xff] %vm1470_vm4, %v1399_v40 }
 0x182   : > { %1773 = vrot.lane.b32.xlu0 %v8894_v58, %s8477_s30 }
 0x183   : > { %v1397_v52 = vpop.permute.xlu1 %1396 }
 0x184   : > { %1482 = vst.msk [vmem:[#allocation3 + $0x58] sm:$0xff] %vm1470_vm4, %v1397_v52  ;;  %v1403_v54 = vpop.permute.xlu0 %1402  ;;  %v9654_v52 = vld [vmem:[#allocation2 + $0x1ad] sm:$0xff] }
 0x185   : > { %1771 = vrot.lane.b32.xlu1 %v8896_v59, %s8477_s30  ;;  %1485 = vst.msk [vmem:[#allocation3 + $0x70] sm:$0xff] %vm1470_vm4, %v1403_v54 }
 0x186   : > { %1777 = vrot.lane.b32.xlu0 %v8906_v60, %s8477_s30 }
 0x187   : > { %v1401_v55 = vpop.permute.xlu1 %1400 }
 0x188   : > { %1484 = vst.msk [vmem:[#allocation3 + $0x68] sm:$0xff] %vm1470_vm4, %v1401_v55  ;;  %v1407_v57 = vpop.permute.xlu0 %1406  ;;  %v9659_v55 = vld [vmem:[#allocation2 + $0x1e5] sm:$0xff] }
 0x189   : > { %1775 = vrot.lane.b32.xlu1 %v8908_v61, %s8477_s30  ;;  %1487 = vst.msk [vmem:[#allocation3 + $0x80] sm:$0xff] %vm1470_vm4, %v1407_v57 }
 0x18a   : > { %1781 = vrot.lane.b32.xlu0 %v8910_v62, %s8477_s30 }
 0x18b   : > { %v1405_v58 = vpop.permute.xlu1 %1404 }
 0x18c   : > { %1486 = vst.msk [vmem:[#allocation3 + $0x78] sm:$0xff] %vm1470_vm4, %v1405_v58  ;;  %v1411_v59 = vpop.permute.xlu0 %1410  ;;  %v9664_v58 = vld [vmem:[#allocation2 + $0x1cd] sm:$0xff] }
 0x18d   : > { %1779 = vrot.lane.b32.xlu1 %v8920_v1, %s8477_s30  ;;  %1489 = vst.msk [vmem:[#allocation3 + $0x90] sm:$0xff] %vm1470_vm4, %v1411_v59 }
 0x18e   : > { %1785 = vrot.lane.b32.xlu0 %v8922_v2, %s8477_s30 }
 0x18f   : > { %v1409_v60 = vpop.permute.xlu1 %1408 }
 0x190   : > { %1488 = vst.msk [vmem:[#allocation3 + $0x88] sm:$0xff] %vm1470_vm4, %v1409_v60  ;;  %v1415_v61 = vpop.permute.xlu0 %1414  ;;  %v9669_v60 = vld [vmem:[#allocation2 + $0x205] sm:$0xff] }
 0x191   : > { %1783 = vrot.lane.b32.xlu1 %v8924_v3, %s8477_s30  ;;  %1491 = vst.msk [vmem:[#allocation3 + $0xa0] sm:$0xff] %vm1470_vm4, %v1415_v61 }
 0x192   : > { %1789 = vrot.lane.b32.xlu0 %v8934_v4, %s8477_s30 }
 0x193   : > { %v1413_v62 = vpop.permute.xlu1 %1412 }
 0x194   : > { %1490 = vst.msk [vmem:[#allocation3 + $0x98] sm:$0xff] %vm1470_vm4, %v1413_v62  ;;  %v1419_v1 = vpop.permute.xlu0 %1418  ;;  %v9674_v62 = vld [vmem:[#allocation2 + $0x1ed] sm:$0xff] }
 0x195   : > { %1787 = vrot.lane.b32.xlu1 %v8936_v5, %s8477_s30  ;;  %1493 = vst.msk [vmem:[#allocation3 + $0xb0] sm:$0xff] %vm1470_vm4, %v1419_v1 }
 0x196   : > { %1793 = vrot.lane.b32.xlu0 %v8938_v6, %s8477_s30 }
 0x197   : > { %v1417_v2 = vpop.permute.xlu1 %1416 }
 0x198   : > { %1492 = vst.msk [vmem:[#allocation3 + $0xa8] sm:$0xff] %vm1470_vm4, %v1417_v2  ;;  %v1423_v3 = vpop.permute.xlu0 %1422  ;;  %v9679_v2 = vld [vmem:[#allocation2 + $0x225] sm:$0xff] }
 0x199   : > { %1791 = vrot.lane.b32.xlu1 %v8946_v7, %s8477_s30  ;;  %1495 = vst.msk [vmem:[#allocation3 + $0xc0] sm:$0xff] %vm1470_vm4, %v1423_v3 }
 0x19a   : > { %1797 = vrot.lane.b32.xlu0 %v8948_v8, %s8477_s30 }
 0x19b   : > { %v1421_v4 = vpop.permute.xlu1 %1420 }
 0x19c   : > { %1494 = vst.msk [vmem:[#allocation3 + $0xb8] sm:$0xff] %vm1470_vm4, %v1421_v4  ;;  %v1427_v5 = vpop.permute.xlu0 %1426  ;;  %v9684_v4 = vld [vmem:[#allocation2 + $0x20d] sm:$0xff] }
 0x19d   : > { %1795 = vrot.lane.b32.xlu1 %v8950_v9, %s8477_s30  ;;  %1497 = vst.msk [vmem:[#allocation3 + $0xd0] sm:$0xff] %vm1470_vm4, %v1427_v5 }
 0x19e   : > { %1801 = vrot.lane.b32.xlu0 %v8960_v10, %s8477_s30 }
 0x19f   : > { %v1425_v6 = vpop.permute.xlu1 %1424 }
 0x1a0   : > { %1496 = vst.msk [vmem:[#allocation3 + $0xc8] sm:$0xff] %vm1470_vm4, %v1425_v6  ;;  %v1431_v7 = vpop.permute.xlu0 %1430  ;;  %v1914_v6 = vld [vmem:[#allocation2 + $0x245] sm:$0xff] }
 0x1a1   : > { %1799 = vrot.lane.b32.xlu1 %v8962_v11, %s8477_s30  ;;  %1499 = vst.msk [vmem:[#allocation3 + $0xe0] sm:$0xff] %vm1470_vm4, %v1431_v7 }
 0x1a2   : > { %1805 = vrot.lane.b32.xlu0 %v8970_v13, %s8477_s30 }
 0x1a3   : > { %v1429_v8 = vpop.permute.xlu1 %1428 }
 0x1a4   : > { %1498 = vst.msk [vmem:[#allocation3 + $0xd8] sm:$0xff] %vm1470_vm4, %v1429_v8  ;;  %v1435_v9 = vpop.permute.xlu0 %1434  ;;  %v9692_v8 = vld [vmem:[#allocation2 + $0x22d] sm:$0xff] }
 0x1a5   : > { %1803 = vrot.lane.b32.xlu1 %v8978_v15, %s8477_s30  ;;  %1501 = vst.msk [vmem:[#allocation3 + $0xf0] sm:$0xff] %vm1470_vm4, %v1435_v9 }
 0x1a6   : > { %1809 = vrot.lane.b32.xlu0 %v8986_v17, %s8477_s30 }
 0x1a7   : > { %v1433_v10 = vpop.permute.xlu1 %1432 }
 0x1a8   : > { %1500 = vst.msk [vmem:[#allocation3 + $0xe8] sm:$0xff] %vm1470_vm4, %v1433_v10  ;;  %v1568_v11 = vpop.permute.xlu0 %1567  ;;  %v1916_v10 = vld [vmem:[#allocation2 + $0x265] sm:$0xff] }
 0x1a9   : > { %1807 = vrot.lane.b32.xlu1 %v8994_v19, %s8477_s30  ;;  %1664 = vst.msk [vmem:[#allocation3] sm:$0xff] %vm1663_vm5, %v1568_v11  ;;  %v1727_v19 = vld [vmem:[#allocation2 + $0x2a4] sm:$0xff] }
 0x1aa   : > { %1813 = vrot.lane.b32.xlu0 %v9002_v21, %s8477_s30 }
 0x1ab   : > { %v1437_v13 = vpop.permute.xlu1 %1436 }
 0x1ac   : > { %1502 = vst.msk [vmem:[#allocation3 + $0xf8] sm:$0xff] %vm1470_vm4, %v1437_v13  ;;  %v1572_v15 = vpop.permute.xlu0 %1571  ;;  %v1915_v13 = vld [vmem:[#allocation2 + $0x24d] sm:$0xff] }
 0x1ad   : > { %1811 = vrot.lane.b32.xlu1 %v9010_v23, %s8477_s30  ;;  %1666 = vst.msk [vmem:[#allocation3 + $0x10] sm:$0xff] %vm1663_vm5, %v1572_v15  ;;  %v9572_v23 = vld [vmem:[#allocation2 + $0xc5] sm:$0xff] }
 0x1ae   : > { %1817 = vrot.lane.b32.xlu0 %v9267_v35, %s8477_s30  ;;  %v1728_v35 = vld [vmem:[#allocation2 + $0x2ac] sm:$0xff] }
 0x1af   : > { %v1570_v17 = vpop.permute.xlu1 %1569 }
 0x1b0   : > { %1665 = vst.msk [vmem:[#allocation3 + $0x8] sm:$0xff] %vm1663_vm5, %v1570_v17  ;;  %v1576_v41 = vpop.permute.xlu0 %1575  ;;  %v2308_v17 = vld [vmem:[%s12868_s1] sm:$0xff] }
 0x1b1   : > { %1815 = vrot.lane.b32.xlu1 %v9022_v29, %s8477_s30  ;;  %1668 = vst.msk [vmem:[#allocation3 + $0x20] sm:$0xff] %vm1663_vm5, %v1576_v41 }
 0x1b2   : > { %1821 = vrot.lane.b32.xlu0 %v1727_v19, %s8477_s30  ;;  %v2309_v19 = vld [vmem:[%s12868_s1 + $0x8] sm:$0xff] }
 0x1b3   : > { %v1574_v21 = vpop.permute.xlu1 %1573  ;;  %v8395_v41 = vpack.c.bf16 %v2309_v19, %v2308_v17  ;;  %v2094_v19 = vld [vmem:[#allocation2 + $0x16e] sm:$0xff] }
 0x1b4   : > { %1667 = vst.msk [vmem:[#allocation3 + $0x18] sm:$0xff] %vm1663_vm5, %v1574_v21  ;;  %v1580_v42 = vpop.permute.xlu0 %1579 }
 0x1b5   : > { %1819 = vrot.lane.b32.xlu1 %v9278_v36, %s8477_s30  ;;  %1670 = vst.msk [vmem:[#allocation3 + $0x30] sm:$0xff] %vm1663_vm5, %v1580_v42  ;;  %v1917_v42 = vld [vmem:[#allocation2 + $0x26d] sm:$0xff]  ;;  %8396 = vmatprep.subr.bf16.mxu0 %v8395_v41 }
 0x1b6   : > { %1954 = vrot.lane.b32.xlu0 %v9572_v23, %s8478_s16  ;;  %8398 = vmatpush3.bf16.msra.mxu0 %v8395_v41 }
 0x1b7   : > { %v1578_v29 = vpop.permute.xlu1 %1577 }
 0x1b8   : > { %1669 = vst.msk [vmem:[#allocation3 + $0x28] sm:$0xff] %vm1663_vm5, %v1578_v29  ;;  %v1584_v44 = vpop.permute.xlu0 %1583  ;;  %v2310_v29 = vld [vmem:[%s12868_s1 + $0x10] sm:$0xff] }
 0x1b9   : > { %1823 = vrot.lane.b32.xlu1 %v1728_v35, %s8477_s30  ;;  %1672 = vst.msk [vmem:[#allocation3 + $0x40] sm:$0xff] %vm1663_vm5, %v1584_v44  ;;  %v2311_v44 = vld [vmem:[%s12868_s1 + $0x18] sm:$0xff] }
 0x1ba   : > { %1958 = vrot.lane.b32.xlu0 %v9580_v43, %s8478_s16 }
 0x1bb   : > { %v1582_v36 = vpop.permute.xlu1 %1581 }
 0x1bc   : > { %1671 = vst.msk [vmem:[#allocation3 + $0x38] sm:$0xff] %vm1663_vm5, %v1582_v36  ;;  %v1588_v53 = vpop.permute.xlu0 %1587  ;;  %v1920_v36 = vld [vmem:[#allocation2 + $0x2a5] sm:$0xff] }
 0x1bd   : > { %1956 = vrot.lane.b32.xlu1 %v9584_v47, %s8478_s16  ;;  %1674 = vst.msk [vmem:[#allocation3 + $0x50] sm:$0xff] %vm1663_vm5, %v1588_v53  ;;  %v8399_v53 = vpack.c.bf16 %v2311_v44, %v2310_v29  ;;  %v2099_v44 = vld [vmem:[#allocation2 + $0x1c6] sm:$0xff] }
 0x1be   : > { %1962 = vrot.lane.b32.xlu0 %v9589_v50, %s8478_s16 }
 0x1bf   : > { %v1586_v63 = vpop.permute.xlu1 %1585  ;;  %8400 = vmatprep.subr.bf16.mxu0 %v8399_v53 }
 0x1c0   : > { %1673 = vst.msk [vmem:[#allocation3 + $0x48] sm:$0xff] %vm1663_vm5, %v1586_v63  ;;  %v1592_v14 = vpop.permute.xlu0 %1591  ;;  %8402 = vmatpush3.bf16.msra.mxu0 %v8399_v53  ;;  %v2098_v53 = vld [vmem:[#allocation2 + $0x1ae] sm:$0xff] }
 0x1c1   : > { %1960 = vrot.lane.b32.xlu1 %v9594_v56, %s8478_s16  ;;  %1676 = vst.msk [vmem:[#allocation3 + $0x60] sm:$0xff] %vm1663_vm5, %v1592_v14  ;;  %v2083_v14 = vld [vmem:[#allocation2 + $0xc6] sm:$0xff] }
 0x1c2   : > { %1966 = vrot.lane.b32.xlu0 %v9599_v12, %s8478_s16 }
 0x1c3   : > { %v1590_v18 = vpop.permute.xlu1 %1589 }
 0x1c4   : > { %1675 = vst.msk [vmem:[#allocation3 + $0x58] sm:$0xff] %vm1663_vm5, %v1590_v18  ;;  %v1596_v22 = vpop.permute.xlu0 %1595 }
 0x1c5   : > { %1964 = vrot.lane.b32.xlu1 %v9604_v16, %s8478_s16  ;;  %1678 = vst.msk [vmem:[#allocation3 + $0x70] sm:$0xff] %vm1663_vm5, %v1596_v22  ;;  %v2312_v22 = vld [vmem:[%s12868_s1 + $0x20] sm:$0xf] }
 0x1c6   : > { %1970 = vrot.lane.b32.xlu0 %v9609_v20, %s8478_s16  ;;  %8174 = vmatprep.subr.msk.mxu0 %vm2410_vm7, %v2312_v22 }
 0x1c7   : > { %v1594_v24 = vpop.permute.xlu1 %1593  ;;  %8175 = vmatpush3.msk.msra.mxu0 %vm2410_vm7, %v2312_v22 }
 0x1c8   : > { %1677 = vst.msk [vmem:[#allocation3 + $0x68] sm:$0xff] %vm1663_vm5, %v1594_v24  ;;  %v1600_v37 = vpop.permute.xlu0 %1599  ;;  %v1921_v24 = vld [vmem:[#allocation2 + $0x2ad] sm:$0xff] }
 0x1c9   : > { %1968 = vrot.lane.b32.xlu1 %v9614_v39, %s8478_s16  ;;  %1680 = vst.msk [vmem:[#allocation3 + $0x80] sm:$0xff] %vm1663_vm5, %v1600_v37 }
 0x1ca   : > { %1974 = vrot.lane.b32.xlu0 %v9619_v51, %s8478_s16 }
 0x1cb   : > { %v1598_v25 = vpop.permute.xlu1 %1597 }
 0x1cc   : > { %1679 = vst.msk [vmem:[#allocation3 + $0x78] sm:$0xff] %vm1663_vm5, %v1598_v25  ;;  %v1604_v26 = vpop.permute.xlu0 %1603  ;;  %v2085_v25 = vld [vmem:[#allocation2 + $0xe6] sm:$0xff] }
 0x1cd   : > { %1972 = vrot.lane.b32.xlu1 %v9624_v34, %s8478_s16  ;;  %1682 = vst.msk [vmem:[#allocation3 + $0x90] sm:$0xff] %vm1663_vm5, %v1604_v26  ;;  %v2084_v26 = vld [vmem:[#allocation2 + $0xce] sm:$0xff] }
 0x1ce   : > { %1978 = vrot.lane.b32.xlu0 %v9629_v48, %s8478_s16 }
 0x1cf   : > { %v1602_v31 = vpop.permute.xlu1 %1601 }
 0x1d0   : > { %1681 = vst.msk [vmem:[#allocation3 + $0x88] sm:$0xff] %vm1663_vm5, %v1602_v31  ;;  %v1608_v32 = vpop.permute.xlu0 %1607 }
 0x1d1   : > { %1976 = vrot.lane.b32.xlu1 %v9634_v30, %s8478_s16  ;;  %1684 = vst.msk [vmem:[#allocation3 + $0xa0] sm:$0xff] %vm1663_vm5, %v1608_v32  ;;  %v2087_v32 = vld [vmem:[#allocation2 + $0x106] sm:$0xff] }
 0x1d2   : > { %1982 = vrot.lane.b32.xlu0 %v9639_v33, %s8478_s16 }
 0x1d3   : > { %v1606_v38 = vpop.permute.xlu1 %1605 }
 0x1d4   : > { %1683 = vst.msk [vmem:[#allocation3 + $0x98] sm:$0xff] %vm1663_vm5, %v1606_v38  ;;  %v1612_v40 = vpop.permute.xlu0 %1611 }
 0x1d5   : > { %1980 = vrot.lane.b32.xlu1 %v9644_v45, %s8478_s16  ;;  %1686 = vst.msk [vmem:[#allocation3 + $0xb0] sm:$0xff] %vm1663_vm5, %v1612_v40  ;;  %v2086_v40 = vld [vmem:[#allocation2 + $0xee] sm:$0xff] }
 0x1d6   : > { %1986 = vrot.lane.b32.xlu0 %v9649_v49, %s8478_s16 }
 0x1d7   : > { %v1610_v54 = vpop.permute.xlu1 %1609 }
 0x1d8   : > { %1685 = vst.msk [vmem:[#allocation3 + $0xa8] sm:$0xff] %vm1663_vm5, %v1610_v54  ;;  %v1616_v57 = vpop.permute.xlu0 %1615 }
 0x1d9   : > { %1984 = vrot.lane.b32.xlu1 %v9654_v52, %s8478_s16  ;;  %1688 = vst.msk [vmem:[#allocation3 + $0xc0] sm:$0xff] %vm1663_vm5, %v1616_v57  ;;  %v2089_v57 = vld [vmem:[#allocation2 + $0x126] sm:$0xff] }
 0x1da   : > { %1990 = vrot.lane.b32.xlu0 %v9659_v55, %s8478_s16 }
 0x1db   : > { %v1614_v59 = vpop.permute.xlu1 %1613 }
 0x1dc   : > { %1687 = vst.msk [vmem:[#allocation3 + $0xb8] sm:$0xff] %vm1663_vm5, %v1614_v59  ;;  %v1620_v61 = vpop.permute.xlu0 %1619 }
 0x1dd   : > { %1988 = vrot.lane.b32.xlu1 %v9664_v58, %s8478_s16  ;;  %1690 = vst.msk [vmem:[#allocation3 + $0xd0] sm:$0xff] %vm1663_vm5, %v1620_v61  ;;  %v2088_v61 = vld [vmem:[#allocation2 + $0x10e] sm:$0xff] }
 0x1de   : > { %1994 = vrot.lane.b32.xlu0 %v9669_v60, %s8478_s16 }
 0x1df   : > { %v1618_v1 = vpop.permute.xlu1 %1617 }
 0x1e0   : > { %1689 = vst.msk [vmem:[#allocation3 + $0xc8] sm:$0xff] %vm1663_vm5, %v1618_v1  ;;  %v1624_v3 = vpop.permute.xlu0 %1623 }
 0x1e1   : > { %1992 = vrot.lane.b32.xlu1 %v9674_v62, %s8478_s16  ;;  %1692 = vst.msk [vmem:[#allocation3 + $0xe0] sm:$0xff] %vm1663_vm5, %v1624_v3  ;;  %v2091_v3 = vld [vmem:[#allocation2 + $0x146] sm:$0xff] }
 0x1e2   : > { %1998 = vrot.lane.b32.xlu0 %v9679_v2, %s8478_s16 }
 0x1e3   : > { %v1622_v5 = vpop.permute.xlu1 %1621 }
 0x1e4   : > { %1691 = vst.msk [vmem:[#allocation3 + $0xd8] sm:$0xff] %vm1663_vm5, %v1622_v5  ;;  %v1628_v7 = vpop.permute.xlu0 %1627 }
 0x1e5   : > { %1996 = vrot.lane.b32.xlu1 %v9684_v4, %s8478_s16  ;;  %1694 = vst.msk [vmem:[#allocation3 + $0xf0] sm:$0xff] %vm1663_vm5, %v1628_v7 }
 0x1e6   : > { %2002 = vrot.lane.b32.xlu0 %v1914_v6, %s8478_s16  ;;  %v2090_v6 = vld [vmem:[#allocation2 + $0x12e] sm:$0xff] }
 0x1e7   : > { %v1626_v9 = vpop.permute.xlu1 %1625 }
 0x1e8   : > { %1693 = vst.msk [vmem:[#allocation3 + $0xe8] sm:$0xff] %vm1663_vm5, %v1626_v9  ;;  %v1762_v11 = vpop.permute.xlu0 %1761  ;;  %v2093_v9 = vld [vmem:[#allocation2 + $0x166] sm:$0xff] }
 0x1e9   : > { %2000 = vrot.lane.b32.xlu1 %v9692_v8, %s8478_s16  ;;  %1858 = vst.msk [vmem:[#allocation3] sm:$0xff] %vm1857_vm6, %v1762_v11  ;;  %v2092_v11 = vld [vmem:[#allocation2 + $0x14e] sm:$0xff] }
 0x1ea   : > { %2006 = vrot.lane.b32.xlu0 %v1916_v10, %s8478_s16 }
 0x1eb   : > { %v1630_v15 = vpop.permute.xlu1 %1629 }
 0x1ec   : > { %1695 = vst.msk [vmem:[#allocation3 + $0xf8] sm:$0xff] %vm1663_vm5, %v1630_v15  ;;  %v1766_v21 = vpop.permute.xlu0 %1765  ;;  %v2095_v15 = vld [vmem:[#allocation2 + $0x186] sm:$0xff] }
 0x1ed   : > { %2004 = vrot.lane.b32.xlu1 %v1915_v13, %s8478_s16  ;;  %1860 = vst.msk [vmem:[#allocation3 + $0x10] sm:$0xff] %vm1857_vm6, %v1766_v21  ;;  %v2097_v21 = vld [vmem:[#allocation2 + $0x1a6] sm:$0xff] }
 0x1ee   : > { %2010 = vrot.lane.b32.xlu0 %v9367_v28, %s8478_s16 }
 0x1ef   : > { %v1764_v35 = vpop.permute.xlu1 %1763 }
 0x1f0   : > { %1859 = vst.msk [vmem:[#allocation3 + $0x8] sm:$0xff] %vm1857_vm6, %v1764_v35  ;;  %v1770_v63 = vpop.permute.xlu0 %1769  ;;  %v2096_v35 = vld [vmem:[#allocation2 + $0x18e] sm:$0xff] }
 0x1f1   : > { %2008 = vrot.lane.b32.xlu1 %v1917_v42, %s8478_s16  ;;  %1862 = vst.msk [vmem:[#allocation3 + $0x20] sm:$0xff] %vm1857_vm6, %v1770_v63 }
 0x1f2   : > { %2014 = vrot.lane.b32.xlu0 %v1920_v36, %s8478_s16 }
 0x1f3   : > { %v1768_v28 = vpop.permute.xlu1 %1767 }
 0x1f4   : > { %1861 = vst.msk [vmem:[#allocation3 + $0x18] sm:$0xff] %vm1857_vm6, %v1768_v28  ;;  %v1774_v18 = vpop.permute.xlu0 %1773  ;;  %v2101_v28 = vld [vmem:[#allocation2 + $0x1e6] sm:$0xff] }
 0x1f5   : > { %2012 = vrot.lane.b32.xlu1 %v9378_v27, %s8478_s16  ;;  %1864 = vst.msk [vmem:[#allocation3 + $0x30] sm:$0xff] %vm1857_vm6, %v1774_v18  ;;  %v2100_v18 = vld [vmem:[#allocation2 + $0x1ce] sm:$0xff] }
 0x1f6   : > { %2147 = vrot.lane.b32.xlu0 %v2083_v14, %s8479_s17 }
 0x1f7   : > { %v1772_v37 = vpop.permute.xlu1 %1771 }
 0x1f8   : > { %1863 = vst.msk [vmem:[#allocation3 + $0x28] sm:$0xff] %vm1857_vm6, %v1772_v37  ;;  %v1778_v27 = vpop.permute.xlu0 %1777 }
 0x1f9   : > { %2016 = vrot.lane.b32.xlu1 %v1921_v24, %s8478_s16  ;;  %1866 = vst.msk [vmem:[#allocation3 + $0x40] sm:$0xff] %vm1857_vm6, %v1778_v27  ;;  %v2103_v24 = vld [vmem:[#allocation2 + $0x206] sm:$0xff] }
 0x1fa   : > { %2151 = vrot.lane.b32.xlu0 %v2085_v25, %s8479_s17  ;;  %v2102_v25 = vld [vmem:[#allocation2 + $0x1ee] sm:$0xff] }
 0x1fb   : > { %v1776_v31 = vpop.permute.xlu1 %1775 }
 0x1fc   : > { %1865 = vst.msk [vmem:[#allocation3 + $0x38] sm:$0xff] %vm1857_vm6, %v1776_v31  ;;  %v1782_v38 = vpop.permute.xlu0 %1781 }
 0x1fd   : > { %2149 = vrot.lane.b32.xlu1 %v2084_v26, %s8479_s17  ;;  %1868 = vst.msk [vmem:[#allocation3 + $0x50] sm:$0xff] %vm1857_vm6, %v1782_v38  ;;  %v2105_v26 = vld [vmem:[#allocation2 + $0x226] sm:$0xff] }
 0x1fe   : > { %2155 = vrot.lane.b32.xlu0 %v2087_v32, %s8479_s17  ;;  %v2104_v32 = vld [vmem:[#allocation2 + $0x20e] sm:$0xff] }
 0x1ff   : > { %v1780_v54 = vpop.permute.xlu1 %1779 }
 0x200   : > { %1867 = vst.msk [vmem:[#allocation3 + $0x48] sm:$0xff] %vm1857_vm6, %v1780_v54  ;;  %v1786_v59 = vpop.permute.xlu0 %1785 }
 0x201   : > { %2153 = vrot.lane.b32.xlu1 %v2086_v40, %s8479_s17  ;;  %1870 = vst.msk [vmem:[#allocation3 + $0x60] sm:$0xff] %vm1857_vm6, %v1786_v59  ;;  %v2107_v40 = vld [vmem:[#allocation2 + $0x246] sm:$0xff] }
 0x202   : > { %2159 = vrot.lane.b32.xlu0 %v2089_v57, %s8479_s17  ;;  %v2106_v57 = vld [vmem:[#allocation2 + $0x22e] sm:$0xff] }
 0x203   : > { %v1784_v1 = vpop.permute.xlu1 %1783 }
 0x204   : > { %1869 = vst.msk [vmem:[#allocation3 + $0x58] sm:$0xff] %vm1857_vm6, %v1784_v1  ;;  %v1790_v5 = vpop.permute.xlu0 %1789 }
 0x205   : > { %2157 = vrot.lane.b32.xlu1 %v2088_v61, %s8479_s17  ;;  %1872 = vst.msk [vmem:[#allocation3 + $0x70] sm:$0xff] %vm1857_vm6, %v1790_v5  ;;  %v2109_v61 = vld [vmem:[#allocation2 + $0x266] sm:$0xff] }
 0x206   : > { %2163 = vrot.lane.b32.xlu0 %v2091_v3, %s8479_s17  ;;  %v2108_v3 = vld [vmem:[#allocation2 + $0x24e] sm:$0xff] }
 0x207   : > { %v1788_v7 = vpop.permute.xlu1 %1787 }
 0x208   : > { %1871 = vst.msk [vmem:[#allocation3 + $0x68] sm:$0xff] %vm1857_vm6, %v1788_v7  ;;  %v1794_v10 = vpop.permute.xlu0 %1793  ;;  %v2110_v7 = vld [vmem:[#allocation2 + $0x26e] sm:$0xff] }
 0x209   : > { %2161 = vrot.lane.b32.xlu1 %v2090_v6, %s8479_s17  ;;  %1874 = vst.msk [vmem:[#allocation3 + $0x80] sm:$0xff] %vm1857_vm6, %v1794_v10  ;;  %v2113_v10 = vld [vmem:[#allocation2 + $0x2a6] sm:$0xff] }
 0x20a   : > { %2167 = vrot.lane.b32.xlu0 %v2093_v9, %s8479_s17 }
 0x20b   : > { %v1792_v13 = vpop.permute.xlu1 %1791 }
 0x20c   : > { %1873 = vst.msk [vmem:[#allocation3 + $0x78] sm:$0xff] %vm1857_vm6, %v1792_v13  ;;  %v1798_v17 = vpop.permute.xlu0 %1797 }
 0x20d   : > { %2165 = vrot.lane.b32.xlu1 %v2092_v11, %s8479_s17  ;;  %1876 = vst.msk [vmem:[#allocation3 + $0x90] sm:$0xff] %vm1857_vm6, %v1798_v17 }
 0x20e   : > { %2171 = vrot.lane.b32.xlu0 %v2095_v15, %s8479_s17  ;;  %v2814_v15 = vld [vmem:[#allocation2 + $0x45] sm:$0xff] }
 0x20f   : > { %v1796_v41 = vpop.permute.xlu1 %1795 }
 0x210   : > { %1875 = vst.msk [vmem:[#allocation3 + $0x88] sm:$0xff] %vm1857_vm6, %v1796_v41  ;;  %v1802_v42 = vpop.permute.xlu0 %1801  ;;  %v2816_v41 = vld [vmem:[#allocation2 + $0x65] sm:$0xff] }
 0x211   : > { %2169 = vrot.lane.b32.xlu1 %v2094_v19, %s8479_s17  ;;  %1878 = vst.msk [vmem:[#allocation3 + $0xa0] sm:$0xff] %vm1857_vm6, %v1802_v42  ;;  %v2815_v42 = vld [vmem:[#allocation2 + $0x4d] sm:$0xff] }
 0x212   : > { %2175 = vrot.lane.b32.xlu0 %v2097_v21, %s8479_s17 }
 0x213   : > { %v1800_v29 = vpop.permute.xlu1 %1799 }
 0x214   : > { %1877 = vst.msk [vmem:[#allocation3 + $0x98] sm:$0xff] %vm1857_vm6, %v1800_v29  ;;  %v1806_v36 = vpop.permute.xlu0 %1805 }
 0x215   : > { %2173 = vrot.lane.b32.xlu1 %v2096_v35, %s8479_s17  ;;  %1880 = vst.msk [vmem:[#allocation3 + $0xb0] sm:$0xff] %vm1857_vm6, %v1806_v36 }
 0x216   : > { %2179 = vrot.lane.b32.xlu0 %v2099_v44, %s8479_s17  ;;  %v2817_v44 = vld [vmem:[#allocation2 + $0x6d] sm:$0xff] }
 0x217   : > { %v1804_v63 = vpop.permute.xlu1 %1803 }
 0x218   : > { %1879 = vst.msk [vmem:[#allocation3 + $0xa8] sm:$0xff] %vm1857_vm6, %v1804_v63  ;;  %v1810_v14 = vpop.permute.xlu0 %1809 }
 0x219   : > { %2177 = vrot.lane.b32.xlu1 %v2098_v53, %s8479_s17  ;;  %1882 = vst.msk [vmem:[#allocation3 + $0xc0] sm:$0xff] %vm1857_vm6, %v1810_v14  ;;  %v9806_v53 = vld [vmem:[#allocation2 + $0xa5] sm:$0xff] }
 0x21a   : > { %2183 = vrot.lane.b32.xlu0 %v2101_v28, %s8479_s17  ;;  %v2819_v28 = vld [vmem:[#allocation2 + $0x8d] sm:$0xff] }
 0x21b   : > { %v1808_v22 = vpop.permute.xlu1 %1807 }
 0x21c   : > { %1881 = vst.msk [vmem:[#allocation3 + $0xb8] sm:$0xff] %vm1857_vm6, %v1808_v22  ;;  %v1814_v37 = vpop.permute.xlu0 %1813  ;;  %v9815_v22 = vld [vmem:[#allocation2 + $0xad] sm:$0xff] }
 0x21d   : > { %2181 = vrot.lane.b32.xlu1 %v2100_v18, %s8479_s17  ;;  %1884 = vst.msk [vmem:[#allocation3 + $0xd0] sm:$0xff] %vm1857_vm6, %v1814_v37 }
 0x21e   : > { %2187 = vrot.lane.b32.xlu0 %v2103_v24, %s8479_s17 }
 0x21f   : > { %v1812_v27 = vpop.permute.xlu1 %1811 }
 0x220   : > { %1883 = vst.msk [vmem:[#allocation3 + $0xc8] sm:$0xff] %vm1857_vm6, %v1812_v27  ;;  %v1818_v31 = vpop.permute.xlu0 %1817 }
 0x221   : > { %2185 = vrot.lane.b32.xlu1 %v2102_v25, %s8479_s17  ;;  %1886 = vst.msk [vmem:[#allocation3 + $0xe0] sm:$0xff] %vm1857_vm6, %v1818_v31 }
 0x222   : > { %2191 = vrot.lane.b32.xlu0 %v2105_v26, %s8479_s17 }
 0x223   : > { %v1816_v38 = vpop.permute.xlu1 %1815 }
 0x224   : > { %1885 = vst.msk [vmem:[#allocation3 + $0xd8] sm:$0xff] %vm1857_vm6, %v1816_v38  ;;  %v1822_v54 = vpop.permute.xlu0 %1821 }
 0x225   : > { %2189 = vrot.lane.b32.xlu1 %v2104_v32, %s8479_s17  ;;  %1888 = vst.msk [vmem:[#allocation3 + $0xf0] sm:$0xff] %vm1857_vm6, %v1822_v54  ;;  %v3006_v32 = vld [vmem:[#allocation2 + $0x48] sm:$0xff] }
 0x226   : > { %2195 = vrot.lane.b32.xlu0 %v2107_v40, %s8479_s17  ;;  %v2751_v40 = vld [vmem:[#allocation2 + $0x4a] sm:$0xff] }
 0x227   : > { %v1820_v59 = vpop.permute.xlu1 %1819 }
 0x228   : > { %1887 = vst.msk [vmem:[#allocation3 + $0xe8] sm:$0xff] %vm1857_vm6, %v1820_v59  ;;  %v1955_v1 = vpop.permute.xlu0 %1954  ;;  %v3008_v59 = vld [vmem:[#allocation2 + $0x68] sm:$0xff] }
 0x229   : > { %2193 = vrot.lane.b32.xlu1 %v2106_v57, %s8479_s17  ;;  %2051 = vst.msk [vmem:[#allocation3] sm:$0xff] %vm2050_vm8, %v1955_v1  ;;  %v2753_v1 = vld [vmem:[#allocation2 + $0x6a] sm:$0xff] }
 0x22a   : > { %2199 = vrot.lane.b32.xlu0 %v2109_v61, %s8479_s17 }
 0x22b   : > { %v1824_v5 = vpop.permute.xlu1 %1823 }
 0x22c   : > { %1889 = vst.msk [vmem:[#allocation3 + $0xf8] sm:$0xff] %vm1857_vm6, %v1824_v5  ;;  %v1959_v6 = vpop.permute.xlu0 %1958 }
 0x22d   : > { %2197 = vrot.lane.b32.xlu1 %v2108_v3, %s8479_s17  ;;  %2053 = vst.msk [vmem:[#allocation3 + $0x10] sm:$0xff] %vm2050_vm8, %v1959_v6  ;;  %v3007_v3 = vld [vmem:[#allocation2 + $0x50] sm:$0xff] }
 0x22e   : > { %2203 = vrot.lane.b32.xlu0 %v9467_v0, %s8479_s17  ;;  %v2114_v0 = vld [vmem:[#allocation2 + $0x2ae] sm:$0xff] }
 0x22f   : > { %v1957_v9 = vpop.permute.xlu1 %1956 }
 0x230   : > { %2052 = vst.msk [vmem:[#allocation3 + $0x8] sm:$0xff] %vm2050_vm8, %v1957_v9  ;;  %v1963_v11 = vpop.permute.xlu0 %1962 }
 0x231   : > { %2201 = vrot.lane.b32.xlu1 %v2110_v7, %s8479_s17  ;;  %2055 = vst.msk [vmem:[#allocation3 + $0x20] sm:$0xff] %vm2050_vm8, %v1963_v11  ;;  %v3010_v7 = vld [vmem:[#allocation2 + $0x88] sm:$0xff] }
 0x232   : > { %2207 = vrot.lane.b32.xlu0 %v2113_v10, %s8479_s17  ;;  %v9907_v10 = vld [vmem:[#allocation2 + $0xa2] sm:$0xff]  ;;  %v2755_v11 = vld [vmem:[#allocation2 + $0x8a] sm:$0xff] }
 0x233   : > { %v1961_v13 = vpop.permute.xlu1 %1960 }
 0x234   : > { %2054 = vst.msk [vmem:[#allocation3 + $0x18] sm:$0xff] %vm2050_vm8, %v1961_v13  ;;  %v1967_v17 = vpop.permute.xlu0 %1966  ;;  %v3009_v13 = vld [vmem:[#allocation2 + $0x70] sm:$0xff] }
 0x235   : > { %2205 = vrot.lane.b32.xlu1 %v9478_v46, %s8479_s17  ;;  %2057 = vst.msk [vmem:[#allocation3 + $0x30] sm:$0xff] %vm2050_vm8, %v1967_v17  ;;  %v2818_v46 = vld [vmem:[#allocation2 + $0x85] sm:$0xff] }
 0x236   : > { %2878 = vrot.lane.b32.xlu0 %v2814_v15, %s8472_s25 }
 0x237   : > { %v1965_v19 = vpop.permute.xlu1 %1964 }
 0x238   : > { %2056 = vst.msk [vmem:[#allocation3 + $0x28] sm:$0xff] %vm2050_vm8, %v1965_v19  ;;  %v1971_v21 = vpop.permute.xlu0 %1970 }
 0x239   : > { %2209 = vrot.lane.b32.xlu1 %v2114_v0, %s8479_s17  ;;  %2059 = vst.msk [vmem:[#allocation3 + $0x40] sm:$0xff] %vm2050_vm8, %v1971_v21  ;;  %v9915_v0 = vld [vmem:[#allocation2 + $0xa8] sm:$0xff] }
 0x23a   : > { %2882 = vrot.lane.b32.xlu0 %v2816_v41, %s8472_s25  ;;  %v9920_v21 = vld [vmem:[#allocation2 + $0xc2] sm:$0xff] }
 0x23b   : > { %v1969_v35 = vpop.permute.xlu1 %1968 }
 0x23c   : > { %2058 = vst.msk [vmem:[#allocation3 + $0x38] sm:$0xff] %vm2050_vm8, %v1969_v35  ;;  %v1975_v29 = vpop.permute.xlu0 %1974  ;;  %v3011_v35 = vld [vmem:[#allocation2 + $0x90] sm:$0xff] }
 0x23d   : > { %2880 = vrot.lane.b32.xlu1 %v2815_v42, %s8472_s25  ;;  %2061 = vst.msk [vmem:[#allocation3 + $0x50] sm:$0xff] %vm2050_vm8, %v1975_v29  ;;  %v9922_v42 = vld [vmem:[#allocation2 + $0xaa] sm:$0xff] }
 0x23e   : > { %2886 = vrot.lane.b32.xlu0 %v2818_v46, %s8472_s25 }
 0x23f   : > { %v1973_v36 = vpop.permute.xlu1 %1972 }
 0x240   : > { %2060 = vst.msk [vmem:[#allocation3 + $0x48] sm:$0xff] %vm2050_vm8, %v1973_v36  ;;  %v1979_v63 = vpop.permute.xlu0 %1978 }
 0x241   : > { %2884 = vrot.lane.b32.xlu1 %v2817_v44, %s8472_s25  ;;  %2063 = vst.msk [vmem:[#allocation3 + $0x60] sm:$0xff] %vm2050_vm8, %v1979_v63  ;;  %v9931_v44 = vld [vmem:[#allocation2 + $0xc8] sm:$0xff] }
 0x242   : > { %2890 = vrot.lane.b32.xlu0 %v9806_v53, %s8472_s25 }
 0x243   : > { %v1977_v14 = vpop.permute.xlu1 %1976 }
 0x244   : > { %2062 = vst.msk [vmem:[#allocation3 + $0x58] sm:$0xff] %vm2050_vm8, %v1977_v14  ;;  %v1983_v18 = vpop.permute.xlu0 %1982  ;;  %v9939_v14 = vld [vmem:[#allocation2 + $0xca] sm:$0xff] }
 0x245   : > { %2888 = vrot.lane.b32.xlu1 %v2819_v28, %s8472_s25  ;;  %2065 = vst.msk [vmem:[#allocation3 + $0x70] sm:$0xff] %vm2050_vm8, %v1983_v18  ;;  %v9937_v28 = vld [vmem:[#allocation2 + $0xe2] sm:$0xff]  ;;  %v9942_v18 = vld [vmem:[#allocation2 + $0xb0] sm:$0xff] }
 0x246   : > { %2894 = vrot.lane.b32.xlu0 %v9572_v23, %s8472_s25 }
 0x247   : > { %v1981_v24 = vpop.permute.xlu1 %1980 }
 0x248   : > { %2064 = vst.msk [vmem:[#allocation3 + $0x68] sm:$0xff] %vm2050_vm8, %v1981_v24  ;;  %v1987_v37 = vpop.permute.xlu0 %1986 }
 0x249   : > { %2892 = vrot.lane.b32.xlu1 %v9815_v22, %s8472_s25  ;;  %2067 = vst.msk [vmem:[#allocation3 + $0x80] sm:$0xff] %vm2050_vm8, %v1987_v37 }
 0x24a   : > { %2898 = vrot.lane.b32.xlu0 %v9580_v43, %s8472_s25 }
 0x24b   : > { %v1985_v25 = vpop.permute.xlu1 %1984 }
 0x24c   : > { %2066 = vst.msk [vmem:[#allocation3 + $0x78] sm:$0xff] %vm2050_vm8, %v1985_v25  ;;  %v1991_v27 = vpop.permute.xlu0 %1990  ;;  %v9950_v25 = vld [vmem:[#allocation2 + $0xe8] sm:$0xff] }
 0x24d   : > { %2896 = vrot.lane.b32.xlu1 %v9584_v47, %s8472_s25  ;;  %2069 = vst.msk [vmem:[#allocation3 + $0x90] sm:$0xff] %vm2050_vm8, %v1991_v27 }
 0x24e   : > { %2902 = vrot.lane.b32.xlu0 %v9589_v50, %s8472_s25 }
 0x24f   : > { %v1989_v23 = vpop.permute.xlu1 %1988 }
 0x250   : > { %2068 = vst.msk [vmem:[#allocation3 + $0x88] sm:$0xff] %vm2050_vm8, %v1989_v23  ;;  %v1995_v26 = vpop.permute.xlu0 %1994 }
 0x251   : > { %2900 = vrot.lane.b32.xlu1 %v9594_v56, %s8472_s25  ;;  %2071 = vst.msk [vmem:[#allocation3 + $0xa0] sm:$0xff] %vm2050_vm8, %v1995_v26  ;;  %v9957_v26 = vld [vmem:[#allocation2 + $0x102] sm:$0xff] }
 0x252   : > { %2906 = vrot.lane.b32.xlu0 %v9599_v12, %s8472_s25 }
 0x253   : > { %v1993_v43 = vpop.permute.xlu1 %1992 }
 0x254   : > { %2070 = vst.msk [vmem:[#allocation3 + $0x98] sm:$0xff] %vm2050_vm8, %v1993_v43  ;;  %v1999_v47 = vpop.permute.xlu0 %1998  ;;  %v9959_v43 = vld [vmem:[#allocation2 + $0xea] sm:$0xff] }
 0x255   : > { %2904 = vrot.lane.b32.xlu1 %v9604_v16, %s8472_s25  ;;  %2073 = vst.msk [vmem:[#allocation3 + $0xb0] sm:$0xff] %vm2050_vm8, %v1999_v47  ;;  %v9962_v47 = vld [vmem:[#allocation2 + $0xd0] sm:$0xff] }
 0x256   : > { %2910 = vrot.lane.b32.xlu0 %v9609_v20, %s8472_s25 }
 0x257   : > { %v1997_v50 = vpop.permute.xlu1 %1996 }
 0x258   : > { %2072 = vst.msk [vmem:[#allocation3 + $0xa8] sm:$0xff] %vm2050_vm8, %v1997_v50  ;;  %v2003_v56 = vpop.permute.xlu0 %2002 }
 0x259   : > { %2908 = vrot.lane.b32.xlu1 %v9614_v39, %s8472_s25  ;;  %2075 = vst.msk [vmem:[#allocation3 + $0xc0] sm:$0xff] %vm2050_vm8, %v2003_v56 }
 0x25a   : > { %2914 = vrot.lane.b32.xlu0 %v9619_v51, %s8472_s25 }
 0x25b   : > { %v2001_v12 = vpop.permute.xlu1 %2000 }
 0x25c   : > { %2074 = vst.msk [vmem:[#allocation3 + $0xb8] sm:$0xff] %vm2050_vm8, %v2001_v12  ;;  %v2007_v16 = vpop.permute.xlu0 %2006  ;;  %v9970_v12 = vld [vmem:[#allocation2 + $0x108] sm:$0xff] }
 0x25d   : > { %2912 = vrot.lane.b32.xlu1 %v9624_v34, %s8472_s25  ;;  %2077 = vst.msk [vmem:[#allocation3 + $0xd0] sm:$0xff] %vm2050_vm8, %v2007_v16 }
 0x25e   : > { %2918 = vrot.lane.b32.xlu0 %v9629_v48, %s8472_s25 }
 0x25f   : > { %v2005_v20 = vpop.permute.xlu1 %2004 }
 0x260   : > { %2076 = vst.msk [vmem:[#allocation3 + $0xc8] sm:$0xff] %vm2050_vm8, %v2005_v20  ;;  %v2011_v39 = vpop.permute.xlu0 %2010 }
 0x261   : > { %2916 = vrot.lane.b32.xlu1 %v9634_v30, %s8472_s25  ;;  %2079 = vst.msk [vmem:[#allocation3 + $0xe0] sm:$0xff] %vm2050_vm8, %v2011_v39  ;;  %v9977_v39 = vld [vmem:[#allocation2 + $0x122] sm:$0xff] }
 0x262   : > { %2922 = vrot.lane.b32.xlu0 %v9639_v33, %s8472_s25 }
 0x263   : > { %v2009_v51 = vpop.permute.xlu1 %2008 }
 0x264   : > { %2078 = vst.msk [vmem:[#allocation3 + $0xd8] sm:$0xff] %vm2050_vm8, %v2009_v51  ;;  %v2015_v34 = vpop.permute.xlu0 %2014  ;;  %v9979_v51 = vld [vmem:[#allocation2 + $0x10a] sm:$0xff] }
 0x265   : > { %2920 = vrot.lane.b32.xlu1 %v9644_v45, %s8472_s25  ;;  %2081 = vst.msk [vmem:[#allocation3 + $0xf0] sm:$0xff] %vm2050_vm8, %v2015_v34  ;;  %v9982_v34 = vld [vmem:[#allocation2 + $0xf0] sm:$0xff] }
 0x266   : > { %2926 = vrot.lane.b32.xlu0 %v9649_v49, %s8472_s25 }
 0x267   : > { %v2013_v48 = vpop.permute.xlu1 %2012 }
 0x268   : > { %2080 = vst.msk [vmem:[#allocation3 + $0xe8] sm:$0xff] %vm2050_vm8, %v2013_v48  ;;  %v2148_v30 = vpop.permute.xlu0 %2147 }
 0x269   : > { %2924 = vrot.lane.b32.xlu1 %v9654_v52, %s8472_s25  ;;  %2244 = vst.msk [vmem:[#allocation3] sm:$0xff] %vm2243_vm9, %v2148_v30  ;;  %v2750_v52 = vld [vmem:[#allocation2 + $0x42] sm:$0xff] }
 0x26a   : > { %2930 = vrot.lane.b32.xlu0 %v9659_v55, %s8472_s25 }
 0x26b   : > { %v2017_v33 = vpop.permute.xlu1 %2016 }
 0x26c   : > { %2082 = vst.msk [vmem:[#allocation3 + $0xf8] sm:$0xff] %vm2050_vm8, %v2017_v33  ;;  %v2152_v45 = vpop.permute.xlu0 %2151  ;;  %v9990_v33 = vld [vmem:[#allocation2 + $0x128] sm:$0xff] }
 0x26d   : > { %2928 = vrot.lane.b32.xlu1 %v9664_v58, %s8472_s25  ;;  %2246 = vst.msk [vmem:[#allocation3 + $0x10] sm:$0xff] %vm2243_vm9, %v2152_v45 }
 0x26e   : > { %2934 = vrot.lane.b32.xlu0 %v9669_v60, %s8472_s25  ;;  %v2752_v60 = vld [vmem:[#allocation2 + $0x62] sm:$0xff] }
 0x26f   : > { %v2150_v49 = vpop.permute.xlu1 %2149 }
 0x270   : > { %2245 = vst.msk [vmem:[#allocation3 + $0x8] sm:$0xff] %vm2243_vm9, %v2150_v49  ;;  %v2156_v31 = vpop.permute.xlu0 %2155  ;;  %v2276_v55 = vld [vmem:[#allocation3] sm:$0xff] }
 0x271   : > { %2932 = vrot.lane.b32.xlu1 %v9674_v62, %s8472_s25  ;;  %2248 = vst.msk [vmem:[#allocation3 + $0x20] sm:$0xff] %vm2243_vm9, %v2156_v31  ;;  %8176 = vmatprep.mubr.msk.f32.mxu0 %vm2313_vm10, %v2276_v55  ;;  %v9999_v31 = vld [vmem:[#allocation2 + $0x12a] sm:$0xff] }
 0x272   : > { %2782 = vst.msk [vmem:[#allocation3] sm:$0xff] %vm495_vm0, %v2750_v52  ;;  %2938 = vrot.lane.b32.xlu0 %v9679_v2, %s8472_s25  ;;  %v2754_v2 = vld [vmem:[#allocation2 + $0x82] sm:$0xff]  ;;  %v10002_v55 = vld [vmem:[#allocation2 + $0x110] sm:$0xff] }
 0x273   : > { %v2154_v58 = vpop.permute.xlu1 %2153  ;;  %v9997_v52 = vld [vmem:[#allocation2 + $0x142] sm:$0xff] }
 0x274   : > { %2247 = vst.msk [vmem:[#allocation3 + $0x18] sm:$0xff] %vm2243_vm9, %v2154_v58  ;;  %v2160_v38 = vpop.permute.xlu0 %2159  ;;  %v2278_v62 = vld [vmem:[#allocation3 + $0x10] sm:$0xff] }
 0x275   : > { %2936 = vrot.lane.b32.xlu1 %v9684_v4, %s8472_s25  ;;  %2250 = vst.msk [vmem:[#allocation3 + $0x30] sm:$0xff] %vm2243_vm9, %v2160_v38 }
 0x276   : > { %2784 = vst.msk [vmem:[#allocation3 + $0x10] sm:$0xff] %vm495_vm0, %v2752_v60  ;;  %3070 = vrot.lane.b32.xlu0 %v3006_v32, %s8473_s26  ;;  %v10010_v32 = vld [vmem:[#allocation2 + $0x148] sm:$0xff] }
 0x277   : > { %v2158_v54 = vpop.permute.xlu1 %2157  ;;  %v2277_v57 = vld [vmem:[#allocation3 + $0x8] sm:$0xff] }
 0x278   : > { %2249 = vst.msk [vmem:[#allocation3 + $0x28] sm:$0xff] %vm2243_vm9, %v2158_v54  ;;  %8177 = vmatmul.mubr.msk.f32.vlgmr.msra.gmra.mrb[0].mxu0 %vm2313_vm10, %v2277_v57  ;;  %v2164_v61 = vpop.permute.xlu0 %2163  ;;  %v2280_v4 = vld [vmem:[#allocation3 + $0x20] sm:$0xff]  ;;  %v10019_v54 = vld [vmem:[#allocation2 + $0x14a] sm:$0xff] }
 0x279   : > { %2783 = vst.msk [vmem:[#allocation3 + $0x8] sm:$0xff] %vm495_vm0, %v2751_v40  ;;  %2940 = vrot.lane.b32.xlu1 %v9692_v8, %s8472_s25  ;;  %8179 = vmatprep.mubr.msk.f32.mxu0 %vm2313_vm10, %v2278_v62  ;;  %2786 = vst.msk [vmem:[#allocation3 + $0x20] sm:$0xff] %vm495_vm0, %v2754_v2  ;;  %v10017_v40 = vld [vmem:[#allocation2 + $0x162] sm:$0xff]  ;;  %v10022_v57 = vld [vmem:[#allocation2 + $0x130] sm:$0xff] }
 0x27a   : > { %2252 = vst.msk [vmem:[#allocation3 + $0x40] sm:$0xff] %vm2243_vm9, %v2164_v61  ;;  %3074 = vrot.lane.b32.xlu0 %v3008_v59, %s8473_s26  ;;  %v10030_v61 = vld [vmem:[#allocation2 + $0x168] sm:$0xff] }
 0x27b   : > { %v2162_v5 = vpop.permute.xlu1 %2161  ;;  %v2279_v6 = vld [vmem:[#allocation3 + $0x18] sm:$0xff] }
 0x27c   : > { %2251 = vst.msk [vmem:[#allocation3 + $0x38] sm:$0xff] %vm2243_vm9, %v2162_v5  ;;  %8180 = vmatmul.mubr.msk.f32.gmra.mrb[2].mxu0 %vm2313_vm10, %v2279_v6  ;;  %v2168_v8 = vpop.permute.xlu0 %2167  ;;  %v2282_v9 = vld [vmem:[#allocation3 + $0x30] sm:$0xff] }
 0x27d   : > { %2785 = vst.msk [vmem:[#allocation3 + $0x18] sm:$0xff] %vm495_vm0, %v2753_v1  ;;  %3072 = vrot.lane.b32.xlu1 %v3007_v3, %s8473_s26  ;;  %8182 = vmatprep.mubr.msk.f32.mxu0 %vm2313_vm10, %v2280_v4  ;;  %2788 = vst.msk [vmem:[#allocation3 + $0x30] sm:$0xff] %vm495_vm0, %v9907_v10  ;;  %v10037_v3 = vld [vmem:[#allocation2 + $0x182] sm:$0xff]  ;;  %v10039_v5 = vld [vmem:[#allocation2 + $0x16a] sm:$0xff] }
 0x27e   : > { %2254 = vst.msk [vmem:[#allocation3 + $0x50] sm:$0xff] %vm2243_vm9, %v2168_v8  ;;  %3078 = vrot.lane.b32.xlu0 %v3010_v7, %s8473_s26  ;;  %v10042_v6 = vld [vmem:[#allocation2 + $0x150] sm:$0xff] }
 0x27f   : > { %v2166_v15 = vpop.permute.xlu1 %2165  ;;  %v2281_v17 = vld [vmem:[#allocation3 + $0x28] sm:$0xff] }
 0x280   : > { %2253 = vst.msk [vmem:[#allocation3 + $0x48] sm:$0xff] %vm2243_vm9, %v2166_v15  ;;  %8183 = vmatmul.mubr.msk.f32.gmra.mrb[4].mxu0 %vm2313_vm10, %v2281_v17  ;;  %v2172_v19 = vpop.permute.xlu0 %2171  ;;  %v10057_v15 = vld [vmem:[#allocation2 + $0x1a2] sm:$0xff]  ;;  %v10059_v17 = vld [vmem:[#allocation2 + $0x18a] sm:$0xff] }
 0x281   : > { %2787 = vst.msk [vmem:[#allocation3 + $0x28] sm:$0xff] %vm495_vm0, %v2755_v11  ;;  %3076 = vrot.lane.b32.xlu1 %v3009_v13, %s8473_s26  ;;  %8185 = vmatprep.mubr.msk.f32.mxu0 %vm2313_vm10, %v2282_v9  ;;  %v2284_v41 = vld [vmem:[#allocation3 + $0x40] sm:$0xff]  ;;  %v10050_v9 = vld [vmem:[#allocation2 + $0x188] sm:$0xff] }
 0x282   : > { %2256 = vst.msk [vmem:[#allocation3 + $0x60] sm:$0xff] %vm2243_vm9, %v2172_v19  ;;  %3082 = vrot.lane.b32.xlu0 %v9915_v0, %s8473_s26  ;;  %v10062_v19 = vld [vmem:[#allocation2 + $0x170] sm:$0xff] }
 0x283   : > { %2790 = vst.msk [vmem:[#allocation3 + $0x40] sm:$0xff] %vm495_vm0, %v9920_v21  ;;  %v2170_v46 = vpop.permute.xlu1 %2169  ;;  %v2283_v29 = vld [vmem:[#allocation3 + $0x38] sm:$0xff] }
 0x284   : > { %2255 = vst.msk [vmem:[#allocation3 + $0x58] sm:$0xff] %vm2243_vm9, %v2170_v46  ;;  %8186 = vmatmul.mubr.msk.f32.gmra.mrb[6].mxu0 %vm2313_vm10, %v2283_v29  ;;  %v2176_v36 = vpop.permute.xlu0 %2175  ;;  %v10070_v46 = vld [vmem:[#allocation2 + $0x1a8] sm:$0xff] }
 0x285   : > { %2789 = vst.msk [vmem:[#allocation3 + $0x38] sm:$0xff] %vm495_vm0, %v9922_v42  ;;  %3080 = vrot.lane.b32.xlu1 %v3011_v35, %s8473_s26  ;;  %8188 = vmatprep.mubr.msk.f32.mxu0 %vm2313_vm10, %v2284_v41  ;;  %v2286_v63 = vld [vmem:[#allocation3 + $0x50] sm:$0xff] }
 0x286   : > { %2258 = vst.msk [vmem:[#allocation3 + $0x70] sm:$0xff] %vm2243_vm9, %v2176_v36  ;;  %3086 = vrot.lane.b32.xlu0 %v9931_v44, %s8473_s26 }
 0x287   : > { %2792 = vst.msk [vmem:[#allocation3 + $0x50] sm:$0xff] %vm495_vm0, %v9937_v28  ;;  %v2174_v24 = vpop.permute.xlu1 %2173  ;;  %v2285_v37 = vld [vmem:[#allocation3 + $0x48] sm:$0xff] }
 0x288   : > { %2257 = vst.msk [vmem:[#allocation3 + $0x68] sm:$0xff] %vm2243_vm9, %v2174_v24  ;;  %8189 = vmatmul.mubr.msk.f32.gmra.mrb[8].mxu0 %vm2313_vm10, %v2285_v37  ;;  %v2180_v27 = vpop.permute.xlu0 %2179  ;;  %v10079_v24 = vld [vmem:[#allocation2 + $0x1aa] sm:$0xff] }
 0x289   : > { %2791 = vst.msk [vmem:[#allocation3 + $0x48] sm:$0xff] %vm495_vm0, %v9939_v14  ;;  %3084 = vrot.lane.b32.xlu1 %v9942_v18, %s8473_s26  ;;  %8191 = vmatprep.mubr.msk.f32.mxu0 %vm2313_vm10, %v2286_v63  ;;  %v2288_v23 = vld [vmem:[#allocation3 + $0x60] sm:$0xff]  ;;  %v10082_v37 = vld [vmem:[#allocation2 + $0x190] sm:$0xff] }
 0x28a   : > { %2260 = vst.msk [vmem:[#allocation3 + $0x80] sm:$0xff] %vm2243_vm9, %v2180_v27  ;;  %3090 = vrot.lane.b32.xlu0 %v9950_v25, %s8473_s26  ;;  %v10077_v63 = vld [vmem:[#allocation2 + $0x1c2] sm:$0xff] }
 0x28b   : > { %2794 = vst.msk [vmem:[#allocation3 + $0x60] sm:$0xff] %vm495_vm0, %v9957_v26  ;;  %v2178_v50 = vpop.permute.xlu1 %2177  ;;  %v2287_v56 = vld [vmem:[#allocation3 + $0x58] sm:$0xff] }
 0x28c   : > { %2259 = vst.msk [vmem:[#allocation3 + $0x78] sm:$0xff] %vm2243_vm9, %v2178_v50  ;;  %8192 = vmatmul.mubr.msk.f32.gmra.mrb[10].mxu0 %vm2313_vm10, %v2287_v56  ;;  %v2184_v16 = vpop.permute.xlu0 %2183  ;;  %v10090_v50 = vld [vmem:[#allocation2 + $0x1c8] sm:$0xff] }
 0x28d   : > { %2793 = vst.msk [vmem:[#allocation3 + $0x58] sm:$0xff] %vm495_vm0, %v9959_v43  ;;  %3088 = vrot.lane.b32.xlu1 %v9962_v47, %s8473_s26  ;;  %8194 = vmatprep.mubr.msk.f32.mxu0 %vm2313_vm10, %v2288_v23  ;;  %v2290_v20 = vld [vmem:[#allocation3 + $0x70] sm:$0xff] }
 0x28e   : > { %2262 = vst.msk [vmem:[#allocation3 + $0x90] sm:$0xff] %vm2243_vm9, %v2184_v16  ;;  %3094 = vrot.lane.b32.xlu0 %v9970_v12, %s8473_s26 }
 0x28f   : > { %2796 = vst.msk [vmem:[#allocation3 + $0x70] sm:$0xff] %vm495_vm0, %v9977_v39  ;;  %v2182_v48 = vpop.permute.xlu1 %2181  ;;  %v2289_v30 = vld [vmem:[#allocation3 + $0x68] sm:$0xff] }
 0x290   : > { %2261 = vst.msk [vmem:[#allocation3 + $0x88] sm:$0xff] %vm2243_vm9, %v2182_v48  ;;  %8195 = vmatmul.mubr.msk.f32.gmra.mrb[12].mxu0 %vm2313_vm10, %v2289_v30  ;;  %v2188_v45 = vpop.permute.xlu0 %2187  ;;  %v10099_v48 = vld [vmem:[#allocation2 + $0x1ca] sm:$0xff] }
 0x291   : > { %2795 = vst.msk [vmem:[#allocation3 + $0x68] sm:$0xff] %vm495_vm0, %v9979_v51  ;;  %3092 = vrot.lane.b32.xlu1 %v9982_v34, %s8473_s26  ;;  %8197 = vmatprep.mubr.msk.f32.mxu0 %vm2313_vm10, %v2290_v20  ;;  %v2292_v49 = vld [vmem:[#allocation3 + $0x80] sm:$0xff]  ;;  %v10102_v30 = vld [vmem:[#allocation2 + $0x1b0] sm:$0xff] }
 0x292   : > { %2264 = vst.msk [vmem:[#allocation3 + $0xa0] sm:$0xff] %vm2243_vm9, %v2188_v45  ;;  %3098 = vrot.lane.b32.xlu0 %v9990_v33, %s8473_s26  ;;  %v10097_v20 = vld [vmem:[#allocation2 + $0x1e2] sm:$0xff] }
 0x293   : > { %2798 = vst.msk [vmem:[#allocation3 + $0x80] sm:$0xff] %vm495_vm0, %v9997_v52  ;;  %v2186_v58 = vpop.permute.xlu1 %2185  ;;  %v2291_v60 = vld [vmem:[#allocation3 + $0x78] sm:$0xff] }
 0x294   : > { %2263 = vst.msk [vmem:[#allocation3 + $0x98] sm:$0xff] %vm2243_vm9, %v2186_v58  ;;  %8198 = vmatmul.mubr.msk.f32.gmra.mrb[14].mxu0 %vm2313_vm10, %v2291_v60  ;;  %v2192_v38 = vpop.permute.xlu0 %2191  ;;  %v10110_v58 = vld [vmem:[#allocation2 + $0x1e8] sm:$0xff] }
 0x295   : > { %2797 = vst.msk [vmem:[#allocation3 + $0x78] sm:$0xff] %vm495_vm0, %v9999_v31  ;;  %3096 = vrot.lane.b32.xlu1 %v10002_v55, %s8473_s26  ;;  %8200 = vmatprep.mubr.msk.f32.mxu0 %vm2313_vm10, %v2292_v49  ;;  %v2294_v62 = vld [vmem:[#allocation3 + $0x90] sm:$0xff] }
 0x296   : > { %2266 = vst.msk [vmem:[#allocation3 + $0xb0] sm:$0xff] %vm2243_vm9, %v2192_v38  ;;  %3102 = vrot.lane.b32.xlu0 %v10010_v32, %s8473_s26 }
 0x297   : > { %2800 = vst.msk [vmem:[#allocation3 + $0x90] sm:$0xff] %vm495_vm0, %v10017_v40  ;;  %v2190_v2 = vpop.permute.xlu1 %2189  ;;  %v2293_v59 = vld [vmem:[#allocation3 + $0x88] sm:$0xff] }
 0x298   : > { %2265 = vst.msk [vmem:[#allocation3 + $0xa8] sm:$0xff] %vm2243_vm9, %v2190_v2  ;;  %8201 = vmatmul.mubr.msk.f32.gmra.mrb[16].mxu0 %vm2313_vm10, %v2293_v59  ;;  %v2196_v4 = vpop.permute.xlu0 %2195  ;;  %v10119_v2 = vld [vmem:[#allocation2 + $0x1ea] sm:$0xff] }
 0x299   : > { %2799 = vst.msk [vmem:[#allocation3 + $0x88] sm:$0xff] %vm495_vm0, %v10019_v54  ;;  %3100 = vrot.lane.b32.xlu1 %v10022_v57, %s8473_s26  ;;  %8203 = vmatprep.mubr.msk.f32.mxu0 %vm2313_vm10, %v2294_v62  ;;  %v2296_v1 = vld [vmem:[#allocation3 + $0xa0] sm:$0xff]  ;;  %v10122_v59 = vld [vmem:[#allocation2 + $0x1d0] sm:$0xff] }
 0x29a   : > { %2268 = vst.msk [vmem:[#allocation3 + $0xc0] sm:$0xff] %vm2243_vm9, %v2196_v4  ;;  %3106 = vrot.lane.b32.xlu0 %v10030_v61, %s8473_s26  ;;  %v10117_v62 = vld [vmem:[#allocation2 + $0x202] sm:$0xff] }
 0x29b   : > { %2802 = vst.msk [vmem:[#allocation3 + $0xa0] sm:$0xff] %vm495_vm0, %v10037_v3  ;;  %v2194_v7 = vpop.permute.xlu1 %2193  ;;  %v2295_v8 = vld [vmem:[#allocation3 + $0x98] sm:$0xff] }
 0x29c   : > { %2267 = vst.msk [vmem:[#allocation3 + $0xb8] sm:$0xff] %vm2243_vm9, %v2194_v7  ;;  %8204 = vmatmul.mubr.msk.f32.gmra.mrb[18].mxu0 %vm2313_vm10, %v2295_v8  ;;  %v2200_v11 = vpop.permute.xlu0 %2199  ;;  %v10130_v7 = vld [vmem:[#allocation2 + $0x208] sm:$0xff] }
 0x29d   : > { %2801 = vst.msk [vmem:[#allocation3 + $0x98] sm:$0xff] %vm495_vm0, %v10039_v5  ;;  %3104 = vrot.lane.b32.xlu1 %v10042_v6, %s8473_s26  ;;  %8206 = vmatprep.mubr.msk.f32.mxu0 %vm2313_vm10, %v2296_v1  ;;  %v2298_v13 = vld [vmem:[#allocation3 + $0xb0] sm:$0xff] }
 0x29e   : > { %2270 = vst.msk [vmem:[#allocation3 + $0xd0] sm:$0xff] %vm2243_vm9, %v2200_v11  ;;  %3110 = vrot.lane.b32.xlu0 %v10050_v9, %s8473_s26 }
 0x29f   : > { %2804 = vst.msk [vmem:[#allocation3 + $0xb0] sm:$0xff] %vm495_vm0, %v10057_v15  ;;  %v2198_v41 = vpop.permute.xlu1 %2197  ;;  %v2297_v35 = vld [vmem:[#allocation3 + $0xa8] sm:$0xff] }
 0x2a0   : > { %2269 = vst.msk [vmem:[#allocation3 + $0xc8] sm:$0xff] %vm2243_vm9, %v2198_v41  ;;  %8207 = vmatmul.mubr.msk.f32.gmra.mrb[20].mxu0 %vm2313_vm10, %v2297_v35  ;;  %v2204_v29 = vpop.permute.xlu0 %2203  ;;  %v10139_v41 = vld [vmem:[#allocation2 + $0x20a] sm:$0xff] }
 0x2a1   : > { %2803 = vst.msk [vmem:[#allocation3 + $0xa8] sm:$0xff] %vm495_vm0, %v10059_v17  ;;  %3108 = vrot.lane.b32.xlu1 %v10062_v19, %s8473_s26  ;;  %8209 = vmatprep.mubr.msk.f32.mxu0 %vm2313_vm10, %v2298_v13  ;;  %v2300_v36 = vld [vmem:[#allocation3 + $0xc0] sm:$0xff]  ;;  %v10142_v35 = vld [vmem:[#allocation2 + $0x1f0] sm:$0xff] }
 0x2a2   : > { %2272 = vst.msk [vmem:[#allocation3 + $0xe0] sm:$0xff] %vm2243_vm9, %v2204_v29  ;;  %3114 = vrot.lane.b32.xlu0 %v10070_v46, %s8473_s26  ;;  %v10137_v13 = vld [vmem:[#allocation2 + $0x222] sm:$0xff] }
 0x2a3   : > { %2806 = vst.msk [vmem:[#allocation3 + $0xc0] sm:$0xff] %vm495_vm0, %v10077_v63  ;;  %v2202_v27 = vpop.permute.xlu1 %2201  ;;  %v2299_v23 = vld [vmem:[#allocation3 + $0xb8] sm:$0xff] }
 0x2a4   : > { %2271 = vst.msk [vmem:[#allocation3 + $0xd8] sm:$0xff] %vm2243_vm9, %v2202_v27  ;;  %8210 = vmatmul.mubr.msk.f32.gmra.mrb[22].mxu0 %vm2313_vm10, %v2299_v23  ;;  %v2208_v56 = vpop.permute.xlu0 %2207  ;;  %v10150_v27 = vld [vmem:[#allocation2 + $0x228] sm:$0xff] }
 0x2a5   : > { %2805 = vst.msk [vmem:[#allocation3 + $0xb8] sm:$0xff] %vm495_vm0, %v10079_v24  ;;  %3112 = vrot.lane.b32.xlu1 %v10082_v37, %s8473_s26  ;;  %8212 = vmatprep.mubr.msk.f32.mxu0 %vm2313_vm10, %v2300_v36  ;;  %v2302_v16 = vld [vmem:[#allocation3 + $0xd0] sm:$0xff] }
 0x2a6   : > { %2274 = vst.msk [vmem:[#allocation3 + $0xf0] sm:$0xff] %vm2243_vm9, %v2208_v56  ;;  %3118 = vrot.lane.b32.xlu0 %v10090_v50, %s8473_s26  ;;  %v10157_v56 = vld [vmem:[#allocation2 + $0x22a] sm:$0xff] }
 0x2a7   : > { %2808 = vst.msk [vmem:[#allocation3 + $0xd0] sm:$0xff] %vm495_vm0, %v10097_v20  ;;  %v2206_v45 = vpop.permute.xlu1 %2205  ;;  %v2301_v49 = vld [vmem:[#allocation3 + $0xc8] sm:$0xff] }
 0x2a8   : > { %2273 = vst.msk [vmem:[#allocation3 + $0xe8] sm:$0xff] %vm2243_vm9, %v2206_v45  ;;  %8213 = vmatmul.mubr.msk.f32.gmra.mrb[24].mxu0 %vm2313_vm10, %v2301_v49  ;;  %v2879_v60 = vpop.permute.xlu0 %2878 }
 0x2a9   : > { %2807 = vst.msk [vmem:[#allocation3 + $0xc8] sm:$0xff] %vm495_vm0, %v10099_v48  ;;  %3116 = vrot.lane.b32.xlu1 %v10102_v30, %s8473_s26  ;;  %8215 = vmatprep.mubr.msk.f32.mxu0 %vm2313_vm10, %v2302_v16  ;;  %v2304_v38 = vld [vmem:[#allocation3 + $0xe0] sm:$0xff]  ;;  %v10160_v16 = vld [vmem:[#allocation2 + $0x210] sm:$0xff] }
 0x2aa   : > { %2974 = vst.msk [vmem:[#allocation3] sm:$0xff] %vm891_vm1, %v2879_v60  ;;  %3122 = vrot.lane.b32.xlu0 %v10110_v58, %s8473_s26 }
 0x2ab   : > { %2810 = vst.msk [vmem:[#allocation3 + $0xe0] sm:$0xff] %vm495_vm0, %v10117_v62  ;;  %v2210_v4 = vpop.permute.xlu1 %2209  ;;  %v2303_v1 = vld [vmem:[#allocation3 + $0xd8] sm:$0xff] }
 0x2ac   : > { %2275 = vst.msk [vmem:[#allocation3 + $0xf8] sm:$0xff] %vm2243_vm9, %v2210_v4  ;;  %8216 = vmatmul.mubr.msk.f32.gmra.mrb[26].mxu0 %vm2313_vm10, %v2303_v1  ;;  %v2883_v8 = vpop.permute.xlu0 %2882 }
 0x2ad   : > { %2809 = vst.msk [vmem:[#allocation3 + $0xd8] sm:$0xff] %vm495_vm0, %v10119_v2  ;;  %3120 = vrot.lane.b32.xlu1 %v10122_v59, %s8473_s26  ;;  %8218 = vmatprep.mubr.msk.f32.mxu0 %vm2313_vm10, %v2304_v38  ;;  %v2306_v11 = vld [vmem:[#allocation3 + $0xf0] sm:$0xff] }
 0x2ae   : > { %2976 = vst.msk [vmem:[#allocation3 + $0x10] sm:$0xff] %vm891_vm1, %v2883_v8  ;;  %3126 = vrot.lane.b32.xlu0 %v10130_v7, %s8473_s26  ;;  %v10171_v38 = vld [vmem:[#allocation2 + $0x230] sm:$0xff] }
 0x2af   : > { %2812 = vst.msk [vmem:[#allocation3 + $0xf0] sm:$0xff] %vm495_vm0, %v10137_v13  ;;  %v2881_v29 = vpop.permute.xlu1 %2880  ;;  %v2305_v36 = vld [vmem:[#allocation3 + $0xe8] sm:$0xff] }
 0x2b0   : > { %2975 = vst.msk [vmem:[#allocation3 + $0x8] sm:$0xff] %vm891_vm1, %v2881_v29  ;;  %8219 = vmatmul.mubr.msk.f32.gmra.mrb[28].mxu0 %vm2313_vm10, %v2305_v36  ;;  %v2887_v23 = vpop.permute.xlu0 %2886 }
 0x2b1   : > { %2811 = vst.msk [vmem:[#allocation3 + $0xe8] sm:$0xff] %vm495_vm0, %v10139_v41  ;;  %3124 = vrot.lane.b32.xlu1 %v10142_v35, %s8473_s26  ;;  %8221 = vmatprep.mubr.msk.f32.mxu0 %vm2313_vm10, %v2306_v11 }
 0x2b2   : > { %2978 = vst.msk [vmem:[#allocation3 + $0x20] sm:$0xff] %vm891_vm1, %v2887_v23  ;;  %3130 = vrot.lane.b32.xlu0 %v10150_v27, %s8473_s26 }
 0x2b3   : > { %v2885_v45 = vpop.permute.xlu1 %2884  ;;  %v2307_v49 = vld [vmem:[#allocation3 + $0xf8] sm:$0xff] }
 0x2b4   : > { %2977 = vst.msk [vmem:[#allocation3 + $0x18] sm:$0xff] %vm891_vm1, %v2885_v45  ;;  %8222 = vmatmul.mubr.msk.f32.gmra.mrb[30].mxu0 %vm2313_vm10, %v2307_v49  ;;  %v2891_v60 = vpop.permute.xlu0 %2890 }
 0x2b5   : > { %2813 = vst.msk [vmem:[#allocation3 + $0xf8] sm:$0xff] %vm495_vm0, %v10157_v56  ;;  %3128 = vrot.lane.b32.xlu1 %v10160_v16, %s8473_s26 }
 0x2b6   : > { %2980 = vst.msk [vmem:[#allocation3 + $0x30] sm:$0xff] %vm891_vm1, %v2891_v60  ;;  %3262 = vrot.lane.b32.xlu0 %v9907_v10, %s8474_s27 }
 0x2b7   : > { %v2889_v4 = vpop.permute.xlu1 %2888 }
 0x2b8   : > { %2979 = vst.msk [vmem:[#allocation3 + $0x28] sm:$0xff] %vm891_vm1, %v2889_v4  ;;  %v2895_v1 = vpop.permute.xlu0 %2894 }
 0x2b9   : > { %3132 = vrot.lane.b32.xlu1 %v10171_v38, %s8473_s26  ;;  %2982 = vst.msk [vmem:[#allocation3 + $0x40] sm:$0xff] %vm891_vm1, %v2895_v1 }
 0x2ba   : > { %3266 = vrot.lane.b32.xlu0 %v9920_v21, %s8474_s27 }
 0x2bb   : > { %v2893_v8 = vpop.permute.xlu1 %2892 }
 0x2bc   : > { %2981 = vst.msk [vmem:[#allocation3 + $0x38] sm:$0xff] %vm891_vm1, %v2893_v8  ;;  %v2899_v11 = vpop.permute.xlu0 %2898 }
 0x2bd   : > { %3264 = vrot.lane.b32.xlu1 %v9922_v42, %s8474_s27  ;;  %2984 = vst.msk [vmem:[#allocation3 + $0x50] sm:$0xff] %vm891_vm1, %v2899_v11 }
 0x2be   : > { %3270 = vrot.lane.b32.xlu0 %v9937_v28, %s8474_s27 }
 0x2bf   : > { %v2897_v10 = vpop.permute.xlu1 %2896 }
 0x2c0   : > { %2983 = vst.msk [vmem:[#allocation3 + $0x48] sm:$0xff] %vm891_vm1, %v2897_v10  ;;  %v2903_v29 = vpop.permute.xlu0 %2902 }
 0x2c1   : > { %3268 = vrot.lane.b32.xlu1 %v9939_v14, %s8474_s27  ;;  %2986 = vst.msk [vmem:[#allocation3 + $0x60] sm:$0xff] %vm891_vm1, %v2903_v29  ;;  %v10248_v29 = vld [vmem:[#allocation2 + $0x242] sm:$0xff] }
 0x2c2   : > { %3274 = vrot.lane.b32.xlu0 %v9957_v26, %s8474_s27 }
 0x2c3   : > { %v2901_v21 = vpop.permute.xlu1 %2900 }
 0x2c4   : > { %2985 = vst.msk [vmem:[#allocation3 + $0x58] sm:$0xff] %vm891_vm1, %v2901_v21  ;;  %v2907_v42 = vpop.permute.xlu0 %2906 }
 0x2c5   : > { %3272 = vrot.lane.b32.xlu1 %v9959_v43, %s8474_s27  ;;  %2988 = vst.msk [vmem:[#allocation3 + $0x70] sm:$0xff] %vm891_vm1, %v2907_v42 }
 0x2c6   : > { %3278 = vrot.lane.b32.xlu0 %v9977_v39, %s8474_s27 }
 0x2c7   : > { %v2905_v28 = vpop.permute.xlu1 %2904 }
 0x2c8   : > { %2987 = vst.msk [vmem:[#allocation3 + $0x68] sm:$0xff] %vm891_vm1, %v2905_v28  ;;  %v2911_v14 = vpop.permute.xlu0 %2910  ;;  %v10256_v28 = vld [vmem:[#allocation2 + $0x262] sm:$0xff] }
 0x2c9   : > { %3276 = vrot.lane.b32.xlu1 %v9979_v51, %s8474_s27  ;;  %2990 = vst.msk [vmem:[#allocation3 + $0x80] sm:$0xff] %vm891_vm1, %v2911_v14 }
 0x2ca   : > { %3282 = vrot.lane.b32.xlu0 %v9997_v52, %s8474_s27 }
 0x2cb   : > { %v2909_v36 = vpop.permute.xlu1 %2908 }
 0x2cc   : > { %2989 = vst.msk [vmem:[#allocation3 + $0x78] sm:$0xff] %vm891_vm1, %v2909_v36  ;;  %v2915_v43 = vpop.permute.xlu0 %2914  ;;  %v10261_v36 = vld [vmem:[#allocation2 + $0x24a] sm:$0xff] }
 0x2cd   : > { %3280 = vrot.lane.b32.xlu1 %v9999_v31, %s8474_s27  ;;  %2992 = vst.msk [vmem:[#allocation3 + $0x90] sm:$0xff] %vm891_vm1, %v2915_v43 }
 0x2ce   : > { %3286 = vrot.lane.b32.xlu0 %v10017_v40, %s8474_s27 }
 0x2cf   : > { %v2913_v23 = vpop.permute.xlu1 %2912 }
 0x2d0   : > { %2991 = vst.msk [vmem:[#allocation3 + $0x88] sm:$0xff] %vm891_vm1, %v2913_v23  ;;  %v2919_v45 = vpop.permute.xlu0 %2918  ;;  %v10266_v23 = vld [vmem:[#allocation2 + $0x282] sm:$0xff] }
 0x2d1   : > { %3284 = vrot.lane.b32.xlu1 %v10019_v54, %s8474_s27  ;;  %2994 = vst.msk [vmem:[#allocation3 + $0xa0] sm:$0xff] %vm891_vm1, %v2919_v45 }
 0x2d2   : > { %3290 = vrot.lane.b32.xlu0 %v10037_v3, %s8474_s27 }
 0x2d3   : > { %v2917_v49 = vpop.permute.xlu1 %2916 }
 0x2d4   : > { %2993 = vst.msk [vmem:[#allocation3 + $0x98] sm:$0xff] %vm891_vm1, %v2917_v49  ;;  %v2923_v60 = vpop.permute.xlu0 %2922  ;;  %v10271_v49 = vld [vmem:[#allocation2 + $0x26a] sm:$0xff] }
 0x2d5   : > { %3288 = vrot.lane.b32.xlu1 %v10039_v5, %s8474_s27  ;;  %2996 = vst.msk [vmem:[#allocation3 + $0xb0] sm:$0xff] %vm891_vm1, %v2923_v60 }
 0x2d6   : > { %3294 = vrot.lane.b32.xlu0 %v10057_v15, %s8474_s27 }
 0x2d7   : > { %v2921_v4 = vpop.permute.xlu1 %2920 }
 0x2d8   : > { %2995 = vst.msk [vmem:[#allocation3 + $0xa8] sm:$0xff] %vm891_vm1, %v2921_v4  ;;  %v2927_v54 = vpop.permute.xlu0 %2926 }
 0x2d9   : > { %3292 = vrot.lane.b32.xlu1 %v10059_v17, %s8474_s27  ;;  %2998 = vst.msk [vmem:[#allocation3 + $0xc0] sm:$0xff] %vm891_vm1, %v2927_v54  ;;  %v10279_v54 = vld [vmem:[#allocation2 + $0x28a] sm:$0xff] }
 0x2da   : > { %3298 = vrot.lane.b32.xlu0 %v10077_v63, %s8474_s27 }
 0x2db   : > { %v2925_v1 = vpop.permute.xlu1 %2924 }
 0x2dc   : > { %2997 = vst.msk [vmem:[#allocation3 + $0xb8] sm:$0xff] %vm891_vm1, %v2925_v1  ;;  %v2931_v5 = vpop.permute.xlu0 %2930 }
 0x2dd   : > { %3296 = vrot.lane.b32.xlu1 %v10079_v24, %s8474_s27  ;;  %3000 = vst.msk [vmem:[#allocation3 + $0xd0] sm:$0xff] %vm891_vm1, %v2931_v5  ;;  %v3392_v5 = vld [vmem:[#allocation2 + $0xc5] sm:$0xff] }
 0x2de   : > { %3302 = vrot.lane.b32.xlu0 %v10097_v20, %s8474_s27 }
 0x2df   : > { %v2929_v15 = vpop.permute.xlu1 %2928 }
 0x2e0   : > { %2999 = vst.msk [vmem:[#allocation3 + $0xc8] sm:$0xff] %vm891_vm1, %v2929_v15  ;;  %v2935_v17 = vpop.permute.xlu0 %2934 }
 0x2e1   : > { %3300 = vrot.lane.b32.xlu1 %v10099_v48, %s8474_s27  ;;  %3002 = vst.msk [vmem:[#allocation3 + $0xe0] sm:$0xff] %vm891_vm1, %v2935_v17 }
 0x2e2   : > { %3306 = vrot.lane.b32.xlu0 %v10117_v62, %s8474_s27 }
 0x2e3   : > { %v2933_v8 = vpop.permute.xlu1 %2932 }
 0x2e4   : > { %3001 = vst.msk [vmem:[#allocation3 + $0xd8] sm:$0xff] %vm891_vm1, %v2933_v8  ;;  %v2939_v11 = vpop.permute.xlu0 %2938  ;;  %v3394_v8 = vld [vmem:[#allocation2 + $0xe5] sm:$0xff] }
 0x2e5   : > { %3304 = vrot.lane.b32.xlu1 %v10119_v2, %s8474_s27  ;;  %3004 = vst.msk [vmem:[#allocation3 + $0xf0] sm:$0xff] %vm891_vm1, %v2939_v11 }
 0x2e6   : > { %3310 = vrot.lane.b32.xlu0 %v10137_v13, %s8474_s27 }
 0x2e7   : > { %v2937_v10 = vpop.permute.xlu1 %2936 }
 0x2e8   : > { %3003 = vst.msk [vmem:[#allocation3 + $0xe8] sm:$0xff] %vm891_vm1, %v2937_v10  ;;  %v3071_v21 = vpop.permute.xlu0 %3070 }
 0x2e9   : > { %3308 = vrot.lane.b32.xlu1 %v10139_v41, %s8474_s27  ;;  %3166 = vst.msk [vmem:[#allocation3] sm:$0xff] %vm1084_vm2, %v3071_v21  ;;  %v10294_v21 = vld [vmem:[#allocation2 + $0x105] sm:$0xff] }
 0x2ea   : > { %3314 = vrot.lane.b32.xlu0 %v10248_v29, %s8474_s27 }
 0x2eb   : > { %v2941_v42 = vpop.permute.xlu1 %2940 }
 0x2ec   : > { %3005 = vst.msk [vmem:[#allocation3 + $0xf8] sm:$0xff] %vm891_vm1, %v2941_v42  ;;  %v3075_v14 = vpop.permute.xlu0 %3074 }
 0x2ed   : > { %3312 = vrot.lane.b32.xlu1 %v10157_v56, %s8474_s27  ;;  %3168 = vst.msk [vmem:[#allocation3 + $0x10] sm:$0xff] %vm1084_vm2, %v3075_v14  ;;  %v3395_v14 = vld [vmem:[#allocation2 + $0xed] sm:$0xff] }
 0x2ee   : > { %3318 = vrot.lane.b32.xlu0 %v10256_v28, %s8474_s27 }
 0x2ef   : > { %v3073_v43 = vpop.permute.xlu1 %3072 }
 0x2f0   : > { %3167 = vst.msk [vmem:[#allocation3 + $0x8] sm:$0xff] %vm1084_vm2, %v3073_v43  ;;  %v3079_v45 = vpop.permute.xlu0 %3078  ;;  %v10301_v43 = vld [vmem:[#allocation2 + $0x125] sm:$0xff] }
 0x2f1   : > { %3316 = vrot.lane.b32.xlu1 %v10261_v36, %s8474_s27  ;;  %3170 = vst.msk [vmem:[#allocation3 + $0x20] sm:$0xff] %vm1084_vm2, %v3079_v45 }
 0x2f2   : > { %3322 = vrot.lane.b32.xlu0 %v10266_v23, %s8474_s27 }
 0x2f3   : > { %v3077_v60 = vpop.permute.xlu1 %3076 }
 0x2f4   : > { %3169 = vst.msk [vmem:[#allocation3 + $0x18] sm:$0xff] %vm1084_vm2, %v3077_v60  ;;  %v3083_v4 = vpop.permute.xlu0 %3082  ;;  %v10305_v60 = vld [vmem:[#allocation2 + $0x10d] sm:$0xff] }
 0x2f5   : > { %3320 = vrot.lane.b32.xlu1 %v10271_v49, %s8474_s27  ;;  %3172 = vst.msk [vmem:[#allocation3 + $0x30] sm:$0xff] %vm1084_vm2, %v3083_v4 }
 0x2f6   : > { %3454 = vrot.lane.b32.xlu0 %v9806_v53, %s8475_s28  ;;  %v3393_v53 = vld [vmem:[#allocation2 + $0xcd] sm:$0xff] }
 0x2f7   : > { %v3081_v1 = vpop.permute.xlu1 %3080 }
 0x2f8   : > { %3171 = vst.msk [vmem:[#allocation3 + $0x28] sm:$0xff] %vm1084_vm2, %v3081_v1  ;;  %v3087_v15 = vpop.permute.xlu0 %3086  ;;  %v10310_v1 = vld [vmem:[#allocation2 + $0x145] sm:$0xff] }
 0x2f9   : > { %3324 = vrot.lane.b32.xlu1 %v10279_v54, %s8474_s27  ;;  %3174 = vst.msk [vmem:[#allocation3 + $0x40] sm:$0xff] %vm1084_vm2, %v3087_v15  ;;  %v10315_v15 = vld [vmem:[#allocation2 + $0x12d] sm:$0xff] }
 0x2fa   : > { %3458 = vrot.lane.b32.xlu0 %v3392_v5, %s8475_s28 }
 0x2fb   : > { %v3085_v17 = vpop.permute.xlu1 %3084 }
 0x2fc   : > { %3173 = vst.msk [vmem:[#allocation3 + $0x38] sm:$0xff] %vm1084_vm2, %v3085_v17  ;;  %v3091_v11 = vpop.permute.xlu0 %3090 }
 0x2fd   : > { %3456 = vrot.lane.b32.xlu1 %v9815_v22, %s8475_s28  ;;  %3176 = vst.msk [vmem:[#allocation3 + $0x50] sm:$0xff] %vm1084_vm2, %v3091_v11 }
 0x2fe   : > { %3462 = vrot.lane.b32.xlu0 %v3394_v8, %s8475_s28  ;;  %v10320_v8 = vld [vmem:[#allocation2 + $0x165] sm:$0xff] }
 0x2ff   : > { %v3089_v10 = vpop.permute.xlu1 %3088 }
 0x300   : > { %3175 = vst.msk [vmem:[#allocation3 + $0x48] sm:$0xff] %vm1084_vm2, %v3089_v10  ;;  %v3095_v42 = vpop.permute.xlu0 %3094 }
 0x301   : > { %3460 = vrot.lane.b32.xlu1 %v3393_v53, %s8475_s28  ;;  %3178 = vst.msk [vmem:[#allocation3 + $0x60] sm:$0xff] %vm1084_vm2, %v3095_v42  ;;  %v10325_v53 = vld [vmem:[#allocation2 + $0x14d] sm:$0xff]  ;;  %v10330_v42 = vld [vmem:[#allocation2 + $0x185] sm:$0xff] }
 0x302   : > { %3466 = vrot.lane.b32.xlu0 %v10294_v21, %s8475_s28  ;;  %12992 = vst [vmem:[#allocation4_spill] sm:$0xff] %v10330_v42 }
 0x303   : > { %v3093_v22 = vpop.permute.xlu1 %3092 }
 0x304   : > { %3177 = vst.msk [vmem:[#allocation3 + $0x58] sm:$0xff] %vm1084_vm2, %v3093_v22  ;;  %v3099_v45 = vpop.permute.xlu0 %3098  ;;  %v10335_v22 = vld [vmem:[#allocation2 + $0x16d] sm:$0xff] }
 0x305   : > { %3464 = vrot.lane.b32.xlu1 %v3395_v14, %s8475_s28  ;;  %3180 = vst.msk [vmem:[#allocation3 + $0x70] sm:$0xff] %vm1084_vm2, %v3099_v45  ;;  %12993 = vst [vmem:[#allocation5_spill] sm:$0xff] %v10335_v22 }
 0x306   : > { %3470 = vrot.lane.b32.xlu0 %v10301_v43, %s8475_s28 }
 0x307   : > { %v3097_v4 = vpop.permute.xlu1 %3096 }
 0x308   : > { %3179 = vst.msk [vmem:[#allocation3 + $0x68] sm:$0xff] %vm1084_vm2, %v3097_v4  ;;  %v3103_v5 = vpop.permute.xlu0 %3102  ;;  %v10340_v4 = vld [vmem:[#allocation2 + $0x1a5] sm:$0xff] }
 0x309   : > { %3468 = vrot.lane.b32.xlu1 %v10305_v60, %s8475_s28  ;;  %3182 = vst.msk [vmem:[#allocation3 + $0x80] sm:$0xff] %vm1084_vm2, %v3103_v5  ;;  %12994 = vst [vmem:[#allocation6_spill] sm:$0xff] %v10340_v4 }
 0x30a   : > { %3474 = vrot.lane.b32.xlu0 %v10310_v1, %s8475_s28 }
 0x30b   : > { %v3101_v17 = vpop.permute.xlu1 %3100 }
 0x30c   : > { %3181 = vst.msk [vmem:[#allocation3 + $0x78] sm:$0xff] %vm1084_vm2, %v3101_v17  ;;  %v3107_v11 = vpop.permute.xlu0 %3106  ;;  %v10345_v17 = vld [vmem:[#allocation2 + $0x18d] sm:$0xff] }
 0x30d   : > { %3472 = vrot.lane.b32.xlu1 %v10315_v15, %s8475_s28  ;;  %3184 = vst.msk [vmem:[#allocation3 + $0x90] sm:$0xff] %vm1084_vm2, %v3107_v11  ;;  %12995 = vst [vmem:[#allocation7_spill] sm:$0xff] %v10345_v17 }
 0x30e   : > { %3478 = vrot.lane.b32.xlu0 %v10320_v8, %s8475_s28 }
 0x30f   : > { %v3105_v10 = vpop.permute.xlu1 %3104 }
 0x310   : > { %3183 = vst.msk [vmem:[#allocation3 + $0x88] sm:$0xff] %vm1084_vm2, %v3105_v10  ;;  %v3111_v14 = vpop.permute.xlu0 %3110  ;;  %v10350_v10 = vld [vmem:[#allocation2 + $0x1c5] sm:$0xff] }
 0x311   : > { %3476 = vrot.lane.b32.xlu1 %v10325_v53, %s8475_s28  ;;  %3186 = vst.msk [vmem:[#allocation3 + $0xa0] sm:$0xff] %vm1084_vm2, %v3111_v14  ;;  %12996 = vst [vmem:[#allocation8_spill] sm:$0xff] %v10350_v10 }
 0x312   : > { %3482 = vrot.lane.b32.xlu0 %v10330_v42, %s8475_s28 }
 0x313   : > { %v3109_v45 = vpop.permute.xlu1 %3108 }
 0x314   : > { %3185 = vst.msk [vmem:[#allocation3 + $0x98] sm:$0xff] %vm1084_vm2, %v3109_v45  ;;  %v3115_v5 = vpop.permute.xlu0 %3114  ;;  %v10355_v45 = vld [vmem:[#allocation2 + $0x1ad] sm:$0xff] }
 0x315   : > { %3480 = vrot.lane.b32.xlu1 %v10335_v22, %s8475_s28  ;;  %3188 = vst.msk [vmem:[#allocation3 + $0xb0] sm:$0xff] %vm1084_vm2, %v3115_v5  ;;  %12997 = vst [vmem:[#allocation9_spill] sm:$0xff] %v10355_v45 }
 0x316   : > { %3486 = vrot.lane.b32.xlu0 %v10340_v4, %s8475_s28  ;;  %v10360_v4 = vld [vmem:[#allocation2 + $0x1e5] sm:$0xff] }
 0x317   : > { %v3113_v11 = vpop.permute.xlu1 %3112  ;;  %12998 = vst [vmem:[#allocation10_spill] sm:$0xff] %v10360_v4 }
 0x318   : > { %3187 = vst.msk [vmem:[#allocation3 + $0xa8] sm:$0xff] %vm1084_vm2, %v3113_v11  ;;  %v3119_v14 = vpop.permute.xlu0 %3118  ;;  %v10365_v11 = vld [vmem:[#allocation2 + $0x1cd] sm:$0xff] }
 0x319   : > { %3484 = vrot.lane.b32.xlu1 %v10345_v17, %s8475_s28  ;;  %3190 = vst.msk [vmem:[#allocation3 + $0xc0] sm:$0xff] %vm1084_vm2, %v3119_v14  ;;  %12999 = vst [vmem:[#allocation11_spill] sm:$0xff] %v10365_v11 }
 0x31a   : > { %3490 = vrot.lane.b32.xlu0 %v10350_v10, %s8475_s28  ;;  %v10370_v10 = vld [vmem:[#allocation2 + $0x205] sm:$0xff] }
 0x31b   : > { %v3117_v5 = vpop.permute.xlu1 %3116  ;;  %13000 = vst [vmem:[#allocation12_spill] sm:$0xff] %v10370_v10 }
 0x31c   : > { %3189 = vst.msk [vmem:[#allocation3 + $0xb8] sm:$0xff] %vm1084_vm2, %v3117_v5  ;;  %v3123_v22 = vpop.permute.xlu0 %3122  ;;  %v10375_v5 = vld [vmem:[#allocation2 + $0x1ed] sm:$0xff] }
 0x31d   : > { %3488 = vrot.lane.b32.xlu1 %v10355_v45, %s8475_s28  ;;  %3192 = vst.msk [vmem:[#allocation3 + $0xd0] sm:$0xff] %vm1084_vm2, %v3123_v22  ;;  %13001 = vst [vmem:[#allocation13_spill] sm:$0xff] %v10375_v5 }
 0x31e   : > { %3494 = vrot.lane.b32.xlu0 %v10360_v4, %s8475_s28  ;;  %v10380_v4 = vld [vmem:[#allocation2 + $0x225] sm:$0xff] }
 0x31f   : > { %v3121_v14 = vpop.permute.xlu1 %3120  ;;  %13002 = vst [vmem:[#allocation14_spill] sm:$0xff] %v10380_v4 }
 0x320   : > { %3191 = vst.msk [vmem:[#allocation3 + $0xc8] sm:$0xff] %vm1084_vm2, %v3121_v14  ;;  %v3127_v17 = vpop.permute.xlu0 %3126  ;;  %v10385_v14 = vld [vmem:[#allocation2 + $0x20d] sm:$0xff] }
 0x321   : > { %3492 = vrot.lane.b32.xlu1 %v10365_v11, %s8475_s28  ;;  %3194 = vst.msk [vmem:[#allocation3 + $0xe0] sm:$0xff] %vm1084_vm2, %v3127_v17  ;;  %13003 = vst [vmem:[#allocation15_spill] sm:$0xff] %v10385_v14 }
 0x322   : > { %3498 = vrot.lane.b32.xlu0 %v10370_v10, %s8475_s28  ;;  %v10390_v10 = vld [vmem:[#allocation2 + $0x245] sm:$0xff] }
 0x323   : > { %v3125_v22 = vpop.permute.xlu1 %3124 }
 0x324   : > { %3193 = vst.msk [vmem:[#allocation3 + $0xd8] sm:$0xff] %vm1084_vm2, %v3125_v22  ;;  %v3131_v45 = vpop.permute.xlu0 %3130  ;;  %v10395_v22 = vld [vmem:[#allocation2 + $0x22d] sm:$0xff] }
 0x325   : > { %3496 = vrot.lane.b32.xlu1 %v10375_v5, %s8475_s28  ;;  %3196 = vst.msk [vmem:[#allocation3 + $0xf0] sm:$0xff] %vm1084_vm2, %v3131_v45  ;;  %13004 = vst [vmem:[#allocation16_spill] sm:$0xff] %v10395_v22 }
 0x326   : > { %3502 = vrot.lane.b32.xlu0 %v10380_v4, %s8475_s28  ;;  %v3418_v4 = vld [vmem:[#allocation2 + $0x265] sm:$0xff] }
 0x327   : > { %v3129_v17 = vpop.permute.xlu1 %3128 }
 0x328   : > { %3195 = vst.msk [vmem:[#allocation3 + $0xe8] sm:$0xff] %vm1084_vm2, %v3129_v17  ;;  %v3263_v11 = vpop.permute.xlu0 %3262  ;;  %v10403_v17 = vld [vmem:[#allocation2 + $0x24d] sm:$0xff] }
 0x329   : > { %3500 = vrot.lane.b32.xlu1 %v10385_v14, %s8475_s28  ;;  %3358 = vst.msk [vmem:[#allocation3] sm:$0xff] %vm1277_vm3, %v3263_v11  ;;  %13005 = vst [vmem:[#allocation17_spill] sm:$0xff] %v10403_v17  ;;  %v3420_v14 = vld [vmem:[#allocation2 + $0x285] sm:$0xff] }
 0x32a   : > { %3506 = vrot.lane.b32.xlu0 %v10390_v10, %s8475_s28 }
 0x32b   : > { %v3133_v45 = vpop.permute.xlu1 %3132 }
 0x32c   : > { %3197 = vst.msk [vmem:[#allocation3 + $0xf8] sm:$0xff] %vm1084_vm2, %v3133_v45  ;;  %v3267_v5 = vpop.permute.xlu0 %3266  ;;  %v3419_v45 = vld [vmem:[#allocation2 + $0x26d] sm:$0xff] }
 0x32d   : > { %3504 = vrot.lane.b32.xlu1 %v10395_v22, %s8475_s28  ;;  %3360 = vst.msk [vmem:[#allocation3 + $0x10] sm:$0xff] %vm1277_vm3, %v3267_v5 }
 0x32e   : > { %3510 = vrot.lane.b32.xlu0 %v3418_v4, %s8475_s28  ;;  %v3421_v4 = vld [vmem:[#allocation2 + $0x28d] sm:$0xff] }
 0x32f   : > { %v3265_v11 = vpop.permute.xlu1 %3264 }
 0x330   : > { %3359 = vst.msk [vmem:[#allocation3 + $0x8] sm:$0xff] %vm1277_vm3, %v3265_v11  ;;  %v3271_v42 = vpop.permute.xlu0 %3270 }
 0x331   : > { %3508 = vrot.lane.b32.xlu1 %v10403_v17, %s8475_s28  ;;  %3362 = vst.msk [vmem:[#allocation3 + $0x20] sm:$0xff] %vm1277_vm3, %v3271_v42 }
 0x332   : > { %3514 = vrot.lane.b32.xlu0 %v3420_v14, %s8475_s28 }
 0x333   : > { %v3269_v22 = vpop.permute.xlu1 %3268 }
 0x334   : > { %3361 = vst.msk [vmem:[#allocation3 + $0x18] sm:$0xff] %vm1277_vm3, %v3269_v22  ;;  %v3275_v5 = vpop.permute.xlu0 %3274 }
 0x335   : > { %3512 = vrot.lane.b32.xlu1 %v3419_v45, %s8475_s28  ;;  %3364 = vst.msk [vmem:[#allocation3 + $0x30] sm:$0xff] %vm1277_vm3, %v3275_v5 }
 0x336   : > { %3646 = vrot.lane.b32.xlu0 %v9915_v0, %s8476_s29 }
 0x337   : > { %v3273_v11 = vpop.permute.xlu1 %3272 }
 0x338   : > { %3363 = vst.msk [vmem:[#allocation3 + $0x28] sm:$0xff] %vm1277_vm3, %v3273_v11  ;;  %v3279_v17 = vpop.permute.xlu0 %3278 }
 0x339   : > { %3516 = vrot.lane.b32.xlu1 %v3421_v4, %s8475_s28  ;;  %3366 = vst.msk [vmem:[#allocation3 + $0x40] sm:$0xff] %vm1277_vm3, %v3279_v17 }
 0x33a   : > { %3650 = vrot.lane.b32.xlu0 %v9931_v44, %s8476_s29 }
 0x33b   : > { %v3277_v42 = vpop.permute.xlu1 %3276 }
 0x33c   : > { %3365 = vst.msk [vmem:[#allocation3 + $0x38] sm:$0xff] %vm1277_vm3, %v3277_v42  ;;  %v3283_v14 = vpop.permute.xlu0 %3282 }
 0x33d   : > { %3648 = vrot.lane.b32.xlu1 %v9942_v18, %s8476_s29  ;;  %3368 = vst.msk [vmem:[#allocation3 + $0x50] sm:$0xff] %vm1277_vm3, %v3283_v14 }
 0x33e   : > { %3654 = vrot.lane.b32.xlu0 %v9950_v25, %s8476_s29 }
 0x33f   : > { %v3281_v0 = vpop.permute.xlu1 %3280 }
 0x340   : > { %3367 = vst.msk [vmem:[#allocation3 + $0x48] sm:$0xff] %vm1277_vm3, %v3281_v0  ;;  %v3287_v22 = vpop.permute.xlu0 %3286 }
 0x341   : > { %3652 = vrot.lane.b32.xlu1 %v9962_v47, %s8476_s29  ;;  %3370 = vst.msk [vmem:[#allocation3 + $0x60] sm:$0xff] %vm1277_vm3, %v3287_v22 }
 0x342   : > { %3658 = vrot.lane.b32.xlu0 %v9970_v12, %s8476_s29 }
 0x343   : > { %v3285_v44 = vpop.permute.xlu1 %3284 }
 0x344   : > { %3369 = vst.msk [vmem:[#allocation3 + $0x58] sm:$0xff] %vm1277_vm3, %v3285_v44  ;;  %v3291_v18 = vpop.permute.xlu0 %3290 }
 0x345   : > { %3656 = vrot.lane.b32.xlu1 %v9982_v34, %s8476_s29  ;;  %3372 = vst.msk [vmem:[#allocation3 + $0x70] sm:$0xff] %vm1277_vm3, %v3291_v18 }
 0x346   : > { %3662 = vrot.lane.b32.xlu0 %v9990_v33, %s8476_s29 }
 0x347   : > { %v3289_v25 = vpop.permute.xlu1 %3288 }
 0x348   : > { %3371 = vst.msk [vmem:[#allocation3 + $0x68] sm:$0xff] %vm1277_vm3, %v3289_v25  ;;  %v3295_v47 = vpop.permute.xlu0 %3294 }
 0x349   : > { %3660 = vrot.lane.b32.xlu1 %v10002_v55, %s8476_s29  ;;  %3374 = vst.msk [vmem:[#allocation3 + $0x80] sm:$0xff] %vm1277_vm3, %v3295_v47 }
 0x34a   : > { %3666 = vrot.lane.b32.xlu0 %v10010_v32, %s8476_s29 }
 0x34b   : > { %v10445_v12 = vpop.f32.mrb[0].mxu0  ;;  %v3293_v34 = vpop.permute.xlu1 %3292 }
 0x34c   : > { %3373 = vst.msk [vmem:[#allocation3 + $0x78] sm:$0xff] %vm1277_vm3, %v3293_v34  ;;  %v10448_v17 = vpop.f32.mrb[1].mxu0  ;;  %v3299_v33 = vpop.permute.xlu0 %3298 }
 0x34d   : > { %3664 = vrot.lane.b32.xlu1 %v10022_v57, %s8476_s29  ;;  %3376 = vst.msk [vmem:[#allocation3 + $0x90] sm:$0xff] %vm1277_vm3, %v3299_v33  ;;  %v3608_v33 = vld [vmem:[#allocation2 + $0x248] sm:$0xff] }
 0x34e   : > { %3670 = vrot.lane.b32.xlu0 %v10030_v61, %s8476_s29 }
 0x34f   : > { %v3297_v55 = vpop.permute.xlu1 %3296  ;;  %v10455_v45 = vpop.f32.mrb[2].mxu0 }
 0x350   : > { %3375 = vst.msk [vmem:[#allocation3 + $0x88] sm:$0xff] %vm1277_vm3, %v3297_v55  ;;  %v10458_v32 = vpop.f32.mrb[3].mxu0  ;;  %v3303_v5 = vpop.permute.xlu0 %3302 }
 0x351   : > { %3668 = vrot.lane.b32.xlu1 %v10042_v6, %s8476_s29  ;;  %3378 = vst.msk [vmem:[#allocation3 + $0xa0] sm:$0xff] %vm1277_vm3, %v3303_v5 }
 0x352   : > { %3674 = vrot.lane.b32.xlu0 %v10050_v9, %s8476_s29 }
 0x353   : > { %v3301_v57 = vpop.permute.xlu1 %3300  ;;  %v10465_v4 = vpop.f32.mrb[4].mxu0 }
 0x354   : > { %3377 = vst.msk [vmem:[#allocation3 + $0x98] sm:$0xff] %vm1277_vm3, %v3301_v57  ;;  %v10468_v61 = vpop.f32.mrb[5].mxu0  ;;  %v3307_v11 = vpop.permute.xlu0 %3306  ;;  %v3610_v57 = vld [vmem:[#allocation2 + $0x268] sm:$0xff] }
 0x355   : > { %3672 = vrot.lane.b32.xlu1 %v10062_v19, %s8476_s29  ;;  %3380 = vst.msk [vmem:[#allocation3 + $0xb0] sm:$0xff] %vm1277_vm3, %v3307_v11 }
 0x356   : > { %3678 = vrot.lane.b32.xlu0 %v10070_v46, %s8476_s29 }
 0x357   : > { %v3305_v6 = vpop.permute.xlu1 %3304  ;;  %v10475_v42 = vpop.f32.mrb[6].mxu0 }
 0x358   : > { %3379 = vst.msk [vmem:[#allocation3 + $0xa8] sm:$0xff] %vm1277_vm3, %v3305_v6  ;;  %v10478_v9 = vpop.f32.mrb[7].mxu0  ;;  %v3311_v14 = vpop.permute.xlu0 %3310  ;;  %v3609_v6 = vld [vmem:[#allocation2 + $0x250] sm:$0xff] }
 0x359   : > { %3676 = vrot.lane.b32.xlu1 %v10082_v37, %s8476_s29  ;;  %3382 = vst.msk [vmem:[#allocation3 + $0xc0] sm:$0xff] %vm1277_vm3, %v3311_v14 }
 0x35a   : > { %3682 = vrot.lane.b32.xlu0 %v10090_v50, %s8476_s29 }
 0x35b   : > { %v3309_v19 = vpop.permute.xlu1 %3308  ;;  %v10485_v0 = vpop.f32.mrb[8].mxu0 }
 0x35c   : > { %3381 = vst.msk [vmem:[#allocation3 + $0xb8] sm:$0xff] %vm1277_vm3, %v3309_v19  ;;  %v10488_v46 = vpop.f32.mrb[9].mxu0  ;;  %v3315_v22 = vpop.permute.xlu0 %3314 }
 0x35d   : > { %3680 = vrot.lane.b32.xlu1 %v10102_v30, %s8476_s29  ;;  %3384 = vst.msk [vmem:[#allocation3 + $0xd0] sm:$0xff] %vm1277_vm3, %v3315_v22  ;;  %v3612_v22 = vld [vmem:[#allocation2 + $0x288] sm:$0xff] }
 0x35e   : > { %3686 = vrot.lane.b32.xlu0 %v10110_v58, %s8476_s29 }
 0x35f   : > { %v3313_v37 = vpop.permute.xlu1 %3312  ;;  %v10495_v44 = vpop.f32.mrb[10].mxu0 }
 0x360   : > { %3383 = vst.msk [vmem:[#allocation3 + $0xc8] sm:$0xff] %vm1277_vm3, %v3313_v37  ;;  %v10498_v50 = vpop.f32.mrb[11].mxu0  ;;  %v3319_v18 = vpop.permute.xlu0 %3318 }
 0x361   : > { %3684 = vrot.lane.b32.xlu1 %v10122_v59, %s8476_s29  ;;  %3386 = vst.msk [vmem:[#allocation3 + $0xe0] sm:$0xff] %vm1277_vm3, %v3319_v18  ;;  %v13010_v18 = vmov 0.0  }
 0x362   : > { %3690 = vrot.lane.b32.xlu0 %v10130_v7, %s8476_s29  ;;  %500 = vst.msk [vmem:[#allocation2 + $0x18] sm:$0x3] %vm499_vm11, %v13010_v18  ;;  %504 = vst.msk [vmem:[#allocation2 + $0x38] sm:$0x3] %vm499_vm11, %v13010_v18 }
 0x363   : > { %v3317_v30 = vpop.permute.xlu1 %3316  ;;  %v10505_v25 = vpop.f32.mrb[12].mxu0  ;;  %508 = vst.msk [vmem:[#allocation2 + $0x58] sm:$0x3] %vm499_vm11, %v13010_v18  ;;  %512 = vst.msk [vmem:[#allocation2 + $0x78] sm:$0x3] %vm499_vm11, %v13010_v18 }
 0x364   : > { %3385 = vst.msk [vmem:[#allocation3 + $0xd8] sm:$0xff] %vm1277_vm3, %v3317_v30  ;;  %v10508_v58 = vpop.f32.mrb[13].mxu0  ;;  %v3323_v47 = vpop.permute.xlu0 %3322 }
 0x365   : > { %3688 = vrot.lane.b32.xlu1 %v10142_v35, %s8476_s29  ;;  %3388 = vst.msk [vmem:[#allocation3 + $0xf0] sm:$0xff] %vm1277_vm3, %v3323_v47 }
 0x366   : > { %3694 = vrot.lane.b32.xlu0 %v10150_v27, %s8476_s29  ;;  %516 = vst.msk [vmem:[#allocation2 + $0x98] sm:$0x3] %vm499_vm11, %v13010_v18  ;;  %520 = vst.msk [vmem:[#allocation2 + $0xb8] sm:$0x3] %vm499_vm11, %v13010_v18 }
 0x367   : > { %v3321_v59 = vpop.permute.xlu1 %3320  ;;  %v10515_v34 = vpop.f32.mrb[14].mxu0  ;;  %524 = vst.msk [vmem:[#allocation2 + $0xd8] sm:$0x3] %vm499_vm11, %v13010_v18  ;;  %528 = vst.msk [vmem:[#allocation2 + $0xf8] sm:$0x3] %vm499_vm11, %v13010_v18 }
 0x368   : > { %3387 = vst.msk [vmem:[#allocation3 + $0xe8] sm:$0xff] %vm1277_vm3, %v3321_v59  ;;  %v10518_v7 = vpop.f32.mrb[15].mxu0  ;;  %v3455_v55 = vpop.permute.xlu0 %3454 }
 0x369   : > { %3692 = vrot.lane.b32.xlu1 %v10160_v16, %s8476_s29  ;;  %3550 = vst.msk [vmem:[#allocation3] sm:$0xff] %vm1470_vm4, %v3455_v55  ;;  %v3613_v55 = vld [vmem:[#allocation2 + $0x290] sm:$0xff] }
 0x36a   : > { %3698 = vrot.lane.b32.xlu0 %v3608_v33, %s8476_s29  ;;  %532 = vst.msk [vmem:[#allocation2 + $0x118] sm:$0x3] %vm499_vm11, %v13010_v18  ;;  %536 = vst.msk [vmem:[#allocation2 + $0x138] sm:$0x3] %vm499_vm11, %v13010_v18 }
 0x36b   : > { %v3325_v35 = vpop.permute.xlu1 %3324  ;;  %v10524_v5 = vpop.f32.mrb[16].mxu0  ;;  %540 = vst.msk [vmem:[#allocation2 + $0x158] sm:$0x3] %vm499_vm11, %v13010_v18  ;;  %544 = vst.msk [vmem:[#allocation2 + $0x178] sm:$0x3] %vm499_vm11, %v13010_v18 }
 0x36c   : > { %13006 = vst [vmem:[#allocation18_spill] sm:$0xff] %v10524_v5  ;;  %3389 = vst.msk [vmem:[#allocation3 + $0xf8] sm:$0xff] %vm1277_vm3, %v3325_v35  ;;  %v10527_v27 = vpop.f32.mrb[17].mxu0  ;;  %v3459_v11 = vpop.permute.xlu0 %3458 }
 0x36d   : > { %13007 = vst [vmem:[#allocation19_spill] sm:$0xff] %v10527_v27  ;;  %3696 = vrot.lane.b32.xlu1 %v10171_v38, %s8476_s29  ;;  %3552 = vst.msk [vmem:[#allocation3 + $0x10] sm:$0xff] %vm1470_vm4, %v3459_v11  ;;  %v3611_v38 = vld [vmem:[#allocation2 + $0x270] sm:$0xff] }
 0x36e   : > { %3702 = vrot.lane.b32.xlu0 %v3610_v57, %s8476_s29  ;;  %548 = vst.msk [vmem:[#allocation2 + $0x198] sm:$0x3] %vm499_vm11, %v13010_v18  ;;  %552 = vst.msk [vmem:[#allocation2 + $0x1b8] sm:$0x3] %vm499_vm11, %v13010_v18 }
 0x36f   : > { %v3457_v16 = vpop.permute.xlu1 %3456  ;;  %v10533_v14 = vpop.f32.mrb[18].mxu0  ;;  %556 = vst.msk [vmem:[#allocation2 + $0x1d8] sm:$0x3] %vm499_vm11, %v13010_v18  ;;  %560 = vst.msk [vmem:[#allocation2 + $0x1f8] sm:$0x3] %vm499_vm11, %v13010_v18 }
 0x370   : > { %13008 = vst [vmem:[#allocation20_spill] sm:$0xff] %v10533_v14  ;;  %3551 = vst.msk [vmem:[#allocation3 + $0x8] sm:$0xff] %vm1470_vm4, %v3457_v16  ;;  %v10536_v19 = vpop.f32.mrb[19].mxu0  ;;  %v3463_v37 = vpop.permute.xlu0 %3462 }
 0x371   : > { %13009 = vst [vmem:[#allocation21_spill] sm:$0xff] %v10536_v19  ;;  %3700 = vrot.lane.b32.xlu1 %v3609_v6, %s8476_s29  ;;  %564 = vst.msk [vmem:[#allocation2 + $0x218] sm:$0x3] %vm499_vm11, %v13010_v18  ;;  %v11143_v19 = vld [vmem:[#allocation2 + $0x12d] sm:$0xff] }
 0x372   : > { %568 = vst.msk [vmem:[#allocation2 + $0x238] sm:$0x3] %vm499_vm11, %v13010_v18  ;;  %572 = vst.msk [vmem:[#allocation2 + $0x258] sm:$0x3] %vm499_vm11, %v13010_v18  ;;  %3706 = vrot.lane.b32.xlu0 %v3612_v22, %s8476_s29 }
 0x373   : > { %576 = vst.msk [vmem:[#allocation2 + $0x278] sm:$0x3] %vm499_vm11, %v13010_v18  ;;  %580 = vst.msk [vmem:[#allocation2 + $0x298] sm:$0x3] %vm499_vm11, %v13010_v18  ;;  %v3461_v30 = vpop.permute.xlu1 %3460  ;;  %v10593_v47 = vpop.f32.mrb[20].mxu0 }
 0x374   : > { %584 = vst.msk [vmem:[#allocation2 + $0x2b8] sm:$0x3] %vm499_vm11, %v13010_v18  ;;  %588 = vst.msk [vmem:[#allocation2 + $0x2d8] sm:$0x3] %vm499_vm11, %v13010_v18  ;;  %v10596_v59 = vpop.f32.mrb[21].mxu0  ;;  %v3467_v33 = vpop.permute.xlu0 %3466 }
 0x375   : > { %592 = vst.msk [vmem:[#allocation2 + $0x2f8] sm:$0x3] %vm499_vm11, %v13010_v18  ;;  %596 = vst.msk [vmem:[#allocation2 + $0x318] sm:$0x3] %vm499_vm11, %v13010_v18  ;;  %3704 = vrot.lane.b32.xlu1 %v3611_v38, %s8476_s29 }
 0x376   : > { %600 = vst.msk [vmem:[#allocation2 + $0x338] sm:$0x3] %vm499_vm11, %v13010_v18  ;;  %13011 = vst [vmem:[#allocation22_spill] sm:$0xff] %v10593_v47  ;;  %3839 = vrot.lane.b32.xlu0 %v9957_v26, %s8477_s30 }
 0x377   : > { %3554 = vst.msk [vmem:[#allocation3 + $0x20] sm:$0xff] %vm1470_vm4, %v3463_v37  ;;  %3553 = vst.msk [vmem:[#allocation3 + $0x18] sm:$0xff] %vm1470_vm4, %v3461_v30  ;;  %v3465_v35 = vpop.permute.xlu1 %3464  ;;  %v10602_v57 = vpop.f32.mrb[22].mxu0 }
 0x378   : > { %13012 = vst [vmem:[#allocation23_spill] sm:$0xff] %v10596_v59  ;;  %3556 = vst.msk [vmem:[#allocation3 + $0x30] sm:$0xff] %vm1470_vm4, %v3467_v33  ;;  %v10605_v11 = vpop.f32.mrb[23].mxu0  ;;  %v3471_v6 = vpop.permute.xlu0 %3470  ;;  %v11139_v59 = vld [vmem:[#allocation2 + $0x12a] sm:$0xff] }
 0x379   : > { %13013 = vst [vmem:[#allocation24_spill] sm:$0xff] %v10602_v57  ;;  %3555 = vst.msk [vmem:[#allocation3 + $0x28] sm:$0xff] %vm1470_vm4, %v3465_v35  ;;  %3708 = vrot.lane.b32.xlu1 %v3613_v55, %s8476_s29  ;;  %v10629_v55 = vld [vmem:[#allocation2 + $0x14a] sm:$0xff] }
 0x37a   : > { %13014 = vst [vmem:[#allocation25_spill] sm:$0xff] %v10605_v11  ;;  %3558 = vst.msk [vmem:[#allocation3 + $0x40] sm:$0xff] %vm1470_vm4, %v3471_v6  ;;  %3843 = vrot.lane.b32.xlu0 %v9977_v39, %s8477_s30  ;;  %v4829_v11 = vld [vmem:[#allocation2 + $0x68] sm:$0xff] }
 0x37b   : > { %v3469_v16 = vpop.permute.xlu1 %3468  ;;  %v10611_v22 = vpop.f32.mrb[24].mxu0 }
 0x37c   : > { %13015 = vst [vmem:[#allocation26_spill] sm:$0xff] %v10611_v22  ;;  %3557 = vst.msk [vmem:[#allocation3 + $0x38] sm:$0xff] %vm1470_vm4, %v3469_v16  ;;  %v10614_v26 = vpop.f32.mrb[25].mxu0  ;;  %v3475_v37 = vpop.permute.xlu0 %3474 }
 0x37d   : > { %13016 = vst [vmem:[#allocation27_spill] sm:$0xff] %v10614_v26  ;;  %3841 = vrot.lane.b32.xlu1 %v9979_v51, %s8477_s30  ;;  %3560 = vst.msk [vmem:[#allocation3 + $0x50] sm:$0xff] %vm1470_vm4, %v3475_v37  ;;  %v11050_v26 = vld [vmem:[#allocation2 + $0x18d] sm:$0xff] }
 0x37e   : > { %3847 = vrot.lane.b32.xlu0 %v9997_v52, %s8477_s30 }
 0x37f   : > { %v3473_v38 = vpop.permute.xlu1 %3472  ;;  %v10621_v30 = vpop.f32.mrb[26].mxu0 }
 0x380   : > { %13017 = vst [vmem:[#allocation28_spill] sm:$0xff] %v10621_v30  ;;  %3559 = vst.msk [vmem:[#allocation3 + $0x48] sm:$0xff] %vm1470_vm4, %v3473_v38  ;;  %v10624_v39 = vpop.f32.mrb[27].mxu0  ;;  %v3479_v33 = vpop.permute.xlu0 %3478  ;;  %v3785_v38 = vld [vmem:[#allocation2 + $0x1a2] sm:$0xff] }
 0x381   : > { %13018 = vst [vmem:[#allocation29_spill] sm:$0xff] %v10624_v39  ;;  %3845 = vrot.lane.b32.xlu1 %v9999_v31, %s8477_s30  ;;  %3562 = vst.msk [vmem:[#allocation3 + $0x60] sm:$0xff] %vm1470_vm4, %v3479_v33  ;;  %v10641_v31 = vld [vmem:[#allocation2 + $0x16a] sm:$0xff]  ;;  %v4826_v30 = vld [vmem:[#allocation2 + $0x40] sm:$0xff] }
 0x382   : > { %3851 = vrot.lane.b32.xlu0 %v10017_v40, %s8477_s30 }
 0x383   : > { %v3477_v51 = vpop.permute.xlu1 %3476  ;;  %v10633_v52 = vpop.f32.mrb[28].mxu0 }
 0x384   : > { %13019 = vst [vmem:[#allocation30_spill] sm:$0xff] %v10633_v52  ;;  %3561 = vst.msk [vmem:[#allocation3 + $0x58] sm:$0xff] %vm1470_vm4, %v3477_v51  ;;  %v10636_v35 = vpop.f32.mrb[29].mxu0  ;;  %v3483_v6 = vpop.permute.xlu0 %3482  ;;  %v10653_v51 = vld [vmem:[#allocation2 + $0x18a] sm:$0xff] }
 0x385   : > { %13020 = vst [vmem:[#allocation31_spill] sm:$0xff] %v10636_v35  ;;  %3849 = vrot.lane.b32.xlu1 %v10629_v55, %s8477_s30  ;;  %3564 = vst.msk [vmem:[#allocation3 + $0x70] sm:$0xff] %vm1470_vm4, %v3483_v6  ;;  %v4822_v35 = vld [vmem:[#allocation2] sm:$0xff] }
 0x386   : > { %3855 = vrot.lane.b32.xlu0 %v10037_v3, %s8477_s30  ;;  %v11028_v52 = vld [vmem:[#allocation2 + $0x185] sm:$0xff] }
 0x387   : > { %v3481_v16 = vpop.permute.xlu1 %3480  ;;  %v10645_v40 = vpop.f32.mrb[30].mxu0 }
 0x388   : > { %13021 = vst [vmem:[#allocation32_spill] sm:$0xff] %v10645_v40  ;;  %3563 = vst.msk [vmem:[#allocation3 + $0x68] sm:$0xff] %vm1470_vm4, %v3481_v16  ;;  %v10648_v37 = vpop.f32.mrb[31].mxu0  ;;  %v3487_v33 = vpop.permute.xlu0 %3486 }
 0x389   : > { %13022 = vst [vmem:[#allocation33_spill] sm:$0xff] %v10648_v37  ;;  %3853 = vrot.lane.b32.xlu1 %v10641_v31, %s8477_s30  ;;  %3566 = vst.msk [vmem:[#allocation3 + $0x80] sm:$0xff] %vm1470_vm4, %v3487_v33  ;;  %v5085_v37 = vld [vmem:[#allocation2 + $0x72] sm:$0xff] }
 0x38a   : > { %3859 = vrot.lane.b32.xlu0 %v3785_v38, %s8477_s30 }
 0x38b   : > { %v3485_v6 = vpop.permute.xlu1 %3484 }
 0x38c   : > { %3565 = vst.msk [vmem:[#allocation3 + $0x78] sm:$0xff] %vm1470_vm4, %v3485_v6  ;;  %v3491_v3 = vpop.permute.xlu0 %3490 }
 0x38d   : > { %3857 = vrot.lane.b32.xlu1 %v10653_v51, %s8477_s30  ;;  %3568 = vst.msk [vmem:[#allocation3 + $0x90] sm:$0xff] %vm1470_vm4, %v3491_v3 }
 0x38e   : > { %3863 = vrot.lane.b32.xlu0 %v10077_v63, %s8477_s30 }
 0x38f   : > { %v3489_v16 = vpop.permute.xlu1 %3488 }
 0x390   : > { %3567 = vst.msk [vmem:[#allocation3 + $0x88] sm:$0xff] %vm1470_vm4, %v3489_v16  ;;  %v3495_v33 = vpop.permute.xlu0 %3494 }
 0x391   : > { %3861 = vrot.lane.b32.xlu1 %v10079_v24, %s8477_s30  ;;  %3570 = vst.msk [vmem:[#allocation3 + $0xa0] sm:$0xff] %vm1470_vm4, %v3495_v33 }
 0x392   : > { %3867 = vrot.lane.b32.xlu0 %v10097_v20, %s8477_s30 }
 0x393   : > { %v3493_v38 = vpop.permute.xlu1 %3492 }
 0x394   : > { %3569 = vst.msk [vmem:[#allocation3 + $0x98] sm:$0xff] %vm1470_vm4, %v3493_v38  ;;  %v3499_v6 = vpop.permute.xlu0 %3498 }
 0x395   : > { %3865 = vrot.lane.b32.xlu1 %v10099_v48, %s8477_s30  ;;  %3572 = vst.msk [vmem:[#allocation3 + $0xb0] sm:$0xff] %vm1470_vm4, %v3499_v6  ;;  %v3804_v6 = vld [vmem:[#allocation2 + $0x2ca] sm:$0xff] }
 0x396   : > { %3871 = vrot.lane.b32.xlu0 %v10117_v62, %s8477_s30 }
 0x397   : > { %v3497_v63 = vpop.permute.xlu1 %3496 }
 0x398   : > { %3571 = vst.msk [vmem:[#allocation3 + $0xa8] sm:$0xff] %vm1470_vm4, %v3497_v63  ;;  %v3503_v24 = vpop.permute.xlu0 %3502 }
 0x399   : > { %3869 = vrot.lane.b32.xlu1 %v10119_v2, %s8477_s30  ;;  %3574 = vst.msk [vmem:[#allocation3 + $0xc0] sm:$0xff] %vm1470_vm4, %v3503_v24  ;;  %v3806_v24 = vld [vmem:[#allocation2 + $0x2ea] sm:$0xff] }
 0x39a   : > { %3875 = vrot.lane.b32.xlu0 %v10137_v13, %s8477_s30 }
 0x39b   : > { %v3501_v20 = vpop.permute.xlu1 %3500 }
 0x39c   : > { %3573 = vst.msk [vmem:[#allocation3 + $0xb8] sm:$0xff] %vm1470_vm4, %v3501_v20  ;;  %v3507_v48 = vpop.permute.xlu0 %3506 }
 0x39d   : > { %3873 = vrot.lane.b32.xlu1 %v10139_v41, %s8477_s30  ;;  %3576 = vst.msk [vmem:[#allocation3 + $0xd0] sm:$0xff] %vm1470_vm4, %v3507_v48 }
 0x39e   : > { %3879 = vrot.lane.b32.xlu0 %v10248_v29, %s8477_s30 }
 0x39f   : > { %v3505_v62 = vpop.permute.xlu1 %3504 }
 0x3a0   : > { %3575 = vst.msk [vmem:[#allocation3 + $0xc8] sm:$0xff] %vm1470_vm4, %v3505_v62  ;;  %v3511_v2 = vpop.permute.xlu0 %3510 }
 0x3a1   : > { %3877 = vrot.lane.b32.xlu1 %v10157_v56, %s8477_s30  ;;  %3578 = vst.msk [vmem:[#allocation3 + $0xe0] sm:$0xff] %vm1470_vm4, %v3511_v2  ;;  %v3801_v56 = vld [vmem:[#allocation2 + $0x2a2] sm:$0xff] }
 0x3a2   : > { %3883 = vrot.lane.b32.xlu0 %v10256_v28, %s8477_s30 }
 0x3a3   : > { %v3509_v13 = vpop.permute.xlu1 %3508 }
 0x3a4   : > { %3577 = vst.msk [vmem:[#allocation3 + $0xd8] sm:$0xff] %vm1470_vm4, %v3509_v13  ;;  %v3515_v41 = vpop.permute.xlu0 %3514 }
 0x3a5   : > { %3881 = vrot.lane.b32.xlu1 %v10261_v36, %s8477_s30  ;;  %3580 = vst.msk [vmem:[#allocation3 + $0xf0] sm:$0xff] %vm1470_vm4, %v3515_v41  ;;  %v3803_v36 = vld [vmem:[#allocation2 + $0x2c2] sm:$0xff] }
 0x3a6   : > { %3887 = vrot.lane.b32.xlu0 %v10266_v23, %s8477_s30  ;;  %v3802_v23 = vld [vmem:[#allocation2 + $0x2aa] sm:$0xff] }
 0x3a7   : > { %v3513_v29 = vpop.permute.xlu1 %3512 }
 0x3a8   : > { %3579 = vst.msk [vmem:[#allocation3 + $0xe8] sm:$0xff] %vm1470_vm4, %v3513_v29  ;;  %v3647_v3 = vpop.permute.xlu0 %3646  ;;  %v13024_v29 = vld [vmem:[#allocation5_spill] sm:$0xff] }
 0x3a9   : > { %3885 = vrot.lane.b32.xlu1 %v10271_v49, %s8477_s30  ;;  %3742 = vst.msk [vmem:[#allocation3] sm:$0xff] %vm1663_vm5, %v3647_v3  ;;  %v3805_v49 = vld [vmem:[#allocation2 + $0x2e2] sm:$0xff]  ;;  %v13026_v3 = vld [vmem:[#allocation7_spill] sm:$0xff] }
 0x3aa   : > { %3891 = vrot.lane.b32.xlu0 %v3801_v56, %s8477_s30 }
 0x3ab   : > { %v3517_v28 = vpop.permute.xlu1 %3516 }
 0x3ac   : > { %3581 = vst.msk [vmem:[#allocation3 + $0xf8] sm:$0xff] %vm1470_vm4, %v3517_v28  ;;  %v3651_v16 = vpop.permute.xlu0 %3650  ;;  %v13027_v28 = vld [vmem:[#allocation8_spill] sm:$0xff] }
 0x3ad   : > { %3889 = vrot.lane.b32.xlu1 %v10279_v54, %s8477_s30  ;;  %3744 = vst.msk [vmem:[#allocation3 + $0x10] sm:$0xff] %vm1663_vm5, %v3651_v16 }
 0x3ae   : > { %3895 = vrot.lane.b32.xlu0 %v3803_v36, %s8477_s30 }
 0x3af   : > { %v3649_v33 = vpop.permute.xlu1 %3648 }
 0x3b0   : > { %3743 = vst.msk [vmem:[#allocation3 + $0x8] sm:$0xff] %vm1663_vm5, %v3649_v33  ;;  %v3655_v38 = vpop.permute.xlu0 %3654  ;;  %v13029_v33 = vld [vmem:[#allocation10_spill] sm:$0xff] }
 0x3b1   : > { %3893 = vrot.lane.b32.xlu1 %v3802_v23, %s8477_s30  ;;  %3746 = vst.msk [vmem:[#allocation3 + $0x20] sm:$0xff] %vm1663_vm5, %v3655_v38  ;;  %v13028_v23 = vld [vmem:[#allocation9_spill] sm:$0xff] }
 0x3b2   : > { %3899 = vrot.lane.b32.xlu0 %v3805_v49, %s8477_s30 }
 0x3b3   : > { %v3653_v63 = vpop.permute.xlu1 %3652 }
 0x3b4   : > { %3745 = vst.msk [vmem:[#allocation3 + $0x18] sm:$0xff] %vm1663_vm5, %v3653_v63  ;;  %v3659_v54 = vpop.permute.xlu0 %3658  ;;  %v13031_v63 = vld [vmem:[#allocation12_spill] sm:$0xff] }
 0x3b5   : > { %3897 = vrot.lane.b32.xlu1 %v3804_v6, %s8477_s30  ;;  %3748 = vst.msk [vmem:[#allocation3 + $0x30] sm:$0xff] %vm1663_vm5, %v3659_v54  ;;  %v13030_v6 = vld [vmem:[#allocation11_spill] sm:$0xff] }
 0x3b6   : > { %4031 = vrot.lane.b32.xlu0 %v10294_v21, %s8478_s16 }
 0x3b7   : > { %v3657_v20 = vpop.permute.xlu1 %3656 }
 0x3b8   : > { %3747 = vst.msk [vmem:[#allocation3 + $0x28] sm:$0xff] %vm1663_vm5, %v3657_v20  ;;  %v3663_v48 = vpop.permute.xlu0 %3662  ;;  %v4384_v20 = vld [vmem:[%s12871_s4 + $0x8] sm:$0xff] }
 0x3b9   : > { %3901 = vrot.lane.b32.xlu1 %v3806_v24, %s8477_s30  ;;  %3750 = vst.msk [vmem:[#allocation3 + $0x40] sm:$0xff] %vm1663_vm5, %v3663_v48  ;;  %v4383_v24 = vld [vmem:[%s12871_s4] sm:$0xff] }
 0x3ba   : > { %4035 = vrot.lane.b32.xlu0 %v10301_v43, %s8478_s16  ;;  %v8403_v48 = vpack.c.bf16 %v4384_v20, %v4383_v24  ;;  %v4164_v20 = vld [vmem:[#allocation2 + $0x150] sm:$0xff] }
 0x3bb   : > { %v3661_v62 = vpop.permute.xlu1 %3660 }
 0x3bc   : > { %3749 = vst.msk [vmem:[#allocation3 + $0x38] sm:$0xff] %vm1663_vm5, %v3661_v62  ;;  %v3667_v2 = vpop.permute.xlu0 %3666  ;;  %8404 = vmatprep.subr.bf16.mxu1 %v8403_v48 }
 0x3bd   : > { %4033 = vrot.lane.b32.xlu1 %v10305_v60, %s8478_s16  ;;  %3752 = vst.msk [vmem:[#allocation3 + $0x50] sm:$0xff] %vm1663_vm5, %v3667_v2  ;;  %v13032_v2 = vld [vmem:[#allocation13_spill] sm:$0xff]  ;;  %8406 = vmatpush3.bf16.msra.mxu1 %v8403_v48 }
 0x3be   : > { %4039 = vrot.lane.b32.xlu0 %v10310_v1, %s8478_s16  ;;  %v13023_v1 = vld [vmem:[#allocation4_spill] sm:$0xff] }
 0x3bf   : > { %v3665_v21 = vpop.permute.xlu1 %3664 }
 0x3c0   : > { %3751 = vst.msk [vmem:[#allocation3 + $0x48] sm:$0xff] %vm1663_vm5, %v3665_v21  ;;  %v3671_v13 = vpop.permute.xlu0 %3670  ;;  %v13033_v21 = vld [vmem:[#allocation14_spill] sm:$0xff] }
 0x3c1   : > { %4037 = vrot.lane.b32.xlu1 %v10315_v15, %s8478_s16  ;;  %3754 = vst.msk [vmem:[#allocation3 + $0x60] sm:$0xff] %vm1663_vm5, %v3671_v13 }
 0x3c2   : > { %4043 = vrot.lane.b32.xlu0 %v10320_v8, %s8478_s16  ;;  %v13025_v8 = vld [vmem:[#allocation6_spill] sm:$0xff] }
 0x3c3   : > { %v3669_v43 = vpop.permute.xlu1 %3668 }
 0x3c4   : > { %3753 = vst.msk [vmem:[#allocation3 + $0x58] sm:$0xff] %vm1663_vm5, %v3669_v43  ;;  %v3675_v60 = vpop.permute.xlu0 %3674  ;;  %v4385_v43 = vld [vmem:[%s12871_s4 + $0x10] sm:$0xff] }
 0x3c5   : > { %4041 = vrot.lane.b32.xlu1 %v10325_v53, %s8478_s16  ;;  %3756 = vst.msk [vmem:[#allocation3 + $0x70] sm:$0xff] %vm1663_vm5, %v3675_v60  ;;  %v4386_v60 = vld [vmem:[%s12871_s4 + $0x18] sm:$0xff] }
 0x3c6   : > { %4047 = vrot.lane.b32.xlu0 %v13023_v1, %s8478_s16  ;;  %v8407_v1 = vpack.c.bf16 %v4386_v60, %v4385_v43  ;;  %v5270_v43 = vld [vmem:[#allocation2 + $0xa0] sm:$0xff] }
 0x3c7   : > { %v3673_v41 = vpop.permute.xlu1 %3672 }
 0x3c8   : > { %3755 = vst.msk [vmem:[#allocation3 + $0x68] sm:$0xff] %vm1663_vm5, %v3673_v41  ;;  %v3679_v15 = vpop.permute.xlu0 %3678  ;;  %8408 = vmatprep.subr.bf16.mxu1 %v8407_v1 }
 0x3c9   : > { %4045 = vrot.lane.b32.xlu1 %v13024_v29, %s8478_s16  ;;  %3758 = vst.msk [vmem:[#allocation3 + $0x80] sm:$0xff] %vm1663_vm5, %v3679_v15  ;;  %v13034_v15 = vld [vmem:[#allocation15_spill] sm:$0xff]  ;;  %8410 = vmatpush3.bf16.msra.mxu1 %v8407_v1 }
 0x3ca   : > { %4051 = vrot.lane.b32.xlu0 %v13025_v8, %s8478_s16  ;;  %v10789_v8 = vld [vmem:[#allocation2 + $0x108] sm:$0xff]  ;;  %v5079_v1 = vld [vmem:[#allocation2 + $0x12] sm:$0xff] }
 0x3cb   : > { %v3677_v56 = vpop.permute.xlu1 %3676 }
 0x3cc   : > { %3757 = vst.msk [vmem:[#allocation3 + $0x78] sm:$0xff] %vm1663_vm5, %v3677_v56  ;;  %v3683_v53 = vpop.permute.xlu0 %3682 }
 0x3cd   : > { %4049 = vrot.lane.b32.xlu1 %v13026_v3, %s8478_s16  ;;  %3760 = vst.msk [vmem:[#allocation3 + $0x90] sm:$0xff] %vm1663_vm5, %v3683_v53  ;;  %v13035_v53 = vld [vmem:[#allocation16_spill] sm:$0xff] }
 0x3ce   : > { %4055 = vrot.lane.b32.xlu0 %v13027_v28, %s8478_s16  ;;  %v4387_v3 = vld [vmem:[%s12871_s4 + $0x20] sm:$0xf]  ;;  %v10802_v28 = vld [vmem:[#allocation2 + $0x128] sm:$0xff] }
 0x3cf   : > { %v3681_v36 = vpop.permute.xlu1 %3680  ;;  %8232 = vmatprep.subr.msk.mxu1 %vm2410_vm7, %v4387_v3 }
 0x3d0   : > { %3759 = vst.msk [vmem:[#allocation3 + $0x88] sm:$0xff] %vm1663_vm5, %v3681_v36  ;;  %v3687_v16 = vpop.permute.xlu0 %3686  ;;  %8233 = vmatpush3.msk.msra.mxu1 %vm2410_vm7, %v4387_v3  ;;  %v4166_v3 = vld [vmem:[#allocation2 + $0x170] sm:$0xff] }
 0x3d1   : > { %4053 = vrot.lane.b32.xlu1 %v13028_v23, %s8478_s16  ;;  %3762 = vst.msk [vmem:[#allocation3 + $0xa0] sm:$0xff] %vm1663_vm5, %v3687_v16  ;;  %8340 = vmatprep.subr.mxu1 %v13010_v18  ;;  %v13036_v16 = vld [vmem:[#allocation17_spill] sm:$0xff]  ;;  %v4160_v23 = vld [vmem:[#allocation2 + $0x110] sm:$0xff] }
 0x3d2   : > { %4059 = vrot.lane.b32.xlu0 %v13029_v33, %s8478_s16 }
 0x3d3   : > { %v3685_v49 = vpop.permute.xlu1 %3684 }
 0x3d4   : > { %3761 = vst.msk [vmem:[#allocation3 + $0x98] sm:$0xff] %vm1663_vm5, %v3685_v49  ;;  %v3691_v38 = vpop.permute.xlu0 %3690  ;;  %v10811_v49 = vld [vmem:[#allocation2 + $0x148] sm:$0xff] }
 0x3d5   : > { %4057 = vrot.lane.b32.xlu1 %v13030_v6, %s8478_s16  ;;  %3764 = vst.msk [vmem:[#allocation3 + $0xb0] sm:$0xff] %vm1663_vm5, %v3691_v38  ;;  %v4162_v6 = vld [vmem:[#allocation2 + $0x130] sm:$0xff] }
 0x3d6   : > { %4063 = vrot.lane.b32.xlu0 %v13031_v63, %s8478_s16 }
 0x3d7   : > { %v3689_v54 = vpop.permute.xlu1 %3688 }
 0x3d8   : > { %3763 = vst.msk [vmem:[#allocation3 + $0xa8] sm:$0xff] %vm1663_vm5, %v3689_v54  ;;  %v3695_v62 = vpop.permute.xlu0 %3694  ;;  %v4886_v54 = vld [vmem:[#allocation2 + $0x5] sm:$0xff] }
 0x3d9   : > { %4061 = vrot.lane.b32.xlu1 %v13032_v2, %s8478_s16  ;;  %3766 = vst.msk [vmem:[#allocation3 + $0xc0] sm:$0xff] %vm1663_vm5, %v3695_v62  ;;  %v5078_v62 = vld [vmem:[#allocation2 + $0xa] sm:$0xff] }
 0x3da   : > { %4067 = vrot.lane.b32.xlu0 %v13033_v21, %s8478_s16  ;;  %v4887_v21 = vld [vmem:[#allocation2 + $0xd] sm:$0xff] }
 0x3db   : > { %v3693_v13 = vpop.permute.xlu1 %3692 }
 0x3dc   : > { %3765 = vst.msk [vmem:[#allocation3 + $0xb8] sm:$0xff] %vm1663_vm5, %v3693_v13  ;;  %v3699_v41 = vpop.permute.xlu0 %3698 }
 0x3dd   : > { %4065 = vrot.lane.b32.xlu1 %v13034_v15, %s8478_s16  ;;  %3768 = vst.msk [vmem:[#allocation3 + $0xd0] sm:$0xff] %vm1663_vm5, %v3699_v41  ;;  %v5271_v15 = vld [vmem:[#allocation2 + $0xa8] sm:$0xff] }
 0x3de   : > { %4071 = vrot.lane.b32.xlu0 %v10390_v10, %s8478_s16 }
 0x3df   : > { %v3697_v29 = vpop.permute.xlu1 %3696 }
 0x3e0   : > { %3767 = vst.msk [vmem:[#allocation3 + $0xc8] sm:$0xff] %vm1663_vm5, %v3697_v29  ;;  %v3703_v56 = vpop.permute.xlu0 %3702 }
 0x3e1   : > { %4069 = vrot.lane.b32.xlu1 %v13035_v53, %s8478_s16  ;;  %3770 = vst.msk [vmem:[#allocation3 + $0xe0] sm:$0xff] %vm1663_vm5, %v3703_v56  ;;  %v10832_v56 = vld [vmem:[#allocation2 + $0x168] sm:$0xff] }
 0x3e2   : > { %4223 = vrot.lane.b32.xlu0 %v10789_v8, %s8479_s17 }
 0x3e3   : > { %v3701_v10 = vpop.permute.xlu1 %3700 }
 0x3e4   : > { %3769 = vst.msk [vmem:[#allocation3 + $0xd8] sm:$0xff] %vm1663_vm5, %v3701_v10  ;;  %v3707_v36 = vpop.permute.xlu0 %3706 }
 0x3e5   : > { %4073 = vrot.lane.b32.xlu1 %v13036_v16, %s8478_s16  ;;  %3772 = vst.msk [vmem:[#allocation3 + $0xf0] sm:$0xff] %vm1663_vm5, %v3707_v36  ;;  %v10839_v36 = vld [vmem:[#allocation2 + $0xa5] sm:$0xff] }
 0x3e6   : > { %4227 = vrot.lane.b32.xlu0 %v10802_v28, %s8479_s17 }
 0x3e7   : > { %v3705_v33 = vpop.permute.xlu1 %3704 }
 0x3e8   : > { %3771 = vst.msk [vmem:[#allocation3 + $0xe8] sm:$0xff] %vm1663_vm5, %v3705_v33  ;;  %v3840_v38 = vpop.permute.xlu0 %3839 }
 0x3e9   : > { %4225 = vrot.lane.b32.xlu1 %v4160_v23, %s8479_s17  ;;  %3935 = vst.msk [vmem:[#allocation3] sm:$0xff] %vm1857_vm6, %v3840_v38  ;;  %v10843_v23 = vld [vmem:[#allocation2 + $0xad] sm:$0xff]  ;;  %v4888_v38 = vld [vmem:[#allocation2 + $0x25] sm:$0xff] }
 0x3ea   : > { %4231 = vrot.lane.b32.xlu0 %v10811_v49, %s8479_s17 }
 0x3eb   : > { %v3709_v63 = vpop.permute.xlu1 %3708 }
 0x3ec   : > { %3773 = vst.msk [vmem:[#allocation3 + $0xf8] sm:$0xff] %vm1663_vm5, %v3709_v63  ;;  %v3844_v24 = vpop.permute.xlu0 %3843  ;;  %v4889_v63 = vld [vmem:[#allocation2 + $0x2d] sm:$0xff] }
 0x3ed   : > { %4229 = vrot.lane.b32.xlu1 %v4162_v6, %s8479_s17  ;;  %3937 = vst.msk [vmem:[#allocation3 + $0x10] sm:$0xff] %vm1857_vm6, %v3844_v24  ;;  %v10853_v24 = vld [vmem:[#allocation2 + $0xaa] sm:$0xff] }
 0x3ee   : > { %4950 = vrot.lane.b32.xlu0 %v4886_v54, %s8472_s25 }
 0x3ef   : > { %v3842_v48 = vpop.permute.xlu1 %3841 }
 0x3f0   : > { %3936 = vst.msk [vmem:[#allocation3 + $0x8] sm:$0xff] %vm1857_vm6, %v3842_v48  ;;  %v3848_v2 = vpop.permute.xlu0 %3847  ;;  %v10857_v48 = vld [vmem:[#allocation2 + $0xb2] sm:$0xff] }
 0x3f1   : > { %4233 = vrot.lane.b32.xlu1 %v4164_v20, %s8479_s17  ;;  %3939 = vst.msk [vmem:[#allocation3 + $0x20] sm:$0xff] %vm1857_vm6, %v3848_v2  ;;  %v5080_v2 = vld [vmem:[#allocation2 + $0x2a] sm:$0xff] }
 0x3f2   : > { %5142 = vrot.lane.b32.xlu0 %v5078_v62, %s8473_s26 }
 0x3f3   : > { %v3846_v13 = vpop.permute.xlu1 %3845 }
 0x3f4   : > { %3938 = vst.msk [vmem:[#allocation3 + $0x18] sm:$0xff] %vm1857_vm6, %v3846_v13  ;;  %v3852_v60 = vpop.permute.xlu0 %3851  ;;  %v5081_v13 = vld [vmem:[#allocation2 + $0x32] sm:$0xff] }
 0x3f5   : > { %4952 = vrot.lane.b32.xlu1 %v4887_v21, %s8472_s25  ;;  %3941 = vst.msk [vmem:[#allocation3 + $0x30] sm:$0xff] %vm1857_vm6, %v3852_v60  ;;  %v10867_v60 = vld [vmem:[#allocation2 + $0x140] sm:$0xff] }
 0x3f6   : > { %5334 = vrot.lane.b32.xlu0 %v5270_v43, %s8474_s27 }
 0x3f7   : > { %v3850_v41 = vpop.permute.xlu1 %3849 }
 0x3f8   : > { %3940 = vst.msk [vmem:[#allocation3 + $0x28] sm:$0xff] %vm1857_vm6, %v3850_v41  ;;  %v3856_v29 = vpop.permute.xlu0 %3855 }
 0x3f9   : > { %5144 = vrot.lane.b32.xlu1 %v5079_v1, %s8473_s26  ;;  %3943 = vst.msk [vmem:[#allocation3 + $0x40] sm:$0xff] %vm1857_vm6, %v3856_v29 }
 0x3fa   : > { %5336 = vrot.lane.b32.xlu0 %v5271_v15, %s8474_s27  ;;  %v5272_v15 = vld [vmem:[#allocation2 + $0xc0] sm:$0xff] }
 0x3fb   : > { %v3854_v53 = vpop.permute.xlu1 %3853 }
 0x3fc   : > { %3942 = vst.msk [vmem:[#allocation3 + $0x38] sm:$0xff] %vm1857_vm6, %v3854_v53  ;;  %v3860_v10 = vpop.permute.xlu0 %3859  ;;  %v10877_v53 = vld [vmem:[#allocation2 + $0x188] sm:$0xff] }
 0x3fd   : > { %4235 = vrot.lane.b32.xlu1 %v10832_v56, %s8479_s17  ;;  %3945 = vst.msk [vmem:[#allocation3 + $0x50] sm:$0xff] %vm1857_vm6, %v3860_v10  ;;  %v10881_v10 = vld [vmem:[#allocation2 + $0x145] sm:$0xff] }
 0x3fe   : > { %4237 = vrot.lane.b32.xlu0 %v4166_v3, %s8479_s17 }
 0x3ff   : > { %v3858_v16 = vpop.permute.xlu1 %3857 }
 0x400   : > { %3944 = vst.msk [vmem:[#allocation3 + $0x48] sm:$0xff] %vm1857_vm6, %v3858_v16  ;;  %v3864_v33 = vpop.permute.xlu0 %3863 }
 0x401   : > { %5526 = vrot.lane.b32.xlu1 %v10839_v36, %s8475_s28  ;;  %3947 = vst.msk [vmem:[#allocation3 + $0x60] sm:$0xff] %vm1857_vm6, %v3864_v33  ;;  %v10886_v33 = vld [vmem:[#allocation2 + $0xc5] sm:$0xff] }
 0x402   : > { %5528 = vrot.lane.b32.xlu0 %v10843_v23, %s8475_s28 }
 0x403   : > { %v3862_v6 = vpop.permute.xlu1 %3861 }
 0x404   : > { %3946 = vst.msk [vmem:[#allocation3 + $0x58] sm:$0xff] %vm1857_vm6, %v3862_v6  ;;  %v3868_v54 = vpop.permute.xlu0 %3867  ;;  %v5273_v6 = vld [vmem:[#allocation2 + $0xc8] sm:$0xff] }
 0x405   : > { %4954 = vrot.lane.b32.xlu1 %v4888_v38, %s8472_s25  ;;  %3949 = vst.msk [vmem:[#allocation3 + $0x70] sm:$0xff] %vm1857_vm6, %v3868_v54  ;;  %v6455_v54 = vld [vmem:[%s12874_s7] sm:$0xff] }
 0x406   : > { %4956 = vrot.lane.b32.xlu0 %v4889_v63, %s8472_s25 }
 0x407   : > { %v3866_v20 = vpop.permute.xlu1 %3865 }
 0x408   : > { %3948 = vst.msk [vmem:[#allocation3 + $0x68] sm:$0xff] %vm1857_vm6, %v3866_v20  ;;  %v3872_v62 = vpop.permute.xlu0 %3871  ;;  %v6456_v20 = vld [vmem:[%s12874_s7 + $0x8] sm:$0xff] }
 0x409   : > { %5718 = vrot.lane.b32.xlu1 %v10853_v24, %s8476_s29  ;;  %3951 = vst.msk [vmem:[#allocation3 + $0x80] sm:$0xff] %vm1857_vm6, %v3872_v62  ;;  %v8411_v62 = vpack.c.bf16 %v6456_v20, %v6455_v54  ;;  %v4891_v20 = vld [vmem:[#allocation2 + $0x4d] sm:$0xff] }
 0x40a   : > { %5720 = vrot.lane.b32.xlu0 %v10857_v48, %s8476_s29 }
 0x40b   : > { %v3870_v21 = vpop.permute.xlu1 %3869  ;;  %8412 = vmatprep.subr.bf16.mxu0 %v8411_v62 }
 0x40c   : > { %3950 = vst.msk [vmem:[#allocation3 + $0x78] sm:$0xff] %vm1857_vm6, %v3870_v21  ;;  %v3876_v43 = vpop.permute.xlu0 %3875  ;;  %v10902_v21 = vld [vmem:[#allocation2 + $0x14d] sm:$0xff]  ;;  %8414 = vmatpush3.bf16.msra.mxu0 %v8411_v62 }
 0x40d   : > { %5146 = vrot.lane.b32.xlu1 %v5080_v2, %s8473_s26  ;;  %3953 = vst.msk [vmem:[#allocation3 + $0x90] sm:$0xff] %vm1857_vm6, %v3876_v43  ;;  %v6457_v43 = vld [vmem:[%s12874_s7 + $0x10] sm:$0xff] }
 0x40e   : > { %5148 = vrot.lane.b32.xlu0 %v5081_v13, %s8473_s26 }
 0x40f   : > { %v3874_v1 = vpop.permute.xlu1 %3873 }
 0x410   : > { %3952 = vst.msk [vmem:[#allocation3 + $0x88] sm:$0xff] %vm1857_vm6, %v3874_v1  ;;  %v3880_v41 = vpop.permute.xlu0 %3879  ;;  %v6458_v1 = vld [vmem:[%s12874_s7 + $0x18] sm:$0xff] }
 0x411   : > { %5911 = vrot.lane.b32.xlu1 %v10867_v60, %s8477_s30  ;;  %3955 = vst.msk [vmem:[#allocation3 + $0xa0] sm:$0xff] %vm1857_vm6, %v3880_v41  ;;  %v4890_v41 = vld [vmem:[#allocation2 + $0x45] sm:$0xff] }
 0x412   : > { %5913 = vrot.lane.b32.xlu0 %v10811_v49, %s8477_s30 }
 0x413   : > { %v3878_v29 = vpop.permute.xlu1 %3877 }
 0x414   : > { %3954 = vst.msk [vmem:[#allocation3 + $0x98] sm:$0xff] %vm1857_vm6, %v3878_v29  ;;  %v3884_v3 = vpop.permute.xlu0 %3883 }
 0x415   : > { %5338 = vrot.lane.b32.xlu1 %v5272_v15, %s8474_s27  ;;  %3957 = vst.msk [vmem:[#allocation3 + $0xb0] sm:$0xff] %vm1857_vm6, %v3884_v3  ;;  %v8415_v15 = vpack.c.bf16 %v6458_v1, %v6457_v43  ;;  %v10939_v43 = vld [vmem:[#allocation2 + $0xd2] sm:$0xff] }
 0x416   : > { %4239 = vrot.lane.b32.xlu0 %v10877_v53, %s8479_s17 }
 0x417   : > { %v3882_v16 = vpop.permute.xlu1 %3881  ;;  %8416 = vmatprep.subr.bf16.mxu0 %v8415_v15 }
 0x418   : > { %3956 = vst.msk [vmem:[#allocation3 + $0xa8] sm:$0xff] %vm1857_vm6, %v3882_v16  ;;  %v3888_v38 = vpop.permute.xlu0 %3887  ;;  %8418 = vmatpush3.bf16.msra.mxu0 %v8415_v15  ;;  %v10918_v16 = vld [vmem:[#allocation2 + $0xca] sm:$0xff] }
 0x419   : > { %6103 = vrot.lane.b32.xlu1 %v10881_v10, %s8478_s16  ;;  %3959 = vst.msk [vmem:[#allocation3 + $0xc0] sm:$0xff] %vm1857_vm6, %v3888_v38 }
 0x41a   : > { %5530 = vrot.lane.b32.xlu0 %v10886_v33, %s8475_s28 }
 0x41b   : > { %v3886_v63 = vpop.permute.xlu1 %3885 }
 0x41c   : > { %3958 = vst.msk [vmem:[#allocation3 + $0xb8] sm:$0xff] %vm1857_vm6, %v3886_v63  ;;  %v3892_v2 = vpop.permute.xlu0 %3891  ;;  %v10925_v63 = vld [vmem:[#allocation2 + $0xcd] sm:$0xff] }
 0x41d   : > { %5340 = vrot.lane.b32.xlu1 %v5273_v6, %s8474_s27  ;;  %3961 = vst.msk [vmem:[#allocation3 + $0xd0] sm:$0xff] %vm1857_vm6, %v3892_v2  ;;  %v6459_v6 = vld [vmem:[%s12874_s7 + $0x20] sm:$0xf]  ;;  %v10935_v2 = vld [vmem:[#allocation2 + $0x152] sm:$0xff] }
 0x41e   : > { %6295 = vrot.lane.b32.xlu0 %v10629_v55, %s8479_s17  ;;  %v4168_v55 = vld [vmem:[#allocation2 + $0x190] sm:$0xff]  ;;  %8290 = vmatprep.subr.msk.mxu0 %vm2410_vm7, %v6459_v6 }
 0x41f   : > { %v3890_v13 = vpop.permute.xlu1 %3889  ;;  %8291 = vmatpush3.msk.msra.mxu0 %vm2410_vm7, %v6459_v6 }
 0x420   : > { %3960 = vst.msk [vmem:[#allocation3 + $0xc8] sm:$0xff] %vm1857_vm6, %v3890_v13  ;;  %v3896_v29 = vpop.permute.xlu0 %3895 }
 0x421   : > { %6105 = vrot.lane.b32.xlu1 %v10902_v21, %s8478_s16  ;;  %3963 = vst.msk [vmem:[#allocation3 + $0xe0] sm:$0xff] %vm1857_vm6, %v3896_v29  ;;  %v5083_v29 = vld [vmem:[#allocation2 + $0x52] sm:$0xff] }
 0x422   : > { %4958 = vrot.lane.b32.xlu0 %v4890_v41, %s8472_s25  ;;  %v5082_v41 = vld [vmem:[#allocation2 + $0x4a] sm:$0xff] }
 0x423   : > { %v3894_v3 = vpop.permute.xlu1 %3893 }
 0x424   : > { %3962 = vst.msk [vmem:[#allocation3 + $0xd8] sm:$0xff] %vm1857_vm6, %v3894_v3  ;;  %v3900_v38 = vpop.permute.xlu0 %3899  ;;  %v10949_v3 = vld [vmem:[#allocation2 + $0x160] sm:$0xff] }
 0x425   : > { %4241 = vrot.lane.b32.xlu1 %v4168_v55, %s8479_s17  ;;  %3965 = vst.msk [vmem:[#allocation3 + $0xf0] sm:$0xff] %vm1857_vm6, %v3900_v38 }
 0x426   : > { %5722 = vrot.lane.b32.xlu0 %v10918_v16, %s8476_s29 }
 0x427   : > { %v3898_v54 = vpop.permute.xlu1 %3897 }
 0x428   : > { %3964 = vst.msk [vmem:[#allocation3 + $0xe8] sm:$0xff] %vm1857_vm6, %v3898_v54  ;;  %v4032_v62 = vpop.permute.xlu0 %4031  ;;  %v5274_v54 = vld [vmem:[#allocation2 + $0xe0] sm:$0xff] }
 0x429   : > { %5532 = vrot.lane.b32.xlu1 %v10925_v63, %s8475_s28  ;;  %4127 = vst.msk [vmem:[#allocation3] sm:$0xff] %vm2050_vm8, %v4032_v62  ;;  %v10959_v62 = vld [vmem:[#allocation2 + $0x1a8] sm:$0xff] }
 0x42a   : > { %4960 = vrot.lane.b32.xlu0 %v4891_v20, %s8472_s25 }
 0x42b   : > { %v3902_v13 = vpop.permute.xlu1 %3901 }
 0x42c   : > { %3966 = vst.msk [vmem:[#allocation3 + $0xf8] sm:$0xff] %vm1857_vm6, %v3902_v13  ;;  %v4036_v1 = vpop.permute.xlu0 %4035 }
 0x42d   : > { %6297 = vrot.lane.b32.xlu1 %v10935_v2, %s8479_s17  ;;  %4129 = vst.msk [vmem:[#allocation3 + $0x10] sm:$0xff] %vm2050_vm8, %v4036_v1  ;;  %v10963_v1 = vld [vmem:[#allocation2 + $0x165] sm:$0xff] }
 0x42e   : > { %5724 = vrot.lane.b32.xlu0 %v10939_v43, %s8476_s29 }
 0x42f   : > { %v4034_v15 = vpop.permute.xlu1 %4033 }
 0x430   : > { %4128 = vst.msk [vmem:[#allocation3 + $0x8] sm:$0xff] %vm2050_vm8, %v4034_v15  ;;  %v4040_v55 = vpop.permute.xlu0 %4039  ;;  %v10968_v15 = vld [vmem:[#allocation2 + $0xe5] sm:$0xff] }
 0x431   : > { %5150 = vrot.lane.b32.xlu1 %v5082_v41, %s8473_s26  ;;  %4131 = vst.msk [vmem:[#allocation3 + $0x20] sm:$0xff] %vm2050_vm8, %v4040_v55  ;;  %v5275_v55 = vld [vmem:[#allocation2 + $0xe8] sm:$0xff] }
 0x432   : > { %5152 = vrot.lane.b32.xlu0 %v5083_v29, %s8473_s26 }
 0x433   : > { %v4038_v38 = vpop.permute.xlu1 %4037 }
 0x434   : > { %4130 = vst.msk [vmem:[#allocation3 + $0x18] sm:$0xff] %vm2050_vm8, %v4038_v38  ;;  %v4044_v6 = vpop.permute.xlu0 %4043 }
 0x435   : > { %5915 = vrot.lane.b32.xlu1 %v10949_v3, %s8477_s30  ;;  %4133 = vst.msk [vmem:[#allocation3 + $0x30] sm:$0xff] %vm2050_vm8, %v4044_v6 }
 0x436   : > { %5917 = vrot.lane.b32.xlu0 %v10832_v56, %s8477_s30 }
 0x437   : > { %v4042_v20 = vpop.permute.xlu1 %4041 }
 0x438   : > { %4132 = vst.msk [vmem:[#allocation3 + $0x28] sm:$0xff] %vm2050_vm8, %v4042_v20  ;;  %v4048_v13 = vpop.permute.xlu0 %4047 }
 0x439   : > { %5342 = vrot.lane.b32.xlu1 %v5274_v54, %s8474_s27  ;;  %4135 = vst.msk [vmem:[#allocation3 + $0x40] sm:$0xff] %vm2050_vm8, %v4048_v13  ;;  %v10978_v54 = vld [vmem:[#allocation2 + $0x16d] sm:$0xff]  ;;  %v4892_v13 = vld [vmem:[#allocation2 + $0x65] sm:$0xff] }
 0x43a   : > { %4243 = vrot.lane.b32.xlu0 %v10959_v62, %s8479_s17 }
 0x43b   : > { %v4046_v41 = vpop.permute.xlu1 %4045 }
 0x43c   : > { %4134 = vst.msk [vmem:[#allocation3 + $0x38] sm:$0xff] %vm2050_vm8, %v4046_v41  ;;  %v4052_v29 = vpop.permute.xlu0 %4051 }
 0x43d   : > { %6107 = vrot.lane.b32.xlu1 %v10963_v1, %s8478_s16  ;;  %4137 = vst.msk [vmem:[#allocation3 + $0x50] sm:$0xff] %vm2050_vm8, %v4052_v29  ;;  %v4170_v29 = vld [vmem:[#allocation2 + $0x1b0] sm:$0xff] }
 0x43e   : > { %5534 = vrot.lane.b32.xlu0 %v10968_v15, %s8475_s28 }
 0x43f   : > { %v4050_v38 = vpop.permute.xlu1 %4049 }
 0x440   : > { %4136 = vst.msk [vmem:[#allocation3 + $0x48] sm:$0xff] %vm2050_vm8, %v4050_v38  ;;  %v4056_v6 = vpop.permute.xlu0 %4055  ;;  %v10988_v38 = vld [vmem:[#allocation2 + $0xea] sm:$0xff] }
 0x441   : > { %5344 = vrot.lane.b32.xlu1 %v5275_v55, %s8474_s27  ;;  %4139 = vst.msk [vmem:[#allocation3 + $0x60] sm:$0xff] %vm2050_vm8, %v4056_v6 }
 0x442   : > { %6299 = vrot.lane.b32.xlu0 %v10641_v31, %s8479_s17  ;;  %v10992_v31 = vld [vmem:[#allocation2 + $0xed] sm:$0xff] }
 0x443   : > { %v4054_v20 = vpop.permute.xlu1 %4053 }
 0x444   : > { %4138 = vst.msk [vmem:[#allocation3 + $0x58] sm:$0xff] %vm2050_vm8, %v4054_v20  ;;  %v4060_v41 = vpop.permute.xlu0 %4059 }
 0x445   : > { %6109 = vrot.lane.b32.xlu1 %v10978_v54, %s8478_s16  ;;  %4141 = vst.msk [vmem:[#allocation3 + $0x70] sm:$0xff] %vm2050_vm8, %v4060_v41  ;;  %v4893_v41 = vld [vmem:[#allocation2 + $0x6d] sm:$0xff] }
 0x446   : > { %4962 = vrot.lane.b32.xlu0 %v4892_v13, %s8472_s25 }
 0x447   : > { %v4058_v55 = vpop.permute.xlu1 %4057 }
 0x448   : > { %4140 = vst.msk [vmem:[#allocation3 + $0x68] sm:$0xff] %vm2050_vm8, %v4058_v55  ;;  %v4064_v6 = vpop.permute.xlu0 %4063  ;;  %v11000_v55 = vld [vmem:[#allocation2 + $0x172] sm:$0xff] }
 0x449   : > { %4245 = vrot.lane.b32.xlu1 %v4170_v29, %s8479_s17  ;;  %4143 = vst.msk [vmem:[#allocation3 + $0x80] sm:$0xff] %vm2050_vm8, %v4064_v6  ;;  %v11004_v6 = vld [vmem:[#allocation2 + $0xf2] sm:$0xff] }
 0x44a   : > { %5726 = vrot.lane.b32.xlu0 %v10988_v38, %s8476_s29 }
 0x44b   : > { %v4062_v20 = vpop.permute.xlu1 %4061 }
 0x44c   : > { %4142 = vst.msk [vmem:[#allocation3 + $0x78] sm:$0xff] %vm2050_vm8, %v4062_v20  ;;  %v4068_v13 = vpop.permute.xlu0 %4067  ;;  %v5084_v20 = vld [vmem:[#allocation2 + $0x6a] sm:$0xff] }
 0x44d   : > { %5536 = vrot.lane.b32.xlu1 %v10992_v31, %s8475_s28  ;;  %4145 = vst.msk [vmem:[#allocation3 + $0x90] sm:$0xff] %vm2050_vm8, %v4068_v13 }
 0x44e   : > { %4964 = vrot.lane.b32.xlu0 %v4893_v41, %s8472_s25 }
 0x44f   : > { %v4066_v29 = vpop.permute.xlu1 %4065 }
 0x450   : > { %4144 = vst.msk [vmem:[#allocation3 + $0x88] sm:$0xff] %vm2050_vm8, %v4066_v29  ;;  %v4072_v18 = vpop.permute.xlu0 %4071  ;;  %v11014_v29 = vld [vmem:[#allocation2 + $0x180] sm:$0xff] }
 0x451   : > { %6301 = vrot.lane.b32.xlu1 %v11000_v55, %s8479_s17  ;;  %4147 = vst.msk [vmem:[#allocation3 + $0xa0] sm:$0xff] %vm2050_vm8, %v4072_v18 }
 0x452   : > { %5728 = vrot.lane.b32.xlu0 %v11004_v6, %s8476_s29 }
 0x453   : > { %v4070_v13 = vpop.permute.xlu1 %4069 }
 0x454   : > { %4146 = vst.msk [vmem:[#allocation3 + $0x98] sm:$0xff] %vm2050_vm8, %v4070_v13  ;;  %v4224_v41 = vpop.permute.xlu0 %4223  ;;  %v5276_v13 = vld [vmem:[#allocation2 + $0x100] sm:$0xff] }
 0x455   : > { %5154 = vrot.lane.b32.xlu1 %v5084_v20, %s8473_s26  ;;  %4319 = vst.msk [vmem:[#allocation3] sm:$0xff] %vm2243_vm9, %v4224_v41  ;;  %v11024_v41 = vld [vmem:[#allocation2 + $0x1c8] sm:$0xff] }
 0x456   : > { %5156 = vrot.lane.b32.xlu0 %v5085_v37, %s8473_s26 }
 0x457   : > { %v4074_v40 = vpop.permute.xlu1 %4073 }
 0x458   : > { %4148 = vst.msk [vmem:[#allocation3 + $0xa8] sm:$0xff] %vm2050_vm8, %v4074_v40  ;;  %v4228_v18 = vpop.permute.xlu0 %4227 }
 0x459   : > { %5919 = vrot.lane.b32.xlu1 %v11014_v29, %s8477_s30  ;;  %4321 = vst.msk [vmem:[#allocation3 + $0x10] sm:$0xff] %vm2243_vm9, %v4228_v18  ;;  %v4824_v18 = vld [vmem:[#allocation2 + $0x20] sm:$0xff] }
 0x45a   : > { %5921 = vrot.lane.b32.xlu0 %v10877_v53, %s8477_s30 }
 0x45b   : > { %v4226_v20 = vpop.permute.xlu1 %4225 }
 0x45c   : > { %4320 = vst.msk [vmem:[#allocation3 + $0x8] sm:$0xff] %vm2243_vm9, %v4226_v20  ;;  %v4232_v37 = vpop.permute.xlu0 %4231  ;;  %v4351_v40 = vld [vmem:[#allocation3] sm:$0xff] }
 0x45d   : > { %5346 = vrot.lane.b32.xlu1 %v5276_v13, %s8474_s27  ;;  %4323 = vst.msk [vmem:[#allocation3 + $0x20] sm:$0xff] %vm2243_vm9, %v4232_v37  ;;  %8234 = vmatprep.mubr.msk.f32.mxu1 %vm2313_vm10, %v4351_v40  ;;  %v11035_v20 = vld [vmem:[#allocation2 + $0x105] sm:$0xff] }
 0x45e   : > { %4854 = vst.msk [vmem:[#allocation3] sm:$0xff] %vm495_vm0, %v4822_v35  ;;  %4247 = vrot.lane.b32.xlu0 %v11024_v41, %s8479_s17  ;;  %v4823_v13 = vld [vmem:[#allocation2 + $0x8] sm:$0xff] }
 0x45f   : > { %v4230_v53 = vpop.permute.xlu1 %4229 }
 0x460   : > { %4322 = vst.msk [vmem:[#allocation3 + $0x18] sm:$0xff] %vm2243_vm9, %v4230_v53  ;;  %v4951_v39 = vpop.permute.xlu0 %4950  ;;  %v4353_v37 = vld [vmem:[#allocation3 + $0x10] sm:$0xff] }
 0x461   : > { %6111 = vrot.lane.b32.xlu1 %v11028_v52, %s8478_s16  ;;  %5046 = vst.msk [vmem:[#allocation3] sm:$0xff] %vm891_vm1, %v4951_v39 }
 0x462   : > { %4856 = vst.msk [vmem:[#allocation3 + $0x10] sm:$0xff] %vm495_vm0, %v4824_v18  ;;  %5538 = vrot.lane.b32.xlu0 %v11035_v20, %s8475_s28  ;;  %v4825_v18 = vld [vmem:[#allocation2 + $0x28] sm:$0xff] }
 0x463   : > { %v4234_v35 = vpop.permute.xlu1 %4233  ;;  %v4352_v40 = vld [vmem:[#allocation3 + $0x8] sm:$0xff] }
 0x464   : > { %4324 = vst.msk [vmem:[#allocation3 + $0x28] sm:$0xff] %vm2243_vm9, %v4234_v35  ;;  %8235 = vmatmul.mubr.msk.f32.vlgmr.msra.gmra.mrb[0].mxu1 %vm2313_vm10, %v4352_v40  ;;  %v5143_v53 = vpop.permute.xlu0 %5142  ;;  %v4355_v39 = vld [vmem:[#allocation3 + $0x20] sm:$0xff] }
 0x465   : > { %4855 = vst.msk [vmem:[#allocation3 + $0x8] sm:$0xff] %vm495_vm0, %v4823_v13  ;;  %5348 = vrot.lane.b32.xlu1 %v10789_v8, %s8474_s27  ;;  %8237 = vmatprep.mubr.msk.f32.mxu1 %vm2313_vm10, %v4353_v37  ;;  %4858 = vst.msk [vmem:[#allocation3 + $0x20] sm:$0xff] %vm495_vm0, %v4826_v30  ;;  %v4894_v8 = vld [vmem:[#allocation2 + $0x85] sm:$0xff]  ;;  %v4172_v30 = vld [vmem:[#allocation2 + $0x1d0] sm:$0xff] }
 0x466   : > { %5238 = vst.msk [vmem:[#allocation3] sm:$0xff] %vm1084_vm2, %v5143_v53  ;;  %6303 = vrot.lane.b32.xlu0 %v10653_v51, %s8479_s17  ;;  %v4827_v37 = vld [vmem:[#allocation2 + $0x48] sm:$0xff] }
 0x467   : > { %v4953_v35 = vpop.permute.xlu1 %4952  ;;  %v4354_v40 = vld [vmem:[#allocation3 + $0x18] sm:$0xff] }
 0x468   : > { %5047 = vst.msk [vmem:[#allocation3 + $0x8] sm:$0xff] %vm891_vm1, %v4953_v35  ;;  %8238 = vmatmul.mubr.msk.f32.gmra.mrb[2].mxu1 %vm2313_vm10, %v4354_v40  ;;  %v5335_v13 = vpop.permute.xlu0 %5334  ;;  %v11065_v35 = vld [vmem:[#allocation2 + $0x10a] sm:$0xff] }
 0x469   : > { %4857 = vst.msk [vmem:[#allocation3 + $0x18] sm:$0xff] %vm495_vm0, %v4825_v18  ;;  %6113 = vrot.lane.b32.xlu1 %v11050_v26, %s8478_s16  ;;  %8240 = vmatprep.mubr.msk.f32.mxu1 %vm2313_vm10, %v4355_v39  ;;  %v11070_v39 = vld [vmem:[#allocation2 + $0x10d] sm:$0xff] }
 0x46a   : > { %5430 = vst.msk [vmem:[#allocation3] sm:$0xff] %vm1277_vm3, %v5335_v13  ;;  %4966 = vrot.lane.b32.xlu0 %v4894_v8, %s8472_s25  ;;  %v4895_v8 = vld [vmem:[#allocation2 + $0x8d] sm:$0xff] }
 0x46b   : > { %v5145_v51 = vpop.permute.xlu1 %5144  ;;  %v4356_v53 = vld [vmem:[#allocation3 + $0x28] sm:$0xff] }
 0x46c   : > { %5239 = vst.msk [vmem:[#allocation3 + $0x8] sm:$0xff] %vm1084_vm2, %v5145_v51  ;;  %8241 = vmatmul.mubr.msk.f32.gmra.mrb[4].mxu1 %vm2313_vm10, %v4356_v53  ;;  %v5337_v18 = vpop.permute.xlu0 %5336  ;;  %v11082_v51 = vld [vmem:[#allocation2 + $0x112] sm:$0xff] }
 0x46d   : > { %4859 = vst.msk [vmem:[#allocation3 + $0x28] sm:$0xff] %vm495_vm0, %v4827_v37  ;;  %4249 = vrot.lane.b32.xlu1 %v4172_v30, %s8479_s17  ;;  %v11078_v37 = vld [vmem:[#allocation2 + $0x192] sm:$0xff] }
 0x46e   : > { %5431 = vst.msk [vmem:[#allocation3 + $0x8] sm:$0xff] %vm1277_vm3, %v5337_v18  ;;  %5730 = vrot.lane.b32.xlu0 %v11065_v35, %s8476_s29  ;;  %v4828_v18 = vld [vmem:[#allocation2 + $0x60] sm:$0xff] }
 0x46f   : > { %v4236_v40 = vpop.permute.xlu1 %4235 }
 0x470   : > { %4325 = vst.msk [vmem:[#allocation3 + $0x30] sm:$0xff] %vm2243_vm9, %v4236_v40  ;;  %v4238_v13 = vpop.permute.xlu0 %4237  ;;  %v5086_v40 = vld [vmem:[#allocation2 + $0x8a] sm:$0xff] }
 0x471   : > { %5540 = vrot.lane.b32.xlu1 %v11070_v39, %s8475_s28  ;;  %4326 = vst.msk [vmem:[#allocation3 + $0x38] sm:$0xff] %vm2243_vm9, %v4238_v13 }
 0x472   : > { %4968 = vrot.lane.b32.xlu0 %v4895_v8, %s8472_s25  ;;  %v5087_v8 = vld [vmem:[#allocation2 + $0x92] sm:$0xff] }
 0x473   : > { %v5527_v30 = vpop.permute.xlu1 %5526 }
 0x474   : > { %5622 = vst.msk [vmem:[#allocation3] sm:$0xff] %vm1470_vm4, %v5527_v30  ;;  %v5529_v53 = vpop.permute.xlu0 %5528 }
 0x475   : > { %6305 = vrot.lane.b32.xlu1 %v11078_v37, %s8479_s17  ;;  %5623 = vst.msk [vmem:[#allocation3 + $0x8] sm:$0xff] %vm1470_vm4, %v5529_v53  ;;  %v11095_v53 = vld [vmem:[#allocation2 + $0x1a0] sm:$0xff] }
 0x476   : > { %5732 = vrot.lane.b32.xlu0 %v11082_v51, %s8476_s29 }
 0x477   : > { %v4955_v13 = vpop.permute.xlu1 %4954  ;;  %v4357_v22 = vld [vmem:[#allocation3 + $0x30] sm:$0xff] }
 0x478   : > { %5048 = vst.msk [vmem:[#allocation3 + $0x10] sm:$0xff] %vm891_vm1, %v4955_v13  ;;  %8243 = vmatprep.mubr.msk.f32.mxu1 %vm2313_vm10, %v4357_v22  ;;  %v4957_v30 = vpop.permute.xlu0 %4956  ;;  %v4358_v57 = vld [vmem:[#allocation3 + $0x38] sm:$0xff] }
 0x479   : > { %4860 = vst.msk [vmem:[#allocation3 + $0x30] sm:$0xff] %vm495_vm0, %v4828_v18  ;;  %5158 = vrot.lane.b32.xlu1 %v5086_v40, %s8473_s26  ;;  %8244 = vmatmul.mubr.msk.f32.gmra.mrb[6].mxu1 %vm2313_vm10, %v4358_v57  ;;  %4861 = vst.msk [vmem:[#allocation3 + $0x38] sm:$0xff] %vm495_vm0, %v4829_v11  ;;  %v5278_v18 = vld [vmem:[#allocation2 + $0x120] sm:$0xff]  ;;  %v11106_v40 = vld [vmem:[#allocation2 + $0x1e8] sm:$0xff] }
 0x47a   : > { %5049 = vst.msk [vmem:[#allocation3 + $0x18] sm:$0xff] %vm891_vm1, %v4957_v30  ;;  %5160 = vrot.lane.b32.xlu0 %v5087_v8, %s8473_s26  ;;  %v11110_v8 = vld [vmem:[#allocation2 + $0x1a5] sm:$0xff] }
 0x47b   : > { %v5719_v13 = vpop.permute.xlu1 %5718 }
 0x47c   : > { %5814 = vst.msk [vmem:[#allocation3] sm:$0xff] %vm1663_vm5, %v5719_v13  ;;  %v5721_v22 = vpop.permute.xlu0 %5720  ;;  %v11115_v13 = vld [vmem:[#allocation2 + $0x125] sm:$0xff] }
 0x47d   : > { %5923 = vrot.lane.b32.xlu1 %v11095_v53, %s8477_s30  ;;  %5815 = vst.msk [vmem:[#allocation3 + $0x8] sm:$0xff] %vm1663_vm5, %v5721_v22 }
 0x47e   : > { %5925 = vrot.lane.b32.xlu0 %v10959_v62, %s8477_s30 }
 0x47f   : > { %v5147_v57 = vpop.permute.xlu1 %5146 }
 0x480   : > { %5240 = vst.msk [vmem:[#allocation3 + $0x10] sm:$0xff] %vm1084_vm2, %v5147_v57  ;;  %v5149_v11 = vpop.permute.xlu0 %5148 }
 0x481   : > { %5350 = vrot.lane.b32.xlu1 %v5278_v18, %s8474_s27  ;;  %5241 = vst.msk [vmem:[#allocation3 + $0x18] sm:$0xff] %vm1084_vm2, %v5149_v11  ;;  %v11123_v18 = vld [vmem:[#allocation2 + $0x1aa] sm:$0xff] }
 0x482   : > { %4251 = vrot.lane.b32.xlu0 %v11106_v40, %s8479_s17  ;;  %v11128_v11 = vld [vmem:[#allocation2 + $0x1ad] sm:$0xff] }
 0x483   : > { %v5912_v30 = vpop.permute.xlu1 %5911 }
 0x484   : > { %6007 = vst.msk [vmem:[#allocation3] sm:$0xff] %vm1857_vm6, %v5912_v30  ;;  %v5914_v62 = vpop.permute.xlu0 %5913 }
 0x485   : > { %6115 = vrot.lane.b32.xlu1 %v11110_v8, %s8478_s16  ;;  %6008 = vst.msk [vmem:[#allocation3 + $0x8] sm:$0xff] %vm1857_vm6, %v5914_v62 }
 0x486   : > { %5542 = vrot.lane.b32.xlu0 %v11115_v13, %s8475_s28 }
 0x487   : > { %v5339_v22 = vpop.permute.xlu1 %5338 }
 0x488   : > { %5432 = vst.msk [vmem:[#allocation3 + $0x10] sm:$0xff] %vm1277_vm3, %v5339_v22  ;;  %v4240_v57 = vpop.permute.xlu0 %4239  ;;  %v4174_v22 = vld [vmem:[#allocation2 + $0x1f0] sm:$0xff] }
 0x489   : > { %5352 = vrot.lane.b32.xlu1 %v10802_v28, %s8474_s27  ;;  %4327 = vst.msk [vmem:[#allocation3 + $0x40] sm:$0xff] %vm2243_vm9, %v4240_v57  ;;  %v4830_v57 = vld [vmem:[#allocation2 + $0x80] sm:$0xff] }
 0x48a   : > { %6307 = vrot.lane.b32.xlu0 %v11123_v18, %s8479_s17 }
 0x48b   : > { %v6104_v30 = vpop.permute.xlu1 %6103 }
 0x48c   : > { %6199 = vst.msk [vmem:[#allocation3] sm:$0xff] %vm2050_vm8, %v6104_v30  ;;  %v5531_v62 = vpop.permute.xlu0 %5530 }
 0x48d   : > { %6117 = vrot.lane.b32.xlu1 %v11128_v11, %s8478_s16  ;;  %5624 = vst.msk [vmem:[#allocation3 + $0x10] sm:$0xff] %vm1470_vm4, %v5531_v62 }
 0x48e   : > { %4970 = vrot.lane.b32.xlu0 %v10839_v36, %s8472_s25 }
 0x48f   : > { %v5341_v28 = vpop.permute.xlu1 %5340 }
 0x490   : > { %5433 = vst.msk [vmem:[#allocation3 + $0x18] sm:$0xff] %vm1277_vm3, %v5341_v28  ;;  %v6296_v47 = vpop.permute.xlu0 %6295  ;;  %v4359_v30 = vld [vmem:[#allocation3 + $0x40] sm:$0xff]  ;;  %v11158_v28 = vld [vmem:[#allocation2 + $0x132] sm:$0xff] }
 0x491   : > { %4253 = vrot.lane.b32.xlu1 %v4174_v22, %s8479_s17  ;;  %6391 = vst.msk [vmem:[#allocation3] sm:$0xff] %vm2243_vm9, %v6296_v47  ;;  %8246 = vmatprep.mubr.msk.f32.mxu1 %vm2313_vm10, %v4359_v30  ;;  %v11153_v22 = vld [vmem:[#allocation2 + $0x1b2] sm:$0xff] }
 0x492   : > { %4862 = vst.msk [vmem:[#allocation3 + $0x40] sm:$0xff] %vm495_vm0, %v4830_v57  ;;  %5734 = vrot.lane.b32.xlu0 %v11139_v59, %s8476_s29 }
 0x493   : > { %v6106_v36 = vpop.permute.xlu1 %6105 }
 0x494   : > { %6200 = vst.msk [vmem:[#allocation3 + $0x8] sm:$0xff] %vm2050_vm8, %v6106_v36  ;;  %v4959_v62 = vpop.permute.xlu0 %4958 }
 0x495   : > { %5544 = vrot.lane.b32.xlu1 %v11143_v19, %s8475_s28  ;;  %5050 = vst.msk [vmem:[#allocation3 + $0x20] sm:$0xff] %vm891_vm1, %v4959_v62  ;;  %v4831_v62 = vld [vmem:[#allocation2 + $0x88] sm:$0xff] }
 0x496   : > { %4972 = vrot.lane.b32.xlu0 %v10843_v23, %s8472_s25 }
 0x497   : > { %v4242_v47 = vpop.permute.xlu1 %4241 }
 0x498   : > { %4328 = vst.msk [vmem:[#allocation3 + $0x48] sm:$0xff] %vm2243_vm9, %v4242_v47  ;;  %v5723_v57 = vpop.permute.xlu0 %5722  ;;  %v6423_v30 = vld [vmem:[#allocation3] sm:$0xff] }
 0x499   : > { %6309 = vrot.lane.b32.xlu1 %v11153_v22, %s8479_s17  ;;  %5816 = vst.msk [vmem:[#allocation3 + $0x10] sm:$0xff] %vm1663_vm5, %v5723_v57  ;;  %8292 = vmatprep.mubr.msk.f32.mxu0 %vm2313_vm10, %v6423_v30  ;;  %v11170_v47 = vld [vmem:[#allocation2 + $0x1c0] sm:$0xff] }
 0x49a   : > { %5736 = vrot.lane.b32.xlu0 %v11158_v28, %s8476_s29 }
 0x49b   : > { %v5533_v36 = vpop.permute.xlu1 %5532 }
 0x49c   : > { %5625 = vst.msk [vmem:[#allocation3 + $0x18] sm:$0xff] %vm1470_vm4, %v5533_v36  ;;  %v4961_v23 = vpop.permute.xlu0 %4960 }
 0x49d   : > { %5162 = vrot.lane.b32.xlu1 %v10853_v24, %s8473_s26  ;;  %5051 = vst.msk [vmem:[#allocation3 + $0x28] sm:$0xff] %vm891_vm1, %v4961_v23 }
 0x49e   : > { %5164 = vrot.lane.b32.xlu0 %v10857_v48, %s8473_s26  ;;  %v11183_v48 = vld [vmem:[#allocation2 + $0x208] sm:$0xff] }
 0x49f   : > { %v6298_v57 = vpop.permute.xlu1 %6297  ;;  %v4360_v30 = vld [vmem:[#allocation3 + $0x48] sm:$0xff] }
 0x4a0   : > { %6392 = vst.msk [vmem:[#allocation3 + $0x8] sm:$0xff] %vm2243_vm9, %v6298_v57  ;;  %8247 = vmatmul.mubr.msk.f32.gmra.mrb[8].mxu1 %vm2313_vm10, %v4360_v30  ;;  %v5725_v36 = vpop.permute.xlu0 %5724 }
 0x4a1   : > { %4863 = vst.msk [vmem:[#allocation3 + $0x48] sm:$0xff] %vm495_vm0, %v4831_v62  ;;  %5927 = vrot.lane.b32.xlu1 %v11170_v47, %s8477_s30  ;;  %v11188_v62 = vld [vmem:[#allocation2 + $0x1c5] sm:$0xff] }
 0x4a2   : > { %5817 = vst.msk [vmem:[#allocation3 + $0x18] sm:$0xff] %vm1663_vm5, %v5725_v36  ;;  %5929 = vrot.lane.b32.xlu0 %v11024_v41, %s8477_s30  ;;  %v11200_v36 = vld [vmem:[#allocation2 + $0x1ca] sm:$0xff] }
 0x4a3   : > { %v5151_v24 = vpop.permute.xlu1 %5150 }
 0x4a4   : > { %5242 = vst.msk [vmem:[#allocation3 + $0x20] sm:$0xff] %vm1084_vm2, %v5151_v24  ;;  %v5153_v23 = vpop.permute.xlu0 %5152 }
 0x4a5   : > { %5354 = vrot.lane.b32.xlu1 %v10867_v60, %s8474_s27  ;;  %5243 = vst.msk [vmem:[#allocation3 + $0x28] sm:$0xff] %vm1084_vm2, %v5153_v23  ;;  %v11205_v23 = vld [vmem:[#allocation2 + $0x1cd] sm:$0xff] }
 0x4a6   : > { %4255 = vrot.lane.b32.xlu0 %v11183_v48, %s8479_s17 }
 0x4a7   : > { %v5916_v57 = vpop.permute.xlu1 %5915  ;;  %v6424_v30 = vld [vmem:[#allocation3 + $0x8] sm:$0xff] }
 0x4a8   : > { %6009 = vst.msk [vmem:[#allocation3 + $0x10] sm:$0xff] %vm1857_vm6, %v5916_v57  ;;  %8293 = vmatmul.mubr.msk.f32.vlgmr.msra.gmra.mrb[32].mxu0 %vm2313_vm10, %v6424_v30  ;;  %v5918_v41 = vpop.permute.xlu0 %5917  ;;  %v4176_v30 = vld [vmem:[#allocation2 + $0x210] sm:$0xff] }
 0x4a9   : > { %6119 = vrot.lane.b32.xlu1 %v11188_v62, %s8478_s16  ;;  %6010 = vst.msk [vmem:[#allocation3 + $0x18] sm:$0xff] %vm1857_vm6, %v5918_v41  ;;  %v4832_v41 = vld [vmem:[#allocation2 + $0xa0] sm:$0xff] }
 0x4aa   : > { %5546 = vrot.lane.b32.xlu0 %v10881_v10, %s8475_s28 }
 0x4ab   : > { %v5343_v60 = vpop.permute.xlu1 %5342 }
 0x4ac   : > { %5434 = vst.msk [vmem:[#allocation3 + $0x20] sm:$0xff] %vm1277_vm3, %v5343_v60  ;;  %v4244_v24 = vpop.permute.xlu0 %4243  ;;  %v11216_v60 = vld [vmem:[#allocation2 + $0x14a] sm:$0xff] }
 0x4ad   : > { %5356 = vrot.lane.b32.xlu1 %v10811_v49, %s8474_s27  ;;  %4329 = vst.msk [vmem:[#allocation3 + $0x50] sm:$0xff] %vm2243_vm9, %v4244_v24 }
 0x4ae   : > { %6311 = vrot.lane.b32.xlu0 %v11200_v36, %s8479_s17 }
 0x4af   : > { %v6108_v57 = vpop.permute.xlu1 %6107 }
 0x4b0   : > { %6201 = vst.msk [vmem:[#allocation3 + $0x10] sm:$0xff] %vm2050_vm8, %v6108_v57  ;;  %v5535_v10 = vpop.permute.xlu0 %5534 }
 0x4b1   : > { %6121 = vrot.lane.b32.xlu1 %v11205_v23, %s8478_s16  ;;  %5626 = vst.msk [vmem:[#allocation3 + $0x20] sm:$0xff] %vm1470_vm4, %v5535_v10 }
 0x4b2   : > { %4974 = vrot.lane.b32.xlu0 %v10886_v33, %s8472_s25 }
 0x4b3   : > { %v5345_v49 = vpop.permute.xlu1 %5344 }
 0x4b4   : > { %5435 = vst.msk [vmem:[#allocation3 + $0x28] sm:$0xff] %vm1277_vm3, %v5345_v49  ;;  %v6300_v24 = vpop.permute.xlu0 %6299  ;;  %v4361_v57 = vld [vmem:[#allocation3 + $0x50] sm:$0xff] }
 0x4b5   : > { %4257 = vrot.lane.b32.xlu1 %v4176_v30, %s8479_s17  ;;  %6393 = vst.msk [vmem:[#allocation3 + $0x10] sm:$0xff] %vm2243_vm9, %v6300_v24  ;;  %8249 = vmatprep.mubr.msk.f32.mxu1 %vm2313_vm10, %v4361_v57  ;;  %v11228_v30 = vld [vmem:[#allocation2 + $0x1d2] sm:$0xff] }
 0x4b6   : > { %4864 = vst.msk [vmem:[#allocation3 + $0x50] sm:$0xff] %vm495_vm0, %v4832_v41  ;;  %5738 = vrot.lane.b32.xlu0 %v11216_v60, %s8476_s29 }
 0x4b7   : > { %v6110_v33 = vpop.permute.xlu1 %6109 }
 0x4b8   : > { %6202 = vst.msk [vmem:[#allocation3 + $0x18] sm:$0xff] %vm2050_vm8, %v6110_v33  ;;  %v4963_v10 = vpop.permute.xlu0 %4962  ;;  %v11243_v33 = vld [vmem:[#allocation2 + $0x1e0] sm:$0xff] }
 0x4b9   : > { %5548 = vrot.lane.b32.xlu1 %v10902_v21, %s8475_s28  ;;  %5052 = vst.msk [vmem:[#allocation3 + $0x30] sm:$0xff] %vm891_vm1, %v4963_v10 }
 0x4ba   : > { %4976 = vrot.lane.b32.xlu0 %v10925_v63, %s8472_s25  ;;  %v4833_v63 = vld [vmem:[#allocation2 + $0xa8] sm:$0xff] }
 0x4bb   : > { %v4246_v49 = vpop.permute.xlu1 %4245 }
 0x4bc   : > { %4330 = vst.msk [vmem:[#allocation3 + $0x58] sm:$0xff] %vm2243_vm9, %v4246_v49  ;;  %v5727_v41 = vpop.permute.xlu0 %5726  ;;  %v6425_v24 = vld [vmem:[#allocation3 + $0x10] sm:$0xff] }
 0x4bd   : > { %6313 = vrot.lane.b32.xlu1 %v11228_v30, %s8479_s17  ;;  %5818 = vst.msk [vmem:[#allocation3 + $0x20] sm:$0xff] %vm1663_vm5, %v5727_v41  ;;  %8295 = vmatprep.mubr.msk.f32.mxu0 %vm2313_vm10, %v6425_v24  ;;  %v11261_v24 = vld [vmem:[#allocation2 + $0x1e5] sm:$0xff] }
 0x4be   : > { %5740 = vrot.lane.b32.xlu0 %v10935_v2, %s8476_s29 }
 0x4bf   : > { %v5537_v21 = vpop.permute.xlu1 %5536 }
 0x4c0   : > { %5627 = vst.msk [vmem:[#allocation3 + $0x28] sm:$0xff] %vm1470_vm4, %v5537_v21  ;;  %v4965_v57 = vpop.permute.xlu0 %4964 }
 0x4c1   : > { %5166 = vrot.lane.b32.xlu1 %v10918_v16, %s8473_s26  ;;  %5053 = vst.msk [vmem:[#allocation3 + $0x38] sm:$0xff] %vm891_vm1, %v4965_v57 }
 0x4c2   : > { %5168 = vrot.lane.b32.xlu0 %v10939_v43, %s8473_s26  ;;  %v11256_v43 = vld [vmem:[#allocation2 + $0x228] sm:$0xff] }
 0x4c3   : > { %v6302_v10 = vpop.permute.xlu1 %6301  ;;  %v4362_v49 = vld [vmem:[#allocation3 + $0x58] sm:$0xff] }
 0x4c4   : > { %6394 = vst.msk [vmem:[#allocation3 + $0x18] sm:$0xff] %vm2243_vm9, %v6302_v10  ;;  %8250 = vmatmul.mubr.msk.f32.gmra.mrb[10].mxu1 %vm2313_vm10, %v4362_v49  ;;  %v5729_v2 = vpop.permute.xlu0 %5728  ;;  %v11278_v49 = vld [vmem:[#allocation2 + $0x1ed] sm:$0xff] }
 0x4c5   : > { %4865 = vst.msk [vmem:[#allocation3 + $0x58] sm:$0xff] %vm495_vm0, %v4833_v63  ;;  %5931 = vrot.lane.b32.xlu1 %v11243_v33, %s8477_s30  ;;  %v11273_v63 = vld [vmem:[#allocation2 + $0x1ea] sm:$0xff] }
 0x4c6   : > { %5819 = vst.msk [vmem:[#allocation3 + $0x28] sm:$0xff] %vm1663_vm5, %v5729_v2  ;;  %5933 = vrot.lane.b32.xlu0 %v11106_v40, %s8477_s30 }
 0x4c7   : > { %v5155_v16 = vpop.permute.xlu1 %5154 }
 0x4c8   : > { %5244 = vst.msk [vmem:[#allocation3 + $0x30] sm:$0xff] %vm1084_vm2, %v5155_v16  ;;  %v5157_v41 = vpop.permute.xlu0 %5156  ;;  %v4178_v16 = vld [vmem:[#allocation2 + $0x230] sm:$0xff] }
 0x4c9   : > { %5358 = vrot.lane.b32.xlu1 %v10949_v3, %s8474_s27  ;;  %5245 = vst.msk [vmem:[#allocation3 + $0x38] sm:$0xff] %vm1084_vm2, %v5157_v41  ;;  %v4834_v41 = vld [vmem:[#allocation2 + $0xc0] sm:$0xff] }
 0x4ca   : > { %4259 = vrot.lane.b32.xlu0 %v11256_v43, %s8479_s17 }
 0x4cb   : > { %v5920_v21 = vpop.permute.xlu1 %5919  ;;  %v6426_v57 = vld [vmem:[#allocation3 + $0x18] sm:$0xff] }
 0x4cc   : > { %6011 = vst.msk [vmem:[#allocation3 + $0x20] sm:$0xff] %vm1857_vm6, %v5920_v21  ;;  %8296 = vmatmul.mubr.msk.f32.gmra.mrb[34].mxu0 %vm2313_vm10, %v6426_v57  ;;  %v5922_v40 = vpop.permute.xlu0 %5921  ;;  %v11289_v21 = vld [vmem:[#allocation2 + $0x16a] sm:$0xff] }
 0x4cd   : > { %6123 = vrot.lane.b32.xlu1 %v11261_v24, %s8478_s16  ;;  %6012 = vst.msk [vmem:[#allocation3 + $0x28] sm:$0xff] %vm1857_vm6, %v5922_v40 }
 0x4ce   : > { %5550 = vrot.lane.b32.xlu0 %v10963_v1, %s8475_s28 }
 0x4cf   : > { %v5347_v3 = vpop.permute.xlu1 %5346 }
 0x4d0   : > { %5436 = vst.msk [vmem:[#allocation3 + $0x30] sm:$0xff] %vm1277_vm3, %v5347_v3  ;;  %v4248_v10 = vpop.permute.xlu0 %4247 }
 0x4d1   : > { %5360 = vrot.lane.b32.xlu1 %v10832_v56, %s8474_s27  ;;  %4331 = vst.msk [vmem:[#allocation3 + $0x60] sm:$0xff] %vm2243_vm9, %v4248_v10  ;;  %v11301_v10 = vld [vmem:[#allocation2 + $0x1f2] sm:$0xff] }
 0x4d2   : > { %6315 = vrot.lane.b32.xlu0 %v11273_v63, %s8479_s17 }
 0x4d3   : > { %v6112_v2 = vpop.permute.xlu1 %6111 }
 0x4d4   : > { %6203 = vst.msk [vmem:[#allocation3 + $0x20] sm:$0xff] %vm2050_vm8, %v6112_v2  ;;  %v5539_v1 = vpop.permute.xlu0 %5538 }
 0x4d5   : > { %6125 = vrot.lane.b32.xlu1 %v11278_v49, %s8478_s16  ;;  %5628 = vst.msk [vmem:[#allocation3 + $0x30] sm:$0xff] %vm1470_vm4, %v5539_v1 }
 0x4d6   : > { %4978 = vrot.lane.b32.xlu0 %v10968_v15, %s8472_s25 }
 0x4d7   : > { %v5349_v56 = vpop.permute.xlu1 %5348 }
 0x4d8   : > { %5437 = vst.msk [vmem:[#allocation3 + $0x38] sm:$0xff] %vm1277_vm3, %v5349_v56  ;;  %v6304_v57 = vpop.permute.xlu0 %6303  ;;  %v4363_v40 = vld [vmem:[#allocation3 + $0x60] sm:$0xff] }
 0x4d9   : > { %4261 = vrot.lane.b32.xlu1 %v4178_v16, %s8479_s17  ;;  %6395 = vst.msk [vmem:[#allocation3 + $0x20] sm:$0xff] %vm2243_vm9, %v6304_v57  ;;  %8252 = vmatprep.mubr.msk.f32.mxu1 %vm2313_vm10, %v4363_v40 }
 0x4da   : > { %4866 = vst.msk [vmem:[#allocation3 + $0x60] sm:$0xff] %vm495_vm0, %v4834_v41  ;;  %5742 = vrot.lane.b32.xlu0 %v11289_v21, %s8476_s29  ;;  %v11316_v41 = vld [vmem:[#allocation2 + $0x200] sm:$0xff] }
 0x4db   : > { %v6114_v15 = vpop.permute.xlu1 %6113 }
 0x4dc   : > { %6204 = vst.msk [vmem:[#allocation3 + $0x28] sm:$0xff] %vm2050_vm8, %v6114_v15  ;;  %v4967_v3 = vpop.permute.xlu0 %4966 }
 0x4dd   : > { %5552 = vrot.lane.b32.xlu1 %v10978_v54, %s8475_s28  ;;  %5054 = vst.msk [vmem:[#allocation3 + $0x40] sm:$0xff] %vm891_vm1, %v4967_v3  ;;  %v11334_v3 = vld [vmem:[#allocation2 + $0x205] sm:$0xff] }
 0x4de   : > { %4980 = vrot.lane.b32.xlu0 %v10992_v31, %s8472_s25  ;;  %v4835_v31 = vld [vmem:[#allocation2 + $0xc8] sm:$0xff] }
 0x4df   : > { %v4250_v2 = vpop.permute.xlu1 %4249 }
 0x4e0   : > { %4332 = vst.msk [vmem:[#allocation3 + $0x68] sm:$0xff] %vm2243_vm9, %v4250_v2  ;;  %v5731_v1 = vpop.permute.xlu0 %5730  ;;  %v6427_v16 = vld [vmem:[#allocation3 + $0x20] sm:$0xff] }
 0x4e1   : > { %6317 = vrot.lane.b32.xlu1 %v11301_v10, %s8479_s17  ;;  %5820 = vst.msk [vmem:[#allocation3 + $0x30] sm:$0xff] %vm1663_vm5, %v5731_v1  ;;  %8298 = vmatprep.mubr.msk.f32.mxu0 %vm2313_vm10, %v6427_v16 }
 0x4e2   : > { %5744 = vrot.lane.b32.xlu0 %v11000_v55, %s8476_s29 }
 0x4e3   : > { %v5541_v54 = vpop.permute.xlu1 %5540 }
 0x4e4   : > { %5629 = vst.msk [vmem:[#allocation3 + $0x38] sm:$0xff] %vm1470_vm4, %v5541_v54  ;;  %v4969_v56 = vpop.permute.xlu0 %4968  ;;  %v11346_v54 = vld [vmem:[#allocation2 + $0x20a] sm:$0xff] }
 0x4e5   : > { %5170 = vrot.lane.b32.xlu1 %v10988_v38, %s8473_s26  ;;  %5055 = vst.msk [vmem:[#allocation3 + $0x48] sm:$0xff] %vm891_vm1, %v4969_v56 }
 0x4e6   : > { %5172 = vrot.lane.b32.xlu0 %v11004_v6, %s8473_s26  ;;  %v11329_v6 = vld [vmem:[#allocation2 + $0x248] sm:$0xff] }
 0x4e7   : > { %v6306_v57 = vpop.permute.xlu1 %6305  ;;  %v4364_v40 = vld [vmem:[#allocation3 + $0x68] sm:$0xff] }
 0x4e8   : > { %6396 = vst.msk [vmem:[#allocation3 + $0x28] sm:$0xff] %vm2243_vm9, %v6306_v57  ;;  %8253 = vmatmul.mubr.msk.f32.gmra.mrb[12].mxu1 %vm2313_vm10, %v4364_v40  ;;  %v5733_v55 = vpop.permute.xlu0 %5732 }
 0x4e9   : > { %4867 = vst.msk [vmem:[#allocation3 + $0x68] sm:$0xff] %vm495_vm0, %v4835_v31  ;;  %5935 = vrot.lane.b32.xlu1 %v11316_v41, %s8477_s30  ;;  %v11350_v31 = vld [vmem:[#allocation2 + $0x20d] sm:$0xff] }
 0x4ea   : > { %5821 = vst.msk [vmem:[#allocation3 + $0x38] sm:$0xff] %vm1663_vm5, %v5733_v55  ;;  %5937 = vrot.lane.b32.xlu0 %v11183_v48, %s8477_s30 }
 0x4eb   : > { %v5159_v38 = vpop.permute.xlu1 %5158 }
 0x4ec   : > { %5246 = vst.msk [vmem:[#allocation3 + $0x40] sm:$0xff] %vm1084_vm2, %v5159_v38  ;;  %v5161_v15 = vpop.permute.xlu0 %5160  ;;  %v4836_v38 = vld [vmem:[#allocation2 + $0xe0] sm:$0xff] }
 0x4ed   : > { %5362 = vrot.lane.b32.xlu1 %v11014_v29, %s8474_s27  ;;  %5247 = vst.msk [vmem:[#allocation3 + $0x48] sm:$0xff] %vm1084_vm2, %v5161_v15  ;;  %v5285_v29 = vld [vmem:[#allocation2 + $0x188] sm:$0xff] }
 0x4ee   : > { %4263 = vrot.lane.b32.xlu0 %v11329_v6, %s8479_s17  ;;  %v11361_v15 = vld [vmem:[#allocation2 + $0x18a] sm:$0xff] }
 0x4ef   : > { %v5924_v2 = vpop.permute.xlu1 %5923  ;;  %v6428_v1 = vld [vmem:[#allocation3 + $0x28] sm:$0xff] }
 0x4f0   : > { %6013 = vst.msk [vmem:[#allocation3 + $0x30] sm:$0xff] %vm1857_vm6, %v5924_v2  ;;  %8299 = vmatmul.mubr.msk.f32.gmra.mrb[36].mxu0 %vm2313_vm10, %v6428_v1  ;;  %v5926_v48 = vpop.permute.xlu0 %5925 }
 0x4f1   : > { %6127 = vrot.lane.b32.xlu1 %v11334_v3, %s8478_s16  ;;  %6014 = vst.msk [vmem:[#allocation3 + $0x38] sm:$0xff] %vm1857_vm6, %v5926_v48 }
 0x4f2   : > { %5554 = vrot.lane.b32.xlu0 %v11028_v52, %s8475_s28  ;;  %v4180_v52 = vld [vmem:[#allocation2 + $0x250] sm:$0xff] }
 0x4f3   : > { %v5351_v16 = vpop.permute.xlu1 %5350 }
 0x4f4   : > { %5438 = vst.msk [vmem:[#allocation3 + $0x40] sm:$0xff] %vm1277_vm3, %v5351_v16  ;;  %v4252_v56 = vpop.permute.xlu0 %4251 }
 0x4f5   : > { %5364 = vrot.lane.b32.xlu1 %v5285_v29, %s8474_s27  ;;  %4333 = vst.msk [vmem:[#allocation3 + $0x70] sm:$0xff] %vm2243_vm9, %v4252_v56  ;;  %v11373_v29 = vld [vmem:[#allocation2 + $0x212] sm:$0xff] }
 0x4f6   : > { %6319 = vrot.lane.b32.xlu0 %v11346_v54, %s8479_s17 }
 0x4f7   : > { %v6116_v57 = vpop.permute.xlu1 %6115 }
 0x4f8   : > { %6205 = vst.msk [vmem:[#allocation3 + $0x30] sm:$0xff] %vm2050_vm8, %v6116_v57  ;;  %v5543_v40 = vpop.permute.xlu0 %5542 }
 0x4f9   : > { %6129 = vrot.lane.b32.xlu1 %v11350_v31, %s8478_s16  ;;  %5630 = vst.msk [vmem:[#allocation3 + $0x40] sm:$0xff] %vm1470_vm4, %v5543_v40  ;;  %v11385_v40 = vld [vmem:[#allocation2 + $0x265] sm:$0xff] }
 0x4fa   : > { %4982 = vrot.lane.b32.xlu0 %v11035_v20, %s8472_s25 }
 0x4fb   : > { %v5353_v55 = vpop.permute.xlu1 %5352 }
 0x4fc   : > { %5439 = vst.msk [vmem:[#allocation3 + $0x48] sm:$0xff] %vm1277_vm3, %v5353_v55  ;;  %v6308_v2 = vpop.permute.xlu0 %6307  ;;  %v4365_v1 = vld [vmem:[#allocation3 + $0x70] sm:$0xff]  ;;  %v11390_v55 = vld [vmem:[#allocation2 + $0x220] sm:$0xff] }
 0x4fd   : > { %4265 = vrot.lane.b32.xlu1 %v4180_v52, %s8479_s17  ;;  %6397 = vst.msk [vmem:[#allocation3 + $0x30] sm:$0xff] %vm2243_vm9, %v6308_v2  ;;  %8255 = vmatprep.mubr.msk.f32.mxu1 %vm2313_vm10, %v4365_v1  ;;  %v4837_v52 = vld [vmem:[#allocation2 + $0xe8] sm:$0xff] }
 0x4fe   : > { %4868 = vst.msk [vmem:[#allocation3 + $0x70] sm:$0xff] %vm495_vm0, %v4836_v38  ;;  %5746 = vrot.lane.b32.xlu0 %v11361_v15, %s8476_s29  ;;  %v11403_v1 = vld [vmem:[#allocation2 + $0x225] sm:$0xff] }
 0x4ff   : > { %v6118_v20 = vpop.permute.xlu1 %6117 }
 0x500   : > { %6206 = vst.msk [vmem:[#allocation3 + $0x38] sm:$0xff] %vm2050_vm8, %v6118_v20  ;;  %v4971_v48 = vpop.permute.xlu0 %4970 }
 0x501   : > { %5556 = vrot.lane.b32.xlu1 %v11050_v26, %s8475_s28  ;;  %5056 = vst.msk [vmem:[#allocation3 + $0x50] sm:$0xff] %vm891_vm1, %v4971_v48 }
 0x502   : > { %4984 = vrot.lane.b32.xlu0 %v11070_v39, %s8472_s25 }
 0x503   : > { %v4254_v16 = vpop.permute.xlu1 %4253 }
 0x504   : > { %4334 = vst.msk [vmem:[#allocation3 + $0x78] sm:$0xff] %vm2243_vm9, %v4254_v16  ;;  %v5735_v56 = vpop.permute.xlu0 %5734  ;;  %v6429_v57 = vld [vmem:[#allocation3 + $0x30] sm:$0xff] }
 0x505   : > { %6321 = vrot.lane.b32.xlu1 %v11373_v29, %s8479_s17  ;;  %5822 = vst.msk [vmem:[#allocation3 + $0x40] sm:$0xff] %vm1663_vm5, %v5735_v56  ;;  %8301 = vmatprep.mubr.msk.f32.mxu0 %vm2313_vm10, %v6429_v57 }
 0x506   : > { %5748 = vrot.lane.b32.xlu0 %v11078_v37, %s8476_s29 }
 0x507   : > { %v5545_v26 = vpop.permute.xlu1 %5544 }
 0x508   : > { %5631 = vst.msk [vmem:[#allocation3 + $0x48] sm:$0xff] %vm1470_vm4, %v5545_v26  ;;  %v4973_v39 = vpop.permute.xlu0 %4972 }
 0x509   : > { %5174 = vrot.lane.b32.xlu1 %v11065_v35, %s8473_s26  ;;  %5057 = vst.msk [vmem:[#allocation3 + $0x58] sm:$0xff] %vm891_vm1, %v4973_v39  ;;  %v5287_v39 = vld [vmem:[#allocation2 + $0x1a8] sm:$0xff] }
 0x50a   : > { %4075 = vrot.lane.b32.xlu0 %v11385_v40, %s8478_s16 }
 0x50b   : > { %v6310_v38 = vpop.permute.xlu1 %6309  ;;  %v4366_v2 = vld [vmem:[#allocation3 + $0x78] sm:$0xff] }
 0x50c   : > { %6398 = vst.msk [vmem:[#allocation3 + $0x38] sm:$0xff] %vm2243_vm9, %v6310_v38  ;;  %8256 = vmatmul.mubr.msk.f32.gmra.mrb[14].mxu1 %vm2313_vm10, %v4366_v2  ;;  %v5737_v37 = vpop.permute.xlu0 %5736  ;;  %v11432_v2 = vld [vmem:[#allocation2 + $0x22d] sm:$0xff] }
 0x50d   : > { %4869 = vst.msk [vmem:[#allocation3 + $0x78] sm:$0xff] %vm495_vm0, %v4837_v52  ;;  %5939 = vrot.lane.b32.xlu1 %v11390_v55, %s8477_s30  ;;  %v11428_v52 = vld [vmem:[#allocation2 + $0x22a] sm:$0xff] }
 0x50e   : > { %5823 = vst.msk [vmem:[#allocation3 + $0x48] sm:$0xff] %vm1663_vm5, %v5737_v37  ;;  %5366 = vrot.lane.b32.xlu0 %v11095_v53, %s8474_s27  ;;  %v11412_v53 = vld [vmem:[#allocation2 + $0x268] sm:$0xff] }
 0x50f   : > { %v5163_v35 = vpop.permute.xlu1 %5162 }
 0x510   : > { %5248 = vst.msk [vmem:[#allocation3 + $0x50] sm:$0xff] %vm1084_vm2, %v5163_v35  ;;  %v5165_v20 = vpop.permute.xlu0 %5164  ;;  %v4838_v35 = vld [vmem:[#allocation2 + $0x100] sm:$0xff] }
 0x511   : > { %5176 = vrot.lane.b32.xlu1 %v11082_v51, %s8473_s26  ;;  %5249 = vst.msk [vmem:[#allocation3 + $0x58] sm:$0xff] %vm1084_vm2, %v5165_v20  ;;  %v11417_v51 = vld [vmem:[#allocation2 + $0x26d] sm:$0xff] }
 0x512   : > { %6131 = vrot.lane.b32.xlu0 %v11403_v1, %s8478_s16 }
 0x513   : > { %v5928_v48 = vpop.permute.xlu1 %5927  ;;  %v6430_v16 = vld [vmem:[#allocation3 + $0x38] sm:$0xff] }
 0x514   : > { %6015 = vst.msk [vmem:[#allocation3 + $0x40] sm:$0xff] %vm1857_vm6, %v5928_v48  ;;  %8302 = vmatmul.mubr.msk.f32.gmra.mrb[38].mxu0 %vm2313_vm10, %v6430_v16  ;;  %v5930_v56 = vpop.permute.xlu0 %5929  ;;  %v4182_v48 = vld [vmem:[#allocation2 + $0x270] sm:$0xff] }
 0x515   : > { %5941 = vrot.lane.b32.xlu1 %v11256_v43, %s8477_s30  ;;  %6016 = vst.msk [vmem:[#allocation3 + $0x48] sm:$0xff] %vm1857_vm6, %v5930_v56 }
 0x516   : > { %4267 = vrot.lane.b32.xlu0 %v11412_v53, %s8479_s17 }
 0x517   : > { %v5355_v57 = vpop.permute.xlu1 %5354 }
 0x518   : > { %5440 = vst.msk [vmem:[#allocation3 + $0x50] sm:$0xff] %vm1277_vm3, %v5355_v57  ;;  %v4256_v26 = vpop.permute.xlu0 %4255 }
 0x519   : > { %4077 = vrot.lane.b32.xlu1 %v11417_v51, %s8478_s16  ;;  %4335 = vst.msk [vmem:[#allocation3 + $0x80] sm:$0xff] %vm2243_vm9, %v4256_v26 }
 0x51a   : > { %5558 = vrot.lane.b32.xlu0 %v11110_v8, %s8475_s28 }
 0x51b   : > { %v6120_v43 = vpop.permute.xlu1 %6119 }
 0x51c   : > { %6207 = vst.msk [vmem:[#allocation3 + $0x40] sm:$0xff] %vm2050_vm8, %v6120_v43  ;;  %v5547_v38 = vpop.permute.xlu0 %5546 }
 0x51d   : > { %5368 = vrot.lane.b32.xlu1 %v5287_v39, %s8474_s27  ;;  %5632 = vst.msk [vmem:[#allocation3 + $0x50] sm:$0xff] %vm1470_vm4, %v5547_v38  ;;  %v4839_v38 = vld [vmem:[#allocation2 + $0x108] sm:$0xff] }
 0x51e   : > { %6323 = vrot.lane.b32.xlu0 %v11428_v52, %s8479_s17 }
 0x51f   : > { %v5357_v37 = vpop.permute.xlu1 %5356 }
 0x520   : > { %5441 = vst.msk [vmem:[#allocation3 + $0x58] sm:$0xff] %vm1277_vm3, %v5357_v37  ;;  %v6312_v8 = vpop.permute.xlu0 %6311  ;;  %v4367_v20 = vld [vmem:[#allocation3 + $0x80] sm:$0xff] }
 0x521   : > { %6133 = vrot.lane.b32.xlu1 %v11432_v2, %s8478_s16  ;;  %6399 = vst.msk [vmem:[#allocation3 + $0x40] sm:$0xff] %vm2243_vm9, %v6312_v8  ;;  %8258 = vmatprep.mubr.msk.f32.mxu1 %vm2313_vm10, %v4367_v20 }
 0x522   : > { %4870 = vst.msk [vmem:[#allocation3 + $0x80] sm:$0xff] %vm495_vm0, %v4838_v35  ;;  %4986 = vrot.lane.b32.xlu0 %v11115_v13, %s8472_s25  ;;  %v11453_v13 = vld [vmem:[#allocation2 + $0x232] sm:$0xff]  ;;  %v11467_v35 = vld [vmem:[%s12869_s2] ss:$0 sm:$0xff] }
 0x523   : > { %v6122_v16 = vpop.permute.xlu1 %6121  ;;  %v2647_v20 = vmul.f32 %v10445_v12, %v11467_v35  ;;  %v11496_v12 = vld [vmem:[%s12872_s5] ss:$0 sm:$0xff] }
 0x524   : > { %6208 = vst.msk [vmem:[#allocation3 + $0x48] sm:$0xff] %vm2050_vm8, %v6122_v16  ;;  %v4975_v56 = vpop.permute.xlu0 %4974 }
 0x525   : > { %4269 = vrot.lane.b32.xlu1 %v4182_v48, %s8479_s17  ;;  %5058 = vst.msk [vmem:[#allocation3 + $0x60] sm:$0xff] %vm891_vm1, %v4975_v56  ;;  %v2646_v48 = vmul.f32 %v11467_v35, %v10448_v17  ;;  %v11488_v56 = vld [vmem:[%s12870_s3] ss:$0 sm:$0xff] }
 0x526   : > { %5750 = vrot.lane.b32.xlu0 %v11123_v18, %s8476_s29  ;;  %v2686_v17 = vadd.f32 %v11488_v56, %v2647_v20 }
 0x527   : > { %v4258_v57 = vpop.permute.xlu1 %4257 }
 0x528   : > { %4336 = vst.msk [vmem:[#allocation3 + $0x88] sm:$0xff] %vm2243_vm9, %v4258_v57  ;;  %v5739_v26 = vpop.permute.xlu0 %5738  ;;  %v6431_v39 = vld [vmem:[#allocation3 + $0x40] sm:$0xff]  ;;  %v2685_v57 = vadd.f32 %v11488_v56, %v2646_v48 }
 0x529   : > { %5560 = vrot.lane.b32.xlu1 %v11128_v11, %s8475_s28  ;;  %5824 = vst.msk [vmem:[#allocation3 + $0x50] sm:$0xff] %vm1663_vm5, %v5739_v26  ;;  %8304 = vmatprep.mubr.msk.f32.mxu0 %vm2313_vm10, %v6431_v39  ;;  %v11506_v39 = vld [vmem:[%s12873_s6] ss:$0 sm:$0xff] }
 0x52a   : > { %4988 = vrot.lane.b32.xlu0 %v11143_v19, %s8472_s25  ;;  %v11471_v19 = vld [vmem:[#allocation2 + $0x285] sm:$0xff] }
 0x52b   : > { %v5549_v43 = vpop.permute.xlu1 %5548 }
 0x52c   : > { %5633 = vst.msk [vmem:[#allocation3 + $0x58] sm:$0xff] %vm1470_vm4, %v5549_v43  ;;  %v4977_v18 = vpop.permute.xlu0 %4976 }
 0x52d   : > { %6325 = vrot.lane.b32.xlu1 %v11453_v13, %s8479_s17  ;;  %5059 = vst.msk [vmem:[#allocation3 + $0x68] sm:$0xff] %vm891_vm1, %v4977_v18 }
 0x52e   : > { %5752 = vrot.lane.b32.xlu0 %v11153_v22, %s8476_s29  ;;  %v11477_v22 = vld [vmem:[#allocation2 + $0x240] sm:$0xff] }
 0x52f   : > { %v6314_v11 = vpop.permute.xlu1 %6313  ;;  %v4368_v37 = vld [vmem:[#allocation3 + $0x88] sm:$0xff] }
 0x530   : > { %6400 = vst.msk [vmem:[#allocation3 + $0x48] sm:$0xff] %vm2243_vm9, %v6314_v11  ;;  %8259 = vmatmul.mubr.msk.f32.gmra.mrb[16].mxu1 %vm2313_vm10, %v4368_v37  ;;  %v5741_v8 = vpop.permute.xlu0 %5740 }
 0x531   : > { %4871 = vst.msk [vmem:[#allocation3 + $0x88] sm:$0xff] %vm495_vm0, %v4839_v38  ;;  %5178 = vrot.lane.b32.xlu1 %v11139_v59, %s8473_s26  ;;  %v2649_v38 = vmul.f32 %v10455_v45, %v11467_v35 }
 0x532   : > { %5825 = vst.msk [vmem:[#allocation3 + $0x58] sm:$0xff] %vm1663_vm5, %v5741_v8  ;;  %4079 = vrot.lane.b32.xlu0 %v11471_v19, %s8478_s16  ;;  %v11513_v8 = vld [vmem:[#allocation2 + $0x245] sm:$0xff] }
 0x533   : > { %v5167_v16 = vpop.permute.xlu1 %5166  ;;  %13037 = vst [vmem:[#allocation4_spill] sm:$0xff] %v11513_v8 }
 0x534   : > { %5250 = vst.msk [vmem:[#allocation3 + $0x60] sm:$0xff] %vm1084_vm2, %v5167_v16  ;;  %v5169_v59 = vpop.permute.xlu0 %5168  ;;  %v2718_v16 = vmax.f32 %v2686_v17, 0.0  ;;  %v11530_v17 = vld [vmem:[#allocation2 + $0x288] sm:$0xff] }
 0x535   : > { %5943 = vrot.lane.b32.xlu1 %v11477_v22, %s8477_s30  ;;  %5251 = vst.msk [vmem:[#allocation3 + $0x68] sm:$0xff] %vm1084_vm2, %v5169_v59  ;;  %v2717_v59 = vmax.f32 %v2685_v57, 0.0 }
 0x536   : > { %5370 = vrot.lane.b32.xlu0 %v11170_v47, %s8474_s27  ;;  %v2648_v47 = vmul.f32 %v11467_v35, %v10458_v32  ;;  %v2688_v32 = vadd.f32 %v11488_v56, %v2649_v38 }
 0x537   : > { %v8236_v26 = vpop.f32.mrb[0].mxu1  ;;  %v5932_v43 = vpop.permute.xlu1 %5931  ;;  %v6432_v18 = vld [vmem:[#allocation3 + $0x48] sm:$0xff] }
 0x538   : > { %v4720_v11 = vmul.f32 %v8236_v26, %v11496_v12  ;;  %6017 = vst.msk [vmem:[#allocation3 + $0x50] sm:$0xff] %vm1857_vm6, %v5932_v43  ;;  %v4553_v37 = vpop.f32.mrb[1].mxu1  ;;  %8305 = vmatmul.mubr.msk.f32.gmra.mrb[40].mxu0 %vm2313_vm10, %v6432_v18  ;;  %v5934_v48 = vpop.permute.xlu0 %5933  ;;  %v2687_v57 = vadd.f32 %v11488_v56, %v2648_v47 }
 0x539   : > { %v4719_v20 = vmul.f32 %v11496_v12, %v4553_v37  ;;  %5180 = vrot.lane.b32.xlu1 %v11158_v28, %s8473_s26  ;;  %6018 = vst.msk [vmem:[#allocation3 + $0x58] sm:$0xff] %vm1857_vm6, %v5934_v48  ;;  %v2651_v37 = vmul.f32 %v10465_v4, %v11467_v35 }
 0x53a   : > { %v4759_v45 = vadd.f32 %v11506_v39, %v4720_v11  ;;  %6135 = vrot.lane.b32.xlu0 %v11513_v8, %s8478_s16 }
 0x53b   : > { %v4758_v26 = vadd.f32 %v11506_v39, %v4719_v20  ;;  %v5359_v43 = vpop.permute.xlu1 %5358  ;;  %v8239_v18 = vpop.f32.mrb[2].mxu1  ;;  %v2650_v20 = vmul.f32 %v11467_v35, %v10468_v61 }
 0x53c   : > { %v4791_v14 = vmax.f32 %v4759_v45, 0.0  ;;  %5442 = vst.msk [vmem:[#allocation3 + $0x60] sm:$0xff] %vm1277_vm3, %v5359_v43  ;;  %v4722_v28 = vmul.f32 %v8239_v18, %v11496_v12  ;;  %v4563_v11 = vpop.f32.mrb[3].mxu1  ;;  %v4260_v38 = vpop.permute.xlu0 %4259  ;;  %v11542_v43 = vld [vmem:[#allocation2 + $0x28d] sm:$0xff] }
 0x53d   : > { %v4790_v48 = vmax.f32 %v4758_v26, 0.0  ;;  %v4721_v27 = vmul.f32 %v11496_v12, %v4563_v11  ;;  %5945 = vrot.lane.b32.xlu1 %v11329_v6, %s8477_s30  ;;  %4337 = vst.msk [vmem:[#allocation3 + $0x90] sm:$0xff] %vm2243_vm9, %v4260_v38  ;;  %v2720_v11 = vmax.f32 %v2688_v32, 0.0  ;;  %v2690_v6 = vadd.f32 %v11488_v56, %v2651_v37  ;;  %v5289_v37 = vld [vmem:[#allocation2 + $0x1c8] sm:$0xff] }
 0x53e   : > { %v11538_v4 = vadd.f32 %v4791_v14, %v2718_v16  ;;  %v4761_v45 = vadd.f32 %v11506_v39, %v4722_v28  ;;  %4271 = vrot.lane.b32.xlu0 %v11530_v17, %s8479_s17  ;;  %v2719_v38 = vmax.f32 %v2687_v57, 0.0 }
 0x53f   : > { %v11544_v18 = vadd.f32 %v4790_v48, %v2717_v59  ;;  %v4760_v47 = vadd.f32 %v11506_v39, %v4721_v27  ;;  %v6124_v61 = vpop.permute.xlu1 %6123  ;;  %v8242_v26 = vpop.f32.mrb[4].mxu1  ;;  %v2689_v59 = vadd.f32 %v11488_v56, %v2650_v20 }
 0x540   : > { %v4793_v14 = vmax.f32 %v4761_v45, 0.0  ;;  %6209 = vst.msk [vmem:[#allocation3 + $0x50] sm:$0xff] %vm2050_vm8, %v6124_v61  ;;  %v4724_v16 = vmul.f32 %v8242_v26, %v11496_v12  ;;  %v4573_v28 = vpop.f32.mrb[5].mxu1  ;;  %v5551_v5 = vpop.permute.xlu0 %5550  ;;  %v2722_v61 = vmax.f32 %v2690_v6, 0.0 }
 0x541   : > { %v4792_v48 = vmax.f32 %v4760_v47, 0.0  ;;  %v4723_v27 = vmul.f32 %v11496_v12, %v4573_v28  ;;  %4081 = vrot.lane.b32.xlu1 %v11542_v43, %s8478_s16  ;;  %5634 = vst.msk [vmem:[#allocation3 + $0x60] sm:$0xff] %vm1470_vm4, %v5551_v5  ;;  %v4840_v47 = vld [vmem:[#allocation2 + $0x120] sm:$0xff] }
 0x542   : > { %v11556_v8 = vadd.f32 %v4793_v14, %v2720_v11  ;;  %v4763_v32 = vadd.f32 %v11506_v39, %v4724_v16  ;;  %5562 = vrot.lane.b32.xlu0 %v11188_v62, %s8475_s28  ;;  %v11566_v11 = vld [vmem:[#allocation2 + $0x24a] sm:$0xff]  ;;  %v2721_v14 = vmax.f32 %v2689_v59, 0.0 }
 0x543   : > { %v11560_v45 = vadd.f32 %v4792_v48, %v2719_v38  ;;  %v4762_v57 = vadd.f32 %v11506_v39, %v4723_v27  ;;  %v5361_v20 = vpop.permute.xlu1 %5360  ;;  %v11572_v48 = vld [vmem:[#allocation2 + $0x24d] sm:$0xff]  ;;  %v4906_v59 = vld [vmem:[#allocation2 + $0x145] sm:$0xff] }
 0x544   : > { %v4795_v26 = vmax.f32 %v4763_v32, 0.0  ;;  %5443 = vst.msk [vmem:[#allocation3 + $0x68] sm:$0xff] %vm1277_vm3, %v5361_v20  ;;  %v6316_v28 = vpop.permute.xlu0 %6315  ;;  %v4369_v5 = vld [vmem:[#allocation3 + $0x90] sm:$0xff]  ;;  %v2653_v32 = vmul.f32 %v10475_v42, %v11467_v35 }
 0x545   : > { %v4794_v16 = vmax.f32 %v4762_v57, 0.0  ;;  %5372 = vrot.lane.b32.xlu1 %v5289_v37, %s8474_s27  ;;  %6401 = vst.msk [vmem:[#allocation3 + $0x50] sm:$0xff] %vm2243_vm9, %v6316_v28  ;;  %8261 = vmatprep.mubr.msk.f32.mxu1 %vm2313_vm10, %v4369_v5  ;;  %v4184_v37 = vld [vmem:[#allocation2 + $0x290] sm:$0xff]  ;;  %v2652_v57 = vmul.f32 %v11467_v35, %v10478_v9 }
 0x546   : > { %v11569_v38 = vadd.f32 %v4795_v26, %v2722_v61  ;;  %4872 = vst.msk [vmem:[#allocation3 + $0x90] sm:$0xff] %vm495_vm0, %v4840_v47  ;;  %6327 = vrot.lane.b32.xlu0 %v11566_v11, %s8479_s17 }
 0x547   : > { %v11576_v62 = vadd.f32 %v4794_v16, %v2721_v14  ;;  %v6126_v6 = vpop.permute.xlu1 %6125  ;;  %v2692_v14 = vadd.f32 %v11488_v56, %v2653_v32  ;;  %v2691_v9 = vadd.f32 %v11488_v56, %v2652_v57 }
 0x548   : > { %6210 = vst.msk [vmem:[#allocation3 + $0x58] sm:$0xff] %vm2050_vm8, %v6126_v6  ;;  %v4979_v27 = vpop.permute.xlu0 %4978 }
 0x549   : > { %6137 = vrot.lane.b32.xlu1 %v11572_v48, %s8478_s16  ;;  %5060 = vst.msk [vmem:[#allocation3 + $0x70] sm:$0xff] %vm891_vm1, %v4979_v27 }
 0x54a   : > { %4990 = vrot.lane.b32.xlu0 %v4906_v59, %s8472_s25  ;;  %v4907_v59 = vld [vmem:[#allocation2 + $0x14d] sm:$0xff] }
 0x54b   : > { %v4262_v20 = vpop.permute.xlu1 %4261 }
 0x54c   : > { %4338 = vst.msk [vmem:[#allocation3 + $0x98] sm:$0xff] %vm2243_vm9, %v4262_v20  ;;  %v5743_v47 = vpop.permute.xlu0 %5742  ;;  %v8245_v61 = vpop.f32.mrb[6].mxu1  ;;  %v6433_v26 = vld [vmem:[#allocation3 + $0x50] sm:$0xff]  ;;  %v2724_v20 = vmax.f32 %v2692_v14, 0.0 }
 0x54d   : > { %4273 = vrot.lane.b32.xlu1 %v4184_v37, %s8479_s17  ;;  %5826 = vst.msk [vmem:[#allocation3 + $0x60] sm:$0xff] %vm1663_vm5, %v5743_v47  ;;  %v4726_v42 = vmul.f32 %v8245_v61, %v11496_v12  ;;  %v4583_v16 = vpop.f32.mrb[7].mxu1  ;;  %8307 = vmatprep.mubr.msk.f32.mxu0 %vm2313_vm10, %v6433_v26  ;;  %v4841_v37 = vld [vmem:[#allocation2 + $0x128] sm:$0xff]  ;;  %v11605_v47 = vld [vmem:[#allocation2 + $0x252] sm:$0xff] }
 0x54e   : > { %v4725_v28 = vmul.f32 %v11496_v12, %v4583_v16  ;;  %5754 = vrot.lane.b32.xlu0 %v11200_v36, %s8476_s29  ;;  %v2723_v36 = vmax.f32 %v2691_v9, 0.0 }
 0x54f   : > { %v5553_v5 = vpop.permute.xlu1 %5552  ;;  %v4765_v6 = vadd.f32 %v11506_v39, %v4726_v42 }
 0x550   : > { %5635 = vst.msk [vmem:[#allocation3 + $0x68] sm:$0xff] %vm1470_vm4, %v5553_v5  ;;  %v4764_v27 = vadd.f32 %v11506_v39, %v4725_v28  ;;  %v4981_v32 = vpop.permute.xlu0 %4980  ;;  %v11621_v28 = vld [vmem:[#allocation2 + $0x2a5] sm:$0xff] }
 0x551   : > { %5564 = vrot.lane.b32.xlu1 %v11205_v23, %s8475_s28  ;;  %v4797_v57 = vmax.f32 %v4765_v6, 0.0  ;;  %5061 = vst.msk [vmem:[#allocation3 + $0x78] sm:$0xff] %vm891_vm1, %v4981_v32  ;;  %v11626_v6 = vld [vmem:[#allocation2 + $0x260] sm:$0xff] }
 0x552   : > { %v4796_v61 = vmax.f32 %v4764_v27, 0.0  ;;  %4992 = vrot.lane.b32.xlu0 %v4907_v59, %s8472_s25 }
 0x553   : > { %v6318_v26 = vpop.permute.xlu1 %6317  ;;  %v4370_v42 = vld [vmem:[#allocation3 + $0x98] sm:$0xff]  ;;  %v11608_v16 = vadd.f32 %v4797_v57, %v2724_v20  ;;  %v11643_v57 = vld [vmem:[#allocation2 + $0x2a8] sm:$0xff] }
 0x554   : > { %6402 = vst.msk [vmem:[#allocation3 + $0x58] sm:$0xff] %vm2243_vm9, %v6318_v26  ;;  %8262 = vmatmul.mubr.msk.f32.gmra.mrb[18].mxu1 %vm2313_vm10, %v4370_v42  ;;  %v11613_v23 = vadd.f32 %v4796_v61, %v2723_v36  ;;  %v5745_v14 = vpop.permute.xlu0 %5744  ;;  %v4842_v26 = vld [vmem:[#allocation2 + $0x140] sm:$0xff] }
 0x555   : > { %4873 = vst.msk [vmem:[#allocation3 + $0x98] sm:$0xff] %vm495_vm0, %v4841_v37  ;;  %6329 = vrot.lane.b32.xlu1 %v11605_v47, %s8479_s17 }
 0x556   : > { %5827 = vst.msk [vmem:[#allocation3 + $0x68] sm:$0xff] %vm1663_vm5, %v5745_v14  ;;  %5756 = vrot.lane.b32.xlu0 %v11228_v30, %s8476_s29  ;;  %v5291_v14 = vld [vmem:[#allocation2 + $0x1e8] sm:$0xff] }
 0x557   : > { %v5171_v9 = vpop.permute.xlu1 %5170 }
 0x558   : > { %5252 = vst.msk [vmem:[#allocation3 + $0x70] sm:$0xff] %vm1084_vm2, %v5171_v9  ;;  %v5173_v5 = vpop.permute.xlu0 %5172  ;;  %v11661_v9 = vld [vmem:[#allocation2 + $0x26a] sm:$0xff] }
 0x559   : > { %5182 = vrot.lane.b32.xlu1 %v11216_v60, %s8473_s26  ;;  %5253 = vst.msk [vmem:[#allocation3 + $0x78] sm:$0xff] %vm1084_vm2, %v5173_v5  ;;  %v5099_v60 = vld [vmem:[#allocation2 + $0x152] sm:$0xff] }
 0x55a   : > { %4083 = vrot.lane.b32.xlu0 %v11621_v28, %s8478_s16 }
 0x55b   : > { %v5936_v59 = vpop.permute.xlu1 %5935  ;;  %v6434_v27 = vld [vmem:[#allocation3 + $0x58] sm:$0xff] }
 0x55c   : > { %6019 = vst.msk [vmem:[#allocation3 + $0x60] sm:$0xff] %vm1857_vm6, %v5936_v59  ;;  %8308 = vmatmul.mubr.msk.f32.gmra.mrb[42].mxu0 %vm2313_vm10, %v6434_v27  ;;  %v5938_v30 = vpop.permute.xlu0 %5937  ;;  %v2655_v27 = vmul.f32 %v10485_v0, %v11467_v35 }
 0x55d   : > { %5947 = vrot.lane.b32.xlu1 %v11626_v6, %s8477_s30  ;;  %6020 = vst.msk [vmem:[#allocation3 + $0x68] sm:$0xff] %vm1857_vm6, %v5938_v30  ;;  %v2654_v30 = vmul.f32 %v11467_v35, %v10488_v46 }
 0x55e   : > { %5374 = vrot.lane.b32.xlu0 %v11243_v33, %s8474_s27  ;;  %v11648_v33 = vld [vmem:[#allocation2 + $0x2ad] sm:$0xff] }
 0x55f   : > { %v5363_v32 = vpop.permute.xlu1 %5362 }
 0x560   : > { %5444 = vst.msk [vmem:[#allocation3 + $0x70] sm:$0xff] %vm1277_vm3, %v5363_v32  ;;  %v4264_v37 = vpop.permute.xlu0 %4263 }
 0x561   : > { %5184 = vrot.lane.b32.xlu1 %v5099_v60, %s8473_s26  ;;  %4339 = vst.msk [vmem:[#allocation3 + $0xa0] sm:$0xff] %vm2243_vm9, %v4264_v37  ;;  %v4186_v37 = vld [vmem:[#allocation2 + $0x2b0] sm:$0xff] }
 0x562   : > { %6139 = vrot.lane.b32.xlu0 %v11385_v40, %s8478_s16 }
 0x563   : > { %v6128_v20 = vpop.permute.xlu1 %6127 }
 0x564   : > { %6211 = vst.msk [vmem:[#allocation3 + $0x60] sm:$0xff] %vm2050_vm8, %v6128_v20  ;;  %v5555_v36 = vpop.permute.xlu0 %5554 }
 0x565   : > { %5949 = vrot.lane.b32.xlu1 %v11412_v53, %s8477_s30  ;;  %5636 = vst.msk [vmem:[#allocation3 + $0x70] sm:$0xff] %vm1470_vm4, %v5555_v36  ;;  %v2694_v36 = vadd.f32 %v11488_v56, %v2655_v27 }
 0x566   : > { %4275 = vrot.lane.b32.xlu0 %v11643_v57, %s8479_s17 }
 0x567   : > { %v5365_v61 = vpop.permute.xlu1 %5364  ;;  %v2726_v27 = vmax.f32 %v2694_v36, 0.0 }
 0x568   : > { %5445 = vst.msk [vmem:[#allocation3 + $0x78] sm:$0xff] %vm1277_vm3, %v5365_v61  ;;  %v6320_v40 = vpop.permute.xlu0 %6319  ;;  %v4371_v42 = vld [vmem:[#allocation3 + $0xa0] sm:$0xff] }
 0x569   : > { %4085 = vrot.lane.b32.xlu1 %v11648_v33, %s8478_s16  ;;  %6403 = vst.msk [vmem:[#allocation3 + $0x60] sm:$0xff] %vm2243_vm9, %v6320_v40  ;;  %8264 = vmatprep.mubr.msk.f32.mxu1 %vm2313_vm10, %v4371_v42  ;;  %v4843_v42 = vld [vmem:[#allocation2 + $0x148] sm:$0xff] }
 0x56a   : > { %4874 = vst.msk [vmem:[#allocation3 + $0xa0] sm:$0xff] %vm495_vm0, %v4842_v26  ;;  %5566 = vrot.lane.b32.xlu0 %v11261_v24, %s8475_s28  ;;  %v4908_v24 = vld [vmem:[#allocation2 + $0x165] sm:$0xff]  ;;  %v2693_v26 = vadd.f32 %v11488_v56, %v2654_v30  ;;  %v4909_v30 = vld [vmem:[#allocation2 + $0x16d] sm:$0xff] }
 0x56b   : > { %v6130_v53 = vpop.permute.xlu1 %6129 }
 0x56c   : > { %6212 = vst.msk [vmem:[#allocation3 + $0x68] sm:$0xff] %vm2050_vm8, %v6130_v53  ;;  %v4983_v5 = vpop.permute.xlu0 %4982 }
 0x56d   : > { %5376 = vrot.lane.b32.xlu1 %v5291_v14, %s8474_s27  ;;  %5062 = vst.msk [vmem:[#allocation3 + $0x80] sm:$0xff] %vm891_vm1, %v4983_v5 }
 0x56e   : > { %6331 = vrot.lane.b32.xlu0 %v11661_v9, %s8479_s17 }
 0x56f   : > { %v4266_v59 = vpop.permute.xlu1 %4265 }
 0x570   : > { %4340 = vst.msk [vmem:[#allocation3 + $0xa8] sm:$0xff] %vm2243_vm9, %v4266_v59  ;;  %v5747_v60 = vpop.permute.xlu0 %5746  ;;  %v6435_v32 = vld [vmem:[#allocation3 + $0x60] sm:$0xff] }
 0x571   : > { %6141 = vrot.lane.b32.xlu1 %v11417_v51, %s8478_s16  ;;  %5828 = vst.msk [vmem:[#allocation3 + $0x70] sm:$0xff] %vm1663_vm5, %v5747_v60  ;;  %8310 = vmatprep.mubr.msk.f32.mxu0 %vm2313_vm10, %v6435_v32  ;;  %v2725_v60 = vmax.f32 %v2693_v26, 0.0 }
 0x572   : > { %4994 = vrot.lane.b32.xlu0 %v4908_v24, %s8472_s25 }
 0x573   : > { %v5557_v20 = vpop.permute.xlu1 %5556  ;;  %v8248_v0 = vpop.f32.mrb[8].mxu1 }
 0x574   : > { %5637 = vst.msk [vmem:[#allocation3 + $0x78] sm:$0xff] %vm1470_vm4, %v5557_v20  ;;  %v4728_v46 = vmul.f32 %v8248_v0, %v11496_v12  ;;  %v4593_v61 = vpop.f32.mrb[9].mxu1  ;;  %v4985_v40 = vpop.permute.xlu0 %4984  ;;  %v11701_v0 = vld [vmem:[#allocation2 + $0x272] sm:$0xff] }
 0x575   : > { %v4727_v51 = vmul.f32 %v11496_v12, %v4593_v61  ;;  %4277 = vrot.lane.b32.xlu1 %v4186_v37, %s8479_s17  ;;  %5063 = vst.msk [vmem:[#allocation3 + $0x88] sm:$0xff] %vm891_vm1, %v4985_v40 }
 0x576   : > { %v4767_v14 = vadd.f32 %v11506_v39, %v4728_v46  ;;  %5758 = vrot.lane.b32.xlu0 %v11273_v63, %s8476_s29  ;;  %v11696_v63 = vld [vmem:[%s12875_s8] ss:$0 sm:$0xff] }
 0x577   : > { %v4766_v53 = vadd.f32 %v11506_v39, %v4727_v51  ;;  %v6322_v5 = vpop.permute.xlu1 %6321  ;;  %v4372_v59 = vld [vmem:[#allocation3 + $0xa8] sm:$0xff] }
 0x578   : > { %v4799_v24 = vmax.f32 %v4767_v14, 0.0  ;;  %6404 = vst.msk [vmem:[#allocation3 + $0x68] sm:$0xff] %vm2243_vm9, %v6322_v5  ;;  %8265 = vmatmul.mubr.msk.f32.gmra.mrb[20].mxu1 %vm2313_vm10, %v4372_v59  ;;  %v5749_v37 = vpop.permute.xlu0 %5748 }
 0x579   : > { %4875 = vst.msk [vmem:[#allocation3 + $0xa8] sm:$0xff] %vm495_vm0, %v4843_v42  ;;  %v4798_v32 = vmax.f32 %v4766_v53, 0.0  ;;  %5568 = vrot.lane.b32.xlu1 %v11278_v49, %s8475_s28  ;;  %v11709_v49 = vld [vmem:[%s12876_s9] ss:$0 sm:$0xff] }
 0x57a   : > { %v11698_v20 = vadd.f32 %v4799_v24, %v2726_v27  ;;  %5829 = vst.msk [vmem:[#allocation3 + $0x78] sm:$0xff] %vm1663_vm5, %v5749_v37  ;;  %4996 = vrot.lane.b32.xlu0 %v4909_v30, %s8472_s25  ;;  %v11723_v24 = vld [vmem:[#allocation2 + $0x2c5] sm:$0xff] }
 0x57b   : > { %v11703_v36 = vadd.f32 %v4798_v32, %v2725_v60  ;;  %v5175_v46 = vpop.permute.xlu1 %5174  ;;  %v8294_v61 = vpop.f32.mrb[32].mxu0 }
 0x57c   : > { %5254 = vst.msk [vmem:[#allocation3 + $0x80] sm:$0xff] %vm1084_vm2, %v5175_v46  ;;  %v6792_v26 = vmul.f32 %v8294_v61, %v11696_v63  ;;  %v6625_v51 = vpop.f32.mrb[33].mxu0  ;;  %v4076_v42 = vpop.permute.xlu0 %4075 }
 0x57d   : > { %v6791_v40 = vmul.f32 %v11696_v63, %v6625_v51  ;;  %6333 = vrot.lane.b32.xlu1 %v11701_v0, %s8479_s17  ;;  %4149 = vst.msk [vmem:[#allocation3 + $0xb0] sm:$0xff] %vm2050_vm8, %v4076_v42  ;;  %v11750_v51 = vld [vmem:[#allocation2 + $0x2c8] sm:$0xff] }
 0x57e   : > { %v6831_v14 = vadd.f32 %v11709_v49, %v6792_v26  ;;  %5760 = vrot.lane.b32.xlu0 %v11301_v10, %s8476_s29  ;;  %v11731_v10 = vld [vmem:[#allocation2 + $0x280] sm:$0xff] }
 0x57f   : > { %v6830_v53 = vadd.f32 %v11709_v49, %v6791_v40  ;;  %v5940_v5 = vpop.permute.xlu1 %5939  ;;  %v6436_v59 = vld [vmem:[#allocation3 + $0x68] sm:$0xff] }
 0x580   : > { %v6863_v27 = vmax.f32 %v6831_v14, 0.0  ;;  %6021 = vst.msk [vmem:[#allocation3 + $0x70] sm:$0xff] %vm1857_vm6, %v5940_v5  ;;  %8311 = vmatmul.mubr.msk.f32.gmra.mrb[44].mxu0 %vm2313_vm10, %v6436_v59  ;;  %v5367_v60 = vpop.permute.xlu0 %5366  ;;  %v4844_v14 = vld [vmem:[#allocation2 + $0x160] sm:$0xff]  ;;  %v5293_v5 = vld [vmem:[#allocation2 + $0x208] sm:$0xff]  ;;  %v2657_v59 = vmul.f32 %v10495_v44, %v11467_v35 }
 0x581   : > { %v6862_v30 = vmax.f32 %v6830_v53, 0.0  ;;  %5186 = vrot.lane.b32.xlu1 %v11289_v21, %s8473_s26  ;;  %5446 = vst.msk [vmem:[#allocation3 + $0x80] sm:$0xff] %vm1277_vm3, %v5367_v60  ;;  %v5101_v21 = vld [vmem:[#allocation2 + $0x172] sm:$0xff] }
 0x582   : > { %v11728_v32 = vadd.f32 %v11538_v4, %v6863_v27  ;;  %4087 = vrot.lane.b32.xlu0 %v11723_v24, %s8478_s16  ;;  %v11770_v27 = vld [vmem:[#allocation2 + $0x28a] sm:$0xff] }
 0x583   : > { %v11734_v37 = vadd.f32 %v11544_v18, %v6862_v30  ;;  %v5177_v46 = vpop.permute.xlu1 %5176  ;;  %v2656_v30 = vmul.f32 %v11467_v35, %v10498_v50 }
 0x584   : > { %5255 = vst.msk [vmem:[#allocation3 + $0x88] sm:$0xff] %vm1084_vm2, %v5177_v46  ;;  %v6132_v61 = vpop.permute.xlu0 %6131 }
 0x585   : > { %5951 = vrot.lane.b32.xlu1 %v11731_v10, %s8477_s30  ;;  %6213 = vst.msk [vmem:[#allocation3 + $0x70] sm:$0xff] %vm2050_vm8, %v6132_v61  ;;  %v2696_v61 = vadd.f32 %v11488_v56, %v2657_v59  ;;  %v2695_v50 = vadd.f32 %v11488_v56, %v2656_v30 }
 0x586   : > { %5378 = vrot.lane.b32.xlu0 %v11316_v41, %s8474_s27  ;;  %v11755_v41 = vld [vmem:[#allocation2 + $0x2cd] sm:$0xff] }
 0x587   : > { %v5942_v4 = vpop.permute.xlu1 %5941  ;;  %v2727_v59 = vmax.f32 %v2695_v50, 0.0 }
 0x588   : > { %6022 = vst.msk [vmem:[#allocation3 + $0x78] sm:$0xff] %vm1857_vm6, %v5942_v4  ;;  %v4268_v18 = vpop.permute.xlu0 %4267  ;;  %v4910_v4 = vld [vmem:[#allocation2 + $0x185] sm:$0xff] }
 0x589   : > { %5188 = vrot.lane.b32.xlu1 %v5101_v21, %s8473_s26  ;;  %4341 = vst.msk [vmem:[#allocation3 + $0xb0] sm:$0xff] %vm2243_vm9, %v4268_v18 }
 0x58a   : > { %6143 = vrot.lane.b32.xlu0 %v11471_v19, %s8478_s16 }
 0x58b   : > { %v4078_v26 = vpop.permute.xlu1 %4077 }
 0x58c   : > { %4150 = vst.msk [vmem:[#allocation3 + $0xb8] sm:$0xff] %vm2050_vm8, %v4078_v26  ;;  %v5559_v40 = vpop.permute.xlu0 %5558 }
 0x58d   : > { %5953 = vrot.lane.b32.xlu1 %v11530_v17, %s8477_s30  ;;  %5638 = vst.msk [vmem:[#allocation3 + $0x80] sm:$0xff] %vm1470_vm4, %v5559_v40 }
 0x58e   : > { %4279 = vrot.lane.b32.xlu0 %v11750_v51, %s8479_s17 }
 0x58f   : > { %v5369_v42 = vpop.permute.xlu1 %5368 }
 0x590   : > { %5447 = vst.msk [vmem:[#allocation3 + $0x88] sm:$0xff] %vm1277_vm3, %v5369_v42  ;;  %v6324_v19 = vpop.permute.xlu0 %6323  ;;  %v4373_v53 = vld [vmem:[#allocation3 + $0xb0] sm:$0xff] }
 0x591   : > { %4089 = vrot.lane.b32.xlu1 %v11755_v41, %s8478_s16  ;;  %6405 = vst.msk [vmem:[#allocation3 + $0x70] sm:$0xff] %vm2243_vm9, %v6324_v19  ;;  %8267 = vmatprep.mubr.msk.f32.mxu1 %vm2313_vm10, %v4373_v53 }
 0x592   : > { %4876 = vst.msk [vmem:[#allocation3 + $0xb0] sm:$0xff] %vm495_vm0, %v4844_v14  ;;  %5570 = vrot.lane.b32.xlu0 %v11334_v3, %s8475_s28  ;;  %v4188_v14 = vld [vmem:[#allocation2 + $0x2d0] sm:$0xff] }
 0x593   : > { %v6134_v17 = vpop.permute.xlu1 %6133 }
 0x594   : > { %6214 = vst.msk [vmem:[#allocation3 + $0x78] sm:$0xff] %vm2050_vm8, %v6134_v17  ;;  %v4987_v60 = vpop.permute.xlu0 %4986 }
 0x595   : > { %5380 = vrot.lane.b32.xlu1 %v5293_v5, %s8474_s27  ;;  %5064 = vst.msk [vmem:[#allocation3 + $0x90] sm:$0xff] %vm891_vm1, %v4987_v60  ;;  %v2728_v5 = vmax.f32 %v2696_v61, 0.0  ;;  %v4845_v60 = vld [vmem:[#allocation2 + $0x168] sm:$0xff] }
 0x596   : > { %6335 = vrot.lane.b32.xlu0 %v11770_v27, %s8479_s17 }
 0x597   : > { %v4270_v3 = vpop.permute.xlu1 %4269  ;;  %v8251_v46 = vpop.f32.mrb[10].mxu1 }
 0x598   : > { %4342 = vst.msk [vmem:[#allocation3 + $0xb8] sm:$0xff] %vm2243_vm9, %v4270_v3  ;;  %v4730_v44 = vmul.f32 %v8251_v46, %v11496_v12  ;;  %v4603_v21 = vpop.f32.mrb[11].mxu1  ;;  %v5751_v26 = vpop.permute.xlu0 %5750  ;;  %v6437_v40 = vld [vmem:[#allocation3 + $0x70] sm:$0xff] }
 0x599   : > { %v4729_v18 = vmul.f32 %v11496_v12, %v4603_v21  ;;  %6145 = vrot.lane.b32.xlu1 %v11542_v43, %s8478_s16  ;;  %5830 = vst.msk [vmem:[#allocation3 + $0x80] sm:$0xff] %vm1663_vm5, %v5751_v26  ;;  %8313 = vmatprep.mubr.msk.f32.mxu0 %vm2313_vm10, %v6437_v40 }
 0x59a   : > { %v4769_v42 = vadd.f32 %v11506_v39, %v4730_v44  ;;  %4998 = vrot.lane.b32.xlu0 %v4910_v4, %s8472_s25 }
 0x59b   : > { %v4768_v19 = vadd.f32 %v11506_v39, %v4729_v18  ;;  %v5561_v53 = vpop.permute.xlu1 %5560  ;;  %v4911_v18 = vld [vmem:[#allocation2 + $0x18d] sm:$0xff] }
 0x59c   : > { %v4801_v17 = vmax.f32 %v4769_v42, 0.0  ;;  %5639 = vst.msk [vmem:[#allocation3 + $0x88] sm:$0xff] %vm1470_vm4, %v5561_v53  ;;  %v4989_v43 = vpop.permute.xlu0 %4988  ;;  %v11808_v42 = vld [vmem:[#allocation2 + $0x292] sm:$0xff] }
 0x59d   : > { %v4800_v30 = vmax.f32 %v4768_v19, 0.0  ;;  %4281 = vrot.lane.b32.xlu1 %v4188_v14, %s8479_s17  ;;  %5065 = vst.msk [vmem:[#allocation3 + $0x98] sm:$0xff] %vm891_vm1, %v4989_v43 }
 0x59e   : > { %v11792_v3 = vadd.f32 %v4801_v17, %v2728_v5  ;;  %5762 = vrot.lane.b32.xlu0 %v11346_v54, %s8476_s29 }
 0x59f   : > { %v11795_v46 = vadd.f32 %v4800_v30, %v2727_v59  ;;  %v6326_v44 = vpop.permute.xlu1 %6325  ;;  %v8297_v61 = vpop.f32.mrb[34].mxu0  ;;  %v4374_v21 = vld [vmem:[#allocation3 + $0xb8] sm:$0xff] }
 0x5a0   : > { %6406 = vst.msk [vmem:[#allocation3 + $0x78] sm:$0xff] %vm2243_vm9, %v6326_v44  ;;  %v6794_v4 = vmul.f32 %v8297_v61, %v11696_v63  ;;  %8268 = vmatmul.mubr.msk.f32.gmra.mrb[22].mxu1 %vm2313_vm10, %v4374_v21  ;;  %v6635_v50 = vpop.f32.mrb[35].mxu0  ;;  %v5753_v40 = vpop.permute.xlu0 %5752  ;;  %v5103_v61 = vld [vmem:[#allocation2 + $0x192] sm:$0xff] }
 0x5a1   : > { %4877 = vst.msk [vmem:[#allocation3 + $0xb8] sm:$0xff] %vm495_vm0, %v4845_v60  ;;  %v6793_v26 = vmul.f32 %v11696_v63, %v6635_v50  ;;  %5572 = vrot.lane.b32.xlu1 %v11350_v31, %s8475_s28  ;;  %v11829_v60 = vld [vmem:[#allocation2 + $0x2e5] sm:$0xff] }
 0x5a2   : > { %v6833_v54 = vadd.f32 %v11709_v49, %v6794_v4  ;;  %5831 = vst.msk [vmem:[#allocation3 + $0x88] sm:$0xff] %vm1663_vm5, %v5753_v40  ;;  %5000 = vrot.lane.b32.xlu0 %v4911_v18, %s8472_s25  ;;  %v11847_v50 = vld [vmem:[#allocation2 + $0x2e8] sm:$0xff]  ;;  %v4846_v40 = vld [vmem:[#allocation2 + $0x180] sm:$0xff] }
 0x5a3   : > { %v6832_v14 = vadd.f32 %v11709_v49, %v6793_v26  ;;  %v5179_v19 = vpop.permute.xlu1 %5178 }
 0x5a4   : > { %v6865_v53 = vmax.f32 %v6833_v54, 0.0  ;;  %5256 = vst.msk [vmem:[#allocation3 + $0x90] sm:$0xff] %vm1084_vm2, %v5179_v19  ;;  %v4080_v17 = vpop.permute.xlu0 %4079  ;;  %v2658_v54 = vmul.f32 %v11467_v35, %v10508_v58  ;;  %v5295_v19 = vld [vmem:[#allocation2 + $0x228] sm:$0xff] }
 0x5a5   : > { %v6864_v5 = vmax.f32 %v6832_v14, 0.0  ;;  %6337 = vrot.lane.b32.xlu1 %v11808_v42, %s8479_s17  ;;  %4151 = vst.msk [vmem:[#allocation3 + $0xc0] sm:$0xff] %vm2050_vm8, %v4080_v17 }
 0x5a6   : > { %v11816_v31 = vadd.f32 %v11556_v8, %v6865_v53  ;;  %5764 = vrot.lane.b32.xlu0 %v11373_v29, %s8476_s29 }
 0x5a7   : > { %v11820_v59 = vadd.f32 %v11560_v45, %v6864_v5  ;;  %v5944_v30 = vpop.permute.xlu1 %5943  ;;  %v11824_v43 = vld [vmem:[#allocation3 + $0x78] sm:$0xff]  ;;  %v5869_v45 = vld [vmem:[#allocation2 + $0x2a0] sm:$0xff] }
 0x5a8   : > { %6023 = vst.msk [vmem:[#allocation3 + $0x80] sm:$0xff] %vm1857_vm6, %v5944_v30  ;;  %8314 = vmatmul.mubr.msk.f32.gmra.mrb[46].mxu0 %vm2313_vm10, %v11824_v43  ;;  %v5371_v8 = vpop.permute.xlu0 %5370  ;;  %v6253_v30 = vld [vmem:[#allocation2 + $0x2aa] sm:$0xff] }
 0x5a9   : > { %5190 = vrot.lane.b32.xlu1 %v11361_v15, %s8473_s26  ;;  %5448 = vst.msk [vmem:[#allocation3 + $0x90] sm:$0xff] %vm1277_vm3, %v5371_v8  ;;  %v2697_v8 = vadd.f32 %v11488_v56, %v2658_v54 }
 0x5aa   : > { %4091 = vrot.lane.b32.xlu0 %v11829_v60, %s8478_s16 }
 0x5ab   : > { %v5181_v29 = vpop.permute.xlu1 %5180 }
 0x5ac   : > { %5257 = vst.msk [vmem:[#allocation3 + $0x98] sm:$0xff] %vm1084_vm2, %v5181_v29  ;;  %v6136_v44 = vpop.permute.xlu0 %6135 }
 0x5ad   : > { %5955 = vrot.lane.b32.xlu1 %v5869_v45, %s8477_s30  ;;  %6215 = vst.msk [vmem:[#allocation3 + $0x80] sm:$0xff] %vm2050_vm8, %v6136_v44 }
 0x5ae   : > { %5382 = vrot.lane.b32.xlu0 %v11390_v55, %s8474_s27  ;;  %v11852_v55 = vld [vmem:[#allocation2 + $0x2ed] sm:$0xff] }
 0x5af   : > { %v5946_v21 = vpop.permute.xlu1 %5945 }
 0x5b0   : > { %6024 = vst.msk [vmem:[#allocation3 + $0x88] sm:$0xff] %vm1857_vm6, %v5946_v21  ;;  %v4272_v15 = vpop.permute.xlu0 %4271 }
 0x5b1   : > { %5192 = vrot.lane.b32.xlu1 %v5103_v61, %s8473_s26  ;;  %4343 = vst.msk [vmem:[#allocation3 + $0xc0] sm:$0xff] %vm2243_vm9, %v4272_v15 }
 0x5b2   : > { %6147 = vrot.lane.b32.xlu0 %v11621_v28, %s8478_s16  ;;  %v2659_v28 = vmul.f32 %v10505_v25, %v11467_v35 }
 0x5b3   : > { %v4082_v4 = vpop.permute.xlu1 %4081 }
 0x5b4   : > { %4152 = vst.msk [vmem:[#allocation3 + $0xc8] sm:$0xff] %vm2050_vm8, %v4082_v4  ;;  %v5563_v18 = vpop.permute.xlu0 %5562  ;;  %v2698_v5 = vadd.f32 %v11488_v56, %v2659_v28  ;;  %v4912_v4 = vld [vmem:[#allocation2 + $0x1a5] sm:$0xff] }
 0x5b5   : > { %5957 = vrot.lane.b32.xlu1 %v11643_v57, %s8477_s30  ;;  %5640 = vst.msk [vmem:[#allocation3 + $0x90] sm:$0xff] %vm1470_vm4, %v5563_v18  ;;  %v2729_v18 = vmax.f32 %v2697_v8, 0.0 }
 0x5b6   : > { %4283 = vrot.lane.b32.xlu0 %v11847_v50, %s8479_s17  ;;  %v2730_v21 = vmax.f32 %v2698_v5, 0.0 }
 0x5b7   : > { %v5373_v26 = vpop.permute.xlu1 %5372 }
 0x5b8   : > { %5449 = vst.msk [vmem:[#allocation3 + $0x98] sm:$0xff] %vm1277_vm3, %v5373_v26  ;;  %v6328_v14 = vpop.permute.xlu0 %6327  ;;  %v4375_v57 = vld [vmem:[#allocation3 + $0xc0] sm:$0xff] }
 0x5b9   : > { %4093 = vrot.lane.b32.xlu1 %v11852_v55, %s8478_s16  ;;  %6407 = vst.msk [vmem:[#allocation3 + $0x80] sm:$0xff] %vm2243_vm9, %v6328_v14  ;;  %8270 = vmatprep.mubr.msk.f32.mxu1 %vm2313_vm10, %v4375_v57  ;;  %v4190_v14 = vld [vmem:[#allocation2 + $0x2f0] sm:$0xff] }
 0x5ba   : > { %4878 = vst.msk [vmem:[#allocation3 + $0xc0] sm:$0xff] %vm495_vm0, %v4846_v40  ;;  %5574 = vrot.lane.b32.xlu0 %v11403_v1, %s8475_s28 }
 0x5bb   : > { %v6138_v25 = vpop.permute.xlu1 %6137  ;;  %v8254_v53 = vpop.f32.mrb[12].mxu1 }
 0x5bc   : > { %6216 = vst.msk [vmem:[#allocation3 + $0x88] sm:$0xff] %vm2050_vm8, %v6138_v25  ;;  %v4732_v58 = vmul.f32 %v8254_v53, %v11496_v12  ;;  %v4613_v17 = vpop.f32.mrb[13].mxu1  ;;  %v4991_v29 = vpop.permute.xlu0 %4990 }
 0x5bd   : > { %v4731_v45 = vmul.f32 %v11496_v12, %v4613_v17  ;;  %5384 = vrot.lane.b32.xlu1 %v5295_v19, %s8474_s27  ;;  %5066 = vst.msk [vmem:[#allocation3 + $0xa0] sm:$0xff] %vm891_vm1, %v4991_v29  ;;  %v4847_v17 = vld [vmem:[#allocation2 + $0x188] sm:$0xff] }
 0x5be   : > { %v4771_v44 = vadd.f32 %v11506_v39, %v4732_v58  ;;  %6339 = vrot.lane.b32.xlu0 %v6253_v30, %s8479_s17 }
 0x5bf   : > { %v4770_v1 = vadd.f32 %v11506_v39, %v4731_v45  ;;  %v4274_v61 = vpop.permute.xlu1 %4273 }
 0x5c0   : > { %v4803_v15 = vmax.f32 %v4771_v44, 0.0  ;;  %4344 = vst.msk [vmem:[#allocation3 + $0xc8] sm:$0xff] %vm2243_vm9, %v4274_v61  ;;  %v5755_v40 = vpop.permute.xlu0 %5754  ;;  %v11881_v28 = vld [vmem:[#allocation3 + $0x80] sm:$0xff] }
 0x5c1   : > { %v4802_v26 = vmax.f32 %v4770_v1, 0.0  ;;  %6149 = vrot.lane.b32.xlu1 %v11648_v33, %s8478_s16  ;;  %5832 = vst.msk [vmem:[#allocation3 + $0x90] sm:$0xff] %vm1663_vm5, %v5755_v40  ;;  %8316 = vmatprep.mubr.msk.f32.mxu0 %vm2313_vm10, %v11881_v28  ;;  %v4913_v1 = vld [vmem:[#allocation2 + $0x1ad] sm:$0xff] }
 0x5c2   : > { %v11883_v54 = vadd.f32 %v4803_v15, %v2730_v21  ;;  %5002 = vrot.lane.b32.xlu0 %v4912_v4, %s8472_s25 }
 0x5c3   : > { %v11888_v57 = vadd.f32 %v4802_v26, %v2729_v18  ;;  %v5565_v19 = vpop.permute.xlu1 %5564  ;;  %v8300_v25 = vpop.f32.mrb[36].mxu0 }
 0x5c4   : > { %5641 = vst.msk [vmem:[#allocation3 + $0x98] sm:$0xff] %vm1470_vm4, %v5565_v19  ;;  %v6796_v33 = vmul.f32 %v8300_v25, %v11696_v63  ;;  %v6645_v53 = vpop.f32.mrb[37].mxu0  ;;  %v4993_v58 = vpop.permute.xlu0 %4992  ;;  %v5871_v19 = vld [vmem:[#allocation2 + $0x2c0] sm:$0xff] }
 0x5c5   : > { %v6795_v5 = vmul.f32 %v11696_v63, %v6645_v53  ;;  %4285 = vrot.lane.b32.xlu1 %v4190_v14, %s8479_s17  ;;  %5067 = vst.msk [vmem:[#allocation3 + $0xa8] sm:$0xff] %vm891_vm1, %v4993_v58  ;;  %v5297_v53 = vld [vmem:[#allocation2 + $0x248] sm:$0xff] }
 0x5c6   : > { %v6835_v30 = vadd.f32 %v11709_v49, %v6796_v33  ;;  %5766 = vrot.lane.b32.xlu0 %v11428_v52, %s8476_s29  ;;  %v6254_v52 = vld [vmem:[#allocation2 + $0x2b2] sm:$0xff] }
 0x5c7   : > { %v6834_v8 = vadd.f32 %v11709_v49, %v6795_v5  ;;  %v6330_v45 = vpop.permute.xlu1 %6329  ;;  %v4376_v29 = vld [vmem:[#allocation3 + $0xc8] sm:$0xff] }
 0x5c8   : > { %v6867_v44 = vmax.f32 %v6835_v30, 0.0  ;;  %6408 = vst.msk [vmem:[#allocation3 + $0x88] sm:$0xff] %vm2243_vm9, %v6330_v45  ;;  %8271 = vmatmul.mubr.msk.f32.gmra.mrb[24].mxu1 %vm2313_vm10, %v4376_v29  ;;  %v5757_v21 = vpop.permute.xlu0 %5756  ;;  %v4848_v45 = vld [vmem:[#allocation2 + $0x1a0] sm:$0xff] }
 0x5c9   : > { %4879 = vst.msk [vmem:[#allocation3 + $0xc8] sm:$0xff] %vm495_vm0, %v4847_v17  ;;  %v6866_v61 = vmax.f32 %v6834_v8, 0.0  ;;  %5576 = vrot.lane.b32.xlu1 %v11432_v2, %s8475_s28  ;;  %v5104_v2 = vld [vmem:[#allocation2 + $0x1aa] sm:$0xff]  ;;  %v2661_v17 = vmul.f32 %v10515_v34, %v11467_v35 }
 0x5ca   : > { %v11906_v15 = vadd.f32 %v11569_v38, %v6867_v44  ;;  %5833 = vst.msk [vmem:[#allocation3 + $0x98] sm:$0xff] %vm1663_vm5, %v5757_v21  ;;  %5004 = vrot.lane.b32.xlu0 %v4913_v1, %s8472_s25 }
 0x5cb   : > { %v11910_v4 = vadd.f32 %v11576_v62, %v6866_v61  ;;  %v5183_v18 = vpop.permute.xlu1 %5182  ;;  %v5105_v62 = vld [vmem:[#allocation2 + $0x1b2] sm:$0xff]  ;;  %v2700_v29 = vadd.f32 %v11488_v56, %v2661_v17  ;;  %v13038_v61 = vld [vmem:[#allocation4_spill] sm:$0xff] }
 0x5cc   : > { %5258 = vst.msk [vmem:[#allocation3 + $0xa0] sm:$0xff] %vm1084_vm2, %v5183_v18  ;;  %v4084_v26 = vpop.permute.xlu0 %4083 }
 0x5cd   : > { %6341 = vrot.lane.b32.xlu1 %v6254_v52, %s8479_s17  ;;  %4153 = vst.msk [vmem:[#allocation3 + $0xd0] sm:$0xff] %vm2050_vm8, %v4084_v26  ;;  %v6255_v52 = vld [vmem:[#allocation2 + $0x2ca] sm:$0xff] }
 0x5ce   : > { %5768 = vrot.lane.b32.xlu0 %v11453_v13, %s8476_s29 }
 0x5cf   : > { %v5948_v38 = vpop.permute.xlu1 %5947  ;;  %v11918_v40 = vld [vmem:[#allocation3 + $0x88] sm:$0xff] }
 0x5d0   : > { %6025 = vst.msk [vmem:[#allocation3 + $0x90] sm:$0xff] %vm1857_vm6, %v5948_v38  ;;  %8317 = vmatmul.mubr.msk.f32.gmra.mrb[48].mxu0 %vm2313_vm10, %v11918_v40  ;;  %v5375_v14 = vpop.permute.xlu0 %5374 }
 0x5d1   : > { %5194 = vrot.lane.b32.xlu1 %v5104_v2, %s8473_s26  ;;  %5450 = vst.msk [vmem:[#allocation3 + $0xa0] sm:$0xff] %vm1277_vm3, %v5375_v14 }
 0x5d2   : > { %5196 = vrot.lane.b32.xlu0 %v5105_v62, %s8473_s26 }
 0x5d3   : > { %v5185_v25 = vpop.permute.xlu1 %5184 }
 0x5d4   : > { %5259 = vst.msk [vmem:[#allocation3 + $0xa8] sm:$0xff] %vm1084_vm2, %v5185_v25  ;;  %v6140_v13 = vpop.permute.xlu0 %6139 }
 0x5d5   : > { %5959 = vrot.lane.b32.xlu1 %v5871_v19, %s8477_s30  ;;  %6217 = vst.msk [vmem:[#allocation3 + $0x90] sm:$0xff] %vm2050_vm8, %v6140_v13 }
 0x5d6   : > { %5961 = vrot.lane.b32.xlu0 %v11750_v51, %s8477_s30  ;;  %v2660_v51 = vmul.f32 %v11467_v35, %v10518_v7  ;;  %v4914_v7 = vld [vmem:[#allocation2 + $0x1c5] sm:$0xff] }
 0x5d7   : > { %v5950_v33 = vpop.permute.xlu1 %5949 }
 0x5d8   : > { %6026 = vst.msk [vmem:[#allocation3 + $0x98] sm:$0xff] %vm1857_vm6, %v5950_v33  ;;  %v4276_v5 = vpop.permute.xlu0 %4275  ;;  %v2699_v35 = vadd.f32 %v11488_v56, %v2660_v51 }
 0x5d9   : > { %5386 = vrot.lane.b32.xlu1 %v11477_v22, %s8474_s27  ;;  %4345 = vst.msk [vmem:[#allocation3 + $0xd0] sm:$0xff] %vm2243_vm9, %v4276_v5 }
 0x5da   : > { %5388 = vrot.lane.b32.xlu0 %v5297_v53, %s8474_s27  ;;  %v2731_v2 = vmax.f32 %v2699_v35, 0.0  ;;  %v4915_v53 = vld [vmem:[#allocation2 + $0x1cd] sm:$0xff] }
 0x5db   : > { %v4086_v58 = vpop.permute.xlu1 %4085 }
 0x5dc   : > { %4154 = vst.msk [vmem:[#allocation3 + $0xd8] sm:$0xff] %vm2050_vm8, %v4086_v58  ;;  %v5567_v30 = vpop.permute.xlu0 %5566 }
 0x5dd   : > { %6151 = vrot.lane.b32.xlu1 %v11723_v24, %s8478_s16  ;;  %5642 = vst.msk [vmem:[#allocation3 + $0xa0] sm:$0xff] %vm1470_vm4, %v5567_v30 }
 0x5de   : > { %6153 = vrot.lane.b32.xlu0 %v11755_v41, %s8478_s16 }
 0x5df   : > { %v5377_v22 = vpop.permute.xlu1 %5376  ;;  %v8257_v8 = vpop.f32.mrb[14].mxu1 }
 0x5e0   : > { %5451 = vst.msk [vmem:[#allocation3 + $0xa8] sm:$0xff] %vm1277_vm3, %v5377_v22  ;;  %v4734_v34 = vmul.f32 %v8257_v8, %v11496_v12  ;;  %v4623_v44 = vpop.f32.mrb[15].mxu1  ;;  %v6332_v1 = vpop.permute.xlu0 %6331  ;;  %v4377_v41 = vld [vmem:[#allocation3 + $0xd0] sm:$0xff] }
 0x5e1   : > { %v4733_v24 = vmul.f32 %v11496_v12, %v4623_v44  ;;  %5578 = vrot.lane.b32.xlu1 %v13038_v61, %s8475_s28  ;;  %6409 = vst.msk [vmem:[#allocation3 + $0x90] sm:$0xff] %vm2243_vm9, %v6332_v1  ;;  %8273 = vmatprep.mubr.msk.f32.mxu1 %vm2313_vm10, %v4377_v41  ;;  %v2732_v12 = vmax.f32 %v2700_v29, 0.0  ;;  %v4849_v29 = vld [vmem:[#allocation2 + $0x1a8] sm:$0xff]  ;;  %v5107_v1 = vld [vmem:[#allocation2 + $0x1d2] sm:$0xff]  ;;  %v5873_v61 = vld [vmem:[#allocation2 + $0x2e0] sm:$0xff] }
 0x5e2   : > { %v4773_v21 = vadd.f32 %v11506_v39, %v4734_v34  ;;  %4880 = vst.msk [vmem:[#allocation3 + $0xd0] sm:$0xff] %vm495_vm0, %v4848_v45  ;;  %5006 = vrot.lane.b32.xlu0 %v4914_v7, %s8472_s25  ;;  %v5106_v44 = vld [vmem:[#allocation2 + $0x1ca] sm:$0xff] }
 0x5e3   : > { %v4772_v18 = vadd.f32 %v11506_v39, %v4733_v24  ;;  %v6142_v56 = vpop.permute.xlu1 %6141 }
 0x5e4   : > { %v4805_v26 = vmax.f32 %v4773_v21, 0.0  ;;  %6218 = vst.msk [vmem:[#allocation3 + $0x98] sm:$0xff] %vm2050_vm8, %v6142_v56  ;;  %v4995_v62 = vpop.permute.xlu0 %4994 }
 0x5e5   : > { %v4804_v38 = vmax.f32 %v4772_v18, 0.0  ;;  %6343 = vrot.lane.b32.xlu1 %v6255_v52, %s8479_s17  ;;  %5068 = vst.msk [vmem:[#allocation3 + $0xb0] sm:$0xff] %vm891_vm1, %v4995_v62  ;;  %v5299_v52 = vld [vmem:[#allocation2 + $0x268] sm:$0xff] }
 0x5e6   : > { %v11961_v14 = vadd.f32 %v4805_v26, %v2732_v12  ;;  %5770 = vrot.lane.b32.xlu0 %v11566_v11, %s8476_s29  ;;  %v6256_v11 = vld [vmem:[#allocation2 + $0x2d2] sm:$0xff]  ;;  %v5490_v12 = vld [vmem:[#allocation2 + $0x265] sm:$0xff] }
 0x5e7   : > { %v11964_v19 = vadd.f32 %v4804_v38, %v2731_v2  ;;  %v4278_v39 = vpop.permute.xlu1 %4277  ;;  %v8303_v25 = vpop.f32.mrb[38].mxu0  ;;  %v13039_v2 = vld [vmem:[#allocation18_spill] sm:$0xff]  ;;  %v4916_v62 = vld [vmem:[#allocation2 + $0x1e5] sm:$0xff] }
 0x5e8   : > { %4346 = vst.msk [vmem:[#allocation3 + $0xd8] sm:$0xff] %vm2243_vm9, %v4278_v39  ;;  %v6798_v13 = vmul.f32 %v8303_v25, %v11696_v63  ;;  %v6655_v33 = vpop.f32.mrb[39].mxu0  ;;  %v5759_v58 = vpop.permute.xlu0 %5758  ;;  %v11973_v17 = vld [vmem:[#allocation3 + $0x90] sm:$0xff]  ;;  %v13040_v39 = vld [vmem:[#allocation19_spill] sm:$0xff] }
 0x5e9   : > { %v6797_v5 = vmul.f32 %v11696_v63, %v6655_v33  ;;  %5580 = vrot.lane.b32.xlu1 %v11572_v48, %s8475_s28  ;;  %5834 = vst.msk [vmem:[#allocation3 + $0xa0] sm:$0xff] %vm1663_vm5, %v5759_v58  ;;  %8319 = vmatprep.mubr.msk.f32.mxu0 %vm2313_vm10, %v11973_v17  ;;  %v12041_v58 = vld [vmem:[%s12872_s5] ss:$0 sm:$0xff] }
 0x5ea   : > { %v6837_v51 = vadd.f32 %v11709_v49, %v6798_v13  ;;  %5008 = vrot.lane.b32.xlu0 %v4915_v53, %s8472_s25  ;;  %v12034_v53 = vld [vmem:[%s12870_s3] ss:$0 sm:$0xff] }
 0x5eb   : > { %v6836_v30 = vadd.f32 %v11709_v49, %v6797_v5  ;;  %v5569_v22 = vpop.permute.xlu1 %5568 }
 0x5ec   : > { %v6869_v8 = vmax.f32 %v6837_v51, 0.0  ;;  %5643 = vst.msk [vmem:[#allocation3 + $0xa8] sm:$0xff] %vm1470_vm4, %v5569_v22  ;;  %v4997_v48 = vpop.permute.xlu0 %4996 }
 0x5ed   : > { %v6868_v45 = vmax.f32 %v6836_v30, 0.0  ;;  %6345 = vrot.lane.b32.xlu1 %v6256_v11, %s8479_s17  ;;  %5069 = vst.msk [vmem:[#allocation3 + $0xb8] sm:$0xff] %vm891_vm1, %v4997_v48 }
 0x5ee   : > { %v11984_v34 = vadd.f32 %v11608_v16, %v6869_v8  ;;  %5772 = vrot.lane.b32.xlu0 %v11605_v47, %s8476_s29 }
 0x5ef   : > { %v11988_v7 = vadd.f32 %v11613_v23, %v6868_v45  ;;  %v6334_v35 = vpop.permute.xlu1 %6333  ;;  %v4378_v24 = vld [vmem:[#allocation3 + $0xd8] sm:$0xff]  ;;  %v12050_v45 = vld [vmem:[%s12873_s6] ss:$0 sm:$0xff] }
 0x5f0   : > { %6410 = vst.msk [vmem:[#allocation3 + $0x98] sm:$0xff] %vm2243_vm9, %v6334_v35  ;;  %8274 = vmatmul.mubr.msk.f32.gmra.mrb[26].mxu1 %vm2313_vm10, %v4378_v24  ;;  %v5761_v16 = vpop.permute.xlu0 %5760  ;;  %v4850_v24 = vld [vmem:[#allocation2 + $0x1c0] sm:$0xff] }
 0x5f1   : > { %4881 = vst.msk [vmem:[#allocation3 + $0xd8] sm:$0xff] %vm495_vm0, %v4849_v29  ;;  %5198 = vrot.lane.b32.xlu1 %v5106_v44, %s8473_s26  ;;  %v5491_v29 = vld [vmem:[#allocation2 + $0x26d] sm:$0xff] }
 0x5f2   : > { %5835 = vst.msk [vmem:[#allocation3 + $0xa8] sm:$0xff] %vm1663_vm5, %v5761_v16  ;;  %5200 = vrot.lane.b32.xlu0 %v5107_v1, %s8473_s26 }
 0x5f3   : > { %v5187_v23 = vpop.permute.xlu1 %5186 }
 0x5f4   : > { %5260 = vst.msk [vmem:[#allocation3 + $0xb0] sm:$0xff] %vm1084_vm2, %v5187_v23  ;;  %v4088_v47 = vpop.permute.xlu0 %4087 }
 0x5f5   : > { %5963 = vrot.lane.b32.xlu1 %v5873_v61, %s8477_s30  ;;  %4155 = vst.msk [vmem:[#allocation3 + $0xe0] sm:$0xff] %vm2050_vm8, %v4088_v47  ;;  %v4917_v61 = vld [vmem:[#allocation2 + $0x1ed] sm:$0xff] }
 0x5f6   : > { %5965 = vrot.lane.b32.xlu0 %v11847_v50, %s8477_s30 }
 0x5f7   : > { %v5952_v41 = vpop.permute.xlu1 %5951  ;;  %v12003_v21 = vld [vmem:[#allocation3 + $0x98] sm:$0xff] }
 0x5f8   : > { %6027 = vst.msk [vmem:[#allocation3 + $0xa0] sm:$0xff] %vm1857_vm6, %v5952_v41  ;;  %8320 = vmatmul.mubr.msk.f32.gmra.mrb[50].mxu0 %vm2313_vm10, %v12003_v21  ;;  %v5379_v18 = vpop.permute.xlu0 %5378 }
 0x5f9   : > { %5390 = vrot.lane.b32.xlu1 %v11626_v6, %s8474_s27  ;;  %5452 = vst.msk [vmem:[#allocation3 + $0xb0] sm:$0xff] %vm1277_vm3, %v5379_v18  ;;  %v12021_v6 = vld [vmem:[%s12869_s2] ss:$0 sm:$0xff] }
 0x5fa   : > { %5392 = vrot.lane.b32.xlu0 %v5299_v52, %s8474_s27  ;;  %v2663_v38 = vmul.f32 %v12021_v6, %v13039_v2 }
 0x5fb   : > { %v5189_v56 = vpop.permute.xlu1 %5188 }
 0x5fc   : > { %5261 = vst.msk [vmem:[#allocation3 + $0xb8] sm:$0xff] %vm1084_vm2, %v5189_v56  ;;  %v6144_v50 = vpop.permute.xlu0 %6143  ;;  %v2702_v5 = vadd.f32 %v12034_v53, %v2663_v38  ;;  %v6258_v56 = vld [vmem:[#allocation2 + $0x2f2] sm:$0xff] }
 0x5fd   : > { %6155 = vrot.lane.b32.xlu1 %v11829_v60, %s8478_s16  ;;  %6219 = vst.msk [vmem:[#allocation3 + $0xa0] sm:$0xff] %vm2050_vm8, %v6144_v50  ;;  %v2662_v60 = vmul.f32 %v12021_v6, %v13040_v39 }
 0x5fe   : > { %6157 = vrot.lane.b32.xlu0 %v11852_v55, %s8478_s16  ;;  %v6257_v55 = vld [vmem:[#allocation2 + $0x2ea] sm:$0xff]  ;;  %v2734_v1 = vmax.f32 %v2702_v5, 0.0 }
 0x5ff   : > { %v5954_v26 = vpop.permute.xlu1 %5953  ;;  %v2701_v30 = vadd.f32 %v12034_v53, %v2662_v60  ;;  %v5108_v60 = vld [vmem:[#allocation2 + $0x1ea] sm:$0xff] }
 0x600   : > { %6028 = vst.msk [vmem:[#allocation3 + $0xa8] sm:$0xff] %vm1857_vm6, %v5954_v26  ;;  %v4280_v25 = vpop.permute.xlu0 %4279 }
 0x601   : > { %5582 = vrot.lane.b32.xlu1 %v5490_v12, %s8475_s28  ;;  %4347 = vst.msk [vmem:[#allocation3 + $0xe0] sm:$0xff] %vm2243_vm9, %v4280_v25  ;;  %v2733_v23 = vmax.f32 %v2701_v30, 0.0 }
 0x602   : > { %5010 = vrot.lane.b32.xlu0 %v4916_v62, %s8472_s25 }
 0x603   : > { %v4090_v13 = vpop.permute.xlu1 %4089  ;;  %v8260_v33 = vpop.f32.mrb[16].mxu1 }
 0x604   : > { %4156 = vst.msk [vmem:[#allocation3 + $0xe8] sm:$0xff] %vm2050_vm8, %v4090_v13  ;;  %v4736_v51 = vmul.f32 %v12041_v58, %v8260_v33  ;;  %v4633_v11 = vpop.f32.mrb[17].mxu1  ;;  %v5571_v8 = vpop.permute.xlu0 %5570  ;;  %v5109_v33 = vld [vmem:[#allocation2 + $0x1f2] sm:$0xff] }
 0x605   : > { %v4735_v22 = vmul.f32 %v12041_v58, %v4633_v11  ;;  %6347 = vrot.lane.b32.xlu1 %v6257_v55, %s8479_s17  ;;  %5644 = vst.msk [vmem:[#allocation3 + $0xb0] sm:$0xff] %vm1470_vm4, %v5571_v8 }
 0x606   : > { %v4775_v48 = vadd.f32 %v12050_v45, %v4736_v51  ;;  %5774 = vrot.lane.b32.xlu0 %v11661_v9, %s8476_s29 }
 0x607   : > { %v4774_v44 = vadd.f32 %v12050_v45, %v4735_v22  ;;  %v5381_v35 = vpop.permute.xlu1 %5380  ;;  %v5876_v22 = vld [vmem:[#allocation2 + $0x308] sm:$0xff] }
 0x608   : > { %v4807_v16 = vmax.f32 %v4775_v48, 0.0  ;;  %5453 = vst.msk [vmem:[#allocation3 + $0xb8] sm:$0xff] %vm1277_vm3, %v5381_v35  ;;  %v6336_v41 = vpop.permute.xlu0 %6335  ;;  %v4379_v52 = vld [vmem:[#allocation3 + $0xe0] sm:$0xff] }
 0x609   : > { %v4806_v47 = vmax.f32 %v4774_v44, 0.0  ;;  %5584 = vrot.lane.b32.xlu1 %v5491_v29, %s8475_s28  ;;  %6411 = vst.msk [vmem:[#allocation3 + $0xa0] sm:$0xff] %vm2243_vm9, %v6336_v41  ;;  %8276 = vmatprep.mubr.msk.f32.mxu1 %vm2313_vm10, %v4379_v52  ;;  %v6067_v35 = vld [vmem:[#allocation2 + $0x305] sm:$0xff] }
 0x60a   : > { %v12059_v18 = vadd.f32 %v4807_v16, %v2734_v1  ;;  %4882 = vst.msk [vmem:[#allocation3 + $0xe0] sm:$0xff] %vm495_vm0, %v4850_v24  ;;  %5012 = vrot.lane.b32.xlu0 %v4917_v61, %s8472_s25  ;;  %v6068_v1 = vld [vmem:[#allocation2 + $0x30d] sm:$0xff]  ;;  %v5492_v61 = vld [vmem:[#allocation2 + $0x285] sm:$0xff] }
 0x60b   : > { %v12064_v9 = vadd.f32 %v4806_v47, %v2733_v23  ;;  %v6146_v50 = vpop.permute.xlu1 %6145  ;;  %v8306_v12 = vpop.f32.mrb[40].mxu0  ;;  %v6259_v52 = vld [vmem:[#allocation2 + $0x30a] sm:$0xff] }
 0x60c   : > { %6220 = vst.msk [vmem:[#allocation3 + $0xa8] sm:$0xff] %vm2050_vm8, %v6146_v50  ;;  %v6800_v26 = vmul.f32 %v8306_v12, %v11696_v63  ;;  %v6665_v2 = vpop.f32.mrb[41].mxu0  ;;  %v4999_v62 = vpop.permute.xlu0 %4998  ;;  %v13041_v50 = vld [vmem:[#allocation20_spill] sm:$0xff] }
 0x60d   : > { %v6799_v38 = vmul.f32 %v11696_v63, %v6665_v2  ;;  %6349 = vrot.lane.b32.xlu1 %v6258_v56, %s8479_s17  ;;  %5070 = vst.msk [vmem:[#allocation3 + $0xc0] sm:$0xff] %vm891_vm1, %v4999_v62  ;;  %v2665_v12 = vmul.f32 %v12021_v6, %v13041_v50  ;;  %v13042_v2 = vld [vmem:[#allocation21_spill] sm:$0xff] }
 0x60e   : > { %v6839_v39 = vadd.f32 %v11709_v49, %v6800_v26  ;;  %5776 = vrot.lane.b32.xlu0 %v11701_v0, %s8476_s29  ;;  %v6260_v26 = vld [vmem:[#allocation2 + $0x312] sm:$0xff] }
 0x60f   : > { %v6838_v25 = vadd.f32 %v11709_v49, %v6799_v38  ;;  %v4282_v55 = vpop.permute.xlu1 %4281  ;;  %v5875_v49 = vld [vmem:[#allocation2 + $0x300] sm:$0xff]  ;;  %v2664_v38 = vmul.f32 %v12021_v6, %v13042_v2 }
 0x610   : > { %v6871_v13 = vmax.f32 %v6839_v39, 0.0  ;;  %4348 = vst.msk [vmem:[#allocation3 + $0xe8] sm:$0xff] %vm2243_vm9, %v4282_v55  ;;  %v5763_v63 = vpop.permute.xlu0 %5762  ;;  %v12078_v51 = vld [vmem:[#allocation3 + $0xa0] sm:$0xff] }
 0x611   : > { %v6870_v5 = vmax.f32 %v6838_v25, 0.0  ;;  %5202 = vrot.lane.b32.xlu1 %v5108_v60, %s8473_s26  ;;  %5836 = vst.msk [vmem:[#allocation3 + $0xb0] sm:$0xff] %vm1663_vm5, %v5763_v63  ;;  %8322 = vmatprep.mubr.msk.f32.mxu0 %vm2313_vm10, %v12078_v51  ;;  %v2704_v25 = vadd.f32 %v12034_v53, %v2665_v12 }
 0x612   : > { %v12081_v11 = vadd.f32 %v11698_v20, %v6871_v13  ;;  %5204 = vrot.lane.b32.xlu0 %v5109_v33, %s8473_s26  ;;  %v4851_v20 = vld [vmem:[#allocation2 + $0x1c8] sm:$0xff]  ;;  %v5877_v33 = vld [vmem:[#allocation2 + $0x320] sm:$0xff] }
 0x613   : > { %v12087_v0 = vadd.f32 %v11703_v36, %v6870_v5  ;;  %v5573_v30 = vpop.permute.xlu1 %5572  ;;  %v5301_v36 = vld [vmem:[#allocation2 + $0x288] sm:$0xff]  ;;  %v2703_v5 = vadd.f32 %v12034_v53, %v2664_v38 }
 0x614   : > { %5645 = vst.msk [vmem:[#allocation3 + $0xb8] sm:$0xff] %vm1470_vm4, %v5573_v30  ;;  %v5001_v8 = vpop.permute.xlu0 %5000  ;;  %v6070_v38 = vld [vmem:[#allocation2 + $0x32d] sm:$0xff] }
 0x615   : > { %5967 = vrot.lane.b32.xlu1 %v5875_v49, %s8477_s30  ;;  %5071 = vst.msk [vmem:[#allocation3 + $0xc8] sm:$0xff] %vm891_vm1, %v5001_v8 }
 0x616   : > { %5969 = vrot.lane.b32.xlu0 %v5876_v22, %s8477_s30 }
 0x617   : > { %v6338_v48 = vpop.permute.xlu1 %6337  ;;  %v4380_v29 = vld [vmem:[#allocation3 + $0xe8] sm:$0xff] }
 0x618   : > { %6412 = vst.msk [vmem:[#allocation3 + $0xa8] sm:$0xff] %vm2243_vm9, %v6338_v48  ;;  %8277 = vmatmul.mubr.msk.f32.gmra.mrb[28].mxu1 %vm2313_vm10, %v4380_v29  ;;  %v5765_v44 = vpop.permute.xlu0 %5764  ;;  %v6069_v29 = vld [vmem:[#allocation2 + $0x325] sm:$0xff] }
 0x619   : > { %4883 = vst.msk [vmem:[#allocation3 + $0xe8] sm:$0xff] %vm495_vm0, %v4851_v20  ;;  %5394 = vrot.lane.b32.xlu1 %v11731_v10, %s8474_s27  ;;  %v5493_v10 = vld [vmem:[#allocation2 + $0x28d] sm:$0xff]  ;;  %v2736_v20 = vmax.f32 %v2704_v25, 0.0 }
 0x61a   : > { %5837 = vst.msk [vmem:[#allocation3 + $0xb8] sm:$0xff] %vm1663_vm5, %v5765_v44  ;;  %5396 = vrot.lane.b32.xlu0 %v5301_v36, %s8474_s27  ;;  %v2735_v36 = vmax.f32 %v2703_v5, 0.0 }
 0x61b   : > { %v5191_v24 = vpop.permute.xlu1 %5190 }
 0x61c   : > { %5262 = vst.msk [vmem:[#allocation3 + $0xc0] sm:$0xff] %vm1084_vm2, %v5191_v24  ;;  %v4092_v16 = vpop.permute.xlu0 %4091  ;;  %v5878_v24 = vld [vmem:[#allocation2 + $0x328] sm:$0xff] }
 0x61d   : > { %6159 = vrot.lane.b32.xlu1 %v6067_v35, %s8478_s16  ;;  %4157 = vst.msk [vmem:[#allocation3 + $0xf0] sm:$0xff] %vm2050_vm8, %v4092_v16 }
 0x61e   : > { %6161 = vrot.lane.b32.xlu0 %v6068_v1, %s8478_s16 }
 0x61f   : > { %v5956_v23 = vpop.permute.xlu1 %5955  ;;  %v12105_v47 = vld [vmem:[#allocation3 + $0xa8] sm:$0xff] }
 0x620   : > { %6029 = vst.msk [vmem:[#allocation3 + $0xb0] sm:$0xff] %vm1857_vm6, %v5956_v23  ;;  %8323 = vmatmul.mubr.msk.f32.gmra.mrb[52].mxu0 %vm2313_vm10, %v12105_v47  ;;  %v5383_v41 = vpop.permute.xlu0 %5382  ;;  %v4852_v23 = vld [vmem:[#allocation2 + $0x1e0] sm:$0xff] }
 0x621   : > { %5586 = vrot.lane.b32.xlu1 %v5492_v61, %s8475_s28  ;;  %5454 = vst.msk [vmem:[#allocation3 + $0xc0] sm:$0xff] %vm1277_vm3, %v5383_v41 }
 0x622   : > { %5588 = vrot.lane.b32.xlu0 %v5493_v10, %s8475_s28  ;;  %v12145_v10 = vld [vmem:[%s12875_s8] ss:$0 sm:$0xff] }
 0x623   : > { %v5193_v56 = vpop.permute.xlu1 %5192 }
 0x624   : > { %5263 = vst.msk [vmem:[#allocation3 + $0xc8] sm:$0xff] %vm1084_vm2, %v5193_v56  ;;  %v6148_v62 = vpop.permute.xlu0 %6147 }
 0x625   : > { %6351 = vrot.lane.b32.xlu1 %v6259_v52, %s8479_s17  ;;  %6221 = vst.msk [vmem:[#allocation3 + $0xb0] sm:$0xff] %vm2050_vm8, %v6148_v62  ;;  %v6261_v52 = vld [vmem:[#allocation2 + $0x32a] sm:$0xff] }
 0x626   : > { %6353 = vrot.lane.b32.xlu0 %v6260_v26, %s8479_s17  ;;  %v12153_v26 = vld [vmem:[%s12876_s9] ss:$0 sm:$0xff] }
 0x627   : > { %v5958_v39 = vpop.permute.xlu1 %5957  ;;  %v8263_v60 = vpop.f32.mrb[18].mxu1 }
 0x628   : > { %6030 = vst.msk [vmem:[#allocation3 + $0xb8] sm:$0xff] %vm1857_vm6, %v5958_v39  ;;  %v4738_v55 = vmul.f32 %v12041_v58, %v8263_v60  ;;  %v4643_v13 = vpop.f32.mrb[19].mxu1  ;;  %v4284_v49 = vpop.permute.xlu0 %4283 }
 0x629   : > { %v4737_v63 = vmul.f32 %v12041_v58, %v4643_v13  ;;  %5778 = vrot.lane.b32.xlu1 %v11770_v27, %s8476_s29  ;;  %4349 = vst.msk [vmem:[#allocation3 + $0xf0] sm:$0xff] %vm2243_vm9, %v4284_v49 }
 0x62a   : > { %v4777_v30 = vadd.f32 %v12050_v45, %v4738_v55  ;;  %5971 = vrot.lane.b32.xlu0 %v5877_v33, %s8477_s30  ;;  %v6262_v33 = vld [vmem:[#allocation2 + $0x332] sm:$0xff] }
 0x62b   : > { %v4776_v22 = vadd.f32 %v12050_v45, %v4737_v63  ;;  %v4094_v8 = vpop.permute.xlu1 %4093  ;;  %v8448_v63 = vld [vmem:[#allocation3] sm:$0xff] }
 0x62c   : > { %v4809_v48 = vmax.f32 %v4777_v30, 0.0  ;;  %4158 = vst.msk [vmem:[#allocation3 + $0xf8] sm:$0xff] %vm2050_vm8, %v4094_v8  ;;  %v5575_v35 = vpop.permute.xlu0 %5574 }
 0x62d   : > { %v4808_v44 = vmax.f32 %v4776_v22, 0.0  ;;  %5780 = vrot.lane.b32.xlu1 %v11808_v42, %s8476_s29  ;;  %5646 = vst.msk [vmem:[#allocation3 + $0xc0] sm:$0xff] %vm1470_vm4, %v5575_v35 }
 0x62e   : > { %v12135_v27 = vadd.f32 %v4809_v48, %v2736_v20  ;;  %6163 = vrot.lane.b32.xlu0 %v6069_v29, %s8478_s16  ;;  %v8450_v20 = vld [vmem:[#allocation3 + $0x8] sm:$0xff] }
 0x62f   : > { %v12138_v1 = vadd.f32 %v4808_v44, %v2735_v36  ;;  %v5385_v16 = vpop.permute.xlu1 %5384  ;;  %v8309_v61 = vpop.f32.mrb[42].mxu0  ;;  %v4853_v48 = vld [vmem:[#allocation2 + $0x1e8] sm:$0xff]  ;;  %v8451_v36 = vld [vmem:[#allocation3 + $0x20] sm:$0xff] }
 0x630   : > { %5455 = vst.msk [vmem:[#allocation3 + $0xc8] sm:$0xff] %vm1277_vm3, %v5385_v16  ;;  %v6802_v42 = vmul.f32 %v12145_v10, %v8309_v61  ;;  %v6675_v41 = vpop.f32.mrb[43].mxu0  ;;  %v6340_v50 = vpop.permute.xlu0 %6339  ;;  %v4381_v12 = vld [vmem:[#allocation3 + $0xf0] sm:$0xff] }
 0x631   : > { %v6801_v56 = vmul.f32 %v12145_v10, %v6675_v41  ;;  %5973 = vrot.lane.b32.xlu1 %v5878_v24, %s8477_s30  ;;  %6413 = vst.msk [vmem:[#allocation3 + $0xb0] sm:$0xff] %vm2243_vm9, %v6340_v50  ;;  %8279 = vmatprep.mubr.msk.f32.mxu1 %vm2313_vm10, %v4381_v12  ;;  %s8480_s30 = smov 112   ;;  %v8452_v24 = vld [vmem:[#allocation3 + $0x18] sm:$0xff]  ;;  %v8453_v61 = vld [vmem:[#allocation3 + $0x30] sm:$0xff] }
 0x632   : > { %v6841_v2 = vadd.f32 %v12153_v26, %v6802_v42  ;;  %4884 = vst.msk [vmem:[#allocation3 + $0xf0] sm:$0xff] %vm495_vm0, %v4852_v23  ;;  %6355 = vrot.lane.b32.xlu0 %v6261_v52, %s8479_s17  ;;  %v8454_v42 = vld [vmem:[#allocation3 + $0x28] sm:$0xff]  ;;  %v8455_v52 = vld [vmem:[#allocation3 + $0x40] sm:$0xff]  ;;  %v13043_v50 = vld [vmem:[#allocation22_spill] sm:$0xff] }
 0x633   : > { %v6840_v62 = vadd.f32 %v12153_v26, %v6801_v56  ;;  %v6150_v39 = vpop.permute.xlu1 %6149  ;;  %v2667_v12 = vmul.f32 %v12021_v6, %v13043_v50  ;;  %v8461_v50 = vld [vmem:[#allocation3 + $0x70] sm:$0xff] }
 0x634   : > { %v6873_v60 = vmax.f32 %v6841_v2, 0.0  ;;  %6222 = vst.msk [vmem:[#allocation3 + $0xb8] sm:$0xff] %vm2050_vm8, %v6150_v39  ;;  %v5003_v55 = vpop.permute.xlu0 %5002  ;;  %v13044_v2 = vld [vmem:[#allocation23_spill] sm:$0xff] }
 0x635   : > { %v6872_v25 = vmax.f32 %v6840_v62, 0.0  ;;  %6165 = vrot.lane.b32.xlu1 %v6070_v38, %s8478_s16  ;;  %5072 = vst.msk [vmem:[#allocation3 + $0xd0] sm:$0xff] %vm891_vm1, %v5003_v55  ;;  %v2666_v38 = vmul.f32 %v12021_v6, %v13044_v2  ;;  %v8456_v39 = vld [vmem:[#allocation3 + $0x38] sm:$0xff]  ;;  %s12702_s16 = scalar_lea.vmem %s12882_s15, %s8018_s21 }
 0x636   : > { %v12164_v13 = vadd.f32 %v11792_v3, %v6873_v60  ;;  %7150 = vrot.lane.b32.xlu0 %v8448_v63, %s8480_s30 }
 0x637   : > { %v12168_v5 = vadd.f32 %v11795_v46, %v6872_v25  ;;  %v4286_v49 = vpop.permute.xlu1 %4285  ;;  %v8449_v46 = vld [vmem:[#allocation3 + $0x10] sm:$0xff] }
 0x638   : > { %4350 = vst.msk [vmem:[#allocation3 + $0xf8] sm:$0xff] %vm2243_vm9, %v4286_v49  ;;  %v5767_v30 = vpop.permute.xlu0 %5766  ;;  %v12173_v22 = vld [vmem:[#allocation3 + $0xb0] sm:$0xff] }
 0x639   : > { %6357 = vrot.lane.b32.xlu1 %v6262_v33, %s8479_s17  ;;  %5838 = vst.msk [vmem:[#allocation3 + $0xc0] sm:$0xff] %vm1663_vm5, %v5767_v30  ;;  %8325 = vmatprep.mubr.msk.f32.mxu0 %vm2313_vm10, %v12173_v22  ;;  %v8457_v25 = vld [vmem:[#allocation3 + $0x50] sm:$0xff]  ;;  %v2706_v33 = vadd.f32 %v12034_v53, %v2667_v12  ;;  %v2705_v30 = vadd.f32 %v12034_v53, %v2666_v38 }
 0x63a   : > { %7154 = vrot.lane.b32.xlu0 %v8449_v46, %s8480_s30 }
 0x63b   : > { %v5577_v3 = vpop.permute.xlu1 %5576 }
 0x63c   : > { %5647 = vst.msk [vmem:[#allocation3 + $0xc8] sm:$0xff] %vm1470_vm4, %v5577_v3  ;;  %v5005_v8 = vpop.permute.xlu0 %5004 }
 0x63d   : > { %7152 = vrot.lane.b32.xlu1 %v8450_v20, %s8480_s30  ;;  %5073 = vst.msk [vmem:[#allocation3 + $0xd8] sm:$0xff] %vm891_vm1, %v5005_v8  ;;  %v8458_v8 = vld [vmem:[#allocation3 + $0x48] sm:$0xff] }
 0x63e   : > { %7158 = vrot.lane.b32.xlu0 %v8451_v36, %s8480_s30  ;;  %v8459_v36 = vld [vmem:[#allocation3 + $0x60] sm:$0xff] }
 0x63f   : > { %v6342_v29 = vpop.permute.xlu1 %6341  ;;  %v4382_v44 = vld [vmem:[#allocation3 + $0xf8] sm:$0xff] }
 0x640   : > { %6414 = vst.msk [vmem:[#allocation3 + $0xb8] sm:$0xff] %vm2243_vm9, %v6342_v29  ;;  %8280 = vmatmul.mubr.msk.f32.gmra.mrb[30].mxu1 %vm2313_vm10, %v4382_v44  ;;  %v5769_v35 = vpop.permute.xlu0 %5768  ;;  %v2738_v44 = vmax.f32 %v2706_v33, 0.0 }
 0x641   : > { %4885 = vst.msk [vmem:[#allocation3 + $0xf8] sm:$0xff] %vm495_vm0, %v4853_v48  ;;  %7156 = vrot.lane.b32.xlu1 %v8452_v24, %s8480_s30  ;;  %v2737_v24 = vmax.f32 %v2705_v30, 0.0 }
 0x642   : > { %5839 = vst.msk [vmem:[#allocation3 + $0xc8] sm:$0xff] %vm1663_vm5, %v5769_v35  ;;  %7162 = vrot.lane.b32.xlu0 %v8453_v61, %s8480_s30 }
 0x643   : > { %v5195_v16 = vpop.permute.xlu1 %5194 }
 0x644   : > { %5264 = vst.msk [vmem:[#allocation3 + $0xd0] sm:$0xff] %vm1084_vm2, %v5195_v16  ;;  %v5197_v23 = vpop.permute.xlu0 %5196 }
 0x645   : > { %7160 = vrot.lane.b32.xlu1 %v8454_v42, %s8480_s30  ;;  %5265 = vst.msk [vmem:[#allocation3 + $0xd8] sm:$0xff] %vm1084_vm2, %v5197_v23  ;;  %v8460_v23 = vld [vmem:[#allocation3 + $0x58] sm:$0xff] }
 0x646   : > { %7166 = vrot.lane.b32.xlu0 %v8455_v52, %s8480_s30 }
 0x647   : > { %v5960_v41 = vpop.permute.xlu1 %5959  ;;  %v12193_v56 = vld [vmem:[#allocation3 + $0xb8] sm:$0xff] }
 0x648   : > { %6031 = vst.msk [vmem:[#allocation3 + $0xc0] sm:$0xff] %vm1857_vm6, %v5960_v41  ;;  %8326 = vmatmul.mubr.msk.f32.gmra.mrb[54].mxu0 %vm2313_vm10, %v12193_v56  ;;  %v5962_v62 = vpop.permute.xlu0 %5961 }
 0x649   : > { %7164 = vrot.lane.b32.xlu1 %v8456_v39, %s8480_s30  ;;  %6032 = vst.msk [vmem:[#allocation3 + $0xc8] sm:$0xff] %vm1857_vm6, %v5962_v62 }
 0x64a   : > { %7170 = vrot.lane.b32.xlu0 %v8457_v25, %s8480_s30 }
 0x64b   : > { %v5387_v60 = vpop.permute.xlu1 %5386  ;;  %v8266_v55 = vpop.f32.mrb[20].mxu1 }
 0x64c   : > { %5456 = vst.msk [vmem:[#allocation3 + $0xd0] sm:$0xff] %vm1277_vm3, %v5387_v60  ;;  %v4740_v63 = vmul.f32 %v12041_v58, %v8266_v55  ;;  %v4653_v49 = vpop.f32.mrb[21].mxu1  ;;  %v5389_v46 = vpop.permute.xlu0 %5388  ;;  %v8462_v60 = vld [vmem:[#allocation3 + $0x68] sm:$0xff] }
 0x64d   : > { %v4739_v3 = vmul.f32 %v12041_v58, %v4653_v49  ;;  %7168 = vrot.lane.b32.xlu1 %v8458_v8, %s8480_s30  ;;  %5457 = vst.msk [vmem:[#allocation3 + $0xd8] sm:$0xff] %vm1277_vm3, %v5389_v46 }
 0x64e   : > { %v4779_v20 = vadd.f32 %v12050_v45, %v4740_v63  ;;  %7174 = vrot.lane.b32.xlu0 %v8459_v36, %s8480_s30 }
 0x64f   : > { %v4778_v48 = vadd.f32 %v12050_v45, %v4739_v3  ;;  %v6152_v29 = vpop.permute.xlu1 %6151 }
 0x650   : > { %v4811_v35 = vmax.f32 %v4779_v20, 0.0  ;;  %6223 = vst.msk [vmem:[#allocation3 + $0xc0] sm:$0xff] %vm2050_vm8, %v6152_v29  ;;  %v6154_v61 = vpop.permute.xlu0 %6153  ;;  %v13045_v29 = vld [vmem:[#allocation24_spill] sm:$0xff] }
 0x651   : > { %v4810_v16 = vmax.f32 %v4778_v48, 0.0  ;;  %7172 = vrot.lane.b32.xlu1 %v8460_v23, %s8480_s30  ;;  %6224 = vst.msk [vmem:[#allocation3 + $0xc8] sm:$0xff] %vm2050_vm8, %v6154_v61  ;;  %v2669_v36 = vmul.f32 %v12021_v6, %v13045_v29 }
 0x652   : > { %v12217_v42 = vadd.f32 %v4811_v35, %v2738_v44  ;;  %7178 = vrot.lane.b32.xlu0 %v8461_v50, %s8480_s30  ;;  %v13046_v44 = vld [vmem:[#allocation25_spill] sm:$0xff] }
 0x653   : > { %v12220_v41 = vadd.f32 %v4810_v16, %v2737_v24  ;;  %v5579_v52 = vpop.permute.xlu1 %5578  ;;  %v8312_v12 = vpop.f32.mrb[44].mxu0  ;;  %v2668_v35 = vmul.f32 %v12021_v6, %v13046_v44  ;;  %v2708_v61 = vadd.f32 %v12034_v53, %v2669_v36 }
 0x654   : > { %5648 = vst.msk [vmem:[#allocation3 + $0xd0] sm:$0xff] %vm1470_vm4, %v5579_v52  ;;  %v6804_v2 = vmul.f32 %v12145_v10, %v8312_v12  ;;  %v6685_v38 = vpop.f32.mrb[45].mxu0  ;;  %v5007_v39 = vpop.permute.xlu0 %5006 }
 0x655   : > { %v6803_v62 = vmul.f32 %v12145_v10, %v6685_v38  ;;  %7176 = vrot.lane.b32.xlu1 %v8462_v60, %s8480_s30  ;;  %5074 = vst.msk [vmem:[#allocation3 + $0xe0] sm:$0xff] %vm891_vm1, %v5007_v39  ;;  %v2707_v50 = vadd.f32 %v12034_v53, %v2668_v35  ;;  %v2740_v60 = vmax.f32 %v2708_v61, 0.0 }
 0x656   : > { %v6843_v25 = vadd.f32 %v12153_v26, %v6804_v2  ;;  %7182 = vrot.lane.b32.xlu0 %v11881_v28, %s8480_s30 }
 0x657   : > { %v6842_v55 = vadd.f32 %v12153_v26, %v6803_v62  ;;  %v6344_v33 = vpop.permute.xlu1 %6343 }
 0x658   : > { %v6875_v63 = vmax.f32 %v6843_v25, 0.0  ;;  %6415 = vst.msk [vmem:[#allocation3 + $0xc0] sm:$0xff] %vm2243_vm9, %v6344_v33  ;;  %v5771_v30 = vpop.permute.xlu0 %5770 }
 0x659   : > { %v6874_v49 = vmax.f32 %v6842_v55, 0.0  ;;  %7180 = vrot.lane.b32.xlu1 %v11824_v43, %s8480_s30  ;;  %5840 = vst.msk [vmem:[#allocation3 + $0xd0] sm:$0xff] %vm1663_vm5, %v5771_v30  ;;  %v2739_v55 = vmax.f32 %v2707_v50, 0.0 }
 0x65a   : > { %v12236_v3 = vadd.f32 %v11883_v54, %v6875_v63  ;;  %7186 = vrot.lane.b32.xlu0 %v11973_v17, %s8480_s30 }
 0x65b   : > { %v12240_v46 = vadd.f32 %v11888_v57, %v6874_v49  ;;  %v5581_v8 = vpop.permute.xlu1 %5580 }
 0x65c   : > { %5649 = vst.msk [vmem:[#allocation3 + $0xd8] sm:$0xff] %vm1470_vm4, %v5581_v8  ;;  %v5009_v28 = vpop.permute.xlu0 %5008 }
 0x65d   : > { %7184 = vrot.lane.b32.xlu1 %v11918_v40, %s8480_s30  ;;  %5075 = vst.msk [vmem:[#allocation3 + $0xe8] sm:$0xff] %vm891_vm1, %v5009_v28 }
 0x65e   : > { %7190 = vrot.lane.b32.xlu0 %v12078_v51, %s8480_s30 }
 0x65f   : > { %v6346_v43 = vpop.permute.xlu1 %6345  ;;  %v6447_v54 = vld [vmem:[#allocation3 + $0xc0] sm:$0xff] }
 0x660   : > { %6416 = vst.msk [vmem:[#allocation3 + $0xc8] sm:$0xff] %vm2243_vm9, %v6346_v43  ;;  %8328 = vmatprep.mubr.msk.f32.mxu0 %vm2313_vm10, %v6447_v54  ;;  %v5773_v57 = vpop.permute.xlu0 %5772 }
 0x661   : > { %7188 = vrot.lane.b32.xlu1 %v12003_v21, %s8480_s30  ;;  %5841 = vst.msk [vmem:[#allocation3 + $0xd8] sm:$0xff] %vm1663_vm5, %v5773_v57 }
 0x662   : > { %7194 = vrot.lane.b32.xlu0 %v12173_v22, %s8480_s30 }
 0x663   : > { %v5199_v17 = vpop.permute.xlu1 %5198 }
 0x664   : > { %5266 = vst.msk [vmem:[#allocation3 + $0xe0] sm:$0xff] %vm1084_vm2, %v5199_v17  ;;  %v5201_v40 = vpop.permute.xlu0 %5200 }
 0x665   : > { %7192 = vrot.lane.b32.xlu1 %v12105_v47, %s8480_s30  ;;  %5267 = vst.msk [vmem:[#allocation3 + $0xe8] sm:$0xff] %vm1084_vm2, %v5201_v40 }
 0x666   : > { %7198 = vrot.lane.b32.xlu0 %v6447_v54, %s8480_s30 }
 0x667   : > { %v5964_v51 = vpop.permute.xlu1 %5963  ;;  %v6448_v20 = vld [vmem:[#allocation3 + $0xc8] sm:$0xff] }
 0x668   : > { %6033 = vst.msk [vmem:[#allocation3 + $0xd0] sm:$0xff] %vm1857_vm6, %v5964_v51  ;;  %8329 = vmatmul.mubr.msk.f32.gmra.mrb[56].mxu0 %vm2313_vm10, %v6448_v20  ;;  %v5966_v21 = vpop.permute.xlu0 %5965 }
 0x669   : > { %7196 = vrot.lane.b32.xlu1 %v12193_v56, %s8480_s30  ;;  %6034 = vst.msk [vmem:[#allocation3 + $0xd8] sm:$0xff] %vm1857_vm6, %v5966_v21 }
 0x66b   : > { %v5391_v22 = vpop.permute.xlu1 %5390 }
 0x66c   : > { %5458 = vst.msk [vmem:[#allocation3 + $0xe0] sm:$0xff] %vm1277_vm3, %v5391_v22  ;;  %v5393_v47 = vpop.permute.xlu0 %5392 }
 0x66d   : > { %7200 = vrot.lane.b32.xlu1 %v6448_v20, %s8480_s30  ;;  %5459 = vst.msk [vmem:[#allocation3 + $0xe8] sm:$0xff] %vm1277_vm3, %v5393_v47 }
 0x66f   : > { %v6156_v48 = vpop.permute.xlu1 %6155 }
 0x670   : > { %6225 = vst.msk [vmem:[#allocation3 + $0xd0] sm:$0xff] %vm2050_vm8, %v6156_v48  ;;  %v6158_v56 = vpop.permute.xlu0 %6157 }
 0x671   : > { %6226 = vst.msk [vmem:[#allocation3 + $0xd8] sm:$0xff] %vm2050_vm8, %v6158_v56 }
 0x673   : > { %v5583_v24 = vpop.permute.xlu1 %5582  ;;  %v8269_v16 = vpop.f32.mrb[22].mxu1 }
 0x674   : > { %5650 = vst.msk [vmem:[#allocation3 + $0xe0] sm:$0xff] %vm1470_vm4, %v5583_v24  ;;  %v4742_v23 = vmul.f32 %v12041_v58, %v8269_v16  ;;  %v4663_v52 = vpop.f32.mrb[23].mxu1  ;;  %v5011_v2 = vpop.permute.xlu0 %5010 }
 0x675   : > { %v4741_v12 = vmul.f32 %v12041_v58, %v4663_v52  ;;  %5076 = vst.msk [vmem:[#allocation3 + $0xf0] sm:$0xff] %vm891_vm1, %v5011_v2  ;;  %v13047_v2 = vld [vmem:[#allocation26_spill] sm:$0xff] }
 0x676   : > { %v4781_v38 = vadd.f32 %v12050_v45, %v4742_v23 }
 0x677   : > { %v4780_v62 = vadd.f32 %v12050_v45, %v4741_v12  ;;  %v6348_v39 = vpop.permute.xlu1 %6347 }
 0x678   : > { %v4813_v25 = vmax.f32 %v4781_v38, 0.0  ;;  %6417 = vst.msk [vmem:[#allocation3 + $0xd0] sm:$0xff] %vm2243_vm9, %v6348_v39  ;;  %v5775_v63 = vpop.permute.xlu0 %5774  ;;  %v2671_v38 = vmul.f32 %v12021_v6, %v13047_v2 }
 0x679   : > { %v4812_v33 = vmax.f32 %v4780_v62, 0.0  ;;  %5842 = vst.msk [vmem:[#allocation3 + $0xe0] sm:$0xff] %vm1663_vm5, %v5775_v63  ;;  %v13048_v62 = vld [vmem:[#allocation27_spill] sm:$0xff] }
 0x67a   : > { %v12285_v49 = vadd.f32 %v4813_v25, %v2740_v60  ;;  %v2670_v39 = vmul.f32 %v12021_v6, %v13048_v62 }
 0x67b   : > { %v12288_v30 = vadd.f32 %v4812_v33, %v2739_v55  ;;  %v5585_v8 = vpop.permute.xlu1 %5584  ;;  %v8315_v28 = vpop.f32.mrb[46].mxu0  ;;  %v2710_v33 = vadd.f32 %v12034_v53, %v2671_v38 }
 0x67c   : > { %5651 = vst.msk [vmem:[#allocation3 + $0xe8] sm:$0xff] %vm1470_vm4, %v5585_v8  ;;  %v6806_v43 = vmul.f32 %v12145_v10, %v8315_v28  ;;  %v6695_v54 = vpop.f32.mrb[47].mxu0  ;;  %v5013_v17 = vpop.permute.xlu0 %5012  ;;  %v2709_v28 = vadd.f32 %v12034_v53, %v2670_v39 }
 0x67d   : > { %v6805_v57 = vmul.f32 %v12145_v10, %v6695_v54  ;;  %5077 = vst.msk [vmem:[#allocation3 + $0xf8] sm:$0xff] %vm891_vm1, %v5013_v17 }
 0x67e   : > { %v6845_v40 = vadd.f32 %v12153_v26, %v6806_v43 }
 0x67f   : > { %v6844_v51 = vadd.f32 %v12153_v26, %v6805_v57  ;;  %v6350_v20 = vpop.permute.xlu1 %6349  ;;  %v6449_v21 = vld [vmem:[#allocation3 + $0xd0] sm:$0xff] }
 0x680   : > { %v6877_v22 = vmax.f32 %v6845_v40, 0.0  ;;  %6418 = vst.msk [vmem:[#allocation3 + $0xd8] sm:$0xff] %vm2243_vm9, %v6350_v20  ;;  %7202 = vrot.lane.b32.xlu0 %v6449_v21, %s8480_s30  ;;  %8331 = vmatprep.mubr.msk.f32.mxu0 %vm2313_vm10, %v6449_v21  ;;  %v5777_v48 = vpop.permute.xlu0 %5776  ;;  %v2742_v20 = vmax.f32 %v2710_v33, 0.0  ;;  %v13049_v33 = vld [vmem:[#allocation28_spill] sm:$0xff] }
 0x681   : > { %v6876_v47 = vmax.f32 %v6844_v51, 0.0  ;;  %5843 = vst.msk [vmem:[#allocation3 + $0xe8] sm:$0xff] %vm1663_vm5, %v5777_v48 }
 0x682   : > { %v12300_v29 = vadd.f32 %v11961_v14, %v6877_v22  ;;  %v2741_v22 = vmax.f32 %v2709_v28, 0.0 }
 0x683   : > { %v12304_v36 = vadd.f32 %v11964_v19, %v6876_v47  ;;  %v5203_v44 = vpop.permute.xlu1 %5202 }
 0x684   : > { %5268 = vst.msk [vmem:[#allocation3 + $0xf0] sm:$0xff] %vm1084_vm2, %v5203_v44  ;;  %v5205_v35 = vpop.permute.xlu0 %5204 }
 0x685   : > { %5269 = vst.msk [vmem:[#allocation3 + $0xf8] sm:$0xff] %vm1084_vm2, %v5205_v35 }
 0x687   : > { %v5968_v56 = vpop.permute.xlu1 %5967  ;;  %v6450_v24 = vld [vmem:[#allocation3 + $0xd8] sm:$0xff] }
 0x688   : > { %6035 = vst.msk [vmem:[#allocation3 + $0xe0] sm:$0xff] %vm1857_vm6, %v5968_v56  ;;  %7204 = vrot.lane.b32.xlu1 %v6450_v24, %s8480_s30  ;;  %8332 = vmatmul.mubr.msk.f32.gmra.mrb[58].mxu0 %vm2313_vm10, %v6450_v24  ;;  %v5970_v14 = vpop.permute.xlu0 %5969 }
 0x689   : > { %6036 = vst.msk [vmem:[#allocation3 + $0xe8] sm:$0xff] %vm1857_vm6, %v5970_v14 }
 0x68b   : > { %v5395_v16 = vpop.permute.xlu1 %5394 }
 0x68c   : > { %5460 = vst.msk [vmem:[#allocation3 + $0xf0] sm:$0xff] %vm1277_vm3, %v5395_v16  ;;  %v5397_v19 = vpop.permute.xlu0 %5396 }
 0x68d   : > { %5461 = vst.msk [vmem:[#allocation3 + $0xf8] sm:$0xff] %vm1277_vm3, %v5397_v19 }
 0x68f   : > { %v6160_v61 = vpop.permute.xlu1 %6159 }
 0x690   : > { %6227 = vst.msk [vmem:[#allocation3 + $0xe0] sm:$0xff] %vm2050_vm8, %v6160_v61  ;;  %v6162_v23 = vpop.permute.xlu0 %6161 }
 0x691   : > { %6228 = vst.msk [vmem:[#allocation3 + $0xe8] sm:$0xff] %vm2050_vm8, %v6162_v23 }
 0x693   : > { %v5587_v52 = vpop.permute.xlu1 %5586 }
 0x694   : > { %5652 = vst.msk [vmem:[#allocation3 + $0xf0] sm:$0xff] %vm1470_vm4, %v5587_v52  ;;  %v5589_v50 = vpop.permute.xlu0 %5588 }
 0x695   : > { %5653 = vst.msk [vmem:[#allocation3 + $0xf8] sm:$0xff] %vm1470_vm4, %v5589_v50 }
 0x697   : > { %v6352_v12 = vpop.permute.xlu1 %6351 }
 0x698   : > { %6419 = vst.msk [vmem:[#allocation3 + $0xe0] sm:$0xff] %vm2243_vm9, %v6352_v12  ;;  %v6354_v60 = vpop.permute.xlu0 %6353 }
 0x699   : > { %6420 = vst.msk [vmem:[#allocation3 + $0xe8] sm:$0xff] %vm2243_vm9, %v6354_v60 }
 0x69b   : > { %v5779_v25 = vpop.permute.xlu1 %5778  ;;  %v8272_v55 = vpop.f32.mrb[24].mxu1 }
 0x69c   : > { %5844 = vst.msk [vmem:[#allocation3 + $0xf0] sm:$0xff] %vm1663_vm5, %v5779_v25  ;;  %v4744_v63 = vmul.f32 %v12041_v58, %v8272_v55  ;;  %v4673_v8 = vpop.f32.mrb[25].mxu1  ;;  %v5972_v54 = vpop.permute.xlu0 %5971 }
 0x69d   : > { %v4743_v43 = vmul.f32 %v12041_v58, %v4673_v8  ;;  %6037 = vst.msk [vmem:[#allocation3 + $0xf0] sm:$0xff] %vm1857_vm6, %v5972_v54 }
 0x69e   : > { %v4783_v57 = vadd.f32 %v12050_v45, %v4744_v63  ;;  %v13050_v63 = vld [vmem:[#allocation29_spill] sm:$0xff] }
 0x69f   : > { %v4782_v17 = vadd.f32 %v12050_v45, %v4743_v43  ;;  %v5781_v40 = vpop.permute.xlu1 %5780  ;;  %v6451_v51 = vld [vmem:[#allocation3 + $0xe0] sm:$0xff] }
 0x6a0   : > { %v4815_v21 = vmax.f32 %v4783_v57, 0.0  ;;  %5845 = vst.msk [vmem:[#allocation3 + $0xf8] sm:$0xff] %vm1663_vm5, %v5781_v40  ;;  %7206 = vrot.lane.b32.xlu0 %v6451_v51, %s8480_s30  ;;  %8334 = vmatprep.mubr.msk.f32.mxu0 %vm2313_vm10, %v6451_v51  ;;  %v6164_v48 = vpop.permute.xlu0 %6163  ;;  %v6452_v44 = vld [vmem:[#allocation3 + $0xe8] sm:$0xff] }
 0x6a1   : > { %v4814_v47 = vmax.f32 %v4782_v17, 0.0  ;;  %6229 = vst.msk [vmem:[#allocation3 + $0xf0] sm:$0xff] %vm2050_vm8, %v6164_v48  ;;  %8335 = vmatmul.mubr.msk.f32.gmra.mrb[60].mxu0 %vm2313_vm10, %v6452_v44  ;;  %7208 = vrot.lane.b32.xlu1 %v6452_v44, %s8480_s30 }
 0x6a2   : > { %v12335_v35 = vadd.f32 %v4815_v21, %v2742_v20 }
 0x6a3   : > { %v12340_v56 = vadd.f32 %v4814_v47, %v2741_v22  ;;  %v5974_v24 = vpop.permute.xlu1 %5973  ;;  %v8318_v14 = vpop.f32.mrb[48].mxu0 }
 0x6a4   : > { %6038 = vst.msk [vmem:[#allocation3 + $0xf8] sm:$0xff] %vm1857_vm6, %v5974_v24  ;;  %v6808_v16 = vmul.f32 %v12145_v10, %v8318_v14  ;;  %v6705_v19 = vpop.f32.mrb[49].mxu0  ;;  %v6356_v23 = vpop.permute.xlu0 %6355 }
 0x6a5   : > { %v6807_v61 = vmul.f32 %v12145_v10, %v6705_v19  ;;  %6421 = vst.msk [vmem:[#allocation3 + $0xf0] sm:$0xff] %vm2243_vm9, %v6356_v23 }
 0x6a6   : > { %v6847_v52 = vadd.f32 %v12153_v26, %v6808_v16 }
 0x6a7   : > { %v6846_v50 = vadd.f32 %v12153_v26, %v6807_v61  ;;  %v6166_v12 = vpop.permute.xlu1 %6165 }
 0x6a8   : > { %v6879_v2 = vmax.f32 %v6847_v52, 0.0  ;;  %6230 = vst.msk [vmem:[#allocation3 + $0xf8] sm:$0xff] %vm2050_vm8, %v6166_v12 }
 0x6a9   : > { %v6878_v38 = vmax.f32 %v6846_v50, 0.0 }
 0x6aa   : > { %v12350_v62 = vadd.f32 %v12059_v18, %v6879_v2  ;;  %v2673_v18 = vmul.f32 %v12021_v6, %v13049_v33 }
 0x6ab   : > { %v12353_v39 = vadd.f32 %v12064_v9, %v6878_v38  ;;  %v6358_v60 = vpop.permute.xlu1 %6357  ;;  %v2672_v9 = vmul.f32 %v12021_v6, %v13050_v63  ;;  %v7029_v38 = vld [vmem:[%s12880_s13] sm:$0xf] }
 0x6ac   : > { %6422 = vst.msk [vmem:[#allocation3 + $0xf8] sm:$0xff] %vm2243_vm9, %v6358_v60  ;;  %v6453_v25 = vld [vmem:[#allocation3 + $0xf0] sm:$0xff]  ;;  %v2712_v28 = vadd.f32 %v12034_v53, %v2673_v18  ;;  %8341 = vmatpush3.msk.msra.mxu1 %vm2410_vm7, %v7029_v38 }
 0x6ad   : > { %7210 = vrot.lane.b32.xlu0 %v6453_v25, %s8480_s30  ;;  %8337 = vmatprep.mubr.msk.f32.mxu0 %vm2313_vm10, %v6453_v25  ;;  %v2711_v57 = vadd.f32 %v12034_v53, %v2672_v9  ;;  %v13051_v60 = vld [vmem:[#allocation30_spill] sm:$0xff] }
 0x6ae   : > { %v2744_v20 = vmax.f32 %v2712_v28, 0.0  ;;  %v2675_v25 = vmul.f32 %v12021_v6, %v13051_v60  ;;  %v13054_v60 = vld [vmem:[#allocation33_spill] sm:$0xff] }
 0x6af   : > { %v2743_v22 = vmax.f32 %v2711_v57, 0.0 }
 0x6b0   : > { %v2714_v63 = vadd.f32 %v12034_v53, %v2675_v25  ;;  %v2676_v25 = vmul.f32 %v12021_v6, %v13054_v60 }
 0x6b3   : > { %v6454_v55 = vld [vmem:[#allocation3 + $0xf8] sm:$0xff] }
 0x6b4   : > { %7212 = vrot.lane.b32.xlu1 %v6454_v55, %s8480_s30  ;;  %8338 = vmatmul.mubr.msk.f32.gmra.mrb[62].mxu0 %vm2313_vm10, %v6454_v55  ;;  %v13052_v55 = vld [vmem:[#allocation31_spill] sm:$0xff] }
 0x6b5   : > { %v2674_v33 = vmul.f32 %v12021_v6, %v13052_v55 }
 0x6c3   : > { %v8275_v8 = vpop.f32.mrb[26].mxu1 }
 0x6c4   : > { %v4746_v43 = vmul.f32 %v12041_v58, %v8275_v8  ;;  %v4683_v54 = vpop.f32.mrb[27].mxu1 }
 0x6c5   : > { %v4745_v17 = vmul.f32 %v12041_v58, %v4683_v54  ;;  %v2746_v54 = vmax.f32 %v2714_v63, 0.0 }
 0x6c6   : > { %v4785_v40 = vadd.f32 %v12050_v45, %v4746_v43 }
 0x6c7   : > { %v4784_v51 = vadd.f32 %v12050_v45, %v4745_v17 }
 0x6c8   : > { %v4817_v21 = vmax.f32 %v4785_v40, 0.0 }
 0x6c9   : > { %v4816_v47 = vmax.f32 %v4784_v51, 0.0 }
 0x6ca   : > { %v12370_v48 = vadd.f32 %v4817_v21, %v2744_v20 }
 0x6cb   : > { %v12372_v44 = vadd.f32 %v4816_v47, %v2743_v22  ;;  %v8321_v24 = vpop.f32.mrb[50].mxu0 }
 0x6cc   : > { %v6810_v14 = vmul.f32 %v12145_v10, %v8321_v24  ;;  %v6715_v16 = vpop.f32.mrb[51].mxu0 }
 0x6cd   : > { %v6809_v19 = vmul.f32 %v12145_v10, %v6715_v16 }
 0x6ce   : > { %v6849_v61 = vadd.f32 %v12153_v26, %v6810_v14 }
 0x6cf   : > { %v6848_v23 = vadd.f32 %v12153_v26, %v6809_v19 }
 0x6d0   : > { %v6881_v52 = vmax.f32 %v6849_v61, 0.0 }
 0x6d1   : > { %v6880_v50 = vmax.f32 %v6848_v23, 0.0 }
 0x6d2   : > { %v12379_v12 = vadd.f32 %v12135_v27, %v6881_v52 }
 0x6d3   : > { %v12382_v2 = vadd.f32 %v12138_v1, %v6880_v50  ;;  %v2713_v1 = vadd.f32 %v12034_v53, %v2674_v33  ;;  %v13053_v50 = vld [vmem:[#allocation32_spill] sm:$0xff] }
 0x6d4   : > { %v2677_v38 = vmul.f32 %v12021_v6, %v13053_v50 }
 0x6d5   : > { %v2745_v17 = vmax.f32 %v2713_v1, 0.0 }
 0x6d6   : > { %v2716_v33 = vadd.f32 %v12034_v53, %v2677_v38 }
 0x6d8   : > { %v2748_v1 = vmax.f32 %v2716_v33, 0.0 }
 0x6eb   : > { %v8278_v18 = vpop.f32.mrb[28].mxu1 }
 0x6ec   : > { %v4748_v27 = vmul.f32 %v12041_v58, %v8278_v18  ;;  %v4693_v9 = vpop.f32.mrb[29].mxu1 }
 0x6ed   : > { %v4747_v8 = vmul.f32 %v12041_v58, %v4693_v9 }
 0x6ee   : > { %v4787_v28 = vadd.f32 %v12050_v45, %v4748_v27  ;;  %v2715_v27 = vadd.f32 %v12034_v53, %v2676_v25 }
 0x6ef   : > { %v4786_v43 = vadd.f32 %v12050_v45, %v4747_v8 }
 0x6f0   : > { %v4819_v57 = vmax.f32 %v4787_v28, 0.0  ;;  %v2747_v28 = vmax.f32 %v2715_v27, 0.0  ;;  %v6963_v27 = vsel %vm495_vm0, %v11816_v31, 0.0 }
 0x6f1   : > { %v4818_v40 = vmax.f32 %v4786_v43, 0.0 }
 0x6f2   : > { %v12398_v51 = vadd.f32 %v4819_v57, %v2746_v54 }
 0x6f3   : > { %v12400_v20 = vadd.f32 %v4818_v40, %v2745_v17  ;;  %v8324_v21 = vpop.f32.mrb[52].mxu0 }
 0x6f4   : > { %v6812_v22 = vmul.f32 %v12145_v10, %v8324_v21  ;;  %v6725_v47 = vpop.f32.mrb[53].mxu0 }
 0x6f5   : > { %v6811_v24 = vmul.f32 %v12145_v10, %v6725_v47 }
 0x6f6   : > { %v6851_v14 = vadd.f32 %v12153_v26, %v6812_v22 }
 0x6f7   : > { %v6850_v16 = vadd.f32 %v12153_v26, %v6811_v24  ;;  %v12436_v24 = vld [vmem:[%s12877_s10] sm:$0xf] }
 0x6f8   : > { %v6883_v19 = vmax.f32 %v6851_v14, 0.0  ;;  %8345 = vmatprep.subr.msk.mxu1 %vm2410_vm7, %v12436_v24 }
 0x6f9   : > { %v6882_v61 = vmax.f32 %v6850_v16, 0.0  ;;  %v13055_v16 = vmov 0.0  }
 0x6fa   : > { %v12407_v23 = vadd.f32 %v12217_v42, %v6883_v19  ;;  %8342 = vmatprep.mubr.msk.f32.mxu1 %vm8481_vm12, %v13055_v16  ;;  %v6959_v19 = vsel %vm495_vm0, %v11728_v32, 0.0 }
 0x6fb   : > { %v12410_v52 = vadd.f32 %v12220_v41, %v6882_v61  ;;  %v6961_v61 = vsel %vm495_vm0, %v11820_v59, 0.0 }
 0x713   : > { %v8281_v55 = vpop.f32.mrb[30].mxu1 }
 0x714   : > { %v4750_v18 = vmul.f32 %v12041_v58, %v8281_v55  ;;  %v4703_v63 = vpop.f32.mrb[31].mxu1 }
 0x715   : > { %v4749_v42 = vmul.f32 %v12041_v58, %v4703_v63 }
 0x716   : > { %v4789_v9 = vadd.f32 %v12050_v45, %v4750_v18 }
 0x717   : > { %v4788_v41 = vadd.f32 %v12050_v45, %v4749_v42  ;;  %v6965_v42 = vsel %vm495_vm0, %v11910_v4, 0.0 }
 0x718   : > { %v4821_v8 = vmax.f32 %v4789_v9, 0.0 }
 0x719   : > { %v4820_v43 = vmax.f32 %v4788_v41, 0.0 }
 0x71a   : > { %v12422_v54 = vadd.f32 %v4821_v8, %v2748_v1 }
 0x71b   : > { %v12424_v6 = vadd.f32 %v4820_v43, %v2747_v28  ;;  %v8327_v57 = vpop.f32.mrb[54].mxu0  ;;  %v6967_v43 = vsel %vm495_vm0, %v11906_v15, 0.0 }
 0x71c   : > { %v6814_v17 = vmul.f32 %v12145_v10, %v8327_v57  ;;  %v6735_v40 = vpop.f32.mrb[55].mxu0  ;;  %v6969_v57 = vsel %vm495_vm0, %v11988_v7, 0.0 }
 0x71d   : > { %v6813_v53 = vmul.f32 %v12145_v10, %v6735_v40 }
 0x71e   : > { %v6853_v58 = vadd.f32 %v12153_v26, %v6814_v17 }
 0x71f   : > { %v6852_v21 = vadd.f32 %v12153_v26, %v6813_v53  ;;  %v6971_v53 = vsel %vm495_vm0, %v11984_v34, 0.0 }
 0x720   : > { %v6885_v22 = vmax.f32 %v6853_v58, 0.0  ;;  %v6973_v58 = vsel %vm495_vm0, %v12087_v0, 0.0 }
 0x721   : > { %v6884_v45 = vmax.f32 %v6852_v21, 0.0 }
 0x722   : > { %v12431_v47 = vadd.f32 %v12285_v49, %v6885_v22  ;;  %v6958_v49 = vsel %vm495_vm0, %v11734_v37, 0.0  ;;  %v6977_v22 = vsel %vm495_vm0, %v12168_v5, 0.0 }
 0x723   : > { %v12439_v14 = vadd.f32 %v12288_v30, %v6884_v45  ;;  %v6960_v38 = vadd.f32 %v6959_v19, %v6958_v49  ;;  %v6979_v19 = vsel %vm495_vm0, %v12164_v13, 0.0  ;;  %v6981_v49 = vsel %vm495_vm0, %v12240_v46, 0.0 }
 0x725   : > { %v6962_v55 = vadd.f32 %v6961_v61, %v6960_v38 }
 0x727   : > { %v6964_v41 = vadd.f32 %v6963_v27, %v6962_v55 }
 0x729   : > { %v6966_v28 = vadd.f32 %v6965_v42, %v6964_v41 }
 0x72b   : > { %v6968_v17 = vadd.f32 %v6967_v43, %v6966_v28 }
 0x72d   : > { %v6970_v40 = vadd.f32 %v6969_v57, %v6968_v17  ;;  %v6987_v57 = vsel %vm495_vm0, %v12300_v29, 0.0  ;;  %v6989_v17 = vsel %vm495_vm0, %v12353_v39, 0.0 }
 0x73b   : > { %v8330_v50 = vpop.f32.mrb[56].mxu0 }
 0x73c   : > { %v6816_v30 = vmul.f32 %v12145_v10, %v8330_v50  ;;  %v6745_v60 = vpop.f32.mrb[57].mxu0 }
 0x73d   : > { %v6815_v25 = vmul.f32 %v12145_v10, %v6745_v60 }
 0x73e   : > { %v6855_v33 = vadd.f32 %v12153_v26, %v6816_v30 }
 0x73f   : > { %v6854_v18 = vadd.f32 %v12153_v26, %v6815_v25 }
 0x740   : > { %v6887_v63 = vmax.f32 %v6855_v33, 0.0  ;;  %v6983_v33 = vsel %vm495_vm0, %v12236_v3, 0.0 }
 0x741   : > { %v6886_v9 = vmax.f32 %v6854_v18, 0.0  ;;  %v6985_v18 = vsel %vm495_vm0, %v12304_v36, 0.0 }
 0x742   : > { %v12459_v1 = vadd.f32 %v12335_v35, %v6887_v63  ;;  %v6972_v35 = vadd.f32 %v6971_v53, %v6970_v40 }
 0x743   : > { %v12462_v8 = vadd.f32 %v12340_v56, %v6886_v9  ;;  %v6975_v56 = vsel %vm495_vm0, %v12081_v11, 0.0 }
 0x744   : > { %v6974_v21 = vadd.f32 %v6973_v58, %v6972_v35  ;;  %v6991_v58 = vsel %vm495_vm0, %v12350_v62, 0.0  ;;  %v6993_v35 = vsel %vm495_vm0, %v12382_v2, 0.0 }
 0x746   : > { %v6976_v45 = vadd.f32 %v6975_v56, %v6974_v21  ;;  %v6997_v56 = vsel %vm495_vm0, %v12410_v52, 0.0 }
 0x748   : > { %v6978_v16 = vadd.f32 %v6977_v22, %v6976_v45 }
 0x74a   : > { %v6980_v61 = vadd.f32 %v6979_v19, %v6978_v16 }
 0x74c   : > { %v6982_v38 = vadd.f32 %v6981_v49, %v6980_v61  ;;  %v6999_v61 = vsel %vm495_vm0, %v12407_v23, 0.0 }
 0x74e   : > { %v6984_v27 = vadd.f32 %v6983_v33, %v6982_v38 }
 0x750   : > { %v6986_v41 = vadd.f32 %v6985_v18, %v6984_v27  ;;  %v7003_v27 = vsel %vm495_vm0, %v12431_v47, 0.0 }
 0x752   : > { %v6988_v40 = vadd.f32 %v6987_v57, %v6986_v41 }
 0x754   : > { %v6990_v53 = vadd.f32 %v6989_v17, %v6988_v40  ;;  %v7007_v17 = vsel %vm495_vm0, %v12459_v1, 0.0 }
 0x756   : > { %v6992_v21 = vadd.f32 %v6991_v58, %v6990_v53 }
 0x75b   : > { %v8333_v50 = vpop.f32.mrb[58].mxu0 }
 0x75c   : > { %v6818_v30 = vmul.f32 %v12145_v10, %v8333_v50  ;;  %v6755_v60 = vpop.f32.mrb[59].mxu0  ;;  %v7001_v50 = vsel %vm495_vm0, %v12439_v14, 0.0 }
 0x75d   : > { %v6817_v25 = vmul.f32 %v12145_v10, %v6755_v60 }
 0x75e   : > { %v6857_v55 = vadd.f32 %v12153_v26, %v6818_v30 }
 0x75f   : > { %v6856_v63 = vadd.f32 %v12153_v26, %v6817_v25 }
 0x760   : > { %v6889_v42 = vmax.f32 %v6857_v55, 0.0 }
 0x761   : > { %v6888_v9 = vmax.f32 %v6856_v63, 0.0 }
 0x762   : > { %v12489_v28 = vadd.f32 %v12370_v48, %v6889_v42  ;;  %v6994_v48 = vadd.f32 %v6993_v35, %v6992_v21  ;;  %v7005_v42 = vsel %vm495_vm0, %v12462_v8, 0.0 }
 0x763   : > { %v12492_v43 = vadd.f32 %v12372_v44, %v6888_v9  ;;  %v6995_v44 = vsel %vm495_vm0, %v12379_v12, 0.0 }
 0x764   : > { %v6996_v22 = vadd.f32 %v6995_v44, %v6994_v48  ;;  %v7011_v48 = vsel %vm495_vm0, %v12489_v28, 0.0 }
 0x765   : > { %v7009_v40 = vsel %vm495_vm0, %v12492_v43, 0.0 }
 0x766   : > { %v6998_v45 = vadd.f32 %v6997_v56, %v6996_v22 }
 0x768   : > { %v7000_v30 = vadd.f32 %v6999_v61, %v6998_v45 }
 0x76a   : > { %v7002_v55 = vadd.f32 %v7001_v50, %v7000_v30 }
 0x76c   : > { %v7004_v41 = vadd.f32 %v7003_v27, %v7002_v55 }
 0x76e   : > { %v7006_v57 = vadd.f32 %v7005_v42, %v7004_v41 }
 0x770   : > { %v7008_v53 = vadd.f32 %v7007_v17, %v7006_v57 }
 0x774   : > { %v8336_v16 = vpop.f32.mrb[60].mxu0 }
 0x775   : > { %v6820_v19 = vmul.f32 %v12145_v10, %v8336_v16  ;;  %v6765_v49 = vpop.f32.mrb[61].mxu0  ;;  %v7151_v16 = vpop.permute.xlu0 %7150 }
 0x776   : > { %v6819_v38 = vmul.f32 %v12145_v10, %v6765_v49 }
 0x777   : > { %v6859_v60 = vadd.f32 %v12153_v26, %v6820_v19 }
 0x778   : > { %v6858_v25 = vadd.f32 %v12153_v26, %v6819_v38  ;;  %v7153_v38 = vpop.permute.xlu1 %7152 }
 0x779   : > { %v6891_v33 = vmax.f32 %v6859_v60, 0.0  ;;  %v7155_v55 = vpop.permute.xlu0 %7154 }
 0x77a   : > { %v6890_v18 = vmax.f32 %v6858_v25, 0.0 }
 0x77b   : > { %v12515_v63 = vadd.f32 %v12398_v51, %v6891_v33  ;;  %v7010_v51 = vadd.f32 %v7009_v40, %v7008_v53 }
 0x77c   : > { %v12522_v9 = vadd.f32 %v12400_v20, %v6890_v18  ;;  %v7157_v27 = vpop.permute.xlu1 %7156 }
 0x77d   : > { %v7012_v56 = vadd.f32 %v7011_v48, %v7010_v51  ;;  %v7015_v30 = vsel %vm495_vm0, %v12515_v63, 0.0  ;;  %v7159_v42 = vpop.permute.xlu0 %7158 }
 0x77e   : > { %v7013_v20 = vsel %vm495_vm0, %v12522_v9, 0.0 }
 0x77f   : > { %v7014_v19 = vadd.f32 %v7013_v20, %v7012_v56 }
 0x780   : > { %v7161_v17 = vpop.permute.xlu1 %7160 }
 0x781   : > { %v7163_v53 = vpop.permute.xlu0 %7162 }
 0x787   : > { %v8339_v58 = vpop.f32.mrb[62].mxu0 }
 0x788   : > { %v6822_v35 = vmul.f32 %v12145_v10, %v8339_v58  ;;  %v6775_v21 = vpop.f32.mrb[63].mxu0  ;;  %v7165_v58 = vpop.permute.xlu1 %7164 }
 0x789   : > { %v6821_v44 = vmul.f32 %v12145_v10, %v6775_v21  ;;  %v7016_v10 = vadd.f32 %v7015_v30, %v7014_v19  ;;  %v7167_v21 = vpop.permute.xlu0 %7166 }
 0x78a   : > { %v6861_v22 = vadd.f32 %v12153_v26, %v6822_v35 }
 0x78b   : > { %v6860_v45 = vadd.f32 %v12153_v26, %v6821_v44 }
 0x78c   : > { %v6893_v49 = vmax.f32 %v6861_v22, 0.0  ;;  %v7169_v48 = vpop.permute.xlu1 %7168 }
 0x78d   : > { %v6892_v61 = vmax.f32 %v6860_v45, 0.0  ;;  %v7171_v20 = vpop.permute.xlu0 %7170 }
 0x78e   : > { %v12537_v50 = vadd.f32 %v12422_v54, %v6893_v49 }
 0x78f   : > { %v12542_v60 = vadd.f32 %v12424_v6, %v6892_v61 }
 0x790   : > { %v7019_v33 = vsel %vm495_vm0, %v12537_v50, 0.0  ;;  %v7173_v44 = vpop.permute.xlu1 %7172 }
 0x791   : > { %v7017_v25 = vsel %vm495_vm0, %v12542_v60, 0.0  ;;  %v7175_v56 = vpop.permute.xlu0 %7174 }
 0x792   : > { %v7018_v26 = vadd.f32 %v7017_v25, %v7016_v10 }
 0x794   : > { %v7020_v18 = vadd.f32 %v7019_v33, %v7018_v26  ;;  %v7177_v22 = vpop.permute.xlu1 %7176 }
 0x796   : > { %v7021_v54 = vrot.slane %v7020_v18, 4 }
 0x798   : > { %v7022_v41 = vadd.f32 %v7021_v54, %v7020_v18  ;;  %v7181_v45 = vpop.permute.xlu1 %7180 }
 0x79a   : > { %v7023_v57 = vrot.slane %v7022_v41, 2 }
 0x79c   : > { %v7024_v40 = vadd.f32 %v7023_v57, %v7022_v41  ;;  %v7185_v19 = vpop.permute.xlu1 %7184 }
 0x79e   : > { %v7025_v6 = vrot.slane %v7024_v40, 1 }
 0x7a0   : > { %v7026_v51 = vadd.f32 %v7025_v6, %v7024_v40  ;;  %v7189_v61 = vpop.permute.xlu1 %7188  ;;  %v12588_v40 = vld [vmem:[%s12878_s11] ss:$0 sm:$0xff] }
 0x7a1   : > { %v12593_v6 = vld [vmem:[%s12879_s12] ss:$0 sm:$0xff] }
 0x7a2   : > { %v7028_v35 = vmul.f32 0.00390625, %v7026_v51 }
 0x7a4   : > { %8343 = vmatmul.mubr.msk.f32.vlgmr.msra.gmra.mrb[32].mxu1 %vm495_vm0, %v7028_v35  ;;  %v7193_v30 = vpop.permute.xlu1 %7192 }
 0x7a5   : > { %8346 = vmatpush3.msk.msra.mxu1 %vm2410_vm7, %v12436_v24  ;;  %8347 = vmatprep.mubr.msk.f32.mxu1 %vm495_vm0, %v7151_v16  ;;  %v7179_v24 = vpop.permute.xlu0 %7178 }
 0x7a8   : > { %8348 = vmatmul.mubr.msk.f32.vlgmr.msra.gmra.mrb[34].mxu1 %vm495_vm0, %v7153_v38  ;;  %v7197_v25 = vpop.permute.xlu1 %7196 }
 0x7a9   : > { %8350 = vmatprep.mubr.msk.f32.mxu1 %vm495_vm0, %v7155_v55  ;;  %v7183_v16 = vpop.permute.xlu0 %7182 }
 0x7ac   : > { %8351 = vmatmul.mubr.msk.f32.gmra.mrb[36].mxu1 %vm495_vm0, %v7157_v27  ;;  %v7201_v26 = vpop.permute.xlu1 %7200 }
 0x7ad   : > { %8353 = vmatprep.mubr.msk.f32.mxu1 %vm495_vm0, %v7159_v42  ;;  %v7187_v49 = vpop.permute.xlu0 %7186 }
 0x7b0   : > { %8354 = vmatmul.mubr.msk.f32.gmra.mrb[38].mxu1 %vm495_vm0, %v7161_v17  ;;  %v7205_v18 = vpop.permute.xlu1 %7204 }
 0x7b1   : > { %8356 = vmatprep.mubr.msk.f32.mxu1 %vm495_vm0, %v7163_v53  ;;  %v7191_v38 = vpop.permute.xlu0 %7190 }
 0x7b4   : > { %8357 = vmatmul.mubr.msk.f32.gmra.mrb[40].mxu1 %vm495_vm0, %v7165_v58  ;;  %v7209_v54 = vpop.permute.xlu1 %7208 }
 0x7b5   : > { %8359 = vmatprep.mubr.msk.f32.mxu1 %vm495_vm0, %v7167_v21  ;;  %v7195_v10 = vpop.permute.xlu0 %7194 }
 0x7b8   : > { %8360 = vmatmul.mubr.msk.f32.gmra.mrb[42].mxu1 %vm495_vm0, %v7169_v48  ;;  %v7213_v41 = vpop.permute.xlu1 %7212 }
 0x7b9   : > { %8362 = vmatprep.mubr.msk.f32.mxu1 %vm495_vm0, %v7171_v20  ;;  %v7199_v55 = vpop.permute.xlu0 %7198 }
 0x7bc   : > { %8363 = vmatmul.mubr.msk.f32.gmra.mrb[44].mxu1 %vm495_vm0, %v7173_v44 }
 0x7bd   : > { %8365 = vmatprep.mubr.msk.f32.mxu1 %vm495_vm0, %v7175_v56  ;;  %v7203_v33 = vpop.permute.xlu0 %7202 }
 0x7c0   : > { %8366 = vmatmul.mubr.msk.f32.gmra.mrb[46].mxu1 %vm495_vm0, %v7177_v22 }
 0x7c1   : > { %8368 = vmatprep.mubr.msk.f32.mxu1 %vm495_vm0, %v7179_v24  ;;  %v7207_v27 = vpop.permute.xlu0 %7206 }
 0x7c4   : > { %8369 = vmatmul.mubr.msk.f32.gmra.mrb[48].mxu1 %vm495_vm0, %v7181_v45 }
 0x7c5   : > { %8371 = vmatprep.mubr.msk.f32.mxu1 %vm495_vm0, %v7183_v16  ;;  %v7211_v42 = vpop.permute.xlu0 %7210 }
 0x7c8   : > { %8372 = vmatmul.mubr.msk.f32.gmra.mrb[50].mxu1 %vm495_vm0, %v7185_v19 }
 0x7c9   : > { %8374 = vmatprep.mubr.msk.f32.mxu1 %vm495_vm0, %v7187_v49 }
 0x7cc   : > { %8375 = vmatmul.mubr.msk.f32.gmra.mrb[52].mxu1 %vm495_vm0, %v7189_v61 }
 0x7cd   : > { %8377 = vmatprep.mubr.msk.f32.mxu1 %vm495_vm0, %v7191_v38 }
 0x7d0   : > { %8378 = vmatmul.mubr.msk.f32.gmra.mrb[54].mxu1 %vm495_vm0, %v7193_v30 }
 0x7d1   : > { %8380 = vmatprep.mubr.msk.f32.mxu1 %vm495_vm0, %v7195_v10 }
 0x7d4   : > { %8381 = vmatmul.mubr.msk.f32.gmra.mrb[56].mxu1 %vm495_vm0, %v7197_v25 }
 0x7d5   : > { %8383 = vmatprep.mubr.msk.f32.mxu1 %vm495_vm0, %v7199_v55 }
 0x7d8   : > { %8384 = vmatmul.mubr.msk.f32.gmra.mrb[58].mxu1 %vm495_vm0, %v7201_v26 }
 0x7d9   : > { %8386 = vmatprep.mubr.msk.f32.mxu1 %vm495_vm0, %v7203_v33 }
 0x7dc   : > { %8387 = vmatmul.mubr.msk.f32.gmra.mrb[60].mxu1 %vm495_vm0, %v7205_v18 }
 0x7dd   : > { %8389 = vmatprep.mubr.msk.f32.mxu1 %vm495_vm0, %v7207_v27 }
 0x7e0   : > { %8390 = vmatmul.mubr.msk.f32.gmra.mrb[62].mxu1 %vm495_vm0, %v7209_v54 }
 0x7e1   : > { %8392 = vmatprep.mubr.msk.f32.mxu1 %vm495_vm0, %v7211_v42 }
 0x7e4   : > { %8393 = vmatmul.mubr.msk.f32.gmra.mrb[64].mxu1 %vm495_vm0, %v7213_v41 }
 0x877   : > { %v12583_v57 = vpop.f32.mrb[32].mxu1 }
 0x878   : > { %v8344_v17 = vpop.f32.mrb[33].mxu1 }
 0x87b   : > { %v8349_v53 = vpop.f32.mrb[34].mxu1 }
 0x87c   : > { %v7514_v51 = vmul.f32 %v8349_v53, %v12588_v40  ;;  %v7347_v58 = vpop.f32.mrb[35].mxu1 }
 0x87d   : > { %v7513_v35 = vmul.f32 %v12588_v40, %v7347_v58 }
 0x87e   : > { %v7553_v21 = vadd.f32 %v12593_v6, %v7514_v51 }
 0x87f   : > { %v7552_v48 = vadd.f32 %v12593_v6, %v7513_v35  ;;  %v8352_v20 = vpop.f32.mrb[36].mxu1 }
 0x880   : > { %v7585_v44 = vmax.f32 %v7553_v21, 0.0  ;;  %v7516_v56 = vmul.f32 %v8352_v20, %v12588_v40  ;;  %v7357_v22 = vpop.f32.mrb[37].mxu1 }
 0x881   : > { %v7584_v24 = vmax.f32 %v7552_v48, 0.0  ;;  %v7515_v45 = vmul.f32 %v12588_v40, %v7357_v22 }
 0x882   : > { %v7555_v16 = vadd.f32 %v12593_v6, %v7516_v56  ;;  %7650 = vrot.lane.b32.xlu1 %v7585_v44, %s8472_s25 }
 0x883   : > { %v7554_v19 = vadd.f32 %v12593_v6, %v7515_v45  ;;  %7648 = vrot.lane.b32.xlu0 %v7584_v24, %s8472_s25  ;;  %v8355_v49 = vpop.f32.mrb[38].mxu1 }
 0x884   : > { %v7587_v61 = vmax.f32 %v7555_v16, 0.0  ;;  %v7518_v38 = vmul.f32 %v8355_v49, %v12588_v40  ;;  %v7367_v30 = vpop.f32.mrb[39].mxu1 }
 0x885   : > { %v7586_v10 = vmax.f32 %v7554_v19, 0.0  ;;  %v7517_v25 = vmul.f32 %v12588_v40, %v7367_v30 }
 0x886   : > { %v7557_v55 = vadd.f32 %v12593_v6, %v7518_v38  ;;  %7654 = vrot.lane.b32.xlu1 %v7587_v61, %s8472_s25 }
 0x887   : > { %v7556_v26 = vadd.f32 %v12593_v6, %v7517_v25  ;;  %7652 = vrot.lane.b32.xlu0 %v7586_v10, %s8472_s25  ;;  %v8358_v33 = vpop.f32.mrb[40].mxu1 }
 0x888   : > { %v7589_v18 = vmax.f32 %v7557_v55, 0.0  ;;  %v7520_v27 = vmul.f32 %v8358_v33, %v12588_v40  ;;  %v7377_v54 = vpop.f32.mrb[41].mxu1 }
 0x889   : > { %v7588_v42 = vmax.f32 %v7556_v26, 0.0  ;;  %v7519_v41 = vmul.f32 %v12588_v40, %v7377_v54 }
 0x88a   : > { %v7559_v17 = vadd.f32 %v12593_v6, %v7520_v27  ;;  %7658 = vrot.lane.b32.xlu1 %v7589_v18, %s8472_s25 }
 0x88b   : > { %v7558_v53 = vadd.f32 %v12593_v6, %v7519_v41  ;;  %7656 = vrot.lane.b32.xlu0 %v7588_v42, %s8472_s25  ;;  %v8361_v51 = vpop.f32.mrb[42].mxu1 }
 0x88c   : > { %v7591_v58 = vmax.f32 %v7559_v17, 0.0  ;;  %v7522_v35 = vmul.f32 %v8361_v51, %v12588_v40  ;;  %v7387_v21 = vpop.f32.mrb[43].mxu1 }
 0x88d   : > { %v7590_v48 = vmax.f32 %v7558_v53, 0.0  ;;  %v7521_v20 = vmul.f32 %v12588_v40, %v7387_v21 }
 0x88e   : > { %v7561_v44 = vadd.f32 %v12593_v6, %v7522_v35  ;;  %7662 = vrot.lane.b32.xlu1 %v7591_v58, %s8472_s25 }
 0x88f   : > { %v7560_v56 = vadd.f32 %v12593_v6, %v7521_v20  ;;  %7660 = vrot.lane.b32.xlu0 %v7590_v48, %s8472_s25  ;;  %v8364_v22 = vpop.f32.mrb[44].mxu1 }
 0x890   : > { %v7593_v24 = vmax.f32 %v7561_v44, 0.0  ;;  %v7524_v45 = vmul.f32 %v8364_v22, %v12588_v40  ;;  %v7397_v16 = vpop.f32.mrb[45].mxu1 }
 0x891   : > { %v7592_v19 = vmax.f32 %v7560_v56, 0.0  ;;  %v7523_v49 = vmul.f32 %v12588_v40, %v7397_v16 }
 0x892   : > { %v7563_v61 = vadd.f32 %v12593_v6, %v7524_v45  ;;  %7666 = vrot.lane.b32.xlu1 %v7593_v24, %s8472_s25 }
 0x893   : > { %v7562_v38 = vadd.f32 %v12593_v6, %v7523_v49  ;;  %7664 = vrot.lane.b32.xlu0 %v7592_v19, %s8472_s25  ;;  %v8367_v30 = vpop.f32.mrb[46].mxu1 }
 0x894   : > { %v7595_v10 = vmax.f32 %v7563_v61, 0.0  ;;  %v7526_v25 = vmul.f32 %v8367_v30, %v12588_v40  ;;  %v7407_v55 = vpop.f32.mrb[47].mxu1 }
 0x895   : > { %v7594_v26 = vmax.f32 %v7562_v38, 0.0  ;;  %v7525_v33 = vmul.f32 %v12588_v40, %v7407_v55 }
 0x896   : > { %v7565_v18 = vadd.f32 %v12593_v6, %v7526_v25  ;;  %7670 = vrot.lane.b32.xlu1 %v7595_v10, %s8472_s25 }
 0x897   : > { %v7564_v27 = vadd.f32 %v12593_v6, %v7525_v33  ;;  %7668 = vrot.lane.b32.xlu0 %v7594_v26, %s8472_s25  ;;  %v8370_v54 = vpop.f32.mrb[48].mxu1 }
 0x898   : > { %v7597_v42 = vmax.f32 %v7565_v18, 0.0  ;;  %v7528_v41 = vmul.f32 %v8370_v54, %v12588_v40  ;;  %v7417_v17 = vpop.f32.mrb[49].mxu1 }
 0x899   : > { %v7596_v53 = vmax.f32 %v7564_v27, 0.0  ;;  %v7527_v51 = vmul.f32 %v12588_v40, %v7417_v17 }
 0x89a   : > { %v7567_v58 = vadd.f32 %v12593_v6, %v7528_v41  ;;  %7674 = vrot.lane.b32.xlu1 %v7597_v42, %s8472_s25 }
 0x89b   : > { %v7566_v35 = vadd.f32 %v12593_v6, %v7527_v51  ;;  %7672 = vrot.lane.b32.xlu0 %v7596_v53, %s8472_s25  ;;  %v8373_v21 = vpop.f32.mrb[50].mxu1 }
 0x89c   : > { %v7599_v48 = vmax.f32 %v7567_v58, 0.0  ;;  %v7530_v20 = vmul.f32 %v8373_v21, %v12588_v40  ;;  %v7427_v44 = vpop.f32.mrb[51].mxu1 }
 0x89d   : > { %v7598_v56 = vmax.f32 %v7566_v35, 0.0  ;;  %v7529_v22 = vmul.f32 %v12588_v40, %v7427_v44 }
 0x89e   : > { %v7569_v24 = vadd.f32 %v12593_v6, %v7530_v20  ;;  %7678 = vrot.lane.b32.xlu1 %v7599_v48, %s8472_s25 }
 0x89f   : > { %v7568_v45 = vadd.f32 %v12593_v6, %v7529_v22  ;;  %7676 = vrot.lane.b32.xlu0 %v7598_v56, %s8472_s25  ;;  %v8376_v16 = vpop.f32.mrb[52].mxu1 }
 0x8a0   : > { %v7601_v19 = vmax.f32 %v7569_v24, 0.0  ;;  %v7532_v49 = vmul.f32 %v8376_v16, %v12588_v40  ;;  %v7437_v61 = vpop.f32.mrb[53].mxu1 }
 0x8a1   : > { %v7600_v38 = vmax.f32 %v7568_v45, 0.0  ;;  %v7531_v30 = vmul.f32 %v12588_v40, %v7437_v61 }
 0x8a2   : > { %v7571_v10 = vadd.f32 %v12593_v6, %v7532_v49  ;;  %7682 = vrot.lane.b32.xlu1 %v7601_v19, %s8472_s25 }
 0x8a3   : > { %v7570_v25 = vadd.f32 %v12593_v6, %v7531_v30  ;;  %7680 = vrot.lane.b32.xlu0 %v7600_v38, %s8472_s25  ;;  %v8379_v55 = vpop.f32.mrb[54].mxu1 }
 0x8a4   : > { %v7603_v26 = vmax.f32 %v7571_v10, 0.0  ;;  %v7534_v33 = vmul.f32 %v8379_v55, %v12588_v40  ;;  %v7447_v18 = vpop.f32.mrb[55].mxu1 }
 0x8a5   : > { %v7602_v27 = vmax.f32 %v7570_v25, 0.0  ;;  %v7533_v54 = vmul.f32 %v12588_v40, %v7447_v18 }
 0x8a6   : > { %v7573_v42 = vadd.f32 %v12593_v6, %v7534_v33  ;;  %7686 = vrot.lane.b32.xlu1 %v7603_v26, %s8472_s25 }
 0x8a7   : > { %v7572_v41 = vadd.f32 %v12593_v6, %v7533_v54  ;;  %7684 = vrot.lane.b32.xlu0 %v7602_v27, %s8472_s25  ;;  %v8382_v17 = vpop.f32.mrb[56].mxu1 }
 0x8a8   : > { %v7605_v53 = vmax.f32 %v7573_v42, 0.0  ;;  %v7536_v51 = vmul.f32 %v8382_v17, %v12588_v40  ;;  %v7457_v58 = vpop.f32.mrb[57].mxu1 }
 0x8a9   : > { %v7604_v35 = vmax.f32 %v7572_v41, 0.0  ;;  %v7535_v21 = vmul.f32 %v12588_v40, %v7457_v58 }
 0x8aa   : > { %v7575_v48 = vadd.f32 %v12593_v6, %v7536_v51  ;;  %7690 = vrot.lane.b32.xlu1 %v7605_v53, %s8472_s25 }
 0x8ab   : > { %v7574_v20 = vadd.f32 %v12593_v6, %v7535_v21  ;;  %7688 = vrot.lane.b32.xlu0 %v7604_v35, %s8472_s25  ;;  %v8385_v44 = vpop.f32.mrb[58].mxu1 }
 0x8ac   : > { %v7607_v56 = vmax.f32 %v7575_v48, 0.0  ;;  %v7538_v22 = vmul.f32 %v8385_v44, %v12588_v40  ;;  %v7467_v24 = vpop.f32.mrb[59].mxu1 }
 0x8ad   : > { %v7606_v45 = vmax.f32 %v7574_v20, 0.0  ;;  %v7537_v16 = vmul.f32 %v12588_v40, %v7467_v24 }
 0x8ae   : > { %v7577_v19 = vadd.f32 %v12593_v6, %v7538_v22  ;;  %7694 = vrot.lane.b32.xlu1 %v7607_v56, %s8472_s25 }
 0x8af   : > { %v7576_v49 = vadd.f32 %v12593_v6, %v7537_v16  ;;  %7692 = vrot.lane.b32.xlu0 %v7606_v45, %s8472_s25  ;;  %v8388_v61 = vpop.f32.mrb[60].mxu1  ;;  %v7030_v16 = vld [vmem:[%s12881_s14] sm:$0x1] }
 0x8b0   : > { %v7609_v38 = vmax.f32 %v7577_v19, 0.0  ;;  %v7540_v30 = vmul.f32 %v8388_v61, %v12588_v40  ;;  %v7477_v10 = vpop.f32.mrb[61].mxu1 }
 0x8b1   : > { %v7608_v25 = vmax.f32 %v7576_v49, 0.0  ;;  %v7539_v55 = vmul.f32 %v12588_v40, %v7477_v10 }
 0x8b2   : > { %v7579_v26 = vadd.f32 %v12593_v6, %v7540_v30  ;;  %7698 = vrot.lane.b32.xlu1 %v7609_v38, %s8472_s25 }
 0x8b3   : > { %v7578_v33 = vadd.f32 %v12593_v6, %v7539_v55  ;;  %7696 = vrot.lane.b32.xlu0 %v7608_v25, %s8472_s25  ;;  %v8391_v18 = vpop.f32.mrb[62].mxu1 }
 0x8b4   : > { %v7611_v27 = vmax.f32 %v7579_v26, 0.0  ;;  %v7542_v54 = vmul.f32 %v8391_v18, %v12588_v40  ;;  %v7487_v42 = vpop.f32.mrb[63].mxu1 }
 0x8b5   : > { %v7610_v41 = vmax.f32 %v7578_v33, 0.0  ;;  %v7541_v17 = vmul.f32 %v12588_v40, %v7487_v42 }
 0x8b6   : > { %v7581_v53 = vadd.f32 %v12593_v6, %v7542_v54  ;;  %7702 = vrot.lane.b32.xlu1 %v7611_v27, %s8472_s25 }
 0x8b7   : > { %v7580_v51 = vadd.f32 %v12593_v6, %v7541_v17  ;;  %7700 = vrot.lane.b32.xlu0 %v7610_v41, %s8472_s25  ;;  %v8394_v58 = vpop.f32.mrb[64].mxu1 }
 0x8b8   : > { %v7613_v35 = vmax.f32 %v7581_v53, 0.0  ;;  %v7544_v21 = vmul.f32 %v8394_v58, %v12588_v40  ;;  %v7497_v48 = vpop.f32.mrb[65].mxu1 }
 0x8b9   : > { %v7612_v20 = vmax.f32 %v7580_v51, 0.0  ;;  %v7543_v44 = vmul.f32 %v12588_v40, %v7497_v48  ;;  %v7104_v40 = vadd.f32 %v12583_v57, %v7030_v16 }
 0x8ba   : > { %v7583_v56 = vadd.f32 %v12593_v6, %v7544_v21  ;;  %7706 = vrot.lane.b32.xlu1 %v7613_v35, %s8472_s25 }
 0x8bb   : > { %v7582_v22 = vadd.f32 %v12593_v6, %v7543_v44  ;;  %7704 = vrot.lane.b32.xlu0 %v7612_v20, %s8472_s25  ;;  %v7980_v19 = vmul.f32 -1.442695, %v7104_v40  ;;  %v7113_v6 = vlaneseq }
 0x8bc   : > { %v7615_v24 = vmax.f32 %v7583_v56, 0.0 }
 0x8bd   : > { %v7614_v45 = vmax.f32 %v7582_v22, 0.0  ;;  %8438 = vpow2.f32 %v7980_v19  ;;  %v7114_v38 = vshrl.u32 %v7113_v6, 7 }
 0x8be   : > { %7710 = vrot.lane.b32.xlu1 %v7615_v24, %s8472_s25 }
 0x8bf   : > { %7708 = vrot.lane.b32.xlu0 %v7614_v45, %s8472_s25  ;;  %v7115_v30 = vsub.s32 0, %v7114_v38 }
 0x8c7   : > { %v8439_v49 = vpop.eup %8438 }
 0x8c8   : > { %v7110_v61 = vadd.f32 1.0, %v8439_v49 }
 0x8ca   : > { %8440 = vrcp.f32 %v7110_v61 }
 0x8d4   : > { %v8441_v10 = vpop.eup %8440 }
 0x8d5   : > { %v12695_v25 = vrot.slane %v8441_v10, %v7115_v30 }
 0x8d7   : > { %v7118_v57 = vmul.f32 %v12695_v25, %v11728_v32  ;;  %v7117_v26 = vmul.f32 %v12695_v25, %v11734_v37  ;;  %v7120_v32 = vmul.f32 %v12695_v25, %v11816_v31  ;;  %v7119_v42 = vmul.f32 %v12695_v25, %v11820_v59 }
 0x8d8   : > { %v7122_v53 = vmul.f32 %v12695_v25, %v11906_v15  ;;  %v7121_v31 = vmul.f32 %v12695_v25, %v11910_v4  ;;  %v7124_v21 = vmul.f32 %v12695_v25, %v11984_v34  ;;  %v7123_v15 = vmul.f32 %v12695_v25, %v11988_v7 }
 0x8d9   : > { %v7126_v56 = vmul.f32 %v12695_v25, %v12081_v11  ;;  %v7125_v34 = vmul.f32 %v12695_v25, %v12087_v0  ;;  %v7128_v16 = vmul.f32 %v12695_v25, %v12164_v13  ;;  %v7127_v11 = vmul.f32 %v12695_v25, %v12168_v5 }
 0x8da   : > { %v7130_v61 = vmul.f32 %v12695_v25, %v12236_v3  ;;  %v7129_v13 = vmul.f32 %v12695_v25, %v12240_v46  ;;  %v7132_v10 = vmul.f32 %v12695_v25, %v12300_v29  ;;  %v7131_v3 = vmul.f32 %v12695_v25, %v12304_v36 }
 0x8db   : > { %v7133_v29 = vmul.f32 %v12695_v25, %v12353_v39 }
 0x8f4   : > { %v7651_v55 = vpop.permute.xlu1 %7650 }
 0x8f5   : > { %v7745_v33 = vsel %vm495_vm0, %v7118_v57, %v7651_v55  ;;  %v7649_v18 = vpop.permute.xlu0 %7648 }
 0x8f6   : > { %7778 = vst.msk [vmem:[%s12702_s16 + $0x8] sm:$0xff] %vm7776_vm13, %v7745_v33  ;;  %v7744_v27 = vsel %vm495_vm0, %v7117_v26, %v7649_v18  ;;  %v7134_v33 = vmul.f32 %v12695_v25, %v12350_v62  ;;  %v7135_v62 = vmul.f32 %v12695_v25, %v12382_v2 }
 0x8f7   : > { %7777 = vst.msk [vmem:[%s12702_s16] sm:$0xff] %vm7776_vm13, %v7744_v27 }
 0x8f8   : > { %v7655_v54 = vpop.permute.xlu1 %7654 }
 0x8f9   : > { %v7747_v37 = vsel %vm495_vm0, %v7120_v32, %v7655_v54  ;;  %v7653_v41 = vpop.permute.xlu0 %7652  ;;  %v7136_v54 = vmul.f32 %v12695_v25, %v12379_v12  ;;  %v7137_v12 = vmul.f32 %v12695_v25, %v12410_v52 }
 0x8fa   : > { %7780 = vst.msk [vmem:[%s12702_s16 + $0x18] sm:$0xff] %vm7776_vm13, %v7747_v37  ;;  %v7746_v17 = vsel %vm495_vm0, %v7119_v42, %v7653_v41 }
 0x8fb   : > { %7779 = vst.msk [vmem:[%s12702_s16 + $0x10] sm:$0xff] %vm7776_vm13, %v7746_v17  ;;  %v7138_v17 = vmul.f32 %v12695_v25, %v12407_v23  ;;  %v7139_v23 = vmul.f32 %v12695_v25, %v12439_v14 }
 0x8fc   : > { %v7659_v51 = vpop.permute.xlu1 %7658 }
 0x8fd   : > { %v7749_v59 = vsel %vm495_vm0, %v7122_v53, %v7659_v51  ;;  %v7657_v58 = vpop.permute.xlu0 %7656 }
 0x8fe   : > { %7782 = vst.msk [vmem:[%s12702_s16 + $0x28] sm:$0xff] %vm7776_vm13, %v7749_v59  ;;  %v7748_v35 = vsel %vm495_vm0, %v7121_v31, %v7657_v58  ;;  %v7140_v59 = vmul.f32 %v12695_v25, %v12431_v47  ;;  %v7141_v47 = vmul.f32 %v12695_v25, %v12462_v8 }
 0x8ff   : > { %7781 = vst.msk [vmem:[%s12702_s16 + $0x20] sm:$0xff] %vm7776_vm13, %v7748_v35 }
 0x900   : > { %v7663_v48 = vpop.permute.xlu1 %7662 }
 0x901   : > { %v7751_v4 = vsel %vm495_vm0, %v7124_v21, %v7663_v48  ;;  %v7661_v20 = vpop.permute.xlu0 %7660  ;;  %v7142_v48 = vmul.f32 %v12695_v25, %v12459_v1  ;;  %v7143_v1 = vmul.f32 %v12695_v25, %v12492_v43 }
 0x902   : > { %7784 = vst.msk [vmem:[%s12702_s16 + $0x38] sm:$0xff] %vm7776_vm13, %v7751_v4  ;;  %v7750_v44 = vsel %vm495_vm0, %v7123_v15, %v7661_v20 }
 0x903   : > { %7783 = vst.msk [vmem:[%s12702_s16 + $0x30] sm:$0xff] %vm7776_vm13, %v7750_v44  ;;  %v7144_v44 = vmul.f32 %v12695_v25, %v12489_v28  ;;  %v7145_v28 = vmul.f32 %v12695_v25, %v12522_v9 }
 0x904   : > { %v7667_v22 = vpop.permute.xlu1 %7666 }
 0x905   : > { %v7753_v7 = vsel %vm495_vm0, %v7126_v56, %v7667_v22  ;;  %v7665_v24 = vpop.permute.xlu0 %7664 }
 0x906   : > { %7786 = vst.msk [vmem:[%s12702_s16 + $0x48] sm:$0xff] %vm7776_vm13, %v7753_v7  ;;  %v7752_v45 = vsel %vm495_vm0, %v7125_v34, %v7665_v24  ;;  %v7146_v7 = vmul.f32 %v12695_v25, %v12515_v63  ;;  %v7147_v63 = vmul.f32 %v12695_v25, %v12542_v60 }
 0x907   : > { %7785 = vst.msk [vmem:[%s12702_s16 + $0x40] sm:$0xff] %vm7776_vm13, %v7752_v45 }
 0x908   : > { %v7671_v40 = vpop.permute.xlu1 %7670 }
 0x909   : > { %v7755_v0 = vsel %vm495_vm0, %v7128_v16, %v7671_v40  ;;  %v7669_v19 = vpop.permute.xlu0 %7668  ;;  %v7148_v40 = vmul.f32 %v12695_v25, %v12537_v50 }
 0x90a   : > { %7788 = vst.msk [vmem:[%s12702_s16 + $0x58] sm:$0xff] %vm7776_vm13, %v7755_v0  ;;  %v7754_v49 = vsel %vm495_vm0, %v7127_v11, %v7669_v19 }
 0x90b   : > { %7787 = vst.msk [vmem:[%s12702_s16 + $0x50] sm:$0xff] %vm7776_vm13, %v7754_v49 }
 0x90c   : > { %v7675_v6 = vpop.permute.xlu1 %7674 }
 0x90d   : > { %v7757_v5 = vsel %vm495_vm0, %v7130_v61, %v7675_v6  ;;  %v7673_v38 = vpop.permute.xlu0 %7672 }
 0x90e   : > { %7790 = vst.msk [vmem:[%s12702_s16 + $0x68] sm:$0xff] %vm7776_vm13, %v7757_v5  ;;  %v7756_v30 = vsel %vm495_vm0, %v7129_v13, %v7673_v38 }
 0x90f   : > { %7789 = vst.msk [vmem:[%s12702_s16 + $0x60] sm:$0xff] %vm7776_vm13, %v7756_v30 }
 0x910   : > { %v7679_v57 = vpop.permute.xlu1 %7678 }
 0x911   : > { %v7759_v46 = vsel %vm495_vm0, %v7132_v10, %v7679_v57  ;;  %v7677_v55 = vpop.permute.xlu0 %7676 }
 0x912   : > { %7792 = vst.msk [vmem:[%s12702_s16 + $0x78] sm:$0xff] %vm7776_vm13, %v7759_v46  ;;  %v7758_v26 = vsel %vm495_vm0, %v7131_v3, %v7677_v55 }
 0x913   : > { %7791 = vst.msk [vmem:[%s12702_s16 + $0x70] sm:$0xff] %vm7776_vm13, %v7758_v26 }
 0x914   : > { %v7683_v18 = vpop.permute.xlu1 %7682 }
 0x915   : > { %v7761_v36 = vsel %vm495_vm0, %v7134_v33, %v7683_v18  ;;  %v7681_v27 = vpop.permute.xlu0 %7680 }
 0x916   : > { %7794 = vst.msk [vmem:[%s12702_s16 + $0x88] sm:$0xff] %vm7776_vm13, %v7761_v36  ;;  %v7760_v32 = vsel %vm495_vm0, %v7133_v29, %v7681_v27 }
 0x917   : > { %7793 = vst.msk [vmem:[%s12702_s16 + $0x80] sm:$0xff] %vm7776_vm13, %v7760_v32 }
 0x918   : > { %v7687_v42 = vpop.permute.xlu1 %7686 }
 0x919   : > { %v7763_v39 = vsel %vm495_vm0, %v7136_v54, %v7687_v42  ;;  %v7685_v37 = vpop.permute.xlu0 %7684 }
 0x91a   : > { %7796 = vst.msk [vmem:[%s12702_s16 + $0x98] sm:$0xff] %vm7776_vm13, %v7763_v39  ;;  %v7762_v41 = vsel %vm495_vm0, %v7135_v62, %v7685_v37 }
 0x91b   : > { %7795 = vst.msk [vmem:[%s12702_s16 + $0x90] sm:$0xff] %vm7776_vm13, %v7762_v41 }
 0x91c   : > { %v7691_v53 = vpop.permute.xlu1 %7690 }
 0x91d   : > { %v7765_v2 = vsel %vm495_vm0, %v7138_v17, %v7691_v53  ;;  %v7689_v51 = vpop.permute.xlu0 %7688 }
 0x91e   : > { %7798 = vst.msk [vmem:[%s12702_s16 + $0xa8] sm:$0xff] %vm7776_vm13, %v7765_v2  ;;  %v7764_v31 = vsel %vm495_vm0, %v7137_v12, %v7689_v51 }
 0x91f   : > { %7797 = vst.msk [vmem:[%s12702_s16 + $0xa0] sm:$0xff] %vm7776_vm13, %v7764_v31 }
 0x920   : > { %v7695_v58 = vpop.permute.xlu1 %7694 }
 0x921   : > { %v7767_v52 = vsel %vm495_vm0, %v7140_v59, %v7695_v58  ;;  %v7693_v35 = vpop.permute.xlu0 %7692 }
 0x922   : > { %7800 = vst.msk [vmem:[%s12702_s16 + $0xb8] sm:$0xff] %vm7776_vm13, %v7767_v52  ;;  %v7766_v21 = vsel %vm495_vm0, %v7139_v23, %v7693_v35 }
 0x923   : > { %7799 = vst.msk [vmem:[%s12702_s16 + $0xb0] sm:$0xff] %vm7776_vm13, %v7766_v21 }
 0x924   : > { %v7699_v15 = vpop.permute.xlu1 %7698 }
 0x925   : > { %v7769_v14 = vsel %vm495_vm0, %v7142_v48, %v7699_v15  ;;  %v7697_v4 = vpop.permute.xlu0 %7696 }
 0x926   : > { %7802 = vst.msk [vmem:[%s12702_s16 + $0xc8] sm:$0xff] %vm7776_vm13, %v7769_v14  ;;  %v7768_v20 = vsel %vm495_vm0, %v7141_v47, %v7697_v4 }
 0x927   : > { %7801 = vst.msk [vmem:[%s12702_s16 + $0xc0] sm:$0xff] %vm7776_vm13, %v7768_v20 }
 0x928   : > { %v7703_v56 = vpop.permute.xlu1 %7702 }
 0x929   : > { %v7771_v8 = vsel %vm495_vm0, %v7144_v44, %v7703_v56  ;;  %v7701_v22 = vpop.permute.xlu0 %7700 }
 0x92a   : > { %7804 = vst.msk [vmem:[%s12702_s16 + $0xd8] sm:$0xff] %vm7776_vm13, %v7771_v8  ;;  %v7770_v34 = vsel %vm495_vm0, %v7143_v1, %v7701_v22 }
 0x92b   : > { %7803 = vst.msk [vmem:[%s12702_s16 + $0xd0] sm:$0xff] %vm7776_vm13, %v7770_v34 }
 0x92c   : > { %v7707_v24 = vpop.permute.xlu1 %7706 }
 0x92d   : > { %v7773_v43 = vsel %vm495_vm0, %v7146_v7, %v7707_v24  ;;  %v7705_v45 = vpop.permute.xlu0 %7704 }
 0x92e   : > { %7806 = vst.msk [vmem:[%s12702_s16 + $0xe8] sm:$0xff] %vm7776_vm13, %v7773_v43  ;;  %v7772_v16 = vsel %vm495_vm0, %v7145_v28, %v7705_v45 }
 0x92f   : > { %7805 = vst.msk [vmem:[%s12702_s16 + $0xe0] sm:$0xff] %vm7776_vm13, %v7772_v16 }
 0x930   : > { %v7711_v11 = vpop.permute.xlu1 %7710 }
 0x931   : > { %v7775_v0 = vsel %vm495_vm0, %v7148_v40, %v7711_v11  ;;  %v7709_v19 = vpop.permute.xlu0 %7708 }
 0x932   : > { %7808 = vst.msk [vmem:[%s12702_s16 + $0xf8] sm:$0xff] %vm7776_vm13, %v7775_v0  ;;  %v7774_v9 = vsel %vm495_vm0, %v7147_v63, %v7709_v19 }
 0x933   : > { %7807 = vst.msk [vmem:[%s12702_s16 + $0xf0] sm:$0xff] %vm7776_vm13, %v7774_v9 }
 0x934 PF: > { %s25_s18 = sadd.s32 1, %s8469_s18  }
 0x935   : > { %p22_p4 = scmp.ge.s32.totalorder %s25_s18, 4  }
 0x937   :  { %24 = sbr.rel (!%p22_p4) target bundleno = 1 (0x1), region = 116 }

</bundles_post_ra>
